<compile_context>
chip_gen: v5e
topology: v5e:2x2
jax: 0.10.0
libtpu: 0.0.40
codegen_flags: <defaults>
</compile_context>

<pallas_src>
import functools
import math

import jax
import jax.numpy as jnp
from jax.experimental import pallas as pl
from jax.experimental.pallas import tpu as pltpu

EPS = 1e-5
LANE = 128                     # pad channel / feature dims to the 128-lane width
CPAD = LANE
HIDDEN = 64                    # stands in for 4096
HIDDEN_PAD = LANE
NUM_CLASSES = 10
NUM_CLASSES_PAD = LANE
IN_CHANNELS = 3
IMG = 16

# Scaled-down VGG feature config: ints = conv out-channels, 'M' = maxpool.
FEATURE_CFG = [16, 'M', 32, 'M', 32, 'M']


def _blocks_from_cfg(cfg):
    """[(out_channels, fuse_pool), ...] -- one entry per conv layer."""
    blocks = []
    for item in cfg:
        if item == 'M':
            assert blocks, "cfg must not start with 'M'"
            blocks[-1] = (blocks[-1][0], True)
        else:
            blocks.append((item, False))
    return blocks


BLOCKS = _blocks_from_cfg(FEATURE_CFG)

# Static per-stage spatial sizes.
_in_sizes = []
_h = IMG
for _cout, _pool in BLOCKS:
    _in_sizes.append(_h)
    if _pool:
        _h //= 2
IN_SIZES = tuple(_in_sizes)            # conv input H (=W) per stage
POOLS = tuple(p for _, p in BLOCKS)
FINAL_SPATIAL = _h
FLAT_PAD = FINAL_SPATIAL * FINAL_SPATIAL * CPAD
MAX_HW = max(IN_SIZES) ** 2


# ----------------------------- Pallas kernels ------------------------------

def _features_kernel(*refs, in_sizes, pools):
    """Whole feature extractor for ONE sample (grid over batch).

    refs = x_ref, (w_i, b_i)*L, out_ref, patch_ref, y_ref, xp_next_1..L-1
      x_ref      : (IMG+2, IMG+2, 128) bf16  spatially pre-padded NHWC sample
      w_i        : (9*128, 128) bf16         im2col-ordered (tap, cin) x cout
      b_i        : (1, 128) f32
      out_ref    : (S*S, 128) bf16           pooled features in (H, W, C) order
      patch_ref  : (MAX_HW, 9*128) bf16      im2col scratch (reused per stage)
      y_ref      : (MAX_HW, 128) bf16        conv+ReLU scratch (reused per stage)
      xp_next_i  : (H_i+2, H_i+2, 128) bf16  padded input slab for stage i+1
    """
    n = len(in_sizes)
    x_ref = refs[0]
    wb = refs[1:1 + 2 * n]
    out_ref = refs[1 + 2 * n]
    patch_ref = refs[2 + 2 * n]
    y_ref = refs[3 + 2 * n]
    xp_next = refs[4 + 2 * n:]
    C = CPAD

    cur = x_ref                                   # current padded input slab
    for i in range(n):
        H = in_sizes[i]
        HW = H * H
        w_ref, b_ref = wb[2 * i], wb[2 * i + 1]

        # im2col into VMEM scratch: column slab t*C:(t+1)*C <- tap t (lane-aligned).
        for t in range(9):
            kh, kw = divmod(t, 3)
            patch_ref[0:HW, t * C:(t + 1) * C] = (
                cur[kh:kh + H, kw:kw + H, :].reshape(HW, C).astype(patch_ref.dtype))

        # One K = 9*C matmul per stage (accumulation inside the MXU), chunked
        # over 128 output rows so the live f32 result stays small (no spills).
        for m0 in range(0, HW, 128):
            mm = min(128, HW - m0)
            acc = jnp.dot(patch_ref[m0:m0 + mm, :], w_ref[...],
                          preferred_element_type=jnp.float32)
            y_ref[m0:m0 + mm, :] = jnp.maximum(acc + b_ref[...], 0.0
                                               ).astype(y_ref.dtype)

        # Fused MaxPool2d(2, 2).
        if pools[i]:
            Ho = H // 2
            y5 = y_ref[0:HW, :].reshape(Ho, 2, Ho, 2, C)

            def corner(a, b, y5=y5, Ho=Ho):
                return y5[:, a:a + 1, :, b:b + 1, :].reshape(Ho, Ho, C)

            p = jnp.maximum(jnp.maximum(corner(0, 0), corner(0, 1)),
                            jnp.maximum(corner(1, 0), corner(1, 1)))
        else:
            Ho = H
            p = y_ref[0:HW, :].reshape(Ho, Ho, C)

        if i < n - 1:
            # Next stage's padded slab in a SINGLE lane-dense full-block store
            # (zero halo included) -- no double / masked stores.
            xp_next[i][...] = jnp.pad(p, ((1, 1), (1, 1), (0, 0))
                                      ).astype(xp_next[i].dtype)
            cur = xp_next[i]
        else:
            out_ref[...] = p.reshape(Ho * Ho, C).astype(out_ref.dtype)


def _classifier_kernel(x_ref, w1_ref, b1_ref, g1_ref, be1_ref,
                       w2_ref, b2_ref, g2_ref, be2_ref,
                       w3_ref, b3_ref, o_ref):
    """Fused classifier: (MaskedLinear + BN1d(train) + ReLU) x2 + MaskedLinear.

    Weights pre-masked, pre-transposed (K, N), zero-padded to 128 lanes, bf16.
    Matmuls run in bf16 with f32 accumulation; BN statistics in f32.
    Intermediate activations never leave VMEM/vregs.
    """
    N = x_ref.shape[0]
    x = x_ref[...].reshape(N, -1)                 # (N, FLAT_PAD) bf16
    inv_n = 1.0 / N                               # trace-time constant

    def lin_bn_relu(h, w_ref, b_ref, g_ref, be_ref):
        y = jnp.dot(h, w_ref[...], preferred_element_type=jnp.float32) + b_ref[...]
        mean = jnp.sum(y, axis=0, keepdims=True) * inv_n
        d = y - mean
        var = jnp.sum(d * d, axis=0, keepdims=True) * inv_n   # biased (train mode)
        return jnp.maximum(d * jax.lax.rsqrt(var + EPS) * g_ref[...] + be_ref[...],
                           0.0)

    h = lin_bn_relu(x, w1_ref, b1_ref, g1_ref, be1_ref)
    h = lin_bn_relu(h.astype(jnp.bfloat16), w2_ref, b2_ref, g2_ref, be2_ref)
    o_ref[...] = (jnp.dot(h.astype(jnp.bfloat16), w3_ref[...],
                          preferred_element_type=jnp.float32)
                  + b3_ref[...]).astype(o_ref.dtype)


# ------------------------------ Op wrappers --------------------------------

def _vmem_spec():
    return pl.BlockSpec(memory_space=pltpu.MemorySpace.VMEM)


def features(xp, packed_convs):
    """One fused pallas_call for the whole extractor, batch-parallel grid."""
    N = xp.shape[0]
    in_specs = [pl.BlockSpec((None, IMG + 2, IMG + 2, CPAD),
                             lambda b: (b, 0, 0, 0))]
    conv_args = []
    for blk in packed_convs:
        in_specs.append(pl.BlockSpec((9 * CPAD, CPAD), lambda b: (0, 0)))
        in_specs.append(pl.BlockSpec((1, CPAD), lambda b: (0, 0)))
        conv_args += [blk["w"], blk["b"]]

    scratch = [pltpu.VMEM((MAX_HW, 9 * CPAD), jnp.bfloat16),   # im2col patches
               pltpu.VMEM((MAX_HW, CPAD), jnp.bfloat16)]       # conv+ReLU output
    for hin in IN_SIZES[1:]:
        scratch.append(pltpu.VMEM((hin + 2, hin + 2, CPAD), jnp.bfloat16))

    return pl.pallas_call(
        functools.partial(_features_kernel, in_sizes=IN_SIZES, pools=POOLS),
        out_shape=jax.ShapeDtypeStruct(
            (N, FINAL_SPATIAL * FINAL_SPATIAL, CPAD), jnp.bfloat16),
        grid=(N,),
        in_specs=in_specs,
        out_specs=pl.BlockSpec((None, FINAL_SPATIAL * FINAL_SPATIAL, CPAD),
                               lambda b: (b, 0, 0)),
        scratch_shapes=scratch,
        compiler_params=pltpu.CompilerParams(
            dimension_semantics=("parallel",)),   # v7x: both TensorCores
    )(xp, *conv_args)


def classifier(x, cls):
    N = x.shape[0]
    return pl.pallas_call(
        _classifier_kernel,
        out_shape=jax.ShapeDtypeStruct((N, NUM_CLASSES_PAD), jnp.float32),
        in_specs=[_vmem_spec()] * 11,
        out_specs=_vmem_spec(),
    )(x, cls["w1"], cls["b1"], cls["g1"], cls["be1"],
      cls["w2"], cls["b2"], cls["g2"], cls["be2"],
      cls["w3"], cls["b3"])


# --------------------------- Parameter creation -----------------------------

def init_params(key):
    """PyTorch-faithful parameter layout (MaskedConv2d / MaskedLinear / BN)."""
    params = {"features": [], "classifier": {}, "meta": {}}
    cin = IN_CHANNELS
    for cout, _ in BLOCKS:
        key, kw = jax.random.split(key)
        std = math.sqrt(2.0 / (3 * 3 * cout))       # normal(0, sqrt(2/(k*k*out)))
        w = std * jax.random.normal(kw, (cout, cin, 3, 3), jnp.float32)
        params["features"].append({
            "w": w, "b": jnp.zeros((cout,), jnp.float32),
            "mask": jnp.ones_like(w)})              # MaskedConv2d mask (all ones)
        cin = cout

    spatial = FINAL_SPATIAL
    flat_dim = cin * spatial * spatial              # analogue of 512*7*7

    def lin(key, fan_out, fan_in):
        key, kw = jax.random.split(key)
        w = 0.01 * jax.random.normal(kw, (fan_out, fan_in), jnp.float32)
        return key, {"w": w, "b": jnp.zeros((fan_out,), jnp.float32),
                     "mask": jnp.ones_like(w)}      # MaskedLinear mask (all ones)

    key, fc1 = lin(key, HIDDEN, flat_dim)
    key, fc2 = lin(key, HIDDEN, HIDDEN)
    key, fc3 = lin(key, NUM_CLASSES, HIDDEN)

    def bn():
        return {"gamma": jnp.ones((1, HIDDEN), jnp.float32),
                "beta": jnp.zeros((1, HIDDEN), jnp.float32)}

    params["classifier"] = {"fc1": fc1, "bn1": bn(), "fc2": fc2,
                            "bn2": bn(), "fc3": fc3}
    params["meta"] = {"c_last": cin, "spatial": spatial}
    return params


def pack_params(params):
    """One-time packing: apply masks, transpose, pad to 128 lanes, cast matmul
    operands to bf16, and fold the NCHW flatten order into fc1's rows."""
    packed = {"convs": [], "classifier": {}}

    for p in params["features"]:
        w = p["w"] * p["mask"]                       # (Cout, Cin, 3, 3)
        cout, cin = w.shape[0], w.shape[1]
        wt = jnp.transpose(w, (2, 3, 1, 0))          # (3, 3, Cin, Cout)
        wt = jnp.pad(wt, ((0, 0), (0, 0), (0, CPAD - cin), (0, CPAD - cout)))
        packed["convs"].append({
            "w": wt.reshape(9 * CPAD, CPAD).astype(jnp.bfloat16),  # im2col order
            "b": jnp.pad(p["b"], (0, CPAD - cout)).reshape(1, CPAD)})

    cls = params["classifier"]
    c_last = params["meta"]["c_last"]
    s = params["meta"]["spatial"]

    # fc1: rows remapped from PyTorch's (C, H, W) flatten order to the kernel's
    # (H, W, Cpad) flatten order -> no activation transpose in the forward pass.
    w1 = (cls["fc1"]["w"] * cls["fc1"]["mask"]).T    # (C*H*W, HIDDEN)
    w1 = w1.reshape(c_last, s, s, HIDDEN)
    w1 = jnp.transpose(w1, (1, 2, 0, 3))             # (H, W, C, HIDDEN)
    w1 = jnp.pad(w1, ((0, 0), (0, 0), (0, CPAD - c_last), (0, HIDDEN_PAD - HIDDEN)))
    w1 = w1.reshape(s * s * CPAD, HIDDEN_PAD)

    w2 = (cls["fc2"]["w"] * cls["fc2"]["mask"]).T    # (HIDDEN, HIDDEN)
    w2 = jnp.pad(w2, ((0, HIDDEN_PAD - HIDDEN), (0, HIDDEN_PAD - HIDDEN)))

    w3 = (cls["fc3"]["w"] * cls["fc3"]["mask"]).T    # (HIDDEN, NUM_CLASSES)
    w3 = jnp.pad(w3, ((0, HIDDEN_PAD - HIDDEN), (0, NUM_CLASSES_PAD - NUM_CLASSES)))

    def pad_vec(v, n_to):
        return jnp.pad(v.reshape(1, -1), ((0, 0), (0, n_to - v.size)))

    def pad_gamma(g):
        return jnp.pad(g, ((0, 0), (0, HIDDEN_PAD - g.shape[1])), constant_values=1.0)

    def pad_beta(b):
        return jnp.pad(b, ((0, 0), (0, HIDDEN_PAD - b.shape[1])))

    packed["classifier"] = {
        "w1": w1.astype(jnp.bfloat16), "b1": pad_vec(cls["fc1"]["b"], HIDDEN_PAD),
        "g1": pad_gamma(cls["bn1"]["gamma"]), "be1": pad_beta(cls["bn1"]["beta"]),
        "w2": w2.astype(jnp.bfloat16), "b2": pad_vec(cls["fc2"]["b"], HIDDEN_PAD),
        "g2": pad_gamma(cls["bn2"]["gamma"]), "be2": pad_beta(cls["bn2"]["beta"]),
        "w3": w3.astype(jnp.bfloat16), "b3": pad_vec(cls["fc3"]["b"], NUM_CLASSES_PAD),
    }
    return packed


# ------------------------------ Forward pass --------------------------------

@jax.jit
def vgg_automl_forward(x_nchw, packed):
    N, cin = x_nchw.shape[0], x_nchw.shape[1]
    # NCHW -> NHWC, 1-pixel spatial halo for conv1, pad channels to 128 lanes,
    # cast to bf16 (MXU-native operands; accumulation stays f32 in-kernel).
    x = jnp.transpose(x_nchw, (0, 2, 3, 1))
    x = jnp.pad(x, ((0, 0), (1, 1), (1, 1), (0, CPAD - cin))).astype(jnp.bfloat16)

    feats = features(x, packed["convs"])            # (N, S*S, 128) bf16, stays tiny
    # x.view(N, -1): PyTorch's (C, H, W) order is folded into fc1's packed rows,
    # so the kernel's (H, W, Cpad) flatten is exact.
    logits = classifier(feats, packed["classifier"])  # (N, 128) lane-dense
    return logits[:, :NUM_CLASSES]


if __name__ == "__main__":
    key = jax.random.PRNGKey(0)
    key, kx = jax.random.split(key)
    x = jax.random.normal(kx, (2, IN_CHANNELS, IMG, IMG), jnp.float32)  # NCHW

    params = init_params(key)
    packed = pack_params(params)            # one-time: masks, transposes, padding, bf16
    packed = jax.tree_util.tree_map(jax.block_until_ready, packed)

    out = vgg_automl_forward(x, packed)
    jax.block_until_ready(out)
    assert out.shape == (2, NUM_CLASSES), out.shape
    assert bool(jnp.all(jnp.isfinite(out)))
    print("KERNEL_OK")
</pallas_src>

<mosaic_0001>
module attributes {stable_mosaic.version = 11 : i64} {
  func.func @_features_kernel(%arg0: i32, %arg1: memref<1x18x18x128xbf16, #tpu.memory_space<vmem>>, %arg2: memref<1152x128xbf16, #tpu.memory_space<vmem>>, %arg3: memref<1x128xf32, #tpu.memory_space<vmem>>, %arg4: memref<1152x128xbf16, #tpu.memory_space<vmem>>, %arg5: memref<1x128xf32, #tpu.memory_space<vmem>>, %arg6: memref<1152x128xbf16, #tpu.memory_space<vmem>>, %arg7: memref<1x128xf32, #tpu.memory_space<vmem>>, %arg8: memref<1x4x128xbf16, #tpu.memory_space<vmem>>, %arg9: memref<256x1152xbf16, #tpu.memory_space<vmem>>, %arg10: memref<256x128xbf16, #tpu.memory_space<vmem>>, %arg11: memref<10x10x128xbf16, #tpu.memory_space<vmem>>, %arg12: memref<6x6x128xbf16, #tpu.memory_space<vmem>>) attributes {dimension_semantics = [#tpu.dimension_semantics<parallel>], iteration_bounds = array<i64: 2>, scalar_prefetch = 0 : i64, scratch_operands = 4 : i64, tpu.core_type = #tpu.core_type<tc>, window_params = [{transform_indices = @transform_0, window_bounds = array<i64: 1, 18, 18, 128>}, {pipeline_mode = #tpu.pipeline_mode<synchronous>, transform_indices = @transform_1, window_bounds = array<i64: 1152, 128>}, {pipeline_mode = #tpu.pipeline_mode<synchronous>, transform_indices = @transform_2, window_bounds = array<i64: 1, 128>}, {pipeline_mode = #tpu.pipeline_mode<synchronous>, transform_indices = @transform_3, window_bounds = array<i64: 1152, 128>}, {pipeline_mode = #tpu.pipeline_mode<synchronous>, transform_indices = @transform_4, window_bounds = array<i64: 1, 128>}, {pipeline_mode = #tpu.pipeline_mode<synchronous>, transform_indices = @transform_5, window_bounds = array<i64: 1152, 128>}, {pipeline_mode = #tpu.pipeline_mode<synchronous>, transform_indices = @transform_6, window_bounds = array<i64: 1, 128>}, {transform_indices = @transform_7, window_bounds = array<i64: 1, 4, 128>}]} {
    %c0 = arith.constant 0 : index
    %c0_0 = arith.constant 0 : index
    %c0_1 = arith.constant 0 : index
    %c0_2 = arith.constant 0 : index
    %0 = vector.load %arg1[%c0, %c0_0, %c0_1, %c0_2] : memref<1x18x18x128xbf16, #tpu.memory_space<vmem>>, vector<1x16x16x128xbf16>
    %1 = vector.shape_cast %0 : vector<1x16x16x128xbf16> to vector<16x16x128xbf16>
    %2 = vector.shape_cast %1 : vector<16x16x128xbf16> to vector<256x128xbf16>
    %c0_3 = arith.constant 0 : index
    %c0_4 = arith.constant 0 : index
    %3 = vector.load %arg9[%c0_3, %c0_4] : memref<256x1152xbf16, #tpu.memory_space<vmem>>, vector<256x128xbf16>
    tpu.vector_store %arg9[%c0_3, %c0_4], %2 {strides = array<i32>} : memref<256x1152xbf16, #tpu.memory_space<vmem>>, vector<256x128xbf16>,
    %c0_5 = arith.constant 0 : index
    %c0_6 = arith.constant 0 : index
    %c1 = arith.constant 1 : index
    %c0_7 = arith.constant 0 : index
    %4 = vector.load %arg1[%c0_5, %c0_6, %c1, %c0_7] : memref<1x18x18x128xbf16, #tpu.memory_space<vmem>>, vector<1x16x16x128xbf16>
    %5 = vector.shape_cast %4 : vector<1x16x16x128xbf16> to vector<16x16x128xbf16>
    %6 = vector.shape_cast %5 : vector<16x16x128xbf16> to vector<256x128xbf16>
    %c0_8 = arith.constant 0 : index
    %c128 = arith.constant 128 : index
    %7 = vector.load %arg9[%c0_8, %c128] : memref<256x1152xbf16, #tpu.memory_space<vmem>>, vector<256x128xbf16>
    tpu.vector_store %arg9[%c0_8, %c128], %6 {strides = array<i32>} : memref<256x1152xbf16, #tpu.memory_space<vmem>>, vector<256x128xbf16>,
    %c0_9 = arith.constant 0 : index
    %c0_10 = arith.constant 0 : index
    %c2 = arith.constant 2 : index
    %c0_11 = arith.constant 0 : index
    %8 = vector.load %arg1[%c0_9, %c0_10, %c2, %c0_11] : memref<1x18x18x128xbf16, #tpu.memory_space<vmem>>, vector<1x16x16x128xbf16>
    %9 = vector.shape_cast %8 : vector<1x16x16x128xbf16> to vector<16x16x128xbf16>
    %10 = vector.shape_cast %9 : vector<16x16x128xbf16> to vector<256x128xbf16>
    %c0_12 = arith.constant 0 : index
    %c256 = arith.constant 256 : index
    %11 = vector.load %arg9[%c0_12, %c256] : memref<256x1152xbf16, #tpu.memory_space<vmem>>, vector<256x128xbf16>
    tpu.vector_store %arg9[%c0_12, %c256], %10 {strides = array<i32>} : memref<256x1152xbf16, #tpu.memory_space<vmem>>, vector<256x128xbf16>,
    %c0_13 = arith.constant 0 : index
    %c1_14 = arith.constant 1 : index
    %c0_15 = arith.constant 0 : index
    %c0_16 = arith.constant 0 : index
    %12 = vector.load %arg1[%c0_13, %c1_14, %c0_15, %c0_16] : memref<1x18x18x128xbf16, #tpu.memory_space<vmem>>, vector<1x16x16x128xbf16>
    %13 = vector.shape_cast %12 : vector<1x16x16x128xbf16> to vector<16x16x128xbf16>
    %14 = vector.shape_cast %13 : vector<16x16x128xbf16> to vector<256x128xbf16>
    %c0_17 = arith.constant 0 : index
    %c384 = arith.constant 384 : index
    %15 = vector.load %arg9[%c0_17, %c384] : memref<256x1152xbf16, #tpu.memory_space<vmem>>, vector<256x128xbf16>
    tpu.vector_store %arg9[%c0_17, %c384], %14 {strides = array<i32>} : memref<256x1152xbf16, #tpu.memory_space<vmem>>, vector<256x128xbf16>,
    %c0_18 = arith.constant 0 : index
    %c1_19 = arith.constant 1 : index
    %c1_20 = arith.constant 1 : index
    %c0_21 = arith.constant 0 : index
    %16 = vector.load %arg1[%c0_18, %c1_19, %c1_20, %c0_21] : memref<1x18x18x128xbf16, #tpu.memory_space<vmem>>, vector<1x16x16x128xbf16>
    %17 = vector.shape_cast %16 : vector<1x16x16x128xbf16> to vector<16x16x128xbf16>
    %18 = vector.shape_cast %17 : vector<16x16x128xbf16> to vector<256x128xbf16>
    %c0_22 = arith.constant 0 : index
    %c512 = arith.constant 512 : index
    %19 = vector.load %arg9[%c0_22, %c512] : memref<256x1152xbf16, #tpu.memory_space<vmem>>, vector<256x128xbf16>
    tpu.vector_store %arg9[%c0_22, %c512], %18 {strides = array<i32>} : memref<256x1152xbf16, #tpu.memory_space<vmem>>, vector<256x128xbf16>,
    %c0_23 = arith.constant 0 : index
    %c1_24 = arith.constant 1 : index
    %c2_25 = arith.constant 2 : index
    %c0_26 = arith.constant 0 : index
    %20 = vector.load %arg1[%c0_23, %c1_24, %c2_25, %c0_26] : memref<1x18x18x128xbf16, #tpu.memory_space<vmem>>, vector<1x16x16x128xbf16>
    %21 = vector.shape_cast %20 : vector<1x16x16x128xbf16> to vector<16x16x128xbf16>
    %22 = vector.shape_cast %21 : vector<16x16x128xbf16> to vector<256x128xbf16>
    %c0_27 = arith.constant 0 : index
    %c640 = arith.constant 640 : index
    %23 = vector.load %arg9[%c0_27, %c640] : memref<256x1152xbf16, #tpu.memory_space<vmem>>, vector<256x128xbf16>
    tpu.vector_store %arg9[%c0_27, %c640], %22 {strides = array<i32>} : memref<256x1152xbf16, #tpu.memory_space<vmem>>, vector<256x128xbf16>,
    %c0_28 = arith.constant 0 : index
    %c2_29 = arith.constant 2 : index
    %c0_30 = arith.constant 0 : index
    %c0_31 = arith.constant 0 : index
    %24 = vector.load %arg1[%c0_28, %c2_29, %c0_30, %c0_31] : memref<1x18x18x128xbf16, #tpu.memory_space<vmem>>, vector<1x16x16x128xbf16>
    %25 = vector.shape_cast %24 : vector<1x16x16x128xbf16> to vector<16x16x128xbf16>
    %26 = vector.shape_cast %25 : vector<16x16x128xbf16> to vector<256x128xbf16>
    %c0_32 = arith.constant 0 : index
    %c768 = arith.constant 768 : index
    %27 = vector.load %arg9[%c0_32, %c768] : memref<256x1152xbf16, #tpu.memory_space<vmem>>, vector<256x128xbf16>
    tpu.vector_store %arg9[%c0_32, %c768], %26 {strides = array<i32>} : memref<256x1152xbf16, #tpu.memory_space<vmem>>, vector<256x128xbf16>,
    %c0_33 = arith.constant 0 : index
    %c2_34 = arith.constant 2 : index
    %c1_35 = arith.constant 1 : index
    %c0_36 = arith.constant 0 : index
    %28 = vector.load %arg1[%c0_33, %c2_34, %c1_35, %c0_36] : memref<1x18x18x128xbf16, #tpu.memory_space<vmem>>, vector<1x16x16x128xbf16>
    %29 = vector.shape_cast %28 : vector<1x16x16x128xbf16> to vector<16x16x128xbf16>
    %30 = vector.shape_cast %29 : vector<16x16x128xbf16> to vector<256x128xbf16>
    %c0_37 = arith.constant 0 : index
    %c896 = arith.constant 896 : index
    %31 = vector.load %arg9[%c0_37, %c896] : memref<256x1152xbf16, #tpu.memory_space<vmem>>, vector<256x128xbf16>
    tpu.vector_store %arg9[%c0_37, %c896], %30 {strides = array<i32>} : memref<256x1152xbf16, #tpu.memory_space<vmem>>, vector<256x128xbf16>,
    %c0_38 = arith.constant 0 : index
    %c2_39 = arith.constant 2 : index
    %c2_40 = arith.constant 2 : index
    %c0_41 = arith.constant 0 : index
    %32 = vector.load %arg1[%c0_38, %c2_39, %c2_40, %c0_41] : memref<1x18x18x128xbf16, #tpu.memory_space<vmem>>, vector<1x16x16x128xbf16>
    %33 = vector.shape_cast %32 : vector<1x16x16x128xbf16> to vector<16x16x128xbf16>
    %34 = vector.shape_cast %33 : vector<16x16x128xbf16> to vector<256x128xbf16>
    %c0_42 = arith.constant 0 : index
    %c1024 = arith.constant 1024 : index
    %35 = vector.load %arg9[%c0_42, %c1024] : memref<256x1152xbf16, #tpu.memory_space<vmem>>, vector<256x128xbf16>
    tpu.vector_store %arg9[%c0_42, %c1024], %34 {strides = array<i32>} : memref<256x1152xbf16, #tpu.memory_space<vmem>>, vector<256x128xbf16>,
    %c0_43 = arith.constant 0 : index
    %c0_44 = arith.constant 0 : index
    %36 = vector.load %arg9[%c0_43, %c0_44] : memref<256x1152xbf16, #tpu.memory_space<vmem>>, vector<128x1152xbf16>
    %c0_45 = arith.constant 0 : index
    %c0_46 = arith.constant 0 : index
    %37 = vector.load %arg2[%c0_45, %c0_46] : memref<1152x128xbf16, #tpu.memory_space<vmem>>, vector<1152x128xbf16>
    %cst = arith.constant dense<0.000000e+00> : vector<128x128xf32>
    %38 = tpu.matmul %36, %37, %cst {dimension_numbers = #tpu.dot_dimension_numbers<[1], [0], [0], [1], [0, 0, 1, 1], [], []>} : vector<128x1152xbf16>, vector<1152x128xbf16>, vector<128x128xf32> -> vector<128x128xf32>
    %c0_47 = arith.constant 0 : index
    %c0_48 = arith.constant 0 : index
    %39 = vector.load %arg3[%c0_47, %c0_48] : memref<1x128xf32, #tpu.memory_space<vmem>>, vector<1x128xf32>
    %40 = vector.broadcast %39 : vector<1x128xf32> to vector<128x128xf32>
    %41 = arith.addf %38, %40 : vector<128x128xf32>
    %cst_49 = arith.constant 0.000000e+00 : f32
    %42 = vector.broadcast %cst_49 : f32 to vector<128x128xf32>
    %43 = arith.maximumf %41, %42 : vector<128x128xf32>
    %44 = arith.truncf %43 : vector<128x128xf32> to vector<128x128xbf16>
    %c0_50 = arith.constant 0 : index
    %c0_51 = arith.constant 0 : index
    %45 = vector.load %arg10[%c0_50, %c0_51] : memref<256x128xbf16, #tpu.memory_space<vmem>>, vector<128x128xbf16>
    tpu.vector_store %arg10[%c0_50, %c0_51], %44 {strides = array<i32>} : memref<256x128xbf16, #tpu.memory_space<vmem>>, vector<128x128xbf16>,
    %c128_52 = arith.constant 128 : index
    %c0_53 = arith.constant 0 : index
    %46 = vector.load %arg9[%c128_52, %c0_53] : memref<256x1152xbf16, #tpu.memory_space<vmem>>, vector<128x1152xbf16>
    %c0_54 = arith.constant 0 : index
    %c0_55 = arith.constant 0 : index
    %47 = vector.load %arg2[%c0_54, %c0_55] : memref<1152x128xbf16, #tpu.memory_space<vmem>>, vector<1152x128xbf16>
    %cst_56 = arith.constant dense<0.000000e+00> : vector<128x128xf32>
    %48 = tpu.matmul %46, %47, %cst_56 {dimension_numbers = #tpu.dot_dimension_numbers<[1], [0], [0], [1], [0, 0, 1, 1], [], []>} : vector<128x1152xbf16>, vector<1152x128xbf16>, vector<128x128xf32> -> vector<128x128xf32>
    %c0_57 = arith.constant 0 : index
    %c0_58 = arith.constant 0 : index
    %49 = vector.load %arg3[%c0_57, %c0_58] : memref<1x128xf32, #tpu.memory_space<vmem>>, vector<1x128xf32>
    %50 = vector.broadcast %49 : vector<1x128xf32> to vector<128x128xf32>
    %51 = arith.addf %48, %50 : vector<128x128xf32>
    %cst_59 = arith.constant 0.000000e+00 : f32
    %52 = vector.broadcast %cst_59 : f32 to vector<128x128xf32>
    %53 = arith.maximumf %51, %52 : vector<128x128xf32>
    %54 = arith.truncf %53 : vector<128x128xf32> to vector<128x128xbf16>
    %c128_60 = arith.constant 128 : index
    %c0_61 = arith.constant 0 : index
    %55 = vector.load %arg10[%c128_60, %c0_61] : memref<256x128xbf16, #tpu.memory_space<vmem>>, vector<128x128xbf16>
    tpu.vector_store %arg10[%c128_60, %c0_61], %54 {strides = array<i32>} : memref<256x128xbf16, #tpu.memory_space<vmem>>, vector<128x128xbf16>,
    %c0_62 = arith.constant 0 : index
    %c0_63 = arith.constant 0 : index
    %56 = vector.load %arg10[%c0_62, %c0_63] : memref<256x128xbf16, #tpu.memory_space<vmem>>, vector<256x128xbf16>
    %57 = vector.shape_cast %56 : vector<256x128xbf16> to vector<8x2x8x2x128xbf16>
    %58 = vector.extract_strided_slice %57 {offsets = [0, 0, 0, 0, 0], sizes = [8, 1, 8, 1, 128], strides = [1, 1, 1, 1, 1]} : vector<8x2x8x2x128xbf16> to vector<8x1x8x1x128xbf16>
    %59 = vector.shape_cast %58 : vector<8x1x8x1x128xbf16> to vector<8x8x128xbf16>
    %60 = vector.extract_strided_slice %57 {offsets = [0, 0, 0, 1, 0], sizes = [8, 1, 8, 1, 128], strides = [1, 1, 1, 1, 1]} : vector<8x2x8x2x128xbf16> to vector<8x1x8x1x128xbf16>
    %61 = vector.shape_cast %60 : vector<8x1x8x1x128xbf16> to vector<8x8x128xbf16>
    %62 = arith.maximumf %59, %61 : vector<8x8x128xbf16>
    %63 = vector.extract_strided_slice %57 {offsets = [0, 1, 0, 0, 0], sizes = [8, 1, 8, 1, 128], strides = [1, 1, 1, 1, 1]} : vector<8x2x8x2x128xbf16> to vector<8x1x8x1x128xbf16>
    %64 = vector.shape_cast %63 : vector<8x1x8x1x128xbf16> to vector<8x8x128xbf16>
    %65 = vector.extract_strided_slice %57 {offsets = [0, 1, 0, 1, 0], sizes = [8, 1, 8, 1, 128], strides = [1, 1, 1, 1, 1]} : vector<8x2x8x2x128xbf16> to vector<8x1x8x1x128xbf16>
    %66 = vector.shape_cast %65 : vector<8x1x8x1x128xbf16> to vector<8x8x128xbf16>
    %67 = arith.maximumf %64, %66 : vector<8x8x128xbf16>
    %68 = arith.maximumf %62, %67 : vector<8x8x128xbf16>
    %c0_i32 = arith.constant 0 : i32
    %69 = arith.sitofp %c0_i32 : i32 to bf16
    %70 = vector.broadcast %69 : bf16 to vector<1x8x128xbf16>
    %71 = tpu.concatenate %70, %68 in 0 : vector<1x8x128xbf16>, vector<8x8x128xbf16> -> vector<9x8x128xbf16>
    %72 = vector.broadcast %69 : bf16 to vector<1x8x128xbf16>
    %73 = tpu.concatenate %71, %72 in 0 : vector<9x8x128xbf16>, vector<1x8x128xbf16> -> vector<10x8x128xbf16>
    %74 = vector.broadcast %69 : bf16 to vector<10x1x128xbf16>
    %75 = tpu.concatenate %74, %73 in 1 : vector<10x1x128xbf16>, vector<10x8x128xbf16> -> vector<10x9x128xbf16>
    %76 = vector.broadcast %69 : bf16 to vector<10x1x128xbf16>
    %77 = tpu.concatenate %75, %76 in 1 : vector<10x9x128xbf16>, vector<10x1x128xbf16> -> vector<10x10x128xbf16>
    %c0_64 = arith.constant 0 : index
    %c0_65 = arith.constant 0 : index
    %c0_66 = arith.constant 0 : index
    %78 = vector.load %arg11[%c0_64, %c0_65, %c0_66] : memref<10x10x128xbf16, #tpu.memory_space<vmem>>, vector<10x10x128xbf16>
    tpu.vector_store %arg11[%c0_64, %c0_65, %c0_66], %77 {strides = array<i32>} : memref<10x10x128xbf16, #tpu.memory_space<vmem>>, vector<10x10x128xbf16>,
    %c0_67 = arith.constant 0 : index
    %c0_68 = arith.constant 0 : index
    %c0_69 = arith.constant 0 : index
    %79 = vector.load %arg11[%c0_67, %c0_68, %c0_69] : memref<10x10x128xbf16, #tpu.memory_space<vmem>>, vector<8x8x128xbf16>
    %80 = vector.shape_cast %79 : vector<8x8x128xbf16> to vector<64x128xbf16>
    %c0_70 = arith.constant 0 : index
    %c0_71 = arith.constant 0 : index
    %81 = vector.load %arg9[%c0_70, %c0_71] : memref<256x1152xbf16, #tpu.memory_space<vmem>>, vector<64x128xbf16>
    tpu.vector_store %arg9[%c0_70, %c0_71], %80 {strides = array<i32>} : memref<256x1152xbf16, #tpu.memory_space<vmem>>, vector<64x128xbf16>,
    %c0_72 = arith.constant 0 : index
    %c1_73 = arith.constant 1 : index
    %c0_74 = arith.constant 0 : index
    %82 = vector.load %arg11[%c0_72, %c1_73, %c0_74] : memref<10x10x128xbf16, #tpu.memory_space<vmem>>, vector<8x8x128xbf16>
    %83 = vector.shape_cast %82 : vector<8x8x128xbf16> to vector<64x128xbf16>
    %c0_75 = arith.constant 0 : index
    %c128_76 = arith.constant 128 : index
    %84 = vector.load %arg9[%c0_75, %c128_76] : memref<256x1152xbf16, #tpu.memory_space<vmem>>, vector<64x128xbf16>
    tpu.vector_store %arg9[%c0_75, %c128_76], %83 {strides = array<i32>} : memref<256x1152xbf16, #tpu.memory_space<vmem>>, vector<64x128xbf16>,
    %c0_77 = arith.constant 0 : index
    %c2_78 = arith.constant 2 : index
    %c0_79 = arith.constant 0 : index
    %85 = vector.load %arg11[%c0_77, %c2_78, %c0_79] : memref<10x10x128xbf16, #tpu.memory_space<vmem>>, vector<8x8x128xbf16>
    %86 = vector.shape_cast %85 : vector<8x8x128xbf16> to vector<64x128xbf16>
    %c0_80 = arith.constant 0 : index
    %c256_81 = arith.constant 256 : index
    %87 = vector.load %arg9[%c0_80, %c256_81] : memref<256x1152xbf16, #tpu.memory_space<vmem>>, vector<64x128xbf16>
    tpu.vector_store %arg9[%c0_80, %c256_81], %86 {strides = array<i32>} : memref<256x1152xbf16, #tpu.memory_space<vmem>>, vector<64x128xbf16>,
    %c1_82 = arith.constant 1 : index
    %c0_83 = arith.constant 0 : index
    %c0_84 = arith.constant 0 : index
    %88 = vector.load %arg11[%c1_82, %c0_83, %c0_84] : memref<10x10x128xbf16, #tpu.memory_space<vmem>>, vector<8x8x128xbf16>
    %89 = vector.shape_cast %88 : vector<8x8x128xbf16> to vector<64x128xbf16>
    %c0_85 = arith.constant 0 : index
    %c384_86 = arith.constant 384 : index
    %90 = vector.load %arg9[%c0_85, %c384_86] : memref<256x1152xbf16, #tpu.memory_space<vmem>>, vector<64x128xbf16>
    tpu.vector_store %arg9[%c0_85, %c384_86], %89 {strides = array<i32>} : memref<256x1152xbf16, #tpu.memory_space<vmem>>, vector<64x128xbf16>,
    %c1_87 = arith.constant 1 : index
    %c1_88 = arith.constant 1 : index
    %c0_89 = arith.constant 0 : index
    %91 = vector.load %arg11[%c1_87, %c1_88, %c0_89] : memref<10x10x128xbf16, #tpu.memory_space<vmem>>, vector<8x8x128xbf16>
    %92 = vector.shape_cast %91 : vector<8x8x128xbf16> to vector<64x128xbf16>
    %c0_90 = arith.constant 0 : index
    %c512_91 = arith.constant 512 : index
    %93 = vector.load %arg9[%c0_90, %c512_91] : memref<256x1152xbf16, #tpu.memory_space<vmem>>, vector<64x128xbf16>
    tpu.vector_store %arg9[%c0_90, %c512_91], %92 {strides = array<i32>} : memref<256x1152xbf16, #tpu.memory_space<vmem>>, vector<64x128xbf16>,
    %c1_92 = arith.constant 1 : index
    %c2_93 = arith.constant 2 : index
    %c0_94 = arith.constant 0 : index
    %94 = vector.load %arg11[%c1_92, %c2_93, %c0_94] : memref<10x10x128xbf16, #tpu.memory_space<vmem>>, vector<8x8x128xbf16>
    %95 = vector.shape_cast %94 : vector<8x8x128xbf16> to vector<64x128xbf16>
    %c0_95 = arith.constant 0 : index
    %c640_96 = arith.constant 640 : index
    %96 = vector.load %arg9[%c0_95, %c640_96] : memref<256x1152xbf16, #tpu.memory_space<vmem>>, vector<64x128xbf16>
    tpu.vector_store %arg9[%c0_95, %c640_96], %95 {strides = array<i32>} : memref<256x1152xbf16, #tpu.memory_space<vmem>>, vector<64x128xbf16>,
    %c2_97 = arith.constant 2 : index
    %c0_98 = arith.constant 0 : index
    %c0_99 = arith.constant 0 : index
    %97 = vector.load %arg11[%c2_97, %c0_98, %c0_99] : memref<10x10x128xbf16, #tpu.memory_space<vmem>>, vector<8x8x128xbf16>
    %98 = vector.shape_cast %97 : vector<8x8x128xbf16> to vector<64x128xbf16>
    %c0_100 = arith.constant 0 : index
    %c768_101 = arith.constant 768 : index
    %99 = vector.load %arg9[%c0_100, %c768_101] : memref<256x1152xbf16, #tpu.memory_space<vmem>>, vector<64x128xbf16>
    tpu.vector_store %arg9[%c0_100, %c768_101], %98 {strides = array<i32>} : memref<256x1152xbf16, #tpu.memory_space<vmem>>, vector<64x128xbf16>,
    %c2_102 = arith.constant 2 : index
    %c1_103 = arith.constant 1 : index
    %c0_104 = arith.constant 0 : index
    %100 = vector.load %arg11[%c2_102, %c1_103, %c0_104] : memref<10x10x128xbf16, #tpu.memory_space<vmem>>, vector<8x8x128xbf16>
    %101 = vector.shape_cast %100 : vector<8x8x128xbf16> to vector<64x128xbf16>
    %c0_105 = arith.constant 0 : index
    %c896_106 = arith.constant 896 : index
    %102 = vector.load %arg9[%c0_105, %c896_106] : memref<256x1152xbf16, #tpu.memory_space<vmem>>, vector<64x128xbf16>
    tpu.vector_store %arg9[%c0_105, %c896_106], %101 {strides = array<i32>} : memref<256x1152xbf16, #tpu.memory_space<vmem>>, vector<64x128xbf16>,
    %c2_107 = arith.constant 2 : index
    %c2_108 = arith.constant 2 : index
    %c0_109 = arith.constant 0 : index
    %103 = vector.load %arg11[%c2_107, %c2_108, %c0_109] : memref<10x10x128xbf16, #tpu.memory_space<vmem>>, vector<8x8x128xbf16>
    %104 = vector.shape_cast %103 : vector<8x8x128xbf16> to vector<64x128xbf16>
    %c0_110 = arith.constant 0 : index
    %c1024_111 = arith.constant 1024 : index
    %105 = vector.load %arg9[%c0_110, %c1024_111] : memref<256x1152xbf16, #tpu.memory_space<vmem>>, vector<64x128xbf16>
    tpu.vector_store %arg9[%c0_110, %c1024_111], %104 {strides = array<i32>} : memref<256x1152xbf16, #tpu.memory_space<vmem>>, vector<64x128xbf16>,
    %c0_112 = arith.constant 0 : index
    %c0_113 = arith.constant 0 : index
    %106 = vector.load %arg9[%c0_112, %c0_113] : memref<256x1152xbf16, #tpu.memory_space<vmem>>, vector<64x1152xbf16>
    %c0_114 = arith.constant 0 : index
    %c0_115 = arith.constant 0 : index
    %107 = vector.load %arg4[%c0_114, %c0_115] : memref<1152x128xbf16, #tpu.memory_space<vmem>>, vector<1152x128xbf16>
    %cst_116 = arith.constant dense<0.000000e+00> : vector<64x128xf32>
    %108 = tpu.matmul %106, %107, %cst_116 {dimension_numbers = #tpu.dot_dimension_numbers<[1], [0], [0], [1], [0, 0, 1, 1], [], []>} : vector<64x1152xbf16>, vector<1152x128xbf16>, vector<64x128xf32> -> vector<64x128xf32>
    %c0_117 = arith.constant 0 : index
    %c0_118 = arith.constant 0 : index
    %109 = vector.load %arg5[%c0_117, %c0_118] : memref<1x128xf32, #tpu.memory_space<vmem>>, vector<1x128xf32>
    %110 = vector.broadcast %109 : vector<1x128xf32> to vector<64x128xf32>
    %111 = arith.addf %108, %110 : vector<64x128xf32>
    %cst_119 = arith.constant 0.000000e+00 : f32
    %112 = vector.broadcast %cst_119 : f32 to vector<64x128xf32>
    %113 = arith.maximumf %111, %112 : vector<64x128xf32>
    %114 = arith.truncf %113 : vector<64x128xf32> to vector<64x128xbf16>
    %c0_120 = arith.constant 0 : index
    %c0_121 = arith.constant 0 : index
    %115 = vector.load %arg10[%c0_120, %c0_121] : memref<256x128xbf16, #tpu.memory_space<vmem>>, vector<64x128xbf16>
    tpu.vector_store %arg10[%c0_120, %c0_121], %114 {strides = array<i32>} : memref<256x128xbf16, #tpu.memory_space<vmem>>, vector<64x128xbf16>,
    %c0_122 = arith.constant 0 : index
    %c0_123 = arith.constant 0 : index
    %116 = vector.load %arg10[%c0_122, %c0_123] : memref<256x128xbf16, #tpu.memory_space<vmem>>, vector<64x128xbf16>
    %117 = vector.shape_cast %116 : vector<64x128xbf16> to vector<4x2x4x2x128xbf16>
    %118 = vector.extract_strided_slice %117 {offsets = [0, 0, 0, 0, 0], sizes = [4, 1, 4, 1, 128], strides = [1, 1, 1, 1, 1]} : vector<4x2x4x2x128xbf16> to vector<4x1x4x1x128xbf16>
    %119 = vector.shape_cast %118 : vector<4x1x4x1x128xbf16> to vector<4x4x128xbf16>
    %120 = vector.extract_strided_slice %117 {offsets = [0, 0, 0, 1, 0], sizes = [4, 1, 4, 1, 128], strides = [1, 1, 1, 1, 1]} : vector<4x2x4x2x128xbf16> to vector<4x1x4x1x128xbf16>
    %121 = vector.shape_cast %120 : vector<4x1x4x1x128xbf16> to vector<4x4x128xbf16>
    %122 = arith.maximumf %119, %121 : vector<4x4x128xbf16>
    %123 = vector.extract_strided_slice %117 {offsets = [0, 1, 0, 0, 0], sizes = [4, 1, 4, 1, 128], strides = [1, 1, 1, 1, 1]} : vector<4x2x4x2x128xbf16> to vector<4x1x4x1x128xbf16>
    %124 = vector.shape_cast %123 : vector<4x1x4x1x128xbf16> to vector<4x4x128xbf16>
    %125 = vector.extract_strided_slice %117 {offsets = [0, 1, 0, 1, 0], sizes = [4, 1, 4, 1, 128], strides = [1, 1, 1, 1, 1]} : vector<4x2x4x2x128xbf16> to vector<4x1x4x1x128xbf16>
    %126 = vector.shape_cast %125 : vector<4x1x4x1x128xbf16> to vector<4x4x128xbf16>
    %127 = arith.maximumf %124, %126 : vector<4x4x128xbf16>
    %128 = arith.maximumf %122, %127 : vector<4x4x128xbf16>
    %c0_i32_124 = arith.constant 0 : i32
    %129 = arith.sitofp %c0_i32_124 : i32 to bf16
    %130 = vector.broadcast %129 : bf16 to vector<1x4x128xbf16>
    %131 = tpu.concatenate %130, %128 in 0 : vector<1x4x128xbf16>, vector<4x4x128xbf16> -> vector<5x4x128xbf16>
    %132 = vector.broadcast %129 : bf16 to vector<1x4x128xbf16>
    %133 = tpu.concatenate %131, %132 in 0 : vector<5x4x128xbf16>, vector<1x4x128xbf16> -> vector<6x4x128xbf16>
    %134 = vector.broadcast %129 : bf16 to vector<6x1x128xbf16>
    %135 = tpu.concatenate %134, %133 in 1 : vector<6x1x128xbf16>, vector<6x4x128xbf16> -> vector<6x5x128xbf16>
    %136 = vector.broadcast %129 : bf16 to vector<6x1x128xbf16>
    %137 = tpu.concatenate %135, %136 in 1 : vector<6x5x128xbf16>, vector<6x1x128xbf16> -> vector<6x6x128xbf16>
    %c0_125 = arith.constant 0 : index
    %c0_126 = arith.constant 0 : index
    %c0_127 = arith.constant 0 : index
    %138 = vector.load %arg12[%c0_125, %c0_126, %c0_127] : memref<6x6x128xbf16, #tpu.memory_space<vmem>>, vector<6x6x128xbf16>
    tpu.vector_store %arg12[%c0_125, %c0_126, %c0_127], %137 {strides = array<i32>} : memref<6x6x128xbf16, #tpu.memory_space<vmem>>, vector<6x6x128xbf16>,
    %c0_128 = arith.constant 0 : index
    %c0_129 = arith.constant 0 : index
    %c0_130 = arith.constant 0 : index
    %139 = vector.load %arg12[%c0_128, %c0_129, %c0_130] : memref<6x6x128xbf16, #tpu.memory_space<vmem>>, vector<4x4x128xbf16>
    %140 = vector.shape_cast %139 : vector<4x4x128xbf16> to vector<16x128xbf16>
    %c0_131 = arith.constant 0 : index
    %c0_132 = arith.constant 0 : index
    %141 = vector.load %arg9[%c0_131, %c0_132] : memref<256x1152xbf16, #tpu.memory_space<vmem>>, vector<16x128xbf16>
    tpu.vector_store %arg9[%c0_131, %c0_132], %140 {strides = array<i32>} : memref<256x1152xbf16, #tpu.memory_space<vmem>>, vector<16x128xbf16>,
    %c0_133 = arith.constant 0 : index
    %c1_134 = arith.constant 1 : index
    %c0_135 = arith.constant 0 : index
    %142 = vector.load %arg12[%c0_133, %c1_134, %c0_135] : memref<6x6x128xbf16, #tpu.memory_space<vmem>>, vector<4x4x128xbf16>
    %143 = vector.shape_cast %142 : vector<4x4x128xbf16> to vector<16x128xbf16>
    %c0_136 = arith.constant 0 : index
    %c128_137 = arith.constant 128 : index
    %144 = vector.load %arg9[%c0_136, %c128_137] : memref<256x1152xbf16, #tpu.memory_space<vmem>>, vector<16x128xbf16>
    tpu.vector_store %arg9[%c0_136, %c128_137], %143 {strides = array<i32>} : memref<256x1152xbf16, #tpu.memory_space<vmem>>, vector<16x128xbf16>,
    %c0_138 = arith.constant 0 : index
    %c2_139 = arith.constant 2 : index
    %c0_140 = arith.constant 0 : index
    %145 = vector.load %arg12[%c0_138, %c2_139, %c0_140] : memref<6x6x128xbf16, #tpu.memory_space<vmem>>, vector<4x4x128xbf16>
    %146 = vector.shape_cast %145 : vector<4x4x128xbf16> to vector<16x128xbf16>
    %c0_141 = arith.constant 0 : index
    %c256_142 = arith.constant 256 : index
    %147 = vector.load %arg9[%c0_141, %c256_142] : memref<256x1152xbf16, #tpu.memory_space<vmem>>, vector<16x128xbf16>
    tpu.vector_store %arg9[%c0_141, %c256_142], %146 {strides = array<i32>} : memref<256x1152xbf16, #tpu.memory_space<vmem>>, vector<16x128xbf16>,
    %c1_143 = arith.constant 1 : index
    %c0_144 = arith.constant 0 : index
    %c0_145 = arith.constant 0 : index
    %148 = vector.load %arg12[%c1_143, %c0_144, %c0_145] : memref<6x6x128xbf16, #tpu.memory_space<vmem>>, vector<4x4x128xbf16>
    %149 = vector.shape_cast %148 : vector<4x4x128xbf16> to vector<16x128xbf16>
    %c0_146 = arith.constant 0 : index
    %c384_147 = arith.constant 384 : index
    %150 = vector.load %arg9[%c0_146, %c384_147] : memref<256x1152xbf16, #tpu.memory_space<vmem>>, vector<16x128xbf16>
    tpu.vector_store %arg9[%c0_146, %c384_147], %149 {strides = array<i32>} : memref<256x1152xbf16, #tpu.memory_space<vmem>>, vector<16x128xbf16>,
    %c1_148 = arith.constant 1 : index
    %c1_149 = arith.constant 1 : index
    %c0_150 = arith.constant 0 : index
    %151 = vector.load %arg12[%c1_148, %c1_149, %c0_150] : memref<6x6x128xbf16, #tpu.memory_space<vmem>>, vector<4x4x128xbf16>
    %152 = vector.shape_cast %151 : vector<4x4x128xbf16> to vector<16x128xbf16>
    %c0_151 = arith.constant 0 : index
    %c512_152 = arith.constant 512 : index
    %153 = vector.load %arg9[%c0_151, %c512_152] : memref<256x1152xbf16, #tpu.memory_space<vmem>>, vector<16x128xbf16>
    tpu.vector_store %arg9[%c0_151, %c512_152], %152 {strides = array<i32>} : memref<256x1152xbf16, #tpu.memory_space<vmem>>, vector<16x128xbf16>,
    %c1_153 = arith.constant 1 : index
    %c2_154 = arith.constant 2 : index
    %c0_155 = arith.constant 0 : index
    %154 = vector.load %arg12[%c1_153, %c2_154, %c0_155] : memref<6x6x128xbf16, #tpu.memory_space<vmem>>, vector<4x4x128xbf16>
    %155 = vector.shape_cast %154 : vector<4x4x128xbf16> to vector<16x128xbf16>
    %c0_156 = arith.constant 0 : index
    %c640_157 = arith.constant 640 : index
    %156 = vector.load %arg9[%c0_156, %c640_157] : memref<256x1152xbf16, #tpu.memory_space<vmem>>, vector<16x128xbf16>
    tpu.vector_store %arg9[%c0_156, %c640_157], %155 {strides = array<i32>} : memref<256x1152xbf16, #tpu.memory_space<vmem>>, vector<16x128xbf16>,
    %c2_158 = arith.constant 2 : index
    %c0_159 = arith.constant 0 : index
    %c0_160 = arith.constant 0 : index
    %157 = vector.load %arg12[%c2_158, %c0_159, %c0_160] : memref<6x6x128xbf16, #tpu.memory_space<vmem>>, vector<4x4x128xbf16>
    %158 = vector.shape_cast %157 : vector<4x4x128xbf16> to vector<16x128xbf16>
    %c0_161 = arith.constant 0 : index
    %c768_162 = arith.constant 768 : index
    %159 = vector.load %arg9[%c0_161, %c768_162] : memref<256x1152xbf16, #tpu.memory_space<vmem>>, vector<16x128xbf16>
    tpu.vector_store %arg9[%c0_161, %c768_162], %158 {strides = array<i32>} : memref<256x1152xbf16, #tpu.memory_space<vmem>>, vector<16x128xbf16>,
    %c2_163 = arith.constant 2 : index
    %c1_164 = arith.constant 1 : index
    %c0_165 = arith.constant 0 : index
    %160 = vector.load %arg12[%c2_163, %c1_164, %c0_165] : memref<6x6x128xbf16, #tpu.memory_space<vmem>>, vector<4x4x128xbf16>
    %161 = vector.shape_cast %160 : vector<4x4x128xbf16> to vector<16x128xbf16>
    %c0_166 = arith.constant 0 : index
    %c896_167 = arith.constant 896 : index
    %162 = vector.load %arg9[%c0_166, %c896_167] : memref<256x1152xbf16, #tpu.memory_space<vmem>>, vector<16x128xbf16>
    tpu.vector_store %arg9[%c0_166, %c896_167], %161 {strides = array<i32>} : memref<256x1152xbf16, #tpu.memory_space<vmem>>, vector<16x128xbf16>,
    %c2_168 = arith.constant 2 : index
    %c2_169 = arith.constant 2 : index
    %c0_170 = arith.constant 0 : index
    %163 = vector.load %arg12[%c2_168, %c2_169, %c0_170] : memref<6x6x128xbf16, #tpu.memory_space<vmem>>, vector<4x4x128xbf16>
    %164 = vector.shape_cast %163 : vector<4x4x128xbf16> to vector<16x128xbf16>
    %c0_171 = arith.constant 0 : index
    %c1024_172 = arith.constant 1024 : index
    %165 = vector.load %arg9[%c0_171, %c1024_172] : memref<256x1152xbf16, #tpu.memory_space<vmem>>, vector<16x128xbf16>
    tpu.vector_store %arg9[%c0_171, %c1024_172], %164 {strides = array<i32>} : memref<256x1152xbf16, #tpu.memory_space<vmem>>, vector<16x128xbf16>,
    %c0_173 = arith.constant 0 : index
    %c0_174 = arith.constant 0 : index
    %166 = vector.load %arg9[%c0_173, %c0_174] : memref<256x1152xbf16, #tpu.memory_space<vmem>>, vector<16x1152xbf16>
    %c0_175 = arith.constant 0 : index
    %c0_176 = arith.constant 0 : index
    %167 = vector.load %arg6[%c0_175, %c0_176] : memref<1152x128xbf16, #tpu.memory_space<vmem>>, vector<1152x128xbf16>
    %cst_177 = arith.constant dense<0.000000e+00> : vector<16x128xf32>
    %168 = tpu.matmul %166, %167, %cst_177 {dimension_numbers = #tpu.dot_dimension_numbers<[1], [0], [0], [1], [0, 0, 1, 1], [], []>} : vector<16x1152xbf16>, vector<1152x128xbf16>, vector<16x128xf32> -> vector<16x128xf32>
    %c0_178 = arith.constant 0 : index
    %c0_179 = arith.constant 0 : index
    %169 = vector.load %arg7[%c0_178, %c0_179] : memref<1x128xf32, #tpu.memory_space<vmem>>, vector<1x128xf32>
    %170 = vector.broadcast %169 : vector<1x128xf32> to vector<16x128xf32>
    %171 = arith.addf %168, %170 : vector<16x128xf32>
    %cst_180 = arith.constant 0.000000e+00 : f32
    %172 = vector.broadcast %cst_180 : f32 to vector<16x128xf32>
    %173 = arith.maximumf %171, %172 : vector<16x128xf32>
    %174 = arith.truncf %173 : vector<16x128xf32> to vector<16x128xbf16>
    %c0_181 = arith.constant 0 : index
    %c0_182 = arith.constant 0 : index
    %175 = vector.load %arg10[%c0_181, %c0_182] : memref<256x128xbf16, #tpu.memory_space<vmem>>, vector<16x128xbf16>
    tpu.vector_store %arg10[%c0_181, %c0_182], %174 {strides = array<i32>} : memref<256x128xbf16, #tpu.memory_space<vmem>>, vector<16x128xbf16>,
    %c0_183 = arith.constant 0 : index
    %c0_184 = arith.constant 0 : index
    %176 = vector.load %arg10[%c0_183, %c0_184] : memref<256x128xbf16, #tpu.memory_space<vmem>>, vector<16x128xbf16>
    %177 = vector.shape_cast %176 : vector<16x128xbf16> to vector<2x2x2x2x128xbf16>
    %178 = vector.extract_strided_slice %177 {offsets = [0, 0, 0, 0, 0], sizes = [2, 1, 2, 1, 128], strides = [1, 1, 1, 1, 1]} : vector<2x2x2x2x128xbf16> to vector<2x1x2x1x128xbf16>
    %179 = vector.shape_cast %178 : vector<2x1x2x1x128xbf16> to vector<2x2x128xbf16>
    %180 = vector.extract_strided_slice %177 {offsets = [0, 0, 0, 1, 0], sizes = [2, 1, 2, 1, 128], strides = [1, 1, 1, 1, 1]} : vector<2x2x2x2x128xbf16> to vector<2x1x2x1x128xbf16>
    %181 = vector.shape_cast %180 : vector<2x1x2x1x128xbf16> to vector<2x2x128xbf16>
    %182 = arith.maximumf %179, %181 : vector<2x2x128xbf16>
    %183 = vector.extract_strided_slice %177 {offsets = [0, 1, 0, 0, 0], sizes = [2, 1, 2, 1, 128], strides = [1, 1, 1, 1, 1]} : vector<2x2x2x2x128xbf16> to vector<2x1x2x1x128xbf16>
    %184 = vector.shape_cast %183 : vector<2x1x2x1x128xbf16> to vector<2x2x128xbf16>
    %185 = vector.extract_strided_slice %177 {offsets = [0, 1, 0, 1, 0], sizes = [2, 1, 2, 1, 128], strides = [1, 1, 1, 1, 1]} : vector<2x2x2x2x128xbf16> to vector<2x1x2x1x128xbf16>
    %186 = vector.shape_cast %185 : vector<2x1x2x1x128xbf16> to vector<2x2x128xbf16>
    %187 = arith.maximumf %184, %186 : vector<2x2x128xbf16>
    %188 = arith.maximumf %182, %187 : vector<2x2x128xbf16>
    %189 = vector.shape_cast %188 : vector<2x2x128xbf16> to vector<4x128xbf16>
    %c0_185 = arith.constant 0 : index
    %c0_186 = arith.constant 0 : index
    %c0_187 = arith.constant 0 : index
    %190 = vector.load %arg8[%c0_185, %c0_186, %c0_187] : memref<1x4x128xbf16, #tpu.memory_space<vmem>>, vector<1x4x128xbf16>
    %191 = vector.shape_cast %190 : vector<1x4x128xbf16> to vector<4x128xbf16>
    %192 = vector.shape_cast %189 : vector<4x128xbf16> to vector<1x4x128xbf16>
    tpu.vector_store %arg8[%c0_185, %c0_186, %c0_187], %192 {strides = array<i32>} : memref<1x4x128xbf16, #tpu.memory_space<vmem>>, vector<1x4x128xbf16>,
    return
  }
  func.func @transform_0(%arg0: i32) -> (i32, i32, i32, i32) {
    %c0_i32 = arith.constant 0 : i32
    %c0_i32_0 = arith.constant 0 : i32
    %c0_i32_1 = arith.constant 0 : i32
    %c0_i32_2 = arith.constant 0 : i32
    return %arg0, %c0_i32, %c0_i32_0, %c0_i32_1 : i32, i32, i32, i32
  }
  func.func @transform_1(%arg0: i32) -> (i32, i32) {
    %c0_i32 = arith.constant 0 : i32
    %c0_i32_0 = arith.constant 0 : i32
    %c0_i32_1 = arith.constant 0 : i32
    return %c0_i32, %c0_i32_0 : i32, i32
  }
  func.func @transform_2(%arg0: i32) -> (i32, i32) {
    %c0_i32 = arith.constant 0 : i32
    %c0_i32_0 = arith.constant 0 : i32
    %c0_i32_1 = arith.constant 0 : i32
    return %c0_i32, %c0_i32_0 : i32, i32
  }
  func.func @transform_3(%arg0: i32) -> (i32, i32) {
    %c0_i32 = arith.constant 0 : i32
    %c0_i32_0 = arith.constant 0 : i32
    %c0_i32_1 = arith.constant 0 : i32
    return %c0_i32, %c0_i32_0 : i32, i32
  }
  func.func @transform_4(%arg0: i32) -> (i32, i32) {
    %c0_i32 = arith.constant 0 : i32
    %c0_i32_0 = arith.constant 0 : i32
    %c0_i32_1 = arith.constant 0 : i32
    return %c0_i32, %c0_i32_0 : i32, i32
  }
  func.func @transform_5(%arg0: i32) -> (i32, i32) {
    %c0_i32 = arith.constant 0 : i32
    %c0_i32_0 = arith.constant 0 : i32
    %c0_i32_1 = arith.constant 0 : i32
    return %c0_i32, %c0_i32_0 : i32, i32
  }
  func.func @transform_6(%arg0: i32) -> (i32, i32) {
    %c0_i32 = arith.constant 0 : i32
    %c0_i32_0 = arith.constant 0 : i32
    %c0_i32_1 = arith.constant 0 : i32
    return %c0_i32, %c0_i32_0 : i32, i32
  }
  func.func @transform_7(%arg0: i32) -> (i32, i32, i32) {
    %c0_i32 = arith.constant 0 : i32
    %c0_i32_0 = arith.constant 0 : i32
    %c0_i32_1 = arith.constant 0 : i32
    return %arg0, %c0_i32, %c0_i32_0 : i32, i32, i32
  }
}

module attributes {stable_mosaic.version = 11 : i64} {
  func.func @_classifier_kernel(%arg0: memref<2x4x128xbf16, #tpu.memory_space<vmem>>, %arg1: memref<512x128xbf16, #tpu.memory_space<vmem>>, %arg2: memref<1x128xf32, #tpu.memory_space<vmem>>, %arg3: memref<1x128xf32, #tpu.memory_space<vmem>>, %arg4: memref<1x128xf32, #tpu.memory_space<vmem>>, %arg5: memref<128x128xbf16, #tpu.memory_space<vmem>>, %arg6: memref<1x128xf32, #tpu.memory_space<vmem>>, %arg7: memref<1x128xf32, #tpu.memory_space<vmem>>, %arg8: memref<1x128xf32, #tpu.memory_space<vmem>>, %arg9: memref<128x128xbf16, #tpu.memory_space<vmem>>, %arg10: memref<1x128xf32, #tpu.memory_space<vmem>>, %arg11: memref<2x128xf32, #tpu.memory_space<vmem>>) attributes {dimension_semantics = [], scalar_prefetch = 0 : i64, scratch_operands = 0 : i64, tpu.core_type = #tpu.core_type<tc>} {
    %c0 = arith.constant 0 : index
    %c0_0 = arith.constant 0 : index
    %c0_1 = arith.constant 0 : index
    %0 = vector.load %arg0[%c0, %c0_0, %c0_1] : memref<2x4x128xbf16, #tpu.memory_space<vmem>>, vector<2x4x128xbf16>
    %1 = vector.shape_cast %0 : vector<2x4x128xbf16> to vector<2x512xbf16>
    %c0_2 = arith.constant 0 : index
    %c0_3 = arith.constant 0 : index
    %2 = vector.load %arg1[%c0_2, %c0_3] : memref<512x128xbf16, #tpu.memory_space<vmem>>, vector<512x128xbf16>
    %cst = arith.constant dense<0.000000e+00> : vector<2x128xf32>
    %3 = tpu.matmul %1, %2, %cst {dimension_numbers = #tpu.dot_dimension_numbers<[1], [0], [0], [1], [0, 0, 1, 1], [], []>} : vector<2x512xbf16>, vector<512x128xbf16>, vector<2x128xf32> -> vector<2x128xf32>
    %c0_4 = arith.constant 0 : index
    %c0_5 = arith.constant 0 : index
    %4 = vector.load %arg2[%c0_4, %c0_5] : memref<1x128xf32, #tpu.memory_space<vmem>>, vector<1x128xf32>
    %5 = vector.broadcast %4 : vector<1x128xf32> to vector<2x128xf32>
    %6 = arith.addf %3, %5 : vector<2x128xf32>
    %cst_6 = arith.constant dense<0.000000e+00> : vector<128xf32>
    %7 = vector.multi_reduction <add>, %6, %cst_6 [0] : vector<2x128xf32> to vector<128xf32>
    %8 = vector.shape_cast %7 : vector<128xf32> to vector<1x128xf32>
    %cst_7 = arith.constant 5.000000e-01 : f32
    %9 = vector.broadcast %cst_7 : f32 to vector<1x128xf32>
    %10 = arith.mulf %8, %9 : vector<1x128xf32>
    %11 = vector.broadcast %10 : vector<1x128xf32> to vector<2x128xf32>
    %12 = arith.subf %6, %11 : vector<2x128xf32>
    %13 = arith.mulf %12, %12 : vector<2x128xf32>
    %cst_8 = arith.constant dense<0.000000e+00> : vector<128xf32>
    %14 = vector.multi_reduction <add>, %13, %cst_8 [0] : vector<2x128xf32> to vector<128xf32>
    %15 = vector.shape_cast %14 : vector<128xf32> to vector<1x128xf32>
    %cst_9 = arith.constant 5.000000e-01 : f32
    %16 = vector.broadcast %cst_9 : f32 to vector<1x128xf32>
    %17 = arith.mulf %15, %16 : vector<1x128xf32>
    %cst_10 = arith.constant 9.99999974E-6 : f32
    %18 = vector.broadcast %cst_10 : f32 to vector<1x128xf32>
    %19 = arith.addf %17, %18 : vector<1x128xf32>
    %20 = math.rsqrt %19 : vector<1x128xf32>
    %21 = vector.broadcast %20 : vector<1x128xf32> to vector<2x128xf32>
    %22 = arith.mulf %12, %21 : vector<2x128xf32>
    %c0_11 = arith.constant 0 : index
    %c0_12 = arith.constant 0 : index
    %23 = vector.load %arg3[%c0_11, %c0_12] : memref<1x128xf32, #tpu.memory_space<vmem>>, vector<1x128xf32>
    %24 = vector.broadcast %23 : vector<1x128xf32> to vector<2x128xf32>
    %25 = arith.mulf %22, %24 : vector<2x128xf32>
    %c0_13 = arith.constant 0 : index
    %c0_14 = arith.constant 0 : index
    %26 = vector.load %arg4[%c0_13, %c0_14] : memref<1x128xf32, #tpu.memory_space<vmem>>, vector<1x128xf32>
    %27 = vector.broadcast %26 : vector<1x128xf32> to vector<2x128xf32>
    %28 = arith.addf %25, %27 : vector<2x128xf32>
    %cst_15 = arith.constant 0.000000e+00 : f32
    %29 = vector.broadcast %cst_15 : f32 to vector<2x128xf32>
    %30 = arith.maximumf %28, %29 : vector<2x128xf32>
    %31 = arith.truncf %30 : vector<2x128xf32> to vector<2x128xbf16>
    %c0_16 = arith.constant 0 : index
    %c0_17 = arith.constant 0 : index
    %32 = vector.load %arg5[%c0_16, %c0_17] : memref<128x128xbf16, #tpu.memory_space<vmem>>, vector<128x128xbf16>
    %cst_18 = arith.constant dense<0.000000e+00> : vector<2x128xf32>
    %33 = tpu.matmul %31, %32, %cst_18 {dimension_numbers = #tpu.dot_dimension_numbers<[1], [0], [0], [1], [0, 0, 1, 1], [], []>} : vector<2x128xbf16>, vector<128x128xbf16>, vector<2x128xf32> -> vector<2x128xf32>
    %c0_19 = arith.constant 0 : index
    %c0_20 = arith.constant 0 : index
    %34 = vector.load %arg6[%c0_19, %c0_20] : memref<1x128xf32, #tpu.memory_space<vmem>>, vector<1x128xf32>
    %35 = vector.broadcast %34 : vector<1x128xf32> to vector<2x128xf32>
    %36 = arith.addf %33, %35 : vector<2x128xf32>
    %cst_21 = arith.constant dense<0.000000e+00> : vector<128xf32>
    %37 = vector.multi_reduction <add>, %36, %cst_21 [0] : vector<2x128xf32> to vector<128xf32>
    %38 = vector.shape_cast %37 : vector<128xf32> to vector<1x128xf32>
    %cst_22 = arith.constant 5.000000e-01 : f32
    %39 = vector.broadcast %cst_22 : f32 to vector<1x128xf32>
    %40 = arith.mulf %38, %39 : vector<1x128xf32>
    %41 = vector.broadcast %40 : vector<1x128xf32> to vector<2x128xf32>
    %42 = arith.subf %36, %41 : vector<2x128xf32>
    %43 = arith.mulf %42, %42 : vector<2x128xf32>
    %cst_23 = arith.constant dense<0.000000e+00> : vector<128xf32>
    %44 = vector.multi_reduction <add>, %43, %cst_23 [0] : vector<2x128xf32> to vector<128xf32>
    %45 = vector.shape_cast %44 : vector<128xf32> to vector<1x128xf32>
    %cst_24 = arith.constant 5.000000e-01 : f32
    %46 = vector.broadcast %cst_24 : f32 to vector<1x128xf32>
    %47 = arith.mulf %45, %46 : vector<1x128xf32>
    %cst_25 = arith.constant 9.99999974E-6 : f32
    %48 = vector.broadcast %cst_25 : f32 to vector<1x128xf32>
    %49 = arith.addf %47, %48 : vector<1x128xf32>
    %50 = math.rsqrt %49 : vector<1x128xf32>
    %51 = vector.broadcast %50 : vector<1x128xf32> to vector<2x128xf32>
    %52 = arith.mulf %42, %51 : vector<2x128xf32>
    %c0_26 = arith.constant 0 : index
    %c0_27 = arith.constant 0 : index
    %53 = vector.load %arg7[%c0_26, %c0_27] : memref<1x128xf32, #tpu.memory_space<vmem>>, vector<1x128xf32>
    %54 = vector.broadcast %53 : vector<1x128xf32> to vector<2x128xf32>
    %55 = arith.mulf %52, %54 : vector<2x128xf32>
    %c0_28 = arith.constant 0 : index
    %c0_29 = arith.constant 0 : index
    %56 = vector.load %arg8[%c0_28, %c0_29] : memref<1x128xf32, #tpu.memory_space<vmem>>, vector<1x128xf32>
    %57 = vector.broadcast %56 : vector<1x128xf32> to vector<2x128xf32>
    %58 = arith.addf %55, %57 : vector<2x128xf32>
    %cst_30 = arith.constant 0.000000e+00 : f32
    %59 = vector.broadcast %cst_30 : f32 to vector<2x128xf32>
    %60 = arith.maximumf %58, %59 : vector<2x128xf32>
    %61 = arith.truncf %60 : vector<2x128xf32> to vector<2x128xbf16>
    %c0_31 = arith.constant 0 : index
    %c0_32 = arith.constant 0 : index
    %62 = vector.load %arg9[%c0_31, %c0_32] : memref<128x128xbf16, #tpu.memory_space<vmem>>, vector<128x128xbf16>
    %cst_33 = arith.constant dense<0.000000e+00> : vector<2x128xf32>
    %63 = tpu.matmul %61, %62, %cst_33 {dimension_numbers = #tpu.dot_dimension_numbers<[1], [0], [0], [1], [0, 0, 1, 1], [], []>} : vector<2x128xbf16>, vector<128x128xbf16>, vector<2x128xf32> -> vector<2x128xf32>
    %c0_34 = arith.constant 0 : index
    %c0_35 = arith.constant 0 : index
    %64 = vector.load %arg10[%c0_34, %c0_35] : memref<1x128xf32, #tpu.memory_space<vmem>>, vector<1x128xf32>
    %65 = vector.broadcast %64 : vector<1x128xf32> to vector<2x128xf32>
    %66 = arith.addf %63, %65 : vector<2x128xf32>
    %c0_36 = arith.constant 0 : index
    %c0_37 = arith.constant 0 : index
    %67 = vector.load %arg11[%c0_36, %c0_37] : memref<2x128xf32, #tpu.memory_space<vmem>>, vector<2x128xf32>
    tpu.vector_store %arg11[%c0_36, %c0_37], %66 {strides = array<i32>} : memref<2x128xf32, #tpu.memory_space<vmem>>, vector<2x128xf32>,
    return
  }
}

</mosaic_0001>

<bundles_post_ra>
// kernel: vgg_automl_forward.3
= control target key start
LH: loop header
LB: loop body
LE: loop exit
PB: predicated region body
PF: predicated region fallthrough
CT: control target
= control target key end

     0   :  { %16 = vsyncpa [#allocation3], 0  ;;  %s1392_s0 = inlined_call_operand.vmem [shape: bf16[2,4,128], index: 0, kind: input, shape index: {}]   ;;  %s1393_s1 = inlined_call_operand.hbm [shape: bf16[512,128], index: 1, kind: input, shape index: {}]   ;;  %s1394_s2 = inlined_call_operand.vmem [shape: f32[1,128], index: 2, kind: input, shape index: {}]   ;;  %s1395_s3 = inlined_call_operand.hbm [shape: f32[1,128], index: 3, kind: input, shape index: {}]   ;;  %s1396_s4 = inlined_call_operand.hbm [shape: f32[1,128], index: 4, kind: input, shape index: {}]   ;;  %s1397_s5 = inlined_call_operand.hbm [shape: bf16[128,128], index: 5, kind: input, shape index: {}]   ;;  %s1398_s6 = inlined_call_operand.hbm [shape: f32[1,128], index: 6, kind: input, shape index: {}]   ;;  %s1399_s7 = inlined_call_operand.hbm [shape: f32[1,128], index: 7, kind: input, shape index: {}]   ;;  %s1400_s8 = inlined_call_operand.hbm [shape: f32[1,128], index: 8, kind: input, shape index: {}]   ;;  %s1401_s9 = inlined_call_operand.hbm [shape: bf16[128,128], index: 9, kind: input, shape index: {}]   ;;  %s1402_s10 = inlined_call_operand.hbm [shape: f32[1,128], index: 10, kind: input, shape index: {}]   ;;  %s1403_s11 = inlined_call_operand.hbm [shape: f32[2,128], index: 11, kind: output, shape index: {}]  }
   0x1   :  { %17 = vsyncpa [#allocation6], 0 }
   0x2   :  { %18 = vsyncpa [#allocation9], 0 }
   0x3   :  { %19 = vsyncpa [#allocation12], 0 }
   0x4   :  { %20 = vsyncpa [#allocation15], 0  ;;  %s44_s19 = sshll.u32 %s1395_s3, 4  ;;  %s45_s19 = int_to_ptr.hbm [resolvable:$true] %s44_s19 }
   0x5   :  { %21 = vsyncpa [#allocation4], 0  ;;  %s1277_s20 = smov [#allocation5]   ;;  %s65_s24 = sshll.u32 %s1397_s5, 4  ;;  %s66_s24 = int_to_ptr.hbm [resolvable:$true] %s65_s24 }
   0x6   :  { %s46_s21 = sshll.u32 %s1277_s20, 4  ;;  %s1278_s25 = smov [#allocation8]   ;;  %s47_s21 = int_to_ptr.vmem [resolvable:$true] %s46_s21 }
   0x7   :  { %49 = dma.hbm_to_vmem [thread:$0]  %s45_s19, 16, %s47_s21, [#allocation6]  }
   0x8   :  { %s67_s26 = sshll.u32 %s1278_s25, 4  ;;  %s90_s29 = sshll.u32 %s1399_s7, 4  ;;  %s68_s26 = int_to_ptr.vmem [resolvable:$true] %s67_s26  ;;  %s91_s29 = int_to_ptr.hbm [resolvable:$true] %s90_s29 }
   0x9   :  { %s1279_s3 = smov 64   ;;  %s1280_s30 = smov 4  }
   0xa   :  { %73 = dma.hbm_to_vmem [thread:$0]  %s66_s24, 1024, %s68_s26, [#allocation9], %s1279_s3, %s1279_s3, %s1280_s30  }
   0xb   :  { %s111_s14 = sshll.u32 %s1401_s9, 4  ;;  %s1281_s15 = smov [#allocation11]   ;;  %s112_s14 = int_to_ptr.hbm [resolvable:$true] %s111_s14 }
   0xc   :  { %s92_s16 = sshll.u32 %s1281_s15, 4  ;;  %s1282_s5 = smov [#allocation14]   ;;  %s93_s16 = int_to_ptr.vmem [resolvable:$true] %s92_s16 }
   0xd   :  { %95 = dma.hbm_to_vmem [thread:$0]  %s91_s29, 16, %s93_s16, [#allocation12]  }
   0xe   :  { %s113_s17 = sshll.u32 %s1282_s5, 4  ;;  %s28_s7 = sshll.u32 %s1393_s1, 4  ;;  %s114_s17 = int_to_ptr.vmem [resolvable:$true] %s113_s17  ;;  %s29_s7 = int_to_ptr.hbm [resolvable:$true] %s28_s7 }
   0xf   :  { %119 = dma.hbm_to_vmem [thread:$0]  %s112_s14, 1024, %s114_s17, [#allocation15], %s1279_s3, %s1279_s3, %s1280_s30  }
  0x10   :  { %s55_s22 = sshll.u32 %s1396_s4, 4  ;;  %s1283_s23 = smov [#allocation2]   ;;  %s56_s22 = int_to_ptr.hbm [resolvable:$true] %s55_s22 }
  0x11   :  { %s30_s9 = sshll.u32 %s1283_s23, 4  ;;  %s1284_s24 = smov [#allocation7]   ;;  %s31_s9 = int_to_ptr.vmem [resolvable:$true] %s30_s9 }
  0x12   :  { %36 = dma.hbm_to_vmem [thread:$0]  %s29_s7, 4096, %s31_s9, [#allocation3], %s1279_s3, %s1279_s3, %s1280_s30  }
  0x13   :  { %s57_s25 = sshll.u32 %s1284_s24, 4  ;;  %s79_s28 = sshll.u32 %s1398_s6, 4  ;;  %s58_s25 = int_to_ptr.vmem [resolvable:$true] %s57_s25  ;;  %s80_s28 = int_to_ptr.hbm [resolvable:$true] %s79_s28 }
  0x14   :  { %60 = dma.hbm_to_vmem [thread:$0]  %s56_s22, 16, %s58_s25, [#allocation6]  }
  0x15   :  { %s101_s12 = sshll.u32 %s1400_s8, 4  ;;  %s1285_s13 = smov [#allocation10]   ;;  %s102_s12 = int_to_ptr.hbm [resolvable:$true] %s101_s12 }
  0x16   :  { %s81_s4 = sshll.u32 %s1285_s13, 4  ;;  %s1286_s14 = smov [#allocation13]   ;;  %s82_s4 = int_to_ptr.vmem [resolvable:$true] %s81_s4 }
  0x17   :  { %84 = dma.hbm_to_vmem [thread:$0]  %s80_s28, 16, %s82_s4, [#allocation9]  }
  0x18   :  { %s103_s3 = sshll.u32 %s1286_s14, 4  ;;  %s125_s16 = sshll.u32 %s1402_s10, 4  ;;  %s104_s3 = int_to_ptr.vmem [resolvable:$true] %s103_s3  ;;  %s126_s16 = int_to_ptr.hbm [resolvable:$true] %s125_s16 }
  0x19   :  { %106 = dma.hbm_to_vmem [thread:$0]  %s102_s12, 16, %s104_s3, [#allocation12]  }
  0x1a   :  { %s1287_s6 = smov [#allocation16]  }
  0x1b   :  { %s127_s5 = sshll.u32 %s1287_s6, 4  ;;  %s128_s5 = int_to_ptr.vmem [resolvable:$true] %s127_s5 }
  0x1c   :  { %130 = dma.hbm_to_vmem [thread:$0]  %s126_s16, 16, %s128_s5, [#allocation15]  }
  0x1d   :  { %1265 = dma.done.wait [#allocation3], 4096  }
  0x1e   :  { %1266 = vsyncadd [#allocation3], 4294963200 }
  0x1f   :  { %1267 = dma.done.wait [#allocation6], 32  }
  0x20   :  { %1268 = vsyncadd [#allocation6], 4294967264 }
  0x21   :  { %1269 = dma.done.wait [#allocation9], 1040  }
  0x22   :  { %1270 = vsyncadd [#allocation9], 4294966256 }
  0x23   :  { %1271 = dma.done.wait [#allocation12], 32  }
  0x24   :  { %1272 = vsyncadd [#allocation12], 4294967264 }
  0x25   :  { %1273 = dma.done.wait [#allocation15], 1040  }
  0x26   :  { %1274 = vsyncadd [#allocation15], 4294966256  ;;  %v961_v0 = vld [vmem:[#allocation2 + $0x38] sm:$0xff]  ;;  %v960_v4 = vld [vmem:[#allocation2 + $0x30] sm:$0xff]  ;;  %vm492_vm0 = vcmask 1041408   ;;  %s747_s22 = sshll.u32 %s1403_s11, 4  ;;  %s748_s22 = int_to_ptr.hbm [resolvable:$true] %s747_s22 }
  0x27   :  { %v969_v1 = vld [vmem:[#allocation2 + $0x78] sm:$0xff]  ;;  %440 = vmatpush.bf16.msra.mxu0 %v961_v0  ;;  %v968_v5 = vld [vmem:[#allocation2 + $0x70] sm:$0xff]  ;;  %v959_v8 = vld [vmem:[#allocation2 + $0x28] sm:$0xff] }
  0x28   :  { %v977_v2 = vld [vmem:[#allocation2 + $0xb8] sm:$0xff]  ;;  %453 = vmatpush.bf16.msra.mxu1 %v969_v1  ;;  %v976_v6 = vld [vmem:[#allocation2 + $0xb0] sm:$0xff]  ;;  %v967_v9 = vld [vmem:[#allocation2 + $0x68] sm:$0xff] }
  0x29   :  { %v985_v3 = vld [vmem:[#allocation2 + $0xf8] sm:$0xff]  ;;  %466 = vmatpush.bf16.msra.mxu2 %v977_v2  ;;  %v984_v7 = vld [vmem:[#allocation2 + $0xf0] sm:$0xff]  ;;  %v975_v10 = vld [vmem:[#allocation2 + $0xa8] sm:$0xff] }
  0x2a   :  { %479 = vmatpush.bf16.msra.mxu3 %v985_v3  ;;  %v983_v11 = vld [vmem:[#allocation2 + $0xe8] sm:$0xff]  ;;  %v958_v12 = vld [vmem:[#allocation2 + $0x20] sm:$0xff]  ;;  %v957_v16 = vld [vmem:[#allocation2 + $0x18] sm:$0xff] }
  0x2b   :  { %441 = vmatpush.bf16.msra.mxu0 %v960_v4  ;;  %v966_v13 = vld [vmem:[#allocation2 + $0x60] sm:$0xff]  ;;  %v965_v17 = vld [vmem:[#allocation2 + $0x58] sm:$0xff]  ;;  %v956_v20 = vld [vmem:[#allocation2 + $0x10] sm:$0xff] }
  0x2c   :  { %454 = vmatpush.bf16.msra.mxu1 %v968_v5  ;;  %v974_v14 = vld [vmem:[#allocation2 + $0xa0] sm:$0xff]  ;;  %v973_v18 = vld [vmem:[#allocation2 + $0x98] sm:$0xff]  ;;  %v964_v21 = vld [vmem:[#allocation2 + $0x50] sm:$0xff] }
  0x2d   :  { %467 = vmatpush.bf16.msra.mxu2 %v976_v6  ;;  %v982_v15 = vld [vmem:[#allocation2 + $0xe0] sm:$0xff]  ;;  %v981_v19 = vld [vmem:[#allocation2 + $0xd8] sm:$0xff]  ;;  %v972_v22 = vld [vmem:[#allocation2 + $0x90] sm:$0xff] }
  0x2e   :  { %480 = vmatpush.bf16.msra.mxu3 %v984_v7  ;;  %v980_v23 = vld [vmem:[#allocation2 + $0xd0] sm:$0xff]  ;;  %v955_v24 = vld [vmem:[#allocation2 + $0x8] sm:$0xff]  ;;  %v167_v26 = vld [vmem:[%s1392_s0] ss:$2 sm:$0x3] }
  0x2f   :  { %442 = vmatpush.bf16.msra.mxu0 %v959_v8  ;;  %v963_v25 = vld [vmem:[#allocation2 + $0x48] sm:$0xff]  ;;  %v761_v29 = vld [vmem:[%s1392_s0 + $0x1] ss:$2 sm:$0x3]  ;;  %v168_v30 = vshrl.u32 %v167_v26, 16  ;;  %v172_v36 = vpack.c.b16 %v167_v26, %v167_v26  ;;  %v992_v57 = vld [vmem:[#allocation8 + $0x30] sm:$0xff] }
  0x30   :  { %455 = vmatpush.bf16.msra.mxu1 %v967_v9  ;;  %v971_v27 = vld [vmem:[#allocation2 + $0x88] sm:$0xff]  ;;  %v954_v31 = vld [vmem:[#allocation2] sm:$0xff]  ;;  %v171_v33 = vshrl.u32 %v761_v29, 16  ;;  %v174_v38 = vpack.c.b16 %v761_v29, %v761_v29  ;;  %v988_v5 = vld [vmem:[#allocation8 + $0x10] sm:$0xff] }
  0x31   :  { %468 = vmatpush.bf16.msra.mxu2 %v975_v10  ;;  %v979_v28 = vld [vmem:[#allocation2 + $0xc8] sm:$0xff]  ;;  %v962_v32 = vld [vmem:[#allocation2 + $0x40] sm:$0xff]  ;;  %v173_v37 = vpack.c.b16 %v168_v30, %v168_v30 }
  0x32   :  { %481 = vmatpush.bf16.msra.mxu3 %v983_v11  ;;  %v970_v34 = vld [vmem:[#allocation2 + $0x80] sm:$0xff]  ;;  %v175_v39 = vpack.c.b16 %v171_v33, %v171_v33  ;;  %v991_v60 = vld [vmem:[#allocation8 + $0x28] sm:$0xff] }
  0x33   :  { %443 = vmatpush.bf16.msra.mxu0 %v958_v12  ;;  %v978_v35 = vld [vmem:[#allocation2 + $0xc0] sm:$0xff]  ;;  %v987_v8 = vld [vmem:[#allocation8 + $0x8] sm:$0xff] }
  0x34   :  { %456 = vmatpush.bf16.msra.mxu1 %v966_v13  ;;  %v1014_v40 = vld [vmem:[%s1394_s2] ss:$0 sm:$0xff]  ;;  %v990_v63 = vld [vmem:[#allocation8 + $0x20] sm:$0xff]  ;;  %s1288_s2 = smov [#allocation17]  }
  0x35   :  { %469 = vmatpush.bf16.msra.mxu2 %v974_v14  ;;  %v993_v51 = vld [vmem:[#allocation8 + $0x38] sm:$0xff]  ;;  %v986_v10 = vld [vmem:[#allocation8] sm:$0xff]  ;;  %s745_s7 = sshll.u32 %s1288_s2, 4  ;;  %s746_s7 = int_to_ptr.vmem [resolvable:$true] %s745_s7 }
  0x36   :  { %482 = vmatpush.bf16.msra.mxu3 %v982_v15  ;;  %v989_v2 = vld [vmem:[#allocation8 + $0x18] sm:$0xff]  ;;  %v1017_v30 = vld [vmem:[#allocation10] ss:$0 sm:$0xff] }
  0x37   :  { %444 = vmatpush.bf16.msra.mxu0 %v957_v16  ;;  %v1001_v33 = vld [vmem:[#allocation14 + $0x38] sm:$0xff] }
  0x38   :  { %457 = vmatpush.bf16.msra.mxu1 %v965_v17 }
  0x39   :  { %470 = vmatpush.bf16.msra.mxu2 %v973_v18 }
  0x3a   :  { %483 = vmatpush.bf16.msra.mxu3 %v981_v19 }
  0x3b   :  { %445 = vmatpush.bf16.msra.mxu0 %v956_v20 }
  0x3c   :  { %458 = vmatpush.bf16.msra.mxu1 %v964_v21 }
  0x3d   :  { %471 = vmatpush.bf16.msra.mxu2 %v972_v22  ;;  %v1015_v22 = vld [vmem:[#allocation5] ss:$0 sm:$0xff] }
  0x3e   :  { %484 = vmatpush.bf16.msra.mxu3 %v980_v23 }
  0x3f   :  { %446 = vmatpush.bf16.msra.mxu0 %v955_v24 }
  0x40   :  { %459 = vmatpush.bf16.msra.mxu1 %v963_v25  ;;  %v1016_v25 = vld [vmem:[#allocation7] ss:$0 sm:$0xff] }
  0x41   :  { %472 = vmatpush.bf16.msra.mxu2 %v971_v27 }
  0x42   :  { %485 = vmatpush.bf16.msra.mxu3 %v979_v28 }
  0x43   :  { %447 = vmatpush.bf16.msra.mxu0 %v954_v31 }
  0x44   :  { %460 = vmatpush.bf16.msra.mxu1 %v962_v32 }
  0x45   :  { %473 = vmatpush.bf16.msra.mxu2 %v970_v34 }
  0x46   :  { %486 = vmatpush.bf16.msra.mxu3 %v978_v35  ;;  %448 = vmatmul.bf16.vlgmr.msra.gmra.mxu0 %v172_v36 }
  0x47   :  { %461 = vmatmul.bf16.vlgmr.msra.gmra.mxu1 %v173_v37  ;;  %603 = vmatpush.bf16.msrb.mxu0 %v993_v51  ;;  %v1000_v37 = vld [vmem:[#allocation14 + $0x30] sm:$0xff] }
  0x48   :  { %474 = vmatmul.bf16.vlgmr.msra.gmra.mxu2 %v174_v38  ;;  %726 = vmatpush.bf16.msrb.mxu1 %v1001_v33 }
  0x49   :  { %487 = vmatmul.bf16.vlgmr.msra.gmra.mxu3 %v175_v39 }
  0x4b   :  { %604 = vmatpush.bf16.msrb.mxu0 %v992_v57 }
  0x4c   :  { %727 = vmatpush.bf16.msrb.mxu1 %v1000_v37 }
  0x4f   :  { %605 = vmatpush.bf16.msrb.mxu0 %v991_v60 }
  0x53   :  { %606 = vmatpush.bf16.msrb.mxu0 %v990_v63 }
  0x57   :  { %607 = vmatpush.bf16.msrb.mxu0 %v989_v2 }
  0x5b   :  { %608 = vmatpush.bf16.msrb.mxu0 %v988_v5 }
  0x5f   :  { %609 = vmatpush.bf16.msrb.mxu0 %v987_v8 }
  0x63   :  { %610 = vmatpush.bf16.msrb.mxu0 %v986_v10 }
  0xc3   :  { %v449_v41 = vpop.f32.mrf.mxu0 }
  0xc4   :  { %v462_v42 = vpop.f32.mrf.mxu1  ;;  %v450_v43 = vadd.f32 %v1014_v40, %v449_v41  ;;  %v999_v41 = vld [vmem:[#allocation14 + $0x28] sm:$0xff] }
  0xc5   :  { %728 = vmatpush.bf16.msrb.mxu1 %v999_v41 }
  0xc6   :  { %v463_v44 = vadd.f32 %v462_v42, %v450_v43 }
  0xcb   :  { %v475_v45 = vpop.f32.mrf.mxu2  ;;  %v451_v48 = vpop.f32.mrf.mxu0 }
  0xcc   :  { %v488_v46 = vpop.f32.mrf.mxu3  ;;  %v476_v47 = vadd.f32 %v475_v45, %v463_v44  ;;  %v464_v49 = vpop.f32.mrf.mxu1  ;;  %v998_v44 = vld [vmem:[#allocation14 + $0x20] sm:$0xff] }
  0xcd   :  { %729 = vmatpush.bf16.msrb.mxu1 %v998_v44 }
  0xce   :  { %v489_v50 = vadd.f32 %v488_v46, %v476_v47  ;;  %v997_v47 = vld [vmem:[#allocation14 + $0x18] sm:$0xff] }
  0xd0   :  { %v493_v52 = vsel %vm492_vm0, %v489_v50, 0.0 }
  0xd1   :  { %v494_v53 = vrot.slane %v493_v52, 4  ;;  %730 = vmatpush.bf16.msrb.mxu1 %v997_v47 }
  0xd3   :  { %v495_v54 = vadd.f32 %v494_v53, %v493_v52  ;;  %v477_v55 = vpop.f32.mrf.mxu2  ;;  %v995_v53 = vld [vmem:[#allocation14 + $0x8] sm:$0xff] }
  0xd4   :  { %v490_v56 = vpop.f32.mrf.mxu3  ;;  %v994_v55 = vld [vmem:[#allocation14] sm:$0xff] }
  0xd5   :  { %v496_v58 = vrot.slane %v495_v54, 2 }
  0xd7   :  { %v497_v59 = vadd.f32 %v496_v58, %v495_v54 }
  0xd9   :  { %v498_v61 = vrot.slane %v497_v59, 1 }
  0xdb   :  { %v499_v62 = vadd.f32 %v498_v61, %v497_v59 }
  0xdd   :  { %v500_v0 = vmul.f32 0.5, %v499_v62 }
  0xdf   :  { %v501_v1 = vsub.f32 %v489_v50, %v500_v0  ;;  %v996_v50 = vld [vmem:[#allocation14 + $0x10] sm:$0xff] }
  0xe0   :  { %731 = vmatpush.bf16.msrb.mxu1 %v996_v50 }
  0xe1   :  { %v502_v3 = vmul.f32 %v501_v1, %v501_v1 }
  0xe3   :  { %v503_v4 = vsel %vm492_vm0, %v502_v3, 0.0  ;;  %v1018_v3 = vld [vmem:[#allocation11] ss:$0 sm:$0xff] }
  0xe4   :  { %v504_v6 = vrot.slane %v503_v4, 4  ;;  %732 = vmatpush.bf16.msrb.mxu1 %v995_v53 }
  0xe6   :  { %v505_v7 = vadd.f32 %v504_v6, %v503_v4  ;;  %v1019_v6 = vld [vmem:[#allocation13] ss:$0 sm:$0xff] }
  0xe8   :  { %v506_v9 = vrot.slane %v505_v7, 2  ;;  %733 = vmatpush.bf16.msrb.mxu1 %v994_v55 }
  0xea   :  { %v507_v11 = vadd.f32 %v506_v9, %v505_v7 }
  0xec   :  { %v508_v12 = vrot.slane %v507_v11, 1 }
  0xee   :  { %v509_v13 = vadd.f32 %v508_v12, %v507_v11  ;;  %v1020_v11 = vld [vmem:[#allocation16] ss:$0 sm:$0xff] }
  0xf0   :  { %v510_v14 = vmul.f32 0.5, %v509_v13 }
  0xf2   :  { %v511_v15 = vadd.f32 1e-05, %v510_v14 }
  0xf4   :  { %1021 = vrsqrt.f32 %v511_v15  ;;  %vm518_vm2 = vweird.f32 %v511_v15 }
  0xfa   :  { %v1022_v16 = vpop.eup %1021 }
  0xfb   :  { %v513_v17 = vmul.f32 %v1022_v16, %v511_v15  ;;  %vm519_vm1 = vweird.f32 %v1022_v16 }
  0xfc   :  { %vm520_vm3 = vmor %vm518_vm2, %vm519_vm1 }
  0xfd   :  { %v514_v18 = vmul.f32 %v1022_v16, %v513_v17 }
  0xff   :  { %v515_v19 = vmul.f32 0.5, %v514_v18 }
 0x101   :  { %v516_v20 = vsub.f32 1.5, %v515_v19 }
 0x103   :  { %v517_v21 = vmul.f32 %v1022_v16, %v516_v20 }
 0x105   :  { %v521_v23 = vsel %vm520_vm3, %v1022_v16, %v517_v21 }
 0x106   :  { %v522_v24 = vmul.f32 %v521_v23, %v501_v1 }
 0x108   :  { %v527_v26 = vmul.f32 %v1015_v22, %v522_v24 }
 0x10a   :  { %v532_v27 = vadd.f32 %v1016_v25, %v527_v26 }
 0x10c   :  { %v533_v28 = vmax.f32 %v532_v27, 0.0 }
 0x10e   :  { %v534_v29 = vpack.c.bf16 %v533_v28, %v533_v28 }
 0x110   :  { %611 = vmatmul.bf16.vlgmr.msrb.gmra.mxu0 %v534_v29 }
 0x18d   :  { %v612_v31 = vpop.f32.mrf.mxu0 }
 0x18e   :  { %v613_v32 = vadd.f32 %v1017_v30, %v612_v31 }
 0x190   :  { %v616_v34 = vsel %vm492_vm0, %v613_v32, 0.0 }
 0x191   :  { %v617_v35 = vrot.slane %v616_v34, 4 }
 0x193   :  { %v618_v36 = vadd.f32 %v617_v35, %v616_v34 }
 0x195   :  { %v619_v38 = vrot.slane %v618_v36, 2  ;;  %v614_v39 = vpop.f32.mrf.mxu0 }
 0x197   :  { %v620_v40 = vadd.f32 %v619_v38, %v618_v36 }
 0x199   :  { %v621_v42 = vrot.slane %v620_v40, 1 }
 0x19b   :  { %v622_v43 = vadd.f32 %v621_v42, %v620_v40 }
 0x19d   :  { %v623_v45 = vmul.f32 0.5, %v622_v43 }
 0x19f   :  { %v624_v46 = vsub.f32 %v613_v32, %v623_v45 }
 0x1a1   :  { %v625_v48 = vmul.f32 %v624_v46, %v624_v46 }
 0x1a3   :  { %v626_v49 = vsel %vm492_vm0, %v625_v48, 0.0 }
 0x1a4   :  { %v627_v51 = vrot.slane %v626_v49, 4 }
 0x1a6   :  { %v628_v52 = vadd.f32 %v627_v51, %v626_v49 }
 0x1a8   :  { %v629_v54 = vrot.slane %v628_v52, 2 }
 0x1aa   :  { %v630_v56 = vadd.f32 %v629_v54, %v628_v52 }
 0x1ac   :  { %v631_v57 = vrot.slane %v630_v56, 1 }
 0x1ae   :  { %v632_v58 = vadd.f32 %v631_v57, %v630_v56 }
 0x1b0   :  { %v633_v59 = vmul.f32 0.5, %v632_v58 }
 0x1b2   :  { %v634_v60 = vadd.f32 1e-05, %v633_v59 }
 0x1b4   :  { %1023 = vrsqrt.f32 %v634_v60  ;;  %vm641_vm5 = vweird.f32 %v634_v60 }
 0x1ba   :  { %v1024_v61 = vpop.eup %1023 }
 0x1bb   :  { %v636_v62 = vmul.f32 %v1024_v61, %v634_v60  ;;  %vm642_vm4 = vweird.f32 %v1024_v61 }
 0x1bc   :  { %vm643_vm6 = vmor %vm641_vm5, %vm642_vm4 }
 0x1bd   :  { %v637_v63 = vmul.f32 %v1024_v61, %v636_v62 }
 0x1bf   :  { %v638_v0 = vmul.f32 0.5, %v637_v63 }
 0x1c1   :  { %v639_v1 = vsub.f32 1.5, %v638_v0 }
 0x1c3   :  { %v640_v2 = vmul.f32 %v1024_v61, %v639_v1 }
 0x1c5   :  { %v644_v4 = vsel %vm643_vm6, %v1024_v61, %v640_v2 }
 0x1c6   :  { %v645_v5 = vmul.f32 %v644_v4, %v624_v46 }
 0x1c8   :  { %v650_v7 = vmul.f32 %v1018_v3, %v645_v5 }
 0x1ca   :  { %v655_v8 = vadd.f32 %v1019_v6, %v650_v7 }
 0x1cc   :  { %v656_v9 = vmax.f32 %v655_v8, 0.0 }
 0x1ce   :  { %v657_v10 = vpack.c.bf16 %v656_v9, %v656_v9 }
 0x1d0   :  { %734 = vmatmul.bf16.vlgmr.msrb.gmra.mxu1 %v657_v10 }
 0x24d   :  { %v735_v12 = vpop.f32.mrf.mxu1 }
 0x24e   :  { %v736_v13 = vadd.f32 %v1020_v11, %v735_v12 }
 0x250   :  { %739 = vst [vmem:[#allocation17] sm:$0x3] %v736_v13 }
 0x251   :  { %750 = dma.vmem_to_hbm [thread:$0]  %s746_s7, 32, %s748_s22, [#allocation4]  }
 0x255   :  { %v737_v14 = vpop.f32.mrf.mxu1 }
 0x256   :  { %1275 = dma.done.wait [#allocation4], 32  }
 0x257   :  { %1276 = vsyncadd [#allocation4], 4294967264 }
 0x258   :  { %755 = vsyncpa [#allocation3], 1 }
 0x259   :  { %756 = vsyncpa [#allocation6], 1 }
 0x25a   :  { %757 = vsyncpa [#allocation9], 1 }
 0x25b   :  { %758 = vsyncpa [#allocation12], 1 }
 0x25c   :  { %759 = vsyncpa [#allocation15], 1 }
 0x25d   :  { %760 = vsyncpa [#allocation4], 1 }

// kernel: vgg_automl_forward.2
= control target key start
LH: loop header
LB: loop body
LE: loop exit
PB: predicated region body
PF: predicated region fallthrough
CT: control target
= control target key end

     0   :  { %12 = vsyncpa [#allocation7], 0  ;;  %s18639_s0 = inlined_call_operand.vmem [shape: bf16[2,18,18,128], index: 0, kind: input, shape index: {}]   ;;  %s18640_s1 = inlined_call_operand.vmem [shape: bf16[1152,128], index: 1, kind: input, shape index: {}]   ;;  %s18641_s2 = inlined_call_operand.hbm [shape: f32[1,128], index: 2, kind: input, shape index: {}]   ;;  %s18642_s3 = inlined_call_operand.hbm [shape: bf16[1152,128], index: 3, kind: input, shape index: {}]   ;;  %s18643_s4 = inlined_call_operand.hbm [shape: f32[1,128], index: 4, kind: input, shape index: {}]   ;;  %s18644_s5 = inlined_call_operand.vmem [shape: bf16[1152,128], index: 5, kind: input, shape index: {}]   ;;  %s18645_s6 = inlined_call_operand.hbm [shape: f32[1,128], index: 6, kind: input, shape index: {}]   ;;  %s18646_s7 = inlined_call_operand.vmem [shape: bf16[2,4,128], index: 7, kind: output, shape index: {}]  }
   0x1   :  { %13 = vsyncpa [#allocation9], 0 }
   0x2   :  { %14 = vsyncpa [#allocation12], 0  ;;  %s15603_s24 = smov 0  }
   0x3 LB: > { %s229_s27 = sshll.u32 %s18642_s3, 4  ;;  %s15612_s28 = sadd.s32 4294967295, %s15554_s24   ;;  %s15554_s24 = sphi %s15603_s24, %s20_s24   ;;  %s230_s27 = int_to_ptr.hbm [resolvable:$true] %s229_s27 }
   0x4   : > { %p12232_p0 = scmp.ge.s32.totalorder %s15554_s24, 1  ;;  %p203_p1 = scmp.lt.s32.totalorder %s15554_s24, 3 }
   0x5   : > { %p15385_p2 = scmp.eq.s32.totalorder %s15612_s28, 0  ;;  %s15556_s30 = smov [#allocation8]  }
   0x6   : > { %p15617_p3 = pnand %p12232_p0, %p203_p1  ;;  %s231_s8 = sshll.u32 %s15556_s30, 4  ;;  %s232_s8 = int_to_ptr.vmem [resolvable:$true] %s231_s8 }
   0x7   : > { %s218_s11 = sshll.u32 %s18641_s2, 4  ;;  %s15557_s13 = smov [#allocation6]   ;;  %s219_s11 = int_to_ptr.hbm [resolvable:$true] %s218_s11 }
   0x8   : > { %p15372_p4 = pneg %p15617_p3  ;;  %s220_s14 = sshll.u32 %s15557_s13, 4  ;;  %s221_s14 = int_to_ptr.vmem [resolvable:$true] %s220_s14 }
   0x9   : > { %s244_s17 = sshll.u32 %s18643_s4, 4  ;;  %s15558_s18 = smov 64   ;;  %s245_s17 = int_to_ptr.hbm [resolvable:$true] %s244_s17 }
   0xa   : > { %p15628_p5 = pnand %p15385_p2, %p15372_p4  ;;  %s15559_s19 = smov 4  }
   0xb   : > { %s15560_s20 = smov [#allocation10]   ;;  %s259_s25 = sshll.u32 %s18645_s6, 4  ;;  %s260_s25 = int_to_ptr.hbm [resolvable:$true] %s259_s25 }
   0xc   : > { %15378 = dma.hbm_to_vmem [thread:$0]  (!%p15628_p5), %s230_s27, 9216, %s232_s8, [#allocation9], %s15558_s18, %s15558_s18, %s15559_s19  }
   0xd   : > { %15375 = dma.hbm_to_vmem [thread:$0]  (!%p15628_p5), %s219_s11, 16, %s221_s14, [#allocation7]  }
   0xe   : > { %s246_s21 = sshll.u32 %s15560_s20, 4  ;;  %s15561_s26 = smov [#allocation11]   ;;  %s247_s21 = int_to_ptr.vmem [resolvable:$true] %s246_s21 }
   0xf   : > { %15381 = dma.hbm_to_vmem [thread:$0]  (!%p15628_p5), %s245_s17, 16, %s247_s21, [#allocation9]  }
  0x10   : > { %s261_s30 = sshll.u32 %s15561_s26, 4  ;;  %282 = sbr.rel (%p15617_p3) target bundleno = 1673 (0x689), region = 48  ;;  %s262_s30 = int_to_ptr.vmem [resolvable:$true] %s261_s30 }
  0x11   : > { %15384 = dma.hbm_to_vmem [thread:$0]  (!%p15628_p5), %s260_s25, 16, %s262_s30, [#allocation12]  }
  0x15   : > { %15541 = dma.done.wait (%p15385_p2), [#allocation7], 16  }
  0x16   : > { %15543 = vsyncadd (%p15385_p2), [#allocation7], 4294967280 }
  0x17   : > { %15545 = dma.done.wait (%p15385_p2), [#allocation9], 9232  }
  0x18   : > { %15547 = vsyncadd (%p15385_p2), [#allocation9], 4294958064 }
  0x19   : > { %15549 = dma.done.wait (%p15385_p2), [#allocation12], 16  }
  0x1a   : > { %15551 = vsyncadd (%p15385_p2), [#allocation12], 4294967280  ;;  %p329_p6 = scmp.lt.s32.totalorder %s15612_s28, 1  ;;  %v14834_v0 = vld [vmem:[%s18640_s1 + $0x38] sm:$0xff]  ;;  %v14833_v4 = vld [vmem:[%s18640_s1 + $0x30] sm:$0xff]  ;;  %vm998_vm1 = vcmask 1042432  }
  0x1b   : > { %v14842_v1 = vld [vmem:[%s18640_s1 + $0x78] sm:$0xff]  ;;  %3871 = vmatpush.bf16.msra.mxu0 %v14834_v0  ;;  %v14841_v5 = vld [vmem:[%s18640_s1 + $0x70] sm:$0xff]  ;;  %v14832_v8 = vld [vmem:[%s18640_s1 + $0x28] sm:$0xff]  ;;  %vm451_vm0 = vsmask.f32 3328  ;;  %v15562_v12 = vmov 0  }
  0x1c   : > { %v14850_v2 = vld [vmem:[%s18640_s1 + $0xb8] sm:$0xff]  ;;  %s18783_s28 = smov (!%p329_p6, %s15612_s28), 1  ;;  %3920 = vmatpush.bf16.msra.mxu1 %v14842_v1  ;;  %v14849_v6 = vld [vmem:[%s18640_s1 + $0xb0] sm:$0xff]  ;;  %v14840_v9 = vld [vmem:[%s18640_s1 + $0x68] sm:$0xff]  ;;  %v8024_v13 = vrot.slane %v15562_v12, 7  ;;  %vm5973_vm4 = vcmask 1040384  }
  0x1d   : > { %v14858_v3 = vld [vmem:[%s18640_s1 + $0xf8] sm:$0xff]  ;;  %3969 = vmatpush.bf16.msra.mxu2 %v14850_v2  ;;  %v14857_v7 = vld [vmem:[%s18640_s1 + $0xf0] sm:$0xff]  ;;  %s15355_s22 = smul.u32 216, %s18783_s28  ;;  %v14848_v10 = vld [vmem:[%s18640_s1 + $0xa8] sm:$0xff]  ;;  %vm8094_vm2 = vsmask.f32 256 }
  0x1e   : > { %4018 = vmatpush.bf16.msra.mxu3 %v14858_v3  ;;  %v14856_v11 = vld [vmem:[%s18640_s1 + $0xe8] sm:$0xff]  ;;  %vm452_vm3 = vsmask.f32 7440  ;;  %v14831_v14 = vld [vmem:[%s18640_s1 + $0x20] sm:$0xff]  ;;  %vm8105_vm5 = vcmask 1044480   ;;  %vm15722_vm8 = vmand %vm5973_vm4, %vm8094_vm2  ;;  %v18659_v20 = vmov 0 }
  0x1f   : > { %3872 = vmatpush.bf16.msra.mxu0 %v14833_v4  ;;  %s15704_s12 = scalar_lea.vmem %s18639_s0, %s15355_s22  ;;  %v14839_v15 = vld [vmem:[%s18640_s1 + $0x60] sm:$0xff]  ;;  %vm8106_vm6 = vsmask.f32 4352  ;;  %vm10579_vm7 = vsmask.f32 2304  ;;  %v18660_v20 = vsel %vm15722_vm8, 4294967295, %v18659_v20  ;;  %vm15774_vm12 = vmor %vm451_vm0, %vm452_vm3 }
  0x20   : > { %3921 = vmatpush.bf16.msra.mxu1 %v14841_v5  ;;  %v14847_v16 = vld [vmem:[%s18640_s1 + $0xa0] sm:$0xff]  ;;  %18661 = vst [vmem:[#allocation16_spill] sm:$0xff] %v18660_v20  ;;  %v14830_v22 = vld [vmem:[%s18640_s1 + $0x18] sm:$0xff]  ;;  %v8096_v24 = vsel %vm15722_vm8, 0, %v8024_v13  ;;  %vm15737_vm9 = vmand %vm8105_vm5, %vm8106_vm6  ;;  %v18662_v25 = vmov 0  ;;  %v18665_v29 = vmov 0 }
  0x21   : > { %3970 = vmatpush.bf16.msra.mxu2 %v14849_v6  ;;  %v14855_v17 = vld [vmem:[%s18640_s1 + $0xe0] sm:$0xff]  ;;  %v14838_v23 = vld [vmem:[%s18640_s1 + $0x58] sm:$0xff]  ;;  %v18663_v25 = vsel %vm15737_vm9, 4294967295, %v18662_v25  ;;  %v8108_v28 = vsel %vm15737_vm9, %v8096_v24, 0  ;;  %vm15746_vm10 = vmand %vm998_vm1, %vm10579_vm7  ;;  %vm999_vm11 = vcmask 1046532   ;;  %vm5977_vm14 = vcmask 1041409  }
  0x22   : > { %4019 = vmatpush.bf16.msra.mxu3 %v14857_v7  ;;  %v339_v18 = vld [vmem:[%s15704_s12] sm:$0xf]  ;;  %v340_v19 = vld [vmem:[%s15704_s12 + $0x4] sm:$0xf]  ;;  %18664 = vst [vmem:[#allocation17_spill] sm:$0xff] %v18663_v25  ;;  %v18666_v29 = vsel %vm15746_vm10, 4294967295, %v18665_v29  ;;  %v8126_v36 = vunpack.c.l.b16 %v8108_v28  ;;  %v8127_v37 = vunpack.c.h.b16 %v8108_v28  ;;  %vm15782_vm13 = vmor %vm998_vm1, %vm999_vm11 }
  0x23   : > { %3873 = vmatpush.bf16.msra.mxu0 %v14832_v8  ;;  %371 = vst [vmem:[#allocation2] sm:$0xf] %v339_v18  ;;  %v403_v21 = vld [vmem:[%s15704_s12] sm:$0xf]  ;;  %v404_v26 = vld [vmem:[%s15704_s12 + $0x4] sm:$0xf] }
  0x24   : > { %3922 = vmatpush.bf16.msra.mxu1 %v14840_v9  ;;  %372 = vst [vmem:[#allocation2 + $0x24] sm:$0xf] %v340_v19  ;;  %v455_v27 = vshrl.u32 %v403_v21, 16  ;;  %v405_v30 = vld [vmem:[%s15704_s12 + $0x8] sm:$0x1]  ;;  %v458_v31 = vshll.u32 %v403_v21, 16  ;;  %v8144_v46 = vpack.c.b16 %v8126_v36, %v8126_v36  ;;  %v8145_v47 = vpack.c.b16 %v8127_v37, %v8127_v37 }
  0x25   : > { %3971 = vmatpush.bf16.msra.mxu2 %v14848_v10  ;;  %18667 = vst [vmem:[#allocation18_spill] sm:$0xff] %v18666_v29  ;;  %v464_v32 = vshll.u32 %v404_v26, 16  ;;  %v468_v33 = vshrl.u32 %v404_v26, 16  ;;  %v14846_v34 = vld [vmem:[%s18640_s1 + $0x98] sm:$0xff]  ;;  %v10581_v38 = vsel %vm15746_vm10, %v8096_v24, 0  ;;  %v474_v44 = vshll.u32 %v405_v30, 16 }
  0x26   : > { %4020 = vmatpush.bf16.msra.mxu3 %v14856_v11  ;;  %v14854_v35 = vld [vmem:[%s18640_s1 + $0xd8] sm:$0xff]  ;;  %v457_v39 = vrot.slane %v455_v27, 4  ;;  %v903_v40 = vld [vmem:[%s15704_s12 + $0x4] sm:$0xf]  ;;  %10586 = vst [vmem:[#allocation5] sm:$0x7] %v10581_v38 }
  0x27   : > { %3874 = vmatpush.bf16.msra.mxu0 %v14831_v14  ;;  %v460_v41 = vrot.slane %v458_v31, 5  ;;  %v466_v42 = vrot.slane %v464_v32, 5  ;;  %v470_v43 = vrot.slane %v468_v33, 4  ;;  %v14829_v45 = vld [vmem:[%s18640_s1 + $0x10] sm:$0xff]  ;;  %10591 = vst [vmem:[#allocation5 + $0x14] sm:$0x7] %v10581_v38 }
  0x28   : > { %3923 = vmatpush.bf16.msra.mxu1 %v14839_v15  ;;  %v14837_v48 = vld [vmem:[%s18640_s1 + $0x50] sm:$0xff]  ;;  %8180 = vst [vmem:[#allocation4] sm:$0xf] %v8144_v46  ;;  %v476_v54 = vrot.slane %v474_v44, 5  ;;  %v902_v55 = vld [vmem:[%s15704_s12] sm:$0xe] }
  0x29   : > { %3972 = vmatpush.bf16.msra.mxu2 %v14847_v16  ;;  %v14845_v49 = vld [vmem:[%s18640_s1 + $0x90] sm:$0xff]  ;;  %v461_v51 = vor.u32 %v460_v41, %v457_v39  ;;  %v471_v52 = vor.u32 %v470_v43, %v466_v42  ;;  %v1003_v56 = vrot.slane %v903_v40, 5  ;;  %8181 = vst [vmem:[#allocation4 + $0x4] sm:$0x1] %v8145_v47  ;;  %v904_v59 = vld [vmem:[%s15704_s12 + $0x8] sm:$0x1] }
  0x2a   : > { %4021 = vmatpush.bf16.msra.mxu3 %v14855_v17  ;;  %v14853_v50 = vld [vmem:[%s18640_s1 + $0xd0] sm:$0xff]  ;;  %8198 = vst [vmem:[#allocation4 + $0x48] sm:$0xf] %v8144_v46  ;;  %v12245_v62 = vrot.slane %v902_v55, 9  ;;  %v14828_v63 = vld [vmem:[%s18640_s1 + $0x8] sm:$0xff]  ;;  %v1006_v4 = vrot.slane %v904_v59, 5 }
  0x2b   : > { %3875 = vmatpush.bf16.msra.mxu0 %v14830_v22  ;;  %v462_v57 = vrot.slane %v461_v51, 4  ;;  %v472_v58 = vrot.slane %v471_v52, 4  ;;  %8199 = vst [vmem:[#allocation4 + $0x4c] sm:$0x1] %v8145_v47  ;;  %v14836_v0 = vld [vmem:[%s18640_s1 + $0x48] sm:$0xff]  ;;  %v1005_v3 = vrot.slane %v1003_v56, 4 }
  0x2c   : > { %3924 = vmatpush.bf16.msra.mxu1 %v14838_v23  ;;  %v14844_v5 = vld [vmem:[%s18640_s1 + $0x88] sm:$0xff]  ;;  %v1004_v10 = vsel %vm15782_vm13, %v12245_v62, %v1003_v56  ;;  %v14827_v11 = vld [vmem:[%s18640_s1] sm:$0xff]  ;;  %v14866_v21 = vld [vmem:[%s18640_s1 + $0x138] sm:$0xff]  ;;  %vm5981_vm15 = vcmask 1042434   ;;  %vm5985_vm0 = vcmask 1043459   ;;  %vm7904_vm1 = vcmask 1044484  }
  0x2d   : > { %3973 = vmatpush.bf16.msra.mxu2 %v14846_v34  ;;  %v467_v61 = vsel %vm15774_vm12, %v462_v57, %v466_v42  ;;  %v10592_v1 = vld [vmem:[#allocation5] sm:$0x3]  ;;  %v477_v2 = vsel %vm15774_vm12, %v472_v58, %v476_v54  ;;  %v14852_v6 = vld [vmem:[%s18640_s1 + $0xc8] sm:$0xff]  ;;  %v14835_v12 = vld [vmem:[%s18640_s1 + $0x40] sm:$0xff]  ;;  %v1007_v14 = vsel %vm15782_vm13, %v1005_v3, %v1006_v4  ;;  %1145 = vst [vmem:[#allocation2 + $0x8] sm:$0xf] %v1004_v10 }
  0x2e   : > { %4022 = vmatpush.bf16.msra.mxu3 %v14854_v35  ;;  %10597 = vst [vmem:[#allocation1] ss:$2 sm:$0xff] %v10592_v1  ;;  %v12551_v7 = vld [vmem:[#allocation2] sm:$0xf]  ;;  %v14759_v13 = vld [vmem:[#allocation2 + $0x20] sm:$0xf0] }
  0x2f   : > { %3876 = vmatpush.bf16.msra.mxu0 %v14829_v45  ;;  %870 = vst [vmem:[#allocation2 + $0x4] sm:$0xf] %v467_v61  ;;  %v8200_v8 = vld [vmem:[#allocation4] sm:$0xf]  ;;  %v14843_v15 = vld [vmem:[%s18640_s1 + $0x80] sm:$0xff]  ;;  %v14874_v22 = vld [vmem:[%s18640_s1 + $0x178] sm:$0xff]  ;;  %v12552_v23 = vor.u32 %v14759_v13, %v12551_v7 }
  0x30   : > { %3925 = vmatpush.bf16.msra.mxu1 %v14837_v48  ;;  %871 = vst [vmem:[#allocation2 + $0x28] sm:$0xf] %v477_v2  ;;  %v8216_v9 = vld [vmem:[#allocation4] sm:$0xf]  ;;  %v14851_v16 = vld [vmem:[%s18640_s1 + $0xc0] sm:$0xff]  ;;  %v14865_v37 = vld [vmem:[%s18640_s1 + $0x130] sm:$0xff] }
  0x31   : > { %3974 = vmatpush.bf16.msra.mxu2 %v14845_v49  ;;  %8208 = vst [vmem:[#allocation2] sm:$0xf] %v8200_v8  ;;  %v8233_v17 = vshrl.u32 %v8216_v9, 16  ;;  %v12261_v18 = vld [vmem:[%s15704_s12 + $0xc] sm:$0xf]  ;;  %v8236_v19 = vshll.u32 %v8216_v9, 16 }
  0x32   : > { %4023 = vmatpush.bf16.msra.mxu3 %v14853_v50  ;;  %1146 = vst [vmem:[#allocation2 + $0x2c] sm:$0xf] %v1007_v14  ;;  %v12262_v24 = vld [vmem:[%s15704_s12 + $0x10] sm:$0xf]  ;;  %v341_v26 = vld [vmem:[%s15704_s12 + $0xc] sm:$0xf] }
  0x33   : > { %3877 = vmatpush.bf16.msra.mxu0 %v14828_v63  ;;  %v8217_v27 = vld [vmem:[#allocation4 + $0x4] sm:$0x1]  ;;  %v8360_v28 = vld [vmem:[#allocation4] sm:$0xe]  ;;  %1210 = vst [vmem:[#allocation2 + $0xc] sm:$0xf] %v12261_v18 }
  0x34   : > { %3926 = vmatpush.bf16.msra.mxu1 %v14836_v0  ;;  %v342_v30 = vld [vmem:[%s15704_s12 + $0x10] sm:$0xf]  ;;  %v8235_v32 = vrot.slane %v8233_v17, 4  ;;  %v8361_v33 = vld [vmem:[#allocation4 + $0x4] sm:$0x1]  ;;  %v8238_v35 = vrot.slane %v8236_v19, 5 }
  0x35   : > { %3975 = vmatpush.bf16.msra.mxu2 %v14844_v5  ;;  %v406_v36 = vld [vmem:[%s15704_s12 + $0xc] sm:$0xf]  ;;  %v8242_v39 = vshll.u32 %v8217_v27, 16  ;;  %v13893_v40 = vrot.slane %v8360_v28, 9  ;;  %1211 = vst [vmem:[#allocation2 + $0x30] sm:$0xf] %v12262_v24 }
  0x36   : > { %4024 = vmatpush.bf16.msra.mxu3 %v14852_v6  ;;  %v14755_v31 = vld [vmem:[#allocation2 + $0x4] sm:$0xf]  ;;  %v14873_v41 = vld [vmem:[%s18640_s1 + $0x170] sm:$0xff]  ;;  %v8239_v42 = vor.u32 %v8238_v35, %v8235_v32  ;;  %v8394_v43 = vrot.slane %v8361_v33, 5  ;;  %373 = vst [vmem:[#allocation2 + $0x48] sm:$0xf] %v341_v26 }
  0x37   : > { %3878 = vmatpush.bf16.msra.mxu0 %v14827_v11  ;;  %v12553_v34 = vld [vmem:[#allocation2 + $0x24] sm:$0xf0]  ;;  %v8244_v45 = vrot.slane %v8242_v39, 5  ;;  %374 = vst [vmem:[#allocation2 + $0x6c] sm:$0xf] %v342_v30  ;;  %v479_v47 = vshrl.u32 %v406_v36, 16 }
  0x38   : > { %3927 = vmatpush.bf16.msra.mxu1 %v14835_v12  ;;  %v12556_v38 = vor.u32 %v14755_v31, %v12553_v34  ;;  %v407_v44 = vld [vmem:[%s15704_s12 + $0x10] sm:$0xf]  ;;  %v8240_v48 = vrot.slane %v8239_v42, 4  ;;  %v8395_v50 = vsel %vm15782_vm13, %v13893_v40, %v8394_v43  ;;  %v408_v51 = vld [vmem:[%s15704_s12 + $0x14] sm:$0x1]  ;;  %v482_v52 = vshll.u32 %v406_v36, 16 }
  0x39   : > { %3976 = vmatpush.bf16.msra.mxu2 %v14843_v15  ;;  %v12559_v46 = vld [vmem:[#allocation2 + $0x8] sm:$0xf]  ;;  %v14760_v49 = vld [vmem:[#allocation2 + $0x28] sm:$0xf0]  ;;  %v481_v56 = vrot.slane %v479_v47, 4  ;;  %v488_v59 = vshll.u32 %v407_v44, 16 }
  0x3a   : > { %4025 = vmatpush.bf16.msra.mxu3 %v14851_v16  ;;  %3879 = vmatmul.bf16.vlgmr.msra.gmra.mxu0 %v12552_v23  ;;  %v12560_v54 = vor.u32 %v14760_v49, %v12559_v46  ;;  %8432 = vst [vmem:[#allocation2 + $0x8] sm:$0xf] %v8395_v50  ;;  %v14756_v55 = vld [vmem:[#allocation2 + $0xc] sm:$0xf]  ;;  %v8245_v57 = vsel %vm15774_vm12, %v8240_v48, %v8244_v45  ;;  %v484_v58 = vrot.slane %v482_v52, 5  ;;  %v492_v61 = vshrl.u32 %v407_v44, 16 }
  0x3b   : > { %4067 = vmatpush.bf16.msrb.mxu0 %v14866_v21  ;;  %3928 = vmatmul.bf16.vlgmr.msra.gmra.mxu1 %v12556_v38  ;;  %v905_v62 = vld [vmem:[%s15704_s12 + $0xc] sm:$0xe]  ;;  %8352 = vst [vmem:[#allocation2 + $0x4] sm:$0xf] %v8245_v57  ;;  %v498_v63 = vshll.u32 %v408_v51, 16  ;;  %v490_v4 = vrot.slane %v488_v59, 5 }
  0x3c   : > { %4116 = vmatpush.bf16.msrb.mxu1 %v14874_v22  ;;  %3977 = vmatmul.bf16.vlgmr.msra.gmra.mxu2 %v12560_v54  ;;  %v906_v0 = vld [vmem:[%s15704_s12 + $0x10] sm:$0xf]  ;;  %v12246_v1 = vrot.slane %v905_v62, 9  ;;  %v12561_v2 = vld [vmem:[#allocation2 + $0x2c] sm:$0xf0]  ;;  %v485_v3 = vor.u32 %v484_v58, %v481_v56  ;;  %v494_v5 = vrot.slane %v492_v61, 4 }
  0x3d   : > { %v907_v6 = vld [vmem:[%s15704_s12 + $0x14] sm:$0x1]  ;;  %v12564_v7 = vor.u32 %v14756_v55, %v12561_v2  ;;  %v12587_v8 = vld [vmem:[#allocation2 + $0x48] sm:$0xf]  ;;  %v1010_v9 = vrot.slane %v906_v0, 5  ;;  %v500_v14 = vrot.slane %v498_v63, 5 }
  0x3e   : > { %v1013_v10 = vrot.slane %v907_v6, 5  ;;  %v14768_v11 = vld [vmem:[#allocation2 + $0x68] sm:$0xf0]  ;;  %v486_v12 = vrot.slane %v485_v3, 4  ;;  %v495_v13 = vor.u32 %v494_v5, %v490_v4  ;;  %v12263_v15 = vld [vmem:[%s15704_s12 + $0x18] sm:$0xf] }
  0x3f   : > { %4068 = vmatpush.bf16.msrb.mxu0 %v14865_v37  ;;  %4026 = vmatmul.bf16.vlgmr.msra.gmra.mxu3 %v12564_v7  ;;  %v1011_v16 = vsel %vm15782_vm13, %v12246_v1, %v1010_v9  ;;  %v1012_v17 = vrot.slane %v1010_v9, 4  ;;  %v12264_v18 = vld [vmem:[%s15704_s12 + $0x1c] sm:$0xf]  ;;  %1212 = vst [vmem:[#allocation2 + $0x54] sm:$0xf] %v12263_v15  ;;  %v14864_v19 = vld [vmem:[%s18640_s1 + $0x128] sm:$0xff]  ;;  %v12588_v26 = vor.u32 %v14768_v11, %v12587_v8 }
  0x40   : > { %4117 = vmatpush.bf16.msrb.mxu1 %v14873_v41  ;;  %v491_v21 = vsel %vm15774_vm12, %v486_v12, %v490_v4  ;;  %v496_v22 = vrot.slane %v495_v13, 4  ;;  %1147 = vst [vmem:[#allocation2 + $0x50] sm:$0xf] %v1011_v16  ;;  %v343_v23 = vld [vmem:[%s15704_s12 + $0x18] sm:$0xf]  ;;  %v14872_v24 = vld [vmem:[%s18640_s1 + $0x168] sm:$0xff] }
  0x41   : > { %872 = vst [vmem:[#allocation2 + $0x4c] sm:$0xf] %v491_v21  ;;  %v1014_v27 = vsel %vm15782_vm13, %v1012_v17, %v1013_v10  ;;  %v344_v28 = vld [vmem:[%s15704_s12 + $0x1c] sm:$0xf]  ;;  %v409_v30 = vld [vmem:[%s15704_s12 + $0x18] sm:$0xf] }
  0x42   : > { %v501_v31 = vsel %vm15774_vm12, %v496_v22, %v500_v14  ;;  %1148 = vst [vmem:[#allocation2 + $0x74] sm:$0xf] %v1014_v27  ;;  %v410_v32 = vld [vmem:[%s15704_s12 + $0x1c] sm:$0xf]  ;;  %v411_v33 = vld [vmem:[%s15704_s12 + $0x20] sm:$0x1] }
  0x43   : > { %4069 = vmatpush.bf16.msrb.mxu0 %v14864_v19  ;;  %873 = vst [vmem:[#allocation2 + $0x70] sm:$0xf] %v501_v31  ;;  %v503_v34 = vshrl.u32 %v409_v30, 16  ;;  %v506_v35 = vshll.u32 %v409_v30, 16  ;;  %v512_v36 = vshll.u32 %v410_v32, 16  ;;  %v516_v37 = vshrl.u32 %v410_v32, 16 }
  0x44   : > { %4118 = vmatpush.bf16.msrb.mxu1 %v14872_v24  ;;  %1213 = vst [vmem:[#allocation2 + $0x78] sm:$0xf] %v12264_v18  ;;  %v522_v38 = vshll.u32 %v411_v33, 16  ;;  %v908_v39 = vld [vmem:[%s15704_s12 + $0x18] sm:$0xe]  ;;  %v14863_v22 = vld [vmem:[%s18640_s1 + $0x120] sm:$0xff] }
  0x45   : > { %375 = vst [vmem:[#allocation2 + $0x90] sm:$0xf] %v343_v23  ;;  %v505_v40 = vrot.slane %v503_v34, 4  ;;  %v508_v41 = vrot.slane %v506_v35, 5  ;;  %v514_v42 = vrot.slane %v512_v36, 5  ;;  %v518_v43 = vrot.slane %v516_v37, 4 }
  0x46   : > { %376 = vst [vmem:[#allocation2 + $0xb4] sm:$0xf] %v344_v28  ;;  %v524_v44 = vrot.slane %v522_v38, 5  ;;  %v12247_v45 = vrot.slane %v908_v39, 9  ;;  %v909_v49 = vld [vmem:[%s15704_s12 + $0x1c] sm:$0xf] }
  0x47   : > { %v12595_v46 = vld [vmem:[#allocation2 + $0x50] sm:$0xf]  ;;  %v509_v47 = vor.u32 %v508_v41, %v505_v40  ;;  %v519_v48 = vor.u32 %v518_v43, %v514_v42  ;;  %v910_v50 = vld [vmem:[%s15704_s12 + $0x20] sm:$0x1]  ;;  %v1017_v52 = vrot.slane %v909_v49, 5  ;;  %4070 = vmatpush.bf16.msrb.mxu0 %v14863_v22  ;;  %vm7907_vm2 = vcmask 1045509  }
  0x48   : > { %v14764_v51 = vld [vmem:[#allocation2 + $0x4c] sm:$0xf]  ;;  %v1020_v54 = vrot.slane %v910_v50, 5  ;;  %v12265_v55 = vld [vmem:[%s15704_s12 + $0x24] sm:$0xf]  ;;  %vm7910_vm3 = vcmask 1046534  }
  0x49   : > { %v14769_v56 = vld [vmem:[#allocation2 + $0x70] sm:$0xf0]  ;;  %v510_v58 = vrot.slane %v509_v47, 4  ;;  %v520_v59 = vrot.slane %v519_v48, 4  ;;  %v1018_v63 = vsel %vm15782_vm13, %v12247_v45, %v1017_v52  ;;  %v1019_v0 = vrot.slane %v1017_v52, 4  ;;  %v14871_v43 = vld [vmem:[%s18640_s1 + $0x160] sm:$0xff] }
  0x4a   : > { %3884 = vmatmul.bf16.gmra.mxu0 %v12588_v26  ;;  %v14765_v57 = vld [vmem:[#allocation2 + $0x54] sm:$0xf]  ;;  %v12589_v61 = vld [vmem:[#allocation2 + $0x6c] sm:$0xf0]  ;;  %v12596_v62 = vor.u32 %v14769_v56, %v12595_v46  ;;  %v12266_v1 = vld [vmem:[%s15704_s12 + $0x28] sm:$0xf]  ;;  %4119 = vmatpush.bf16.msrb.mxu1 %v14871_v43 }
  0x4b   : > { %1214 = vst [vmem:[#allocation2 + $0x9c] sm:$0xf] %v12265_v55  ;;  %v12592_v2 = vor.u32 %v14764_v51, %v12589_v61  ;;  %v12597_v3 = vld [vmem:[#allocation2 + $0x74] sm:$0xf0]  ;;  %v515_v4 = vsel %vm15774_vm12, %v510_v58, %v514_v42  ;;  %v525_v5 = vsel %vm15774_vm12, %v520_v59, %v524_v44  ;;  %v345_v6 = vld [vmem:[%s15704_s12 + $0x24] sm:$0xf]  ;;  %v1021_v9 = vsel %vm15782_vm13, %v1019_v0, %v1020_v54 }
  0x4c   : > { %1149 = vst [vmem:[#allocation2 + $0x98] sm:$0xf] %v1018_v63  ;;  %3982 = vmatmul.bf16.gmra.mxu2 %v12596_v62  ;;  %v12600_v7 = vor.u32 %v14765_v57, %v12597_v3  ;;  %v12623_v8 = vld [vmem:[#allocation2 + $0x90] sm:$0xf]  ;;  %v346_v10 = vld [vmem:[%s15704_s12 + $0x28] sm:$0xf] }
  0x4d   : > { %874 = vst [vmem:[#allocation2 + $0x94] sm:$0xf] %v515_v4  ;;  %3933 = vmatmul.bf16.gmra.mxu1 %v12592_v2  ;;  %v14777_v11 = vld [vmem:[#allocation2 + $0xb0] sm:$0xf0]  ;;  %v412_v12 = vld [vmem:[%s15704_s12 + $0x24] sm:$0xf] }
  0x4e   : > { %875 = vst [vmem:[#allocation2 + $0xb8] sm:$0xf] %v525_v5  ;;  %v413_v13 = vld [vmem:[%s15704_s12 + $0x28] sm:$0xf]  ;;  %v414_v14 = vld [vmem:[%s15704_s12 + $0x2c] sm:$0x1]  ;;  %v12624_v23 = vor.u32 %v14777_v11, %v12623_v8 }
  0x4f   : > { %1150 = vst [vmem:[#allocation2 + $0xbc] sm:$0xf] %v1021_v9  ;;  %4031 = vmatmul.bf16.gmra.mxu3 %v12600_v7  ;;  %v527_v15 = vshrl.u32 %v412_v12, 16  ;;  %v530_v16 = vshll.u32 %v412_v12, 16  ;;  %v536_v17 = vshll.u32 %v413_v13, 16  ;;  %v540_v18 = vshrl.u32 %v413_v13, 16 }
  0x50   : > { %1215 = vst [vmem:[#allocation2 + $0xc0] sm:$0xf] %v12266_v1  ;;  %v546_v19 = vshll.u32 %v414_v14, 16  ;;  %v911_v21 = vld [vmem:[%s15704_s12 + $0x24] sm:$0xe]  ;;  %vm7913_vm5 = vcmask 1047559  }
  0x51   : > { %377 = vst [vmem:[#allocation2 + $0xd8] sm:$0xf] %v345_v6  ;;  %v529_v24 = vrot.slane %v527_v15, 4  ;;  %v532_v26 = vrot.slane %v530_v16, 5  ;;  %v538_v27 = vrot.slane %v536_v17, 5  ;;  %v542_v28 = vrot.slane %v540_v18, 4 }
  0x52   : > { %378 = vst [vmem:[#allocation2 + $0xfc] sm:$0xf] %v346_v10  ;;  %v12248_v30 = vrot.slane %v911_v21, 9  ;;  %v912_v33 = vld [vmem:[%s15704_s12 + $0x28] sm:$0xf]  ;;  %v548_v36 = vrot.slane %v546_v19, 5 }
  0x53   : > { %v12631_v31 = vld [vmem:[#allocation2 + $0x98] sm:$0xf]  ;;  %v533_v32 = vor.u32 %v532_v26, %v529_v24  ;;  %v913_v34 = vld [vmem:[%s15704_s12 + $0x2c] sm:$0x1]  ;;  %v543_v35 = vor.u32 %v542_v28, %v538_v27  ;;  %v1024_v37 = vrot.slane %v912_v33, 5  ;;  %v14862_v19 = vld [vmem:[%s18640_s1 + $0x118] sm:$0xff] }
  0x54   : > { %v1027_v38 = vrot.slane %v913_v34, 5  ;;  %v12267_v39 = vld [vmem:[%s15704_s12 + $0x30] sm:$0xf]  ;;  %v14773_v40 = vld [vmem:[#allocation2 + $0x94] sm:$0xf]  ;;  %4071 = vmatpush.bf16.msrb.mxu0 %v14862_v19  ;;  %vm10625_vm6 = vcmask 1041408  }
  0x55   : > { %v534_v42 = vrot.slane %v533_v32, 4  ;;  %v12625_v44 = vld [vmem:[#allocation2 + $0xb4] sm:$0xf0]  ;;  %v14774_v45 = vld [vmem:[#allocation2 + $0x9c] sm:$0xf]  ;;  %v544_v46 = vrot.slane %v543_v35, 4  ;;  %v1025_v47 = vsel %vm15782_vm13, %v12248_v30, %v1024_v37 }
  0x56   : > { %v14778_v41 = vld [vmem:[#allocation2 + $0xb8] sm:$0xf0]  ;;  %v1026_v48 = vrot.slane %v1024_v37, 4  ;;  %1216 = vst [vmem:[#allocation2 + $0xe4] sm:$0xf] %v12267_v39  ;;  %v12628_v58 = vor.u32 %v14773_v40, %v12625_v44  ;;  %vm10629_vm7 = vcmask 1043458  }
  0x57   : > { %v12633_v49 = vld [vmem:[#allocation2 + $0xbc] sm:$0xf0]  ;;  %v539_v50 = vsel %vm15774_vm12, %v534_v42, %v538_v27  ;;  %1151 = vst [vmem:[#allocation2 + $0xe0] sm:$0xf] %v1025_v47  ;;  %v12268_v51 = vld [vmem:[%s15704_s12 + $0x34] sm:$0xf]  ;;  %v12632_v52 = vor.u32 %v14778_v41, %v12631_v31  ;;  %v549_v54 = vsel %vm15774_vm12, %v544_v46, %v548_v36 }
  0x58   : > { %876 = vst [vmem:[#allocation2 + $0xdc] sm:$0xf] %v539_v50  ;;  %v1028_v55 = vsel %vm15782_vm13, %v1026_v48, %v1027_v38  ;;  %v347_v56 = vld [vmem:[%s15704_s12 + $0x30] sm:$0xf]  ;;  %v348_v57 = vld [vmem:[%s15704_s12 + $0x34] sm:$0xf]  ;;  %v12636_v1 = vor.u32 %v14774_v45, %v12633_v49 }
  0x59   : > { %877 = vst [vmem:[#allocation2 + $0x100] sm:$0xf] %v549_v54  ;;  %v415_v59 = vld [vmem:[%s15704_s12 + $0x30] sm:$0xf]  ;;  %v416_v61 = vld [vmem:[%s15704_s12 + $0x34] sm:$0xf] }
  0x5a   : > { %3889 = vmatmul.bf16.gmra.mxu0 %v12624_v23  ;;  %1152 = vst [vmem:[#allocation2 + $0x104] sm:$0xf] %v1028_v55  ;;  %v417_v62 = vld [vmem:[%s15704_s12 + $0x38] sm:$0x1]  ;;  %v551_v63 = vshrl.u32 %v415_v59, 16  ;;  %v554_v0 = vshll.u32 %v415_v59, 16 }
  0x5b   : > { %1217 = vst [vmem:[#allocation2 + $0x108] sm:$0xf] %v12268_v51  ;;  %v560_v2 = vshll.u32 %v416_v61, 16  ;;  %v564_v3 = vshrl.u32 %v416_v61, 16  ;;  %v570_v4 = vshll.u32 %v417_v62, 16  ;;  %v14870_v31 = vld [vmem:[%s18640_s1 + $0x158] sm:$0xff] }
  0x5c   : > { %3987 = vmatmul.bf16.gmra.mxu2 %v12632_v52  ;;  %379 = vst [vmem:[#allocation2 + $0x120] sm:$0xf] %v347_v56  ;;  %v553_v5 = vrot.slane %v551_v63, 4  ;;  %v556_v6 = vrot.slane %v554_v0, 5  ;;  %v914_v7 = vld [vmem:[%s15704_s12 + $0x30] sm:$0xe]  ;;  %4120 = vmatpush.bf16.msrb.mxu1 %v14870_v31 }
  0x5d   : > { %3938 = vmatmul.bf16.gmra.mxu1 %v12628_v58  ;;  %v12659_v8 = vld [vmem:[#allocation2 + $0xd8] sm:$0xf]  ;;  %380 = vst [vmem:[#allocation2 + $0x144] sm:$0xf] %v348_v57  ;;  %v562_v9 = vrot.slane %v560_v2, 5  ;;  %v566_v10 = vrot.slane %v564_v3, 4 }
  0x5e   : > { %v14786_v11 = vld [vmem:[#allocation2 + $0xf8] sm:$0xf0]  ;;  %v557_v12 = vor.u32 %v556_v6, %v553_v5  ;;  %v915_v13 = vld [vmem:[%s15704_s12 + $0x34] sm:$0xf]  ;;  %v12249_v14 = vrot.slane %v914_v7, 9  ;;  %v572_v16 = vrot.slane %v570_v4, 5 }
  0x5f   : > { %4036 = vmatmul.bf16.gmra.mxu3 %v12636_v1  ;;  %v567_v15 = vor.u32 %v566_v10, %v562_v9  ;;  %v916_v17 = vld [vmem:[%s15704_s12 + $0x38] sm:$0x1]  ;;  %v1031_v18 = vrot.slane %v915_v13, 5  ;;  %v12660_v23 = vor.u32 %v14786_v11, %v12659_v8  ;;  %v12269_v30 = vld [vmem:[%s15704_s12 + $0x3c] sm:$0xf]  ;;  %s12244_s14 = sshll.u32 %s18783_s28, 1 }
  0x60   : > { %v558_v21 = vrot.slane %v557_v12, 4  ;;  %v1034_v22 = vrot.slane %v916_v17, 5  ;;  %v12667_v32 = vld [vmem:[#allocation2 + $0xe0] sm:$0xf]  ;;  %v12270_v36 = vld [vmem:[%s15704_s12 + $0x40] sm:$0xf] }
  0x61   : > { %v568_v24 = vrot.slane %v567_v15, 4  ;;  %v1032_v26 = vsel %vm15782_vm13, %v12249_v14, %v1031_v18  ;;  %v1033_v27 = vrot.slane %v1031_v18, 4  ;;  %v14787_v33 = vld [vmem:[#allocation2 + $0x100] sm:$0xf0]  ;;  %v14782_v37 = vld [vmem:[#allocation2 + $0xdc] sm:$0xf] }
  0x62   : > { %v563_v28 = vsel %vm15774_vm12, %v558_v21, %v562_v9  ;;  %1153 = vst [vmem:[#allocation2 + $0x128] sm:$0xf] %v1032_v26  ;;  %v12661_v38 = vld [vmem:[#allocation2 + $0xfc] sm:$0xf0]  ;;  %v349_v39 = vld [vmem:[%s15704_s12 + $0x3c] sm:$0xf]  ;;  %v12668_v51 = vor.u32 %v14787_v33, %v12667_v32 }
  0x63   : > { %v573_v34 = vsel %vm15774_vm12, %v568_v24, %v572_v16  ;;  %878 = vst [vmem:[#allocation2 + $0x124] sm:$0xf] %v563_v28  ;;  %v1035_v35 = vsel %vm15782_vm13, %v1033_v27, %v1034_v22  ;;  %v350_v40 = vld [vmem:[%s15704_s12 + $0x40] sm:$0xf]  ;;  %v418_v41 = vld [vmem:[%s15704_s12 + $0x3c] sm:$0xf]  ;;  %v12664_v56 = vor.u32 %v14782_v37, %v12661_v38 }
  0x64   : > { %879 = vst [vmem:[#allocation2 + $0x148] sm:$0xf] %v573_v34  ;;  %v419_v42 = vld [vmem:[%s15704_s12 + $0x40] sm:$0xf]  ;;  %v14783_v43 = vld [vmem:[#allocation2 + $0xe4] sm:$0xf] }
  0x65   : > { %1154 = vst [vmem:[#allocation2 + $0x14c] sm:$0xf] %v1035_v35  ;;  %v12669_v44 = vld [vmem:[#allocation2 + $0x104] sm:$0xf0]  ;;  %v420_v45 = vld [vmem:[%s15704_s12 + $0x44] sm:$0x1] }
  0x66   : > { %1218 = vst [vmem:[#allocation2 + $0x12c] sm:$0xf] %v12269_v30  ;;  %v575_v46 = vshrl.u32 %v418_v41, 16  ;;  %v578_v47 = vshll.u32 %v418_v41, 16  ;;  %v584_v48 = vshll.u32 %v419_v42, 16  ;;  %v588_v49 = vshrl.u32 %v419_v42, 16 }
  0x67   : > { %1219 = vst [vmem:[#allocation2 + $0x150] sm:$0xf] %v12270_v36  ;;  %v594_v50 = vshll.u32 %v420_v45, 16  ;;  %v917_v55 = vld [vmem:[%s15704_s12 + $0x3c] sm:$0xe]  ;;  %v12672_v63 = vor.u32 %v14783_v43, %v12669_v44  ;;  %v14861_v15 = vld [vmem:[%s18640_s1 + $0x110] sm:$0xff] }
  0x68   : > { %381 = vst [vmem:[#allocation2 + $0x168] sm:$0xf] %v349_v39  ;;  %v577_v52 = vrot.slane %v575_v46, 4  ;;  %v580_v54 = vrot.slane %v578_v47, 5  ;;  %v586_v57 = vrot.slane %v584_v48, 5  ;;  %v590_v58 = vrot.slane %v588_v49, 4  ;;  %4072 = vmatpush.bf16.msrb.mxu0 %v14861_v15 }
  0x69   : > { %382 = vst [vmem:[#allocation2 + $0x18c] sm:$0xf] %v350_v40  ;;  %v918_v61 = vld [vmem:[%s15704_s12 + $0x40] sm:$0xf]  ;;  %v12250_v62 = vrot.slane %v917_v55, 9  ;;  %v596_v1 = vrot.slane %v594_v50, 5 }
  0x6a   : > { %3894 = vmatmul.bf16.gmra.mxu0 %v12660_v23  ;;  %v581_v59 = vor.u32 %v580_v54, %v577_v52  ;;  %v591_v0 = vor.u32 %v590_v58, %v586_v57  ;;  %v919_v2 = vld [vmem:[%s15704_s12 + $0x44] sm:$0x1]  ;;  %v1038_v3 = vrot.slane %v918_v61, 5  ;;  %v12695_v6 = vld [vmem:[#allocation2 + $0x120] sm:$0xf]  ;;  %v14869_v16 = vld [vmem:[%s18640_s1 + $0x150] sm:$0xff] }
  0x6b   : > { %v1041_v5 = vrot.slane %v919_v2, 5  ;;  %v14795_v10 = vld [vmem:[#allocation2 + $0x140] sm:$0xf0]  ;;  %v12271_v12 = vld [vmem:[%s15704_s12 + $0x48] sm:$0xf]  ;;  %4121 = vmatpush.bf16.msrb.mxu1 %v14869_v16  ;;  %v14889_v15 = vld [vmem:[%s18640_s1 + $0x1f0] sm:$0xff] }
  0x6c   : > { %3992 = vmatmul.bf16.gmra.mxu2 %v12668_v51  ;;  %v582_v4 = vrot.slane %v581_v59, 4  ;;  %v592_v7 = vrot.slane %v591_v0, 4  ;;  %v1039_v8 = vsel %vm15782_vm13, %v12250_v62, %v1038_v3  ;;  %v1040_v9 = vrot.slane %v1038_v3, 4  ;;  %v421_v17 = vld [vmem:[%s15704_s12 + $0x48] sm:$0xf] }
  0x6d   : > { %3943 = vmatmul.bf16.gmra.mxu1 %v12664_v56  ;;  %1155 = vst [vmem:[#allocation2 + $0x170] sm:$0xf] %v1039_v8  ;;  %v12272_v18 = vld [vmem:[%s15704_s12 + $0x4c] sm:$0xf]  ;;  %v351_v19 = vld [vmem:[%s15704_s12 + $0x48] sm:$0xf]  ;;  %v12696_v21 = vor.u32 %v14795_v10, %v12695_v6 }
  0x6e   : > { %v587_v11 = vsel %vm15774_vm12, %v582_v4, %v586_v57  ;;  %v597_v13 = vsel %vm15774_vm12, %v592_v7, %v596_v1  ;;  %v1042_v14 = vsel %vm15782_vm13, %v1040_v9, %v1041_v5  ;;  %v352_v22 = vld [vmem:[%s15704_s12 + $0x4c] sm:$0xf]  ;;  %1220 = vst [vmem:[#allocation2 + $0x174] sm:$0xf] %v12271_v12  ;;  %v423_v24 = vld [vmem:[%s15704_s12 + $0x50] sm:$0x1] }
  0x6f   : > { %4041 = vmatmul.bf16.gmra.mxu3 %v12672_v63  ;;  %880 = vst [vmem:[#allocation2 + $0x16c] sm:$0xf] %v587_v11  ;;  %v422_v23 = vld [vmem:[%s15704_s12 + $0x4c] sm:$0xf]  ;;  %v599_v26 = vshrl.u32 %v421_v17, 16  ;;  %v602_v27 = vshll.u32 %v421_v17, 16 }
  0x70   : > { %881 = vst [vmem:[#allocation2 + $0x190] sm:$0xf] %v597_v13  ;;  %v12703_v28 = vld [vmem:[#allocation2 + $0x128] sm:$0xf]  ;;  %v608_v30 = vshll.u32 %v422_v23, 16  ;;  %v612_v31 = vshrl.u32 %v422_v23, 16 }
  0x71   : > { %1156 = vst [vmem:[#allocation2 + $0x194] sm:$0xf] %v1042_v14  ;;  %v618_v32 = vshll.u32 %v423_v24, 16  ;;  %v14791_v33 = vld [vmem:[#allocation2 + $0x124] sm:$0xf]  ;;  %v601_v34 = vrot.slane %v599_v26, 4 }
  0x72   : > { %1221 = vst [vmem:[#allocation2 + $0x198] sm:$0xf] %v12272_v18  ;;  %v604_v35 = vrot.slane %v602_v27, 5  ;;  %v920_v36 = vld [vmem:[%s15704_s12 + $0x48] sm:$0xe]  ;;  %v610_v38 = vrot.slane %v608_v30, 5 }
  0x73   : > { %383 = vst [vmem:[#allocation2 + $0x1b0] sm:$0xf] %v351_v19  ;;  %v14796_v37 = vld [vmem:[#allocation2 + $0x148] sm:$0xf0]  ;;  %v614_v39 = vrot.slane %v612_v31, 4  ;;  %v12251_v43 = vrot.slane %v920_v36, 9 }
  0x74   : > { %384 = vst [vmem:[#allocation2 + $0x1d4] sm:$0xf] %v352_v22  ;;  %v12697_v40 = vld [vmem:[#allocation2 + $0x144] sm:$0xf0]  ;;  %v605_v41 = vor.u32 %v604_v35, %v601_v34  ;;  %v921_v42 = vld [vmem:[%s15704_s12 + $0x4c] sm:$0xf]  ;;  %v12704_v48 = vor.u32 %v14796_v37, %v12703_v28 }
  0x75   : > { %v615_v44 = vor.u32 %v614_v39, %v610_v38  ;;  %v620_v45 = vrot.slane %v618_v32, 5  ;;  %v922_v46 = vld [vmem:[%s15704_s12 + $0x50] sm:$0x1]  ;;  %v1045_v47 = vrot.slane %v921_v42, 5  ;;  %v14792_v49 = vld [vmem:[#allocation2 + $0x12c] sm:$0xf]  ;;  %v12700_v54 = vor.u32 %v14791_v33, %v12697_v40 }
  0x76   : > { %v12705_v50 = vld [vmem:[#allocation2 + $0x14c] sm:$0xf0]  ;;  %v606_v51 = vrot.slane %v605_v41, 4  ;;  %v1048_v52 = vrot.slane %v922_v46, 5  ;;  %v12273_v63 = vld [vmem:[%s15704_s12 + $0x54] sm:$0xf] }
  0x77   : > { %v616_v55 = vrot.slane %v615_v44, 4  ;;  %v1046_v56 = vsel %vm15782_vm13, %v12251_v43, %v1045_v47  ;;  %v1047_v57 = vrot.slane %v1045_v47, 4  ;;  %v12708_v59 = vor.u32 %v14792_v49, %v12705_v50  ;;  %v424_v0 = vld [vmem:[%s15704_s12 + $0x54] sm:$0xf]  ;;  %v12731_v1 = vld [vmem:[#allocation2 + $0x168] sm:$0xf] }
  0x78   : > { %v611_v58 = vsel %vm15774_vm12, %v606_v51, %v610_v38  ;;  %1157 = vst [vmem:[#allocation2 + $0x1b8] sm:$0xf] %v1046_v56  ;;  %v14804_v2 = vld [vmem:[#allocation2 + $0x188] sm:$0xf0]  ;;  %v12274_v3 = vld [vmem:[%s15704_s12 + $0x58] sm:$0xf] }
  0x79   : > { %v621_v61 = vsel %vm15774_vm12, %v616_v55, %v620_v45  ;;  %882 = vst [vmem:[#allocation2 + $0x1b4] sm:$0xf] %v611_v58  ;;  %v1049_v62 = vsel %vm15782_vm13, %v1047_v57, %v1048_v52  ;;  %v425_v4 = vld [vmem:[%s15704_s12 + $0x58] sm:$0xf]  ;;  %v623_v5 = vshrl.u32 %v424_v0, 16  ;;  %v626_v6 = vshll.u32 %v424_v0, 16 }
  0x7a   : > { %3899 = vmatmul.bf16.gmra.mxu0 %v12696_v21  ;;  %883 = vst [vmem:[#allocation2 + $0x1d8] sm:$0xf] %v621_v61  ;;  %v632_v7 = vshll.u32 %v425_v4, 16  ;;  %v14882_v8 = vld [vmem:[%s18640_s1 + $0x1b8] sm:$0xff]  ;;  %v636_v10 = vshrl.u32 %v425_v4, 16  ;;  %v14860_v11 = vld [vmem:[%s18640_s1 + $0x108] sm:$0xff]  ;;  %v12732_v19 = vor.u32 %v14804_v2, %v12731_v1 }
  0x7b   : > { %1158 = vst [vmem:[#allocation2 + $0x1dc] sm:$0xf] %v1049_v62  ;;  %v14890_v9 = vld [vmem:[%s18640_s1 + $0x1f8] sm:$0xff]  ;;  %v14868_v12 = vld [vmem:[%s18640_s1 + $0x148] sm:$0xff]  ;;  %v625_v13 = vrot.slane %v623_v5, 4  ;;  %4165 = vmatpush.bf16.msrb.mxu2 %v14882_v8  ;;  %v14881_v14 = vld [vmem:[%s18640_s1 + $0x1b0] sm:$0xff]  ;;  %4073 = vmatpush.bf16.msrb.mxu0 %v14860_v11 }
  0x7c   : > { %3997 = vmatmul.bf16.gmra.mxu2 %v12704_v48  ;;  %1222 = vst [vmem:[#allocation2 + $0x1bc] sm:$0xf] %v12273_v63  ;;  %4214 = vmatpush.bf16.msrb.mxu3 %v14890_v9  ;;  %v628_v16 = vrot.slane %v626_v6, 5  ;;  %v634_v17 = vrot.slane %v632_v7, 5  ;;  %v638_v18 = vrot.slane %v636_v10, 4  ;;  %v14880_v31 = vld [vmem:[%s18640_s1 + $0x1a8] sm:$0xff] }
  0x7d   : > { %3948 = vmatmul.bf16.gmra.mxu1 %v12700_v54  ;;  %1223 = vst [vmem:[#allocation2 + $0x1e0] sm:$0xf] %v12274_v3  ;;  %v353_v21 = vld [vmem:[%s15704_s12 + $0x54] sm:$0xf]  ;;  %v354_v22 = vld [vmem:[%s15704_s12 + $0x58] sm:$0xf] }
  0x7e   : > { %4122 = vmatpush.bf16.msrb.mxu1 %v14868_v12  ;;  %v629_v23 = vor.u32 %v628_v16, %v625_v13  ;;  %v639_v24 = vor.u32 %v638_v18, %v634_v17  ;;  %v12739_v26 = vld [vmem:[#allocation2 + $0x170] sm:$0xf]  ;;  %385 = vst [vmem:[#allocation2 + $0x1f8] sm:$0xf] %v353_v21  ;;  %v426_v27 = vld [vmem:[%s15704_s12 + $0x5c] sm:$0x1] }
  0x7f   : > { %4046 = vmatmul.bf16.gmra.mxu3 %v12708_v59  ;;  %v14800_v28 = vld [vmem:[#allocation2 + $0x16c] sm:$0xf]  ;;  %v12733_v30 = vld [vmem:[#allocation2 + $0x18c] sm:$0xf0]  ;;  %4166 = vmatpush.bf16.msrb.mxu2 %v14881_v14  ;;  %v14888_v32 = vld [vmem:[%s18640_s1 + $0x1e8] sm:$0xff]  ;;  %v642_v36 = vshll.u32 %v426_v27, 16 }
  0x80   : > { %4215 = vmatpush.bf16.msrb.mxu3 %v14889_v15  ;;  %386 = vst [vmem:[#allocation2 + $0x21c] sm:$0xf] %v354_v22  ;;  %v630_v33 = vrot.slane %v629_v23, 4  ;;  %v14805_v34 = vld [vmem:[#allocation2 + $0x190] sm:$0xf0]  ;;  %v640_v35 = vrot.slane %v639_v24, 4  ;;  %v12736_v50 = vor.u32 %v14800_v28, %v12733_v30 }
  0x81   : > { %v923_v37 = vld [vmem:[%s15704_s12 + $0x54] sm:$0xe]  ;;  %v14801_v38 = vld [vmem:[#allocation2 + $0x174] sm:$0xf]  ;;  %v924_v40 = vld [vmem:[%s15704_s12 + $0x58] sm:$0xf]  ;;  %v12740_v45 = vor.u32 %v14805_v34, %v12739_v26 }
  0x82   : > { %v635_v39 = vsel %vm15774_vm12, %v630_v33, %v634_v17  ;;  %v925_v41 = vld [vmem:[%s15704_s12 + $0x5c] sm:$0x1]  ;;  %v644_v42 = vrot.slane %v642_v36, 5  ;;  %v12252_v43 = vrot.slane %v923_v37, 9  ;;  %v1052_v44 = vrot.slane %v924_v40, 5  ;;  %v14887_v47 = vld [vmem:[%s18640_s1 + $0x1e0] sm:$0xff] }
  0x83   : > { %884 = vst [vmem:[#allocation2 + $0x1fc] sm:$0xf] %v635_v39  ;;  %v12741_v46 = vld [vmem:[#allocation2 + $0x194] sm:$0xf0]  ;;  %4167 = vmatpush.bf16.msrb.mxu2 %v14880_v31  ;;  %v1055_v48 = vrot.slane %v925_v41, 5  ;;  %v14878_v5 = vld [vmem:[%s18640_s1 + $0x198] sm:$0xff] }
  0x84   : > { %4216 = vmatpush.bf16.msrb.mxu3 %v14888_v32  ;;  %v12275_v49 = vld [vmem:[%s15704_s12 + $0x60] sm:$0xf]  ;;  %v645_v52 = vsel %vm15774_vm12, %v640_v35, %v644_v42  ;;  %v1053_v54 = vsel %vm15782_vm13, %v12252_v43, %v1052_v44  ;;  %v1054_v55 = vrot.slane %v1052_v44, 4  ;;  %v12276_v56 = vld [vmem:[%s15704_s12 + $0x64] sm:$0xf]  ;;  %v12744_v57 = vor.u32 %v14801_v38, %v12741_v46  ;;  %v14886_v6 = vld [vmem:[%s18640_s1 + $0x1d8] sm:$0xff] }
  0x85   : > { %v14879_v51 = vld [vmem:[%s18640_s1 + $0x1a0] sm:$0xff]  ;;  %1224 = vst [vmem:[#allocation2 + $0x204] sm:$0xf] %v12275_v49  ;;  %v12293_v59 = vld [vmem:[%s15704_s12 + $0xc] sm:$0xf]  ;;  %v14885_v14 = vld [vmem:[%s18640_s1 + $0x1d0] sm:$0xff] }
  0x86   : > { %885 = vst [vmem:[#allocation2 + $0x220] sm:$0xf] %v645_v52  ;;  %v1056_v58 = vsel %vm15782_vm13, %v1054_v55, %v1055_v48  ;;  %v12767_v61 = vld [vmem:[#allocation2 + $0x1b0] sm:$0xf]  ;;  %v12294_v62 = vld [vmem:[%s15704_s12 + $0x10] sm:$0xf] }
  0x87   : > { %1159 = vst [vmem:[#allocation2 + $0x200] sm:$0xf] %v1053_v54  ;;  %v1291_v63 = vshrl.u32 %v12293_v59, 16  ;;  %v1294_v0 = vshll.u32 %v12293_v59, 16  ;;  %4168 = vmatpush.bf16.msrb.mxu2 %v14879_v51  ;;  %v1300_v1 = vshll.u32 %v12294_v62, 16  ;;  %v1304_v2 = vshrl.u32 %v12294_v62, 16 }
  0x88   : > { %4217 = vmatpush.bf16.msrb.mxu3 %v14887_v47  ;;  %1160 = vst [vmem:[#allocation2 + $0x224] sm:$0xf] %v1056_v58  ;;  %v12437_v3 = vld [vmem:[%s15704_s12 + $0x18] sm:$0xf]  ;;  %v14813_v4 = vld [vmem:[#allocation2 + $0x1d0] sm:$0xf0] }
  0x89   : > { %1225 = vst [vmem:[#allocation2 + $0x228] sm:$0xf] %v12276_v56  ;;  %v1293_v7 = vrot.slane %v1291_v63, 4  ;;  %v1296_v8 = vrot.slane %v1294_v0, 5  ;;  %v14859_v9 = vld [vmem:[%s18640_s1 + $0x100] sm:$0xff]  ;;  %v1302_v11 = vrot.slane %v1300_v1, 5  ;;  %v12768_v17 = vor.u32 %v14813_v4, %v12767_v61 }
  0x8a   : > { %3904 = vmatmul.bf16.gmra.mxu0 %v12732_v19  ;;  %v14867_v10 = vld [vmem:[%s18640_s1 + $0x140] sm:$0xff]  ;;  %v1306_v12 = vrot.slane %v1304_v2, 4  ;;  %v2124_v13 = vshrl.u32 %v12437_v3, 16  ;;  %v2127_v16 = vshll.u32 %v12437_v3, 16  ;;  %v14877_v18 = vld [vmem:[%s18640_s1 + $0x190] sm:$0xff]  ;;  %v14884_v34 = vld [vmem:[%s18640_s1 + $0x1c8] sm:$0xff] }
  0x8b   : > { %v1297_v15 = vor.u32 %v1296_v8, %v1293_v7  ;;  %4074 = vmatpush.bf16.msrb.mxu0 %v14859_v9  ;;  %4169 = vmatpush.bf16.msrb.mxu2 %v14878_v5  ;;  %v12775_v22 = vld [vmem:[#allocation2 + $0x1b8] sm:$0xf]  ;;  %v12295_v23 = vld [vmem:[%s15704_s12 + $0x14] sm:$0x1]  ;;  %v14814_v27 = vld [vmem:[#allocation2 + $0x1d8] sm:$0xf0] }
  0x8c   : > { %4002 = vmatmul.bf16.gmra.mxu2 %v12740_v45  ;;  %4218 = vmatpush.bf16.msrb.mxu3 %v14886_v6  ;;  %v1307_v19 = vor.u32 %v1306_v12, %v1302_v11  ;;  %v2126_v21 = vrot.slane %v2124_v13, 4  ;;  %v2129_v26 = vrot.slane %v2127_v16, 5  ;;  %v1310_v30 = vshll.u32 %v12295_v23, 16  ;;  %v12341_v31 = vld [vmem:[%s15704_s12 + $0xc] sm:$0xe]  ;;  %v14875_v49 = vld [vmem:[%s18640_s1 + $0x180] sm:$0xff] }
  0x8d   : > { %3953 = vmatmul.bf16.gmra.mxu1 %v12736_v50  ;;  %v1298_v24 = vrot.slane %v1297_v15, 4  ;;  %v14809_v32 = vld [vmem:[#allocation2 + $0x1b4] sm:$0xf]  ;;  %v12769_v33 = vld [vmem:[#allocation2 + $0x1d4] sm:$0xf0]  ;;  %v14876_v39 = vld [vmem:[%s18640_s1 + $0x188] sm:$0xff]  ;;  %v12776_v48 = vor.u32 %v14814_v27, %v12775_v22 }
  0x8e   : > { %4123 = vmatpush.bf16.msrb.mxu1 %v14867_v10  ;;  %v1308_v28 = vrot.slane %v1307_v19, 4  ;;  %v12342_v36 = vld [vmem:[%s15704_s12 + $0x10] sm:$0xf]  ;;  %v12343_v37 = vld [vmem:[%s15704_s12 + $0x14] sm:$0x1]  ;;  %v2130_v38 = vor.u32 %v2129_v26, %v2126_v21  ;;  %v1312_v40 = vrot.slane %v1310_v30, 5  ;;  %v12772_v59 = vor.u32 %v14809_v32, %v12769_v33 }
  0x8f   : > { %4051 = vmatmul.bf16.gmra.mxu3 %v12744_v57  ;;  %v1303_v35 = vsel %vm15774_vm12, %v1298_v24, %v1302_v11  ;;  %4170 = vmatpush.bf16.msrb.mxu2 %v14877_v18  ;;  %v12389_v41 = vrot.slane %v12341_v31, 9  ;;  %v14810_v42 = vld [vmem:[#allocation2 + $0x1bc] sm:$0xf]  ;;  %v12777_v43 = vld [vmem:[#allocation2 + $0x1dc] sm:$0xf0]  ;;  %v1836_v44 = vrot.slane %v12342_v36, 5 }
  0x90   : > { %4219 = vmatpush.bf16.msrb.mxu3 %v14885_v14  ;;  %1706 = vst [vmem:[#allocation2 + $0x10] sm:$0xf] %v1303_v35  ;;  %v1839_v45 = vrot.slane %v12343_v37, 5  ;;  %v12405_v46 = vld [vmem:[%s15704_s12 + $0x18] sm:$0xf]  ;;  %v1313_v50 = vsel %vm15774_vm12, %v1308_v28, %v1312_v40  ;;  %v14883_v54 = vld [vmem:[%s18640_s1 + $0x1c0] sm:$0xff]  ;;  %v12780_v1 = vor.u32 %v14810_v42, %v12777_v43 }
  0x91   : > { %v12406_v47 = vld [vmem:[%s15704_s12 + $0x1c] sm:$0xf]  ;;  %2043 = vst [vmem:[#allocation2 + $0x18] sm:$0xf] %v12405_v46  ;;  %v12439_v52 = vld [vmem:[%s15704_s12 + $0x20] sm:$0x1]  ;;  %v1837_v55 = vsel %vm15782_vm13, %v12389_v41, %v1836_v44 }
  0x92   : > { %v12438_v51 = vld [vmem:[%s15704_s12 + $0x1c] sm:$0xf]  ;;  %1707 = vst [vmem:[#allocation2 + $0x34] sm:$0xf] %v1313_v50  ;;  %v1838_v56 = vrot.slane %v1836_v44, 4  ;;  %v2131_v57 = vrot.slane %v2130_v38, 4 }
  0x93   : > { %v2133_v58 = vshll.u32 %v12438_v51, 16  ;;  %4171 = vmatpush.bf16.msrb.mxu2 %v14876_v39  ;;  %1978 = vst [vmem:[#allocation2 + $0x14] sm:$0xf] %v1837_v55  ;;  %v2137_v61 = vshrl.u32 %v12438_v51, 16  ;;  %v2143_v62 = vshll.u32 %v12439_v52, 16  ;;  %v14898_v18 = vld [vmem:[%s18640_s1 + $0x238] sm:$0xff] }
  0x94   : > { %4220 = vmatpush.bf16.msrb.mxu3 %v14884_v34  ;;  %v1840_v63 = vsel %vm15782_vm13, %v1838_v56, %v1839_v45  ;;  %2044 = vst [vmem:[#allocation2 + $0x3c] sm:$0xf] %v12406_v47  ;;  %v12296_v3 = vld [vmem:[%s15704_s12 + $0x18] sm:$0xf]  ;;  %v12297_v6 = vld [vmem:[%s15704_s12 + $0x1c] sm:$0xf]  ;;  %4263 = vmatpush.bf16.msra.mxu0 %v14898_v18 }
  0x95   : > { %v2135_v0 = vrot.slane %v2133_v58, 5  ;;  %1979 = vst [vmem:[#allocation2 + $0x38] sm:$0xf] %v1840_v63  ;;  %v2139_v2 = vrot.slane %v2137_v61, 4  ;;  %v2145_v5 = vrot.slane %v2143_v62, 5  ;;  %v1315_v7 = vshrl.u32 %v12296_v3, 16 }
  0x96   : > { %v1318_v8 = vshll.u32 %v12296_v3, 16  ;;  %v1324_v10 = vshll.u32 %v12297_v6, 16  ;;  %v1328_v11 = vshrl.u32 %v12297_v6, 16  ;;  %v12440_v12 = vld [vmem:[%s15704_s12 + $0x24] sm:$0xf]  ;;  %v14978_v19 = vld [vmem:[%s18640_s1 + $0x38] sm:$0xff] }
  0x97   : > { %v2136_v4 = vsel %vm15774_vm12, %v2131_v57, %v2135_v0  ;;  %4172 = vmatpush.bf16.msrb.mxu2 %v14875_v49  ;;  %v2140_v9 = vor.u32 %v2139_v2, %v2135_v0  ;;  %v12803_v13 = vld [vmem:[#allocation2 + $0x1f8] sm:$0xf]  ;;  %v14822_v14 = vld [vmem:[#allocation2 + $0x218] sm:$0xf0]  ;;  %v1317_v15 = vrot.slane %v1315_v7, 4  ;;  %v2148_v26 = vshrl.u32 %v12440_v12, 16  ;;  %5388 = vmatpush.bf16.msra.mxu1 %v14978_v19 }
  0x98   : > { %4221 = vmatpush.bf16.msrb.mxu3 %v14883_v54  ;;  %2539 = vst [vmem:[#allocation2 + $0x1c] sm:$0xf] %v2136_v4  ;;  %v1320_v16 = vrot.slane %v1318_v8, 5  ;;  %v1326_v21 = vrot.slane %v1324_v10, 5  ;;  %v12298_v22 = vld [vmem:[%s15704_s12 + $0x20] sm:$0x1]  ;;  %v12804_v27 = vor.u32 %v14822_v14, %v12803_v13 }
  0x99   : > { %v1330_v24 = vrot.slane %v1328_v11, 4  ;;  %v1334_v30 = vshll.u32 %v12298_v22, 16  ;;  %v12344_v31 = vld [vmem:[%s15704_s12 + $0x18] sm:$0xe]  ;;  %v2151_v35 = vshll.u32 %v12440_v12, 16  ;;  %v2150_v41 = vrot.slane %v2148_v26, 4 }
  0x9a   : > { %3909 = vmatmul.bf16.gmra.mxu0 %v12768_v17  ;;  %v2141_v17 = vrot.slane %v2140_v9, 4  ;;  %v1321_v23 = vor.u32 %v1320_v16, %v1317_v15  ;;  %v12390_v34 = vrot.slane %v12344_v31, 9  ;;  %v12811_v36 = vld [vmem:[#allocation2 + $0x200] sm:$0xf]  ;;  %v14823_v37 = vld [vmem:[#allocation2 + $0x220] sm:$0xf0] }
  0x9b   : > { %v1331_v33 = vor.u32 %v1330_v24, %v1326_v21  ;;  %v1336_v38 = vrot.slane %v1334_v30, 5  ;;  %v12345_v39 = vld [vmem:[%s15704_s12 + $0x1c] sm:$0xf]  ;;  %v12346_v40 = vld [vmem:[%s15704_s12 + $0x20] sm:$0x1]  ;;  %v2153_v56 = vrot.slane %v2151_v35, 5  ;;  %v12812_v61 = vor.u32 %v14823_v37, %v12811_v36 }
  0x9c   : > { %4007 = vmatmul.bf16.gmra.mxu2 %v12776_v48  ;;  %v2146_v28 = vsel %vm15774_vm12, %v2141_v17, %v2145_v5  ;;  %v1322_v32 = vrot.slane %v1321_v23, 4  ;;  %v14818_v42 = vld [vmem:[#allocation2 + $0x1fc] sm:$0xf]  ;;  %v12805_v43 = vld [vmem:[#allocation2 + $0x21c] sm:$0xf0]  ;;  %v1843_v46 = vrot.slane %v12345_v39, 5 }
  0x9d   : > { %3958 = vmatmul.bf16.gmra.mxu1 %v12772_v59  ;;  %2540 = vst [vmem:[#allocation2 + $0x40] sm:$0xf] %v2146_v28  ;;  %v1332_v45 = vrot.slane %v1331_v33, 4  ;;  %v1846_v47 = vrot.slane %v12346_v40, 5  ;;  %v12441_v48 = vld [vmem:[%s15704_s12 + $0x28] sm:$0xf]  ;;  %v12808_v2 = vor.u32 %v14818_v42, %v12805_v43 }
  0x9e   : > { %v1327_v44 = vsel %vm15774_vm12, %v1322_v32, %v1326_v21  ;;  %v12407_v49 = vld [vmem:[%s15704_s12 + $0x24] sm:$0xf]  ;;  %v12408_v50 = vld [vmem:[%s15704_s12 + $0x28] sm:$0xf]  ;;  %v1844_v52 = vsel %vm15782_vm13, %v12390_v34, %v1843_v46  ;;  %v1845_v54 = vrot.slane %v1843_v46, 4  ;;  %v2157_v57 = vshll.u32 %v12441_v48, 16 }
  0x9f   : > { %4056 = vmatmul.bf16.gmra.mxu3 %v12780_v1  ;;  %1708 = vst [vmem:[#allocation2 + $0x58] sm:$0xf] %v1327_v44  ;;  %v1337_v51 = vsel %vm15774_vm12, %v1332_v45, %v1336_v38  ;;  %v12442_v55 = vld [vmem:[%s15704_s12 + $0x2c] sm:$0x1]  ;;  %v2161_v58 = vshrl.u32 %v12441_v48, 16  ;;  %v2154_v1 = vor.u32 %v2153_v56, %v2150_v41  ;;  %v14897_v28 = vld [vmem:[%s18640_s1 + $0x230] sm:$0xff] }
  0xa0   : > { %2045 = vst [vmem:[#allocation2 + $0x60] sm:$0xf] %v12407_v49  ;;  %v2167_v59 = vshll.u32 %v12442_v55, 16  ;;  %v14819_v62 = vld [vmem:[#allocation2 + $0x204] sm:$0xf]  ;;  %v1847_v0 = vsel %vm15782_vm13, %v1845_v54, %v1846_v47  ;;  %v2159_v3 = vrot.slane %v2157_v57, 5  ;;  %4264 = vmatpush.bf16.msra.mxu0 %v14897_v28 }
  0xa1   : > { %1709 = vst [vmem:[#allocation2 + $0x7c] sm:$0xf] %v1337_v51  ;;  %v12813_v63 = vld [vmem:[#allocation2 + $0x224] sm:$0xf0]  ;;  %v2163_v4 = vrot.slane %v2161_v58, 4  ;;  %v2155_v5 = vrot.slane %v2154_v1, 4 }
  0xa2   : > { %1980 = vst [vmem:[#allocation2 + $0x5c] sm:$0xf] %v1844_v52  ;;  %v2169_v6 = vrot.slane %v2167_v59, 5  ;;  %v12816_v7 = vor.u32 %v14819_v62, %v12813_v63  ;;  %v12299_v9 = vld [vmem:[%s15704_s12 + $0x24] sm:$0xf]  ;;  %v14977_v30 = vld [vmem:[%s18640_s1 + $0x30] sm:$0xff] }
  0xa3   : > { %1981 = vst [vmem:[#allocation2 + $0x80] sm:$0xf] %v1847_v0  ;;  %v2164_v8 = vor.u32 %v2163_v4, %v2159_v3  ;;  %v12300_v10 = vld [vmem:[%s15704_s12 + $0x28] sm:$0xf]  ;;  %v12443_v11 = vld [vmem:[%s15704_s12 + $0x30] sm:$0xf]  ;;  %v2160_v12 = vsel %vm15774_vm12, %v2155_v5, %v2159_v3  ;;  %5389 = vmatpush.bf16.msra.mxu1 %v14977_v30 }
  0xa4   : > { %2046 = vst [vmem:[#allocation2 + $0x84] sm:$0xf] %v12408_v50  ;;  %v1339_v13 = vshrl.u32 %v12299_v9, 16  ;;  %v1342_v14 = vshll.u32 %v12299_v9, 16  ;;  %v1348_v15 = vshll.u32 %v12300_v10, 16  ;;  %v1352_v18 = vshrl.u32 %v12300_v10, 16 }
  0xa5   : > { %v12567_v16 = vld [vmem:[#allocation2 + $0x10] sm:$0xf]  ;;  %v2165_v17 = vrot.slane %v2164_v8, 4  ;;  %2541 = vst [vmem:[#allocation2 + $0x64] sm:$0xf] %v2160_v12  ;;  %v2172_v24 = vshrl.u32 %v12443_v11, 16 }
  0xa6   : > { %v14761_v19 = vld [vmem:[#allocation2 + $0x30] sm:$0xf0]  ;;  %v1341_v21 = vrot.slane %v1339_v13, 4  ;;  %v1344_v22 = vrot.slane %v1342_v14, 5  ;;  %v1350_v23 = vrot.slane %v1348_v15, 5  ;;  %v1354_v31 = vrot.slane %v1352_v18, 4 }
  0xa7   : > { %v16099_v26 = vld [vmem:[#allocation6] ss:$0 sm:$0xff]  ;;  %v12301_v32 = vld [vmem:[%s15704_s12 + $0x2c] sm:$0x1]  ;;  %v2175_v34 = vshll.u32 %v12443_v11, 16  ;;  %v12568_v35 = vor.u32 %v14761_v19, %v12567_v16  ;;  %v2174_v39 = vrot.slane %v2172_v24, 4 }
  0xa8   : > { %v1345_v33 = vor.u32 %v1344_v22, %v1341_v21  ;;  %v1355_v36 = vor.u32 %v1354_v31, %v1350_v23  ;;  %v1358_v37 = vshll.u32 %v12301_v32, 16  ;;  %v12347_v38 = vld [vmem:[%s15704_s12 + $0x24] sm:$0xe]  ;;  %v12348_v42 = vld [vmem:[%s15704_s12 + $0x28] sm:$0xf] }
  0xa9   : > { %v12349_v43 = vld [vmem:[%s15704_s12 + $0x2c] sm:$0x1]  ;;  %v12391_v44 = vrot.slane %v12347_v38, 9  ;;  %v12575_v46 = vld [vmem:[#allocation2 + $0x18] sm:$0xf]  ;;  %v1850_v49 = vrot.slane %v12348_v42, 5 }
  0xaa   : > { %3914 = vmatmul.bf16.gmra.mxu0 %v12804_v27  ;;  %v2170_v27 = vsel %vm15774_vm12, %v2165_v17, %v2169_v6  ;;  %v1346_v41 = vrot.slane %v1345_v33, 4  ;;  %v1356_v47 = vrot.slane %v1355_v36, 4  ;;  %v1360_v48 = vrot.slane %v1358_v37, 5  ;;  %v12444_v50 = vld [vmem:[%s15704_s12 + $0x34] sm:$0xf]  ;;  %v14896_v42 = vld [vmem:[%s18640_s1 + $0x228] sm:$0xff] }
  0xab   : > { %2542 = vst [vmem:[#allocation2 + $0x88] sm:$0xf] %v2170_v27  ;;  %v14757_v52 = vld [vmem:[#allocation2 + $0x14] sm:$0xf]  ;;  %v12569_v54 = vld [vmem:[#allocation2 + $0x34] sm:$0xf0]  ;;  %v1851_v62 = vsel %vm15782_vm13, %v12391_v44, %v1850_v49  ;;  %4265 = vmatpush.bf16.msra.mxu0 %v14896_v42 }
  0xac   : > { %4012 = vmatmul.bf16.gmra.mxu2 %v12812_v61  ;;  %v14762_v55 = vld [vmem:[#allocation2 + $0x38] sm:$0xf0]  ;;  %v1351_v56 = vsel %vm15774_vm12, %v1346_v41, %v1350_v23  ;;  %v1853_v57 = vrot.slane %v12349_v43, 5  ;;  %v2177_v58 = vrot.slane %v2175_v34, 5  ;;  %v1361_v61 = vsel %vm15774_vm12, %v1356_v47, %v1360_v48  ;;  %v12409_v0 = vld [vmem:[%s15704_s12 + $0x30] sm:$0xf] }
  0xad   : > { %3963 = vmatmul.bf16.gmra.mxu1 %v12808_v2  ;;  %1710 = vst [vmem:[#allocation2 + $0xa0] sm:$0xf] %v1351_v56  ;;  %v1852_v63 = vrot.slane %v1850_v49, 4  ;;  %v14758_v1 = vld [vmem:[#allocation2 + $0x1c] sm:$0xf]  ;;  %v2181_v5 = vshll.u32 %v12444_v50, 16  ;;  %v12576_v10 = vor.u32 %v14762_v55, %v12575_v46  ;;  %v12572_v14 = vor.u32 %v14757_v52, %v12569_v54 }
  0xae   : > { %v12577_v2 = vld [vmem:[#allocation2 + $0x3c] sm:$0xf0]  ;;  %1711 = vst [vmem:[#allocation2 + $0xc4] sm:$0xf] %v1361_v61  ;;  %v12445_v3 = vld [vmem:[%s15704_s12 + $0x38] sm:$0x1]  ;;  %v2178_v4 = vor.u32 %v2177_v58, %v2174_v39 }
  0xaf   : > { %4061 = vmatmul.bf16.gmra.mxu3 %v12816_v7  ;;  %v2185_v6 = vshrl.u32 %v12444_v50, 16  ;;  %v1854_v7 = vsel %vm15782_vm13, %v1852_v63, %v1853_v57  ;;  %1982 = vst [vmem:[#allocation2 + $0xa4] sm:$0xf] %v1851_v62  ;;  %v12410_v8 = vld [vmem:[%s15704_s12 + $0x34] sm:$0xf]  ;;  %v2191_v9 = vshll.u32 %v12445_v3, 16  ;;  %v12580_v19 = vor.u32 %v14758_v1, %v12577_v2 }
  0xb0   : > { %1983 = vst [vmem:[#allocation2 + $0xc8] sm:$0xf] %v1854_v7  ;;  %v2179_v11 = vrot.slane %v2178_v4, 4  ;;  %v2183_v12 = vrot.slane %v2181_v5, 5  ;;  %v12302_v22 = vld [vmem:[%s15704_s12 + $0x30] sm:$0xf] }
  0xb1   : > { %v2187_v13 = vrot.slane %v2185_v6, 4  ;;  %2047 = vst [vmem:[#allocation2 + $0xa8] sm:$0xf] %v12409_v0  ;;  %v2193_v18 = vrot.slane %v2191_v9, 5  ;;  %v12303_v23 = vld [vmem:[%s15704_s12 + $0x34] sm:$0xf] }
  0xb2   : > { %2048 = vst [vmem:[#allocation2 + $0xcc] sm:$0xf] %v12410_v8  ;;  %v2184_v16 = vsel %vm15774_vm12, %v2179_v11, %v2183_v12  ;;  %v1363_v28 = vshrl.u32 %v12302_v22, 16  ;;  %v1366_v30 = vshll.u32 %v12302_v22, 16  ;;  %v1372_v31 = vshll.u32 %v12303_v23, 16  ;;  %v14976_v43 = vld [vmem:[%s18640_s1 + $0x28] sm:$0xff] }
  0xb3   : > { %v2188_v17 = vor.u32 %v2187_v13, %v2183_v12  ;;  %2543 = vst [vmem:[#allocation2 + $0xac] sm:$0xf] %v2184_v16  ;;  %v12603_v33 = vld [vmem:[#allocation2 + $0x58] sm:$0xf]  ;;  %v1376_v34 = vshrl.u32 %v12303_v23, 16  ;;  %5390 = vmatpush.bf16.msra.mxu1 %v14976_v43 }
  0xb4   : > { %v14770_v36 = vld [vmem:[#allocation2 + $0x78] sm:$0xf0]  ;;  %v1365_v38 = vrot.slane %v1363_v28, 4  ;;  %v1368_v39 = vrot.slane %v1366_v30, 5  ;;  %v12304_v44 = vld [vmem:[%s15704_s12 + $0x38] sm:$0x1] }
  0xb5   : > { %v2189_v27 = vrot.slane %v2188_v17, 4  ;;  %v1374_v46 = vrot.slane %v1372_v31, 5  ;;  %v1378_v47 = vrot.slane %v1376_v34, 4  ;;  %v12604_v48 = vor.u32 %v14770_v36, %v12603_v33  ;;  %v12350_v50 = vld [vmem:[%s15704_s12 + $0x30] sm:$0xe] }
  0xb6   : > { %v1382_v49 = vshll.u32 %v12304_v44, 16  ;;  %v12351_v57 = vld [vmem:[%s15704_s12 + $0x34] sm:$0xf]  ;;  %v12392_v58 = vrot.slane %v12350_v50, 9  ;;  %v12611_v61 = vld [vmem:[#allocation2 + $0x60] sm:$0xf] }
  0xb7   : > { %v3880_v40 = vpop.f32.mrf.mxu0  ;;  %v2194_v37 = vsel %vm15774_vm12, %v2189_v27, %v2193_v18  ;;  %v1379_v56 = vor.u32 %v1378_v47, %v1374_v46  ;;  %v12352_v63 = vld [vmem:[%s15704_s12 + $0x38] sm:$0x1]  ;;  %v1857_v0 = vrot.slane %v12351_v57, 5  ;;  %v12447_v1 = vld [vmem:[%s15704_s12 + $0x40] sm:$0xf] }
  0xb8   : > { %v3881_v45 = vadd.f32 %v16099_v26, %v3880_v40  ;;  %v3929_v51 = vpop.f32.mrf.mxu1  ;;  %v12446_v40 = vld [vmem:[%s15704_s12 + $0x3c] sm:$0xf]  ;;  %2544 = vst [vmem:[#allocation2 + $0xd0] sm:$0xf] %v2194_v37  ;;  %v1384_v62 = vrot.slane %v1382_v49, 5  ;;  %v1860_v7 = vrot.slane %v12352_v63, 5 }
  0xb9   : > { %v14766_v2 = vld [vmem:[#allocation2 + $0x5c] sm:$0xf]  ;;  %v12605_v3 = vld [vmem:[#allocation2 + $0x7c] sm:$0xf0]  ;;  %v14771_v4 = vld [vmem:[#allocation2 + $0x80] sm:$0xf0]  ;;  %v1858_v9 = vsel %vm15782_vm13, %v12392_v58, %v1857_v0 }
  0xba   : > { %v3930_v59 = vadd.f32 %v3929_v51, %v3881_v45  ;;  %4075 = vmatmul.bf16.vlgmr.msrb.gmra.mxu0 %v12568_v35  ;;  %v1369_v45 = vor.u32 %v1368_v39, %v1365_v38  ;;  %v2196_v51 = vshrl.u32 %v12446_v40, 16  ;;  %v1380_v6 = vrot.slane %v1379_v56, 4  ;;  %v12448_v8 = vld [vmem:[%s15704_s12 + $0x44] sm:$0x1]  ;;  %1984 = vst [vmem:[#allocation2 + $0xec] sm:$0xf] %v1858_v9 }
  0xbb   : > { %v2199_v12 = vshll.u32 %v12446_v40, 16  ;;  %v12411_v17 = vld [vmem:[%s15704_s12 + $0x3c] sm:$0xf]  ;;  %v2205_v18 = vshll.u32 %v12447_v1, 16  ;;  %v12612_v28 = vor.u32 %v14771_v4, %v12611_v61  ;;  %v2215_v33 = vshll.u32 %v12448_v8, 16  ;;  %v14975_v8 = vld [vmem:[%s18640_s1 + $0x20] sm:$0xff] }
  0xbc   : > { %4173 = vmatmul.bf16.vlgmr.msrb.gmra.mxu2 %v12576_v10  ;;  %v1370_v55 = vrot.slane %v1369_v45, 4  ;;  %v1859_v10 = vrot.slane %v1857_v0, 4  ;;  %v2198_v11 = vrot.slane %v2196_v51, 4  ;;  %v1385_v16 = vsel %vm15774_vm12, %v1380_v6, %v1384_v62  ;;  %2049 = vst [vmem:[#allocation2 + $0xf0] sm:$0xf] %v12411_v17  ;;  %5391 = vmatpush.bf16.msra.mxu1 %v14975_v8 }
  0xbd   : > { %4124 = vmatmul.bf16.vlgmr.msrb.gmra.mxu1 %v12572_v14  ;;  %v14767_v14 = vld [vmem:[#allocation2 + $0x64] sm:$0xf]  ;;  %1713 = vst [vmem:[#allocation2 + $0x10c] sm:$0xf] %v1385_v16  ;;  %v2201_v27 = vrot.slane %v2199_v12, 5  ;;  %v2207_v30 = vrot.slane %v2205_v18, 5  ;;  %v12608_v34 = vor.u32 %v14766_v2, %v12605_v3 }
  0xbe   : > { %v1375_v5 = vsel %vm15774_vm12, %v1370_v55, %v1374_v46  ;;  %v1861_v23 = vsel %vm15782_vm13, %v1859_v10, %v1860_v7  ;;  %v2217_v38 = vrot.slane %v2215_v33, 5  ;;  %v12305_v44 = vld [vmem:[%s15704_s12 + $0x3c] sm:$0xf]  ;;  %v12306_v45 = vld [vmem:[%s15704_s12 + $0x40] sm:$0xf] }
  0xbf   : > { %v3882_v15 = vpop.f32.mrf.mxu0  ;;  %v3978_v35 = vpop.f32.mrf.mxu2  ;;  %4222 = vmatmul.bf16.vlgmr.msrb.gmra.mxu3 %v12580_v19  ;;  %1712 = vst [vmem:[#allocation2 + $0xe8] sm:$0xf] %v1375_v5  ;;  %v2209_v19 = vshrl.u32 %v12447_v1, 16  ;;  %v1387_v47 = vshrl.u32 %v12305_v44, 16  ;;  %v12639_v49 = vld [vmem:[#allocation2 + $0xa0] sm:$0xf] }
  0xc0   : > { %v3883_v21 = vadd.f32 %v16099_v26, %v3882_v15  ;;  %v3931_v24 = vpop.f32.mrf.mxu1  ;;  %v3979_v41 = vadd.f32 %v3978_v35, %v3930_v59  ;;  %v12613_v15 = vld [vmem:[#allocation2 + $0x84] sm:$0xf0]  ;;  %1985 = vst [vmem:[#allocation2 + $0x110] sm:$0xf] %v1861_v23  ;;  %v2202_v35 = vor.u32 %v2201_v27, %v2198_v11  ;;  %v1396_v51 = vshll.u32 %v12306_v45, 16  ;;  %v14895_v7 = vld [vmem:[%s18640_s1 + $0x220] sm:$0xff] }
  0xc1   : > { %v2211_v31 = vrot.slane %v2209_v19, 4  ;;  %v1389_v55 = vrot.slane %v1387_v47, 4  ;;  %v8689_v61 = vld [vmem:[#allocation4 + $0x48] sm:$0xf]  ;;  %v8713_v0 = vld [vmem:[#allocation4 + $0x4c] sm:$0x1]  ;;  %4266 = vmatpush.bf16.msra.mxu0 %v14895_v7 }
  0xc2   : > { %v3932_v32 = vadd.f32 %v3931_v24, %v3883_v21  ;;  %v4027_v52 = vpop.f32.mrf.mxu3  ;;  %v12412_v24 = vld [vmem:[%s15704_s12 + $0x40] sm:$0xf]  ;;  %v2203_v43 = vrot.slane %v2202_v35, 4  ;;  %v8712_v62 = vld [vmem:[#allocation4 + $0x48] sm:$0xf]  ;;  %v1400_v3 = vshrl.u32 %v12306_v45, 16 }
  0xc3   : > { %v16143_v59 = vadd.f32 %v4027_v52, %v3979_v41  ;;  %2050 = vst [vmem:[#allocation2 + $0x114] sm:$0xf] %v12412_v24  ;;  %v2212_v37 = vor.u32 %v2211_v31, %v2207_v30  ;;  %v12616_v41 = vor.u32 %v14767_v14, %v12613_v15  ;;  %v14779_v52 = vld [vmem:[#allocation2 + $0xc0] sm:$0xf0]  ;;  %v8813_v1 = vshrl.u32 %v8712_v62, 16 }
  0xc4   : > { %v2208_v50 = vsel %vm15774_vm12, %v2203_v43, %v2207_v30  ;;  %v8816_v2 = vshll.u32 %v8712_v62, 16  ;;  %v12640_v4 = vor.u32 %v14779_v52, %v12639_v49  ;;  %v8822_v6 = vshll.u32 %v8713_v0, 16  ;;  %v12307_v15 = vld [vmem:[%s15704_s12 + $0x44] sm:$0x1]  ;;  %v12647_v19 = vld [vmem:[#allocation2 + $0xa8] sm:$0xf] }
  0xc5   : > { %v2213_v46 = vrot.slane %v2212_v37, 4  ;;  %2545 = vst [vmem:[#allocation2 + $0xf4] sm:$0xf] %v2208_v50  ;;  %v1398_v10 = vrot.slane %v1396_v51, 5  ;;  %v12353_v24 = vld [vmem:[%s15704_s12 + $0x3c] sm:$0xe] }
  0xc6   : > { %v8818_v14 = vrot.slane %v8816_v2, 5  ;;  %v12354_v27 = vld [vmem:[%s15704_s12 + $0x40] sm:$0xf]  ;;  %v12641_v30 = vld [vmem:[#allocation2 + $0xc4] sm:$0xf0]  ;;  %v1406_v35 = vshll.u32 %v12307_v15, 16 }
  0xc7   : > { %v3885_v54 = vpop.f32.mrf.mxu0  ;;  %v3980_v13 = vpop.f32.mrf.mxu2  ;;  %v16181_v31 = vld [vmem:[#allocation2 + $0xac] sm:$0xf]  ;;  %v12649_v37 = vld [vmem:[#allocation2 + $0xcc] sm:$0xf0]  ;;  %v12414_v51 = vld [vmem:[%s15704_s12 + $0x4c] sm:$0xf] }
  0xc8   : > { %v3981_v21 = vadd.f32 %v3980_v13, %v3932_v32  ;;  %v3886_v22 = vadd.f32 %v16099_v26, %v3885_v54  ;;  %v2218_v54 = vsel %vm15774_vm12, %v2213_v46, %v2217_v38  ;;  %v8815_v13 = vrot.slane %v8813_v1, 4  ;;  %v12450_v1 = vld [vmem:[%s15704_s12 + $0x4c] sm:$0xf]  ;;  %v12451_v2 = vld [vmem:[%s15704_s12 + $0x50] sm:$0x1] }
  0xc9   : > { %2546 = vst [vmem:[#allocation2 + $0x118] sm:$0xf] %v2218_v54  ;;  %v1408_v46 = vrot.slane %v1406_v35, 5  ;;  %v12308_v15 = vld [vmem:[%s15704_s12 + $0x48] sm:$0xf] }
  0xca   : > { %4080 = vmatmul.bf16.gmra.mxu0 %v12604_v48  ;;  %v4029_v36 = vpop.f32.mrf.mxu3  ;;  %v3934_v32 = vpop.f32.mrf.mxu1  ;;  %v1390_v48 = vshll.u32 %v12305_v44, 16  ;;  %v16168_v5 = vld [vmem:[#allocation2 + $0x110] sm:$0xf0]  ;;  %v8819_v33 = vor.u32 %v8818_v14, %v8815_v13  ;;  %v2233_v13 = vshrl.u32 %v12450_v1, 16  ;;  %v2239_v14 = vshll.u32 %v12451_v2, 16 }
  0xcb   : > { %v16159_v39 = vadd.f32 %v4029_v36, %v3981_v21  ;;  %v3935_v40 = vadd.f32 %v3934_v32, %v3886_v22  ;;  %8697 = vst [vmem:[#allocation2 + $0x114] sm:$0xf] %v8689_v61  ;;  %v14780_v21 = vld [vmem:[#allocation2 + $0xc8] sm:$0xf0]  ;;  %v8824_v22 = vrot.slane %v8822_v6, 5 }
  0xcc   : > { %4178 = vmatmul.bf16.gmra.mxu2 %v12612_v28  ;;  %v1392_v56 = vrot.slane %v1390_v48, 5  ;;  %v14775_v28 = vld [vmem:[#allocation2 + $0xa4] sm:$0xf]  ;;  %v12355_v36 = vld [vmem:[%s15704_s12 + $0x44] sm:$0x1]  ;;  %v8820_v44 = vrot.slane %v8819_v33, 4  ;;  %v12648_v54 = vor.u32 %v14780_v21, %v12647_v19 }
  0xcd   : > { %4129 = vmatmul.bf16.gmra.mxu1 %v12608_v34  ;;  %v1402_v34 = vrot.slane %v1400_v3, 4  ;;  %v12413_v32 = vld [vmem:[%s15704_s12 + $0x48] sm:$0xf]  ;;  %v12644_v62 = vor.u32 %v14775_v28, %v12641_v30  ;;  %2052 = vst [vmem:[#allocation2 + $0x15c] sm:$0xf] %v12414_v51  ;;  %v1414_v28 = vshll.u32 %v12308_v15, 16 }
  0xce   : > { %v1393_v9 = vor.u32 %v1392_v56, %v1389_v55  ;;  %2051 = vst [vmem:[#allocation2 + $0x138] sm:$0xf] %v12413_v32  ;;  %v16193_v55 = vld [vmem:[#allocation2 + $0xe8] sm:$0xf]  ;;  %v16195_v56 = vld [vmem:[#allocation2 + $0x108] sm:$0xf0] }
  0xcf   : > { %v3887_v42 = vpop.f32.mrf.mxu0  ;;  %4227 = vmatmul.bf16.gmra.mxu3 %v12616_v41  ;;  %v3983_v57 = vpop.f32.mrf.mxu2  ;;  %v1864_v41 = vrot.slane %v12354_v27, 5  ;;  %v1403_v45 = vor.u32 %v1402_v34, %v1398_v10  ;;  %v12449_v61 = vld [vmem:[%s15704_s12 + $0x48] sm:$0xf]  ;;  %v12676_v21 = vor.u32 %v16195_v56, %v16193_v55  ;;  %v1411_v27 = vshrl.u32 %v12308_v15, 16  ;;  %v14974_v32 = vld [vmem:[%s18640_s1 + $0x18] sm:$0xff] }
  0xd0   : > { %v3888_v58 = vadd.f32 %v16099_v26, %v3887_v42  ;;  %v3984_v63 = vadd.f32 %v3983_v57, %v3935_v40  ;;  %v1394_v23 = vrot.slane %v1393_v9, 4  ;;  %v12393_v40 = vrot.slane %v12353_v24, 9  ;;  %v16187_v43 = vld [vmem:[#allocation2 + $0x114] sm:$0xf0]  ;;  %5392 = vmatpush.bf16.msra.mxu1 %v14974_v32  ;;  %v12356_v56 = vld [vmem:[%s15704_s12 + $0x48] sm:$0xe] }
  0xd1   : > { %v1867_v42 = vrot.slane %v12355_v36, 5  ;;  %v1866_v50 = vrot.slane %v1864_v41, 4  ;;  %v8825_v57 = vsel %vm15774_vm12, %v8820_v44, %v8824_v22  ;;  %v2220_v7 = vshrl.u32 %v12449_v61, 16  ;;  %v14894_v36 = vld [vmem:[%s18640_s1 + $0x218] sm:$0xff] }
  0xd2   : > { %v4032_v11 = vpop.f32.mrf.mxu3  ;;  %v3936_v12 = vpop.f32.mrf.mxu1  ;;  %v1399_v38 = vsel %vm15774_vm12, %v1394_v23, %v1398_v10  ;;  %v1865_v49 = vsel %vm15782_vm13, %v12393_v40, %v1864_v41  ;;  %8841 = vst [vmem:[#allocation2 + $0x118] sm:$0xf] %v8825_v57  ;;  %v2223_v8 = vshll.u32 %v12449_v61, 16  ;;  %v2229_v9 = vshll.u32 %v12450_v1, 16  ;;  %v12309_v23 = vld [vmem:[%s15704_s12 + $0x4c] sm:$0xf]  ;;  %4267 = vmatpush.bf16.msra.mxu0 %v14894_v36 }
  0xd3   : > { %v16177_v16 = vadd.f32 %v4032_v11, %v3984_v63  ;;  %v3937_v17 = vadd.f32 %v3936_v12, %v3888_v58  ;;  %1714 = vst [vmem:[#allocation2 + $0x130] sm:$0xf] %v1399_v38  ;;  %v1404_v58 = vrot.slane %v1403_v45, 4  ;;  %v12652_v63 = vor.u32 %v16181_v31, %v12649_v37  ;;  %v12310_v41 = vld [vmem:[%s15704_s12 + $0x50] sm:$0x1] }
  0xd4   : > { %1986 = vst [vmem:[#allocation2 + $0x134] sm:$0xf] %v1865_v49  ;;  %v1868_v0 = vsel %vm15782_vm13, %v1866_v50, %v1867_v42  ;;  %v2231_v19 = vrot.slane %v2229_v9, 5  ;;  %v2235_v22 = vrot.slane %v2233_v13, 4  ;;  %v1420_v30 = vshll.u32 %v12309_v23, 16 }
  0xd5   : > { %v1409_v6 = vsel %vm15774_vm12, %v1404_v58, %v1408_v46  ;;  %1987 = vst [vmem:[#allocation2 + $0x158] sm:$0xf] %v1868_v0  ;;  %v2241_v35 = vrot.slane %v2239_v14, 5  ;;  %v1424_v37 = vshrl.u32 %v12309_v23, 16  ;;  %v1413_v42 = vrot.slane %v1411_v27, 4 }
  0xd6   : > { %1715 = vst [vmem:[#allocation2 + $0x154] sm:$0xf] %v1409_v6  ;;  %v2236_v34 = vor.u32 %v2235_v22, %v2231_v19  ;;  %v1416_v44 = vrot.slane %v1414_v28, 5  ;;  %v16221_v45 = vld [vmem:[#allocation2 + $0xec] sm:$0xf]  ;;  %v1430_v49 = vshll.u32 %v12310_v41, 16 }
  0xd7   : > { %v3890_v18 = vpop.f32.mrf.mxu0  ;;  %v3985_v47 = vpop.f32.mrf.mxu2  ;;  %v12357_v57 = vld [vmem:[%s15704_s12 + $0x4c] sm:$0xf]  ;;  %v12358_v1 = vld [vmem:[%s15704_s12 + $0x50] sm:$0x1]  ;;  %v14785_v13 = vld [vmem:[#allocation2 + $0xf4] sm:$0xf] }
  0xd8   : > { %v3891_v48 = vadd.f32 %v16099_v26, %v3890_v18  ;;  %v3986_v52 = vadd.f32 %v3985_v47, %v3937_v17  ;;  %v2222_v17 = vrot.slane %v2220_v7, 4  ;;  %v2225_v18 = vrot.slane %v2223_v8, 5 }
  0xd9   : > { %v2237_v46 = vrot.slane %v2236_v34, 4  ;;  %v1422_v47 = vrot.slane %v1420_v30, 5  ;;  %v1417_v55 = vor.u32 %v1416_v44, %v1413_v42  ;;  %v1432_v6 = vrot.slane %v1430_v49, 5  ;;  %v12454_v30 = vld [vmem:[%s15704_s12 + $0x5c] sm:$0x1] }
  0xda   : > { %4085 = vmatmul.bf16.gmra.mxu0 %v12640_v4  ;;  %v4034_v3 = vpop.f32.mrf.mxu3  ;;  %v3939_v4 = vpop.f32.mrf.mxu1  ;;  %v2226_v24 = vor.u32 %v2225_v18, %v2222_v17  ;;  %v12394_v7 = vrot.slane %v12356_v56, 9  ;;  %v1871_v8 = vrot.slane %v12357_v57, 5  ;;  %v1874_v9 = vrot.slane %v12358_v1, 5  ;;  %v12416_v17 = vld [vmem:[%s15704_s12 + $0x58] sm:$0xf] }
  0xdb   : > { %v16207_v10 = vadd.f32 %v4034_v3, %v3986_v52  ;;  %v3940_v11 = vadd.f32 %v3939_v4, %v3891_v48  ;;  %v1426_v48 = vrot.slane %v1424_v37, 4  ;;  %v16223_v52 = vld [vmem:[#allocation2 + $0x10c] sm:$0xf0]  ;;  %v2242_v0 = vsel %vm15774_vm12, %v2237_v46, %v2241_v35  ;;  %v12415_v4 = vld [vmem:[%s15704_s12 + $0x54] sm:$0xf] }
  0xdc   : > { %4183 = vmatmul.bf16.gmra.mxu2 %v12648_v54  ;;  %v2227_v40 = vrot.slane %v2226_v24, 4  ;;  %2548 = vst [vmem:[#allocation2 + $0x160] sm:$0xf] %v2242_v0  ;;  %v1418_v2 = vrot.slane %v1417_v55, 4  ;;  %v12452_v18 = vld [vmem:[%s15704_s12 + $0x54] sm:$0xf]  ;;  %v1872_v22 = vsel %vm15782_vm13, %v12394_v7, %v1871_v8 }
  0xdd   : > { %4134 = vmatmul.bf16.gmra.mxu1 %v12644_v62  ;;  %v1427_v3 = vor.u32 %v1426_v48, %v1422_v47  ;;  %2053 = vst [vmem:[#allocation2 + $0x180] sm:$0xf] %v12415_v4  ;;  %v1873_v23 = vrot.slane %v1871_v8, 4  ;;  %v12453_v24 = vld [vmem:[%s15704_s12 + $0x58] sm:$0xf]  ;;  %v2244_v27 = vshrl.u32 %v12452_v18, 16 }
  0xde   : > { %v2232_v54 = vsel %vm15774_vm12, %v2227_v40, %v2231_v19  ;;  %v1423_v14 = vsel %vm15774_vm12, %v1418_v2, %v1422_v47  ;;  %1988 = vst [vmem:[#allocation2 + $0x17c] sm:$0xf] %v1872_v22  ;;  %v2257_v36 = vshrl.u32 %v12453_v24, 16  ;;  %v2263_v32 = vshll.u32 %v12454_v30, 16  ;;  %v12711_v57 = vld [vmem:[#allocation2 + $0x130] sm:$0xf] }
  0xdf   : > { %v3892_v12 = vpop.f32.mrf.mxu0  ;;  %4232 = vmatmul.bf16.gmra.mxu3 %v12652_v63  ;;  %v3988_v31 = vpop.f32.mrf.mxu2  ;;  %v12683_v63 = vld [vmem:[#allocation2 + $0xf0] sm:$0xf]  ;;  %2547 = vst [vmem:[#allocation2 + $0x13c] sm:$0xf] %v2232_v54  ;;  %v1428_v15 = vrot.slane %v1427_v3, 4  ;;  %v1875_v34 = vsel %vm15782_vm13, %v1873_v23, %v1874_v9  ;;  %v2246_v35 = vrot.slane %v2244_v27, 4 }
  0xe0   : > { %v3893_v33 = vadd.f32 %v16099_v26, %v3892_v12  ;;  %v3989_v38 = vadd.f32 %v3988_v31, %v3940_v11  ;;  %v12680_v11 = vor.u32 %v16221_v45, %v16223_v52  ;;  %v12684_v12 = vor.u32 %v16168_v5, %v12683_v63  ;;  %1716 = vst [vmem:[#allocation2 + $0x178] sm:$0xf] %v1423_v14  ;;  %v14893_v2 = vld [vmem:[%s18640_s1 + $0x210] sm:$0xff]  ;;  %v12313_v8 = vld [vmem:[%s15704_s12 + $0x5c] sm:$0x1] }
  0xe1   : > { %v1433_v28 = vsel %vm15774_vm12, %v1428_v15, %v1432_v6  ;;  %v2247_v31 = vshll.u32 %v12452_v18, 16  ;;  %1989 = vst [vmem:[#allocation2 + $0x1a0] sm:$0xf] %v1875_v34  ;;  %v12688_v45 = vor.u32 %v14785_v13, %v16187_v43  ;;  %v2259_v47 = vrot.slane %v2257_v36, 4  ;;  %v14973_v3 = vld [vmem:[%s18640_s1 + $0x10] sm:$0xff]  ;;  %4268 = vmatpush.bf16.msra.mxu0 %v14893_v2 }
  0xe2   : > { %v4037_v50 = vpop.f32.mrf.mxu3  ;;  %v3941_v51 = vpop.f32.mrf.mxu1  ;;  %1717 = vst [vmem:[#allocation2 + $0x19c] sm:$0xf] %v1433_v28  ;;  %v2265_v49 = vrot.slane %v2263_v32, 5  ;;  %5393 = vmatpush.bf16.msra.mxu1 %v14973_v3  ;;  %v1454_v15 = vshll.u32 %v12313_v8, 16  ;;  %v12455_v22 = vld [vmem:[%s15704_s12 + $0x60] sm:$0xf] }
  0xe3   : > { %v16229_v58 = vadd.f32 %v4037_v50, %v3989_v38  ;;  %v3942_v61 = vadd.f32 %v3941_v51, %v3893_v33  ;;  %v2253_v33 = vshll.u32 %v12453_v24, 16  ;;  %v2249_v40 = vrot.slane %v2247_v31, 5  ;;  %2054 = vst [vmem:[#allocation2 + $0x1a4] sm:$0xf] %v12416_v17  ;;  %v12311_v50 = vld [vmem:[%s15704_s12 + $0x54] sm:$0xf] }
  0xe4   : > { %v12312_v51 = vld [vmem:[%s15704_s12 + $0x58] sm:$0xf]  ;;  %v1435_v54 = vshrl.u32 %v12311_v50, 16  ;;  %v1438_v55 = vshll.u32 %v12311_v50, 16  ;;  %v14798_v28 = vld [vmem:[#allocation2 + $0x158] sm:$0xf0] }
  0xe5   : > { %v2255_v41 = vrot.slane %v2253_v33, 5  ;;  %v2250_v48 = vor.u32 %v2249_v40, %v2246_v35  ;;  %v1444_v56 = vshll.u32 %v12312_v51, 16  ;;  %v1448_v63 = vshrl.u32 %v12312_v51, 16  ;;  %v12360_v31 = vld [vmem:[%s15704_s12 + $0x58] sm:$0xf] }
  0xe6   : > { %v1437_v4 = vrot.slane %v1435_v54, 4  ;;  %v1440_v9 = vrot.slane %v1438_v55, 5  ;;  %v12361_v33 = vld [vmem:[%s15704_s12 + $0x5c] sm:$0x1]  ;;  %v12456_v34 = vld [vmem:[%s15704_s12 + $0x64] sm:$0xf] }
  0xe7   : > { %v3895_v62 = vpop.f32.mrf.mxu0  ;;  %v3990_v19 = vpop.f32.mrf.mxu2  ;;  %v2260_v52 = vor.u32 %v2259_v47, %v2255_v41  ;;  %v1450_v14 = vrot.slane %v1448_v63, 4  ;;  %v14793_v36 = vld [vmem:[#allocation2 + $0x134] sm:$0xf]  ;;  %v12713_v32 = vld [vmem:[#allocation2 + $0x154] sm:$0xf0]  ;;  %v1881_v47 = vrot.slane %v12361_v33, 5 }
  0xe8   : > { %v3991_v5 = vadd.f32 %v3990_v19, %v3942_v61  ;;  %v14797_v61 = vld [vmem:[#allocation2 + $0x150] sm:$0xf0]  ;;  %v1441_v19 = vor.u32 %v1440_v9, %v1437_v4  ;;  %v2271_v51 = vshll.u32 %v12455_v22, 16  ;;  %v2281_v54 = vshrl.u32 %v12456_v34, 16 }
  0xe9   : > { %v2261_v1 = vrot.slane %v2260_v52, 4  ;;  %v2277_v52 = vshll.u32 %v12456_v34, 16  ;;  %v12716_v4 = vor.u32 %v14793_v36, %v12713_v32  ;;  %v14806_v34 = vld [vmem:[#allocation2 + $0x198] sm:$0xf0]  ;;  %v14994_v32 = vld [vmem:[%s18640_s1 + $0xb8] sm:$0xff] }
  0xea   : > { %4090 = vmatmul.bf16.gmra.mxu0 %v12676_v21  ;;  %v3896_v21 = vadd.f32 %v16099_v26, %v3895_v62  ;;  %v4039_v37 = vpop.f32.mrf.mxu3  ;;  %v3944_v38 = vpop.f32.mrf.mxu1  ;;  %v2251_v62 = vrot.slane %v2250_v48, 4  ;;  %v12457_v48 = vld [vmem:[%s15704_s12 + $0x68] sm:$0x1]  ;;  %v2273_v2 = vrot.slane %v2271_v51, 5  ;;  %5486 = vmatpush.bf16.msra.mxu3 %v14994_v32  ;;  %v12458_v32 = vld [vmem:[%s15704_s12 + $0x6c] sm:$0xf] }
  0xeb   : > { %v16251_v42 = vadd.f32 %v4039_v37, %v3991_v5  ;;  %v2266_v13 = vsel %vm15774_vm12, %v2261_v1, %v2265_v49  ;;  %v12719_v5 = vld [vmem:[#allocation2 + $0x138] sm:$0xf]  ;;  %v1442_v37 = vrot.slane %v1441_v19, 4  ;;  %v2268_v49 = vshrl.u32 %v12455_v22, 16  ;;  %v12418_v1 = vld [vmem:[%s15704_s12 + $0x64] sm:$0xf] }
  0xec   : > { %v3945_v44 = vadd.f32 %v3944_v38, %v3896_v21  ;;  %4188 = vmatmul.bf16.gmra.mxu2 %v12684_v12  ;;  %v2256_v7 = vsel %vm15774_vm12, %v2251_v62, %v2255_v41  ;;  %v12712_v12 = vor.u32 %v14797_v61, %v12711_v57  ;;  %2550 = vst [vmem:[#allocation2 + $0x1a8] sm:$0xf] %v2266_v13  ;;  %v12359_v21 = vld [vmem:[%s15704_s12 + $0x54] sm:$0xe]  ;;  %v1456_v38 = vrot.slane %v1454_v15, 5 }
  0xed   : > { %4139 = vmatmul.bf16.gmra.mxu1 %v12680_v11  ;;  %v1446_v11 = vrot.slane %v1444_v56, 5  ;;  %2549 = vst [vmem:[#allocation2 + $0x184] sm:$0xf] %v2256_v7  ;;  %v12395_v40 = vrot.slane %v12359_v21, 9  ;;  %v12417_v41 = vld [vmem:[%s15704_s12 + $0x60] sm:$0xf] }
  0xee   : > { %2055 = vst [vmem:[#allocation2 + $0x1c8] sm:$0xf] %v12417_v41  ;;  %v12721_v56 = vld [vmem:[#allocation2 + $0x15c] sm:$0xf0]  ;;  %v2270_v63 = vrot.slane %v2268_v49, 4  ;;  %v2279_v3 = vrot.slane %v2277_v52, 5 }
  0xef   : > { %v3897_v46 = vpop.f32.mrf.mxu0  ;;  %4237 = vmatmul.bf16.gmra.mxu3 %v12688_v45  ;;  %v3993_v43 = vpop.f32.mrf.mxu2  ;;  %v1451_v30 = vor.u32 %v1450_v14, %v1446_v11  ;;  %v1447_v50 = vsel %vm15774_vm12, %v1442_v37, %v1446_v11  ;;  %v2283_v7 = vrot.slane %v2281_v54, 4  ;;  %v2287_v8 = vshll.u32 %v12457_v48, 16  ;;  %2056 = vst [vmem:[#allocation2 + $0x1ec] sm:$0xf] %v12418_v1  ;;  %v12314_v21 = vld [vmem:[%s15704_s12 + $0x60] sm:$0xf] }
  0xf0   : > { %v3898_v0 = vadd.f32 %v16099_v26, %v3897_v46  ;;  %v3994_v6 = vadd.f32 %v3993_v43, %v3945_v44  ;;  %v14794_v44 = vld [vmem:[#allocation2 + $0x13c] sm:$0xf]  ;;  %v1878_v46 = vrot.slane %v12360_v31, 5  ;;  %1718 = vst [vmem:[#allocation2 + $0x1c0] sm:$0xf] %v1447_v50  ;;  %v2274_v13 = vor.u32 %v2273_v2, %v2270_v63  ;;  %v14984_v2 = vld [vmem:[%s18640_s1 + $0x68] sm:$0xff] }
  0xf1   : > { %v1452_v45 = vrot.slane %v1451_v30, 4  ;;  %v2289_v19 = vrot.slane %v2287_v8, 5  ;;  %v12316_v48 = vld [vmem:[%s15704_s12 + $0x68] sm:$0x1]  ;;  %v14807_v1 = vld [vmem:[#allocation2 + $0x1a0] sm:$0xf0] }
  0xf2   : > { %v4042_v17 = vpop.f32.mrf.mxu3  ;;  %v3946_v18 = vpop.f32.mrf.mxu1  ;;  %v1879_v61 = vsel %vm15782_vm13, %v12395_v40, %v1878_v46  ;;  %v1880_v62 = vrot.slane %v1878_v46, 4  ;;  %v2275_v22 = vrot.slane %v2274_v13, 4  ;;  %v14972_v46 = vld [vmem:[%s18640_s1 + $0x8] sm:$0xff]  ;;  %v1478_v52 = vshll.u32 %v12316_v48, 16 }
  0xf3   : > { %v16270_v23 = vadd.f32 %v4042_v17, %v3994_v6  ;;  %v3947_v24 = vadd.f32 %v3946_v18, %v3898_v0  ;;  %v1457_v57 = vsel %vm15774_vm12, %v1452_v45, %v1456_v38  ;;  %v12720_v0 = vor.u32 %v14798_v28, %v12719_v5  ;;  %1990 = vst [vmem:[#allocation2 + $0x1c4] sm:$0xf] %v1879_v61  ;;  %v12747_v28 = vld [vmem:[#allocation2 + $0x178] sm:$0xf]  ;;  %v14892_v45 = vld [vmem:[%s18640_s1 + $0x208] sm:$0xff] }
  0xf4   : > { %1719 = vst [vmem:[#allocation2 + $0x1e4] sm:$0xf] %v1457_v57  ;;  %v1882_v6 = vsel %vm15782_vm13, %v1880_v62, %v1881_v47  ;;  %v2284_v18 = vor.u32 %v2283_v7, %v2279_v3  ;;  %v1462_v5 = vshll.u32 %v12314_v21, 16  ;;  %v2280_v36 = vsel %vm15774_vm12, %v2275_v22, %v2279_v3  ;;  %4269 = vmatpush.bf16.msra.mxu0 %v14892_v45  ;;  %v14993_v57 = vld [vmem:[%s18640_s1 + $0xb0] sm:$0xff]  ;;  %v14992_v3 = vld [vmem:[%s18640_s1 + $0xa8] sm:$0xff] }
  0xf5   : > { %1991 = vst [vmem:[#allocation2 + $0x1e8] sm:$0xf] %v1882_v6  ;;  %v12748_v50 = vor.u32 %v14806_v34, %v12747_v28  ;;  %5394 = vmatpush.bf16.msra.mxu1 %v14972_v46  ;;  %v12362_v6 = vld [vmem:[%s15704_s12 + $0x60] sm:$0xe]  ;;  %v14802_v7 = vld [vmem:[#allocation2 + $0x17c] sm:$0xf]  ;;  %5487 = vmatpush.bf16.msra.mxu3 %v14993_v57 }
  0xf6   : > { %v2285_v30 = vrot.slane %v2284_v18, 4  ;;  %v1464_v38 = vrot.slane %v1462_v5, 5  ;;  %2551 = vst [vmem:[#allocation2 + $0x1cc] sm:$0xf] %v2280_v36  ;;  %v12749_v8 = vld [vmem:[#allocation2 + $0x19c] sm:$0xf0] }
  0xf7   : > { %v3900_v27 = vpop.f32.mrf.mxu0  ;;  %v3995_v55 = vpop.f32.mrf.mxu2  ;;  %v12364_v13 = vld [vmem:[%s15704_s12 + $0x68] sm:$0x1]  ;;  %v12757_v22 = vld [vmem:[#allocation2 + $0x1a4] sm:$0xf0]  ;;  %v2295_v45 = vshll.u32 %v12458_v32, 16 }
  0xf8   : > { %v3901_v35 = vadd.f32 %v16099_v26, %v3900_v27  ;;  %v3996_v43 = vadd.f32 %v3995_v55, %v3947_v24  ;;  %v12315_v24 = vld [vmem:[%s15704_s12 + $0x64] sm:$0xf]  ;;  %v1459_v27 = vshrl.u32 %v12314_v21, 16  ;;  %v14803_v21 = vld [vmem:[#allocation2 + $0x184] sm:$0xf] }
  0xf9   : > { %v1468_v31 = vshll.u32 %v12315_v24, 16  ;;  %v1472_v33 = vshrl.u32 %v12315_v24, 16  ;;  %v12419_v24 = vld [vmem:[%s15704_s12 + $0x6c] sm:$0xf]  ;;  %v16329_v5 = vld [vmem:[#allocation6] ss:$0 sm:$0xff]  ;;  %5488 = vmatpush.bf16.msra.mxu3 %v14992_v3  ;;  %v12760_v48 = vor.u32 %v14803_v21, %v12757_v22 }
  0xfa   : > { %4095 = vmatmul.bf16.gmra.mxu0 %v12712_v12  ;;  %v4044_v9 = vpop.f32.mrf.mxu3  ;;  %v3949_v11 = vpop.f32.mrf.mxu1  ;;  %v12724_v12 = vor.u32 %v14794_v44, %v12721_v56  ;;  %v1461_v37 = vrot.slane %v1459_v27, 4  ;;  %v2290_v44 = vsel %vm15774_vm12, %v2285_v30, %v2289_v19  ;;  %v14985_v56 = vld [vmem:[%s18640_s1 + $0x70] sm:$0xff]  ;;  %v1888_v19 = vrot.slane %v12364_v13, 5  ;;  %2057 = vst [vmem:[#allocation2 + $0x210] sm:$0xf] %v12419_v24 }
  0xfb   : > { %v16287_v14 = vadd.f32 %v4044_v9, %v3996_v43  ;;  %v3950_v15 = vadd.f32 %v3949_v11, %v3901_v35  ;;  %v14986_v35 = vld [vmem:[%s18640_s1 + $0x78] sm:$0xff]  ;;  %2552 = vst [vmem:[#allocation2 + $0x1f0] sm:$0xf] %v2290_v44  ;;  %v1474_v51 = vrot.slane %v1472_v33, 4  ;;  %v1480_v11 = vrot.slane %v1478_v52, 5 }
  0xfc   : > { %4193 = vmatmul.bf16.gmra.mxu2 %v12720_v0  ;;  %v1465_v49 = vor.u32 %v1464_v38, %v1461_v37  ;;  %v12755_v0 = vld [vmem:[#allocation2 + $0x180] sm:$0xf]  ;;  %v12420_v34 = vld [vmem:[%s15704_s12 + $0x70] sm:$0xf]  ;;  %v12752_v38 = vor.u32 %v14802_v7, %v12749_v8  ;;  %v2292_v44 = vshrl.u32 %v12458_v32, 16  ;;  %v2297_v57 = vrot.slane %v2295_v45, 5 }
  0xfd   : > { %4144 = vmatmul.bf16.gmra.mxu1 %v12716_v4  ;;  %5437 = vmatpush.bf16.msra.mxu2 %v14986_v35  ;;  %v12756_v35 = vor.u32 %v14807_v1, %v12755_v0  ;;  %v12459_v37 = vld [vmem:[%s15704_s12 + $0x70] sm:$0xf]  ;;  %2058 = vst [vmem:[#allocation2 + $0x234] sm:$0xf] %v12420_v34  ;;  %v12783_v1 = vld [vmem:[#allocation2 + $0x1c0] sm:$0xf] }
  0xfe   : > { %v1466_v61 = vrot.slane %v1465_v49, 4  ;;  %v14983_v49 = vld [vmem:[%s18640_s1 + $0x60] sm:$0xff]  ;;  %v14815_v7 = vld [vmem:[#allocation2 + $0x1e0] sm:$0xf0]  ;;  %v12486_v34 = vld [vmem:[%s15704_s12 + $0x1c] sm:$0xf] }
  0xff   : > { %v3902_v17 = vpop.f32.mrf.mxu0  ;;  %4242 = vmatmul.bf16.gmra.mxu3 %v12724_v12  ;;  %v3998_v40 = vpop.f32.mrf.mxu2  ;;  %v12363_v12 = vld [vmem:[%s15704_s12 + $0x64] sm:$0xf]  ;;  %vm10652_vm11 = vsmask.f32 3336 }
 0x100   : > { %v3903_v41 = vadd.f32 %v16099_v26, %v3902_v17  ;;  %v3999_v47 = vadd.f32 %v3998_v40, %v3950_v15  ;;  %v1470_v26 = vrot.slane %v1468_v31, 5  ;;  %v12396_v15 = vrot.slane %v12362_v6, 9  ;;  %v16352_v3 = vld [vmem:[%s15704_s12 + $0x64] sm:$0xf] }
 0x101   : > { %5438 = vmatpush.bf16.msra.mxu2 %v14985_v56  ;;  %v1885_v18 = vrot.slane %v12363_v12, 5  ;;  %v2294_v56 = vrot.slane %v2292_v44, 4  ;;  %v14990_v12 = vld [vmem:[%s18640_s1 + $0x98] sm:$0xff] }
 0x102   : > { %v4047_v54 = vpop.f32.mrf.mxu3  ;;  %v3951_v55 = vpop.f32.mrf.mxu1  ;;  %v1475_v4 = vor.u32 %v1474_v51, %v1470_v26  ;;  %v1471_v9 = vsel %vm15774_vm12, %v1466_v61, %v1470_v26  ;;  %v2301_v26 = vshll.u32 %v12459_v37, 16  ;;  %v2305_v51 = vshrl.u32 %v12459_v37, 16  ;;  %v427_v61 = vld [vmem:[%s15704_s12 + $0x60] sm:$0xf] }
 0x103   : > { %v16315_v62 = vadd.f32 %v4047_v54, %v3999_v47  ;;  %v3952_v63 = vadd.f32 %v3951_v55, %v3903_v41  ;;  %1720 = vst [vmem:[#allocation2 + $0x208] sm:$0xf] %v1471_v9  ;;  %v1886_v31 = vsel %vm15782_vm13, %v12396_v15, %v1885_v18  ;;  %v1887_v33 = vrot.slane %v1885_v18, 4  ;;  %v12460_v41 = vld [vmem:[%s15704_s12 + $0x74] sm:$0x1]  ;;  %v14891_v18 = vld [vmem:[%s18640_s1 + $0x200] sm:$0xff] }
 0x104   : > { %v1476_v17 = vrot.slane %v1475_v4, 4  ;;  %1992 = vst [vmem:[#allocation2 + $0x20c] sm:$0xf] %v1886_v31  ;;  %v2311_v0 = vshll.u32 %v12460_v41, 16  ;;  %v647_v4 = vshrl.u32 %v427_v61, 16  ;;  %v650_v6 = vshll.u32 %v427_v61, 16  ;;  %4270 = vmatpush.bf16.msra.mxu0 %v14891_v18 }
 0x105   : > { %5439 = vmatpush.bf16.msra.mxu2 %v14984_v2  ;;  %v1889_v40 = vsel %vm15782_vm13, %v1887_v33, %v1888_v19  ;;  %v2298_v2 = vor.u32 %v2297_v57, %v2294_v56  ;;  %v14971_v19 = vld [vmem:[%s18640_s1] sm:$0xff]  ;;  %v12485_v33 = vld [vmem:[%s15704_s12 + $0x18] sm:$0xe] }
 0x106   : > { %v1481_v30 = vsel %vm15774_vm12, %v1476_v17, %v1480_v11  ;;  %1993 = vst [vmem:[#allocation2 + $0x230] sm:$0xf] %v1889_v40  ;;  %v2313_v9 = vrot.slane %v2311_v0, 5  ;;  %v14982_v11 = vld [vmem:[%s18640_s1 + $0x58] sm:$0xff]  ;;  %v649_v21 = vrot.slane %v647_v4, 4  ;;  %5395 = vmatpush.bf16.msra.mxu1 %v14971_v19  ;;  %v14989_v40 = vld [vmem:[%s18640_s1 + $0x90] sm:$0xff] }
 0x107   : > { %v3905_v43 = vpop.f32.mrf.mxu0  ;;  %v4000_v27 = vpop.f32.mrf.mxu2  ;;  %1721 = vst [vmem:[#allocation2 + $0x22c] sm:$0xf] %v1481_v30  ;;  %v2299_v17 = vrot.slane %v2298_v2, 4  ;;  %v12784_v30 = vor.u32 %v14815_v7, %v12783_v1  ;;  %v355_v57 = vld [vmem:[%s15704_s12 + $0x60] sm:$0xf]  ;;  %v660_v7 = vshrl.u32 %v16352_v3, 16 }
 0x108   : > { %v3906_v28 = vadd.f32 %v16329_v5, %v3905_v43  ;;  %v4001_v36 = vadd.f32 %v4000_v27, %v3952_v63  ;;  %v2303_v63 = vrot.slane %v2301_v26, 5  ;;  %v2307_v43 = vrot.slane %v2305_v51, 4  ;;  %v14811_v51 = vld [vmem:[#allocation2 + $0x1c4] sm:$0xf]  ;;  %v356_v61 = vld [vmem:[%s15704_s12 + $0x64] sm:$0xf] }
 0x109   : > { %5440 = vmatpush.bf16.msra.mxu2 %v14983_v49  ;;  %v652_v27 = vrot.slane %v650_v6, 5  ;;  %v14980_v49 = vld [vmem:[%s18640_s1 + $0x48] sm:$0xff]  ;;  %v12533_v26 = vrot.slane %v12485_v33, 9  ;;  %387 = vst [vmem:[#allocation2 + $0x240] sm:$0xf] %v355_v57  ;;  %v14987_v33 = vld [vmem:[%s18640_s1 + $0x80] sm:$0xff] }
 0x10a   : > { %4100 = vmatmul.bf16.gmra.mxu0 %v12748_v50  ;;  %v4049_v46 = vpop.f32.mrf.mxu3  ;;  %v3954_v47 = vpop.f32.mrf.mxu1  ;;  %v14991_v50 = vld [vmem:[%s18640_s1 + $0xa0] sm:$0xff]  ;;  %v2308_v8 = vor.u32 %v2307_v43, %v2303_v63  ;;  %v2304_v31 = vsel %vm15774_vm12, %v2299_v17, %v2303_v63  ;;  %v429_v63 = vld [vmem:[%s15704_s12 + $0x68] sm:$0x1]  ;;  %v14812_v1 = vld [vmem:[#allocation2 + $0x1cc] sm:$0xf] }
 0x10b   : > { %v16348_v52 = vadd.f32 %v4049_v46, %v4001_v36  ;;  %v3955_v54 = vadd.f32 %v3954_v47, %v3906_v28  ;;  %5489 = vmatpush.bf16.msra.mxu3 %v14991_v50  ;;  %v656_v28 = vshll.u32 %v16352_v3, 16  ;;  %v12487_v36 = vld [vmem:[%s15704_s12 + $0x20] sm:$0x1]  ;;  %2553 = vst [vmem:[#allocation2 + $0x214] sm:$0xf] %v2304_v31  ;;  %v653_v41 = vor.u32 %v652_v27, %v649_v21  ;;  %v14988_v50 = vld [vmem:[%s18640_s1 + $0x88] sm:$0xff] }
 0x10c   : > { %4198 = vmatmul.bf16.gmra.mxu2 %v12756_v35  ;;  %v2309_v24 = vrot.slane %v2308_v8, 4  ;;  %v12791_v47 = vld [vmem:[#allocation2 + $0x1c8] sm:$0xf]  ;;  %v2672_v56 = vrot.slane %v12487_v36, 5  ;;  %v12793_v2 = vld [vmem:[#allocation2 + $0x1ec] sm:$0xf0] }
 0x10d   : > { %4149 = vmatmul.bf16.gmra.mxu1 %v12752_v38  ;;  %5441 = vmatpush.bf16.msra.mxu2 %v14982_v11  ;;  %v14981_v38 = vld [vmem:[%s18640_s1 + $0x50] sm:$0xff]  ;;  %v654_v43 = vrot.slane %v653_v41, 4  ;;  %v658_v0 = vrot.slane %v656_v28, 5  ;;  %388 = vst [vmem:[#allocation2 + $0x264] sm:$0xf] %v356_v61  ;;  %v666_v8 = vshll.u32 %v429_v63, 16 }
 0x10e   : > { %v2314_v37 = vsel %vm15774_vm12, %v2309_v24, %v2313_v9  ;;  %v662_v21 = vrot.slane %v660_v7, 4  ;;  %v14979_v31 = vld [vmem:[%s18640_s1 + $0x40] sm:$0xff]  ;;  %v15002_v63 = vld [vmem:[%s18640_s1 + $0xf8] sm:$0xff]  ;;  %v12490_v7 = vld [vmem:[%s15704_s12 + $0x2c] sm:$0x1] }
 0x10f   : > { %v3907_v55 = vpop.f32.mrf.mxu0  ;;  %4247 = vmatmul.bf16.gmra.mxu3 %v12760_v48  ;;  %v4003_v13 = vpop.f32.mrf.mxu2  ;;  %v14816_v48 = vld [vmem:[#allocation2 + $0x1e8] sm:$0xf0]  ;;  %2554 = vst [vmem:[#allocation2 + $0x238] sm:$0xf] %v2314_v37  ;;  %v668_v36 = vrot.slane %v666_v8, 5  ;;  %5535 = vmatpush.bf16.msrb.mxu0 %v15002_v63 }
 0x110   : > { %v3908_v15 = vadd.f32 %v16329_v5, %v3907_v55  ;;  %v4004_v22 = vadd.f32 %v4003_v13, %v3955_v54  ;;  %5490 = vmatpush.bf16.msra.mxu3 %v14990_v12  ;;  %v12785_v54 = vld [vmem:[#allocation2 + $0x1e4] sm:$0xf0]  ;;  %v2669_v55 = vrot.slane %v12486_v34, 5  ;;  %v659_v12 = vsel %vm15774_vm12, %v654_v43, %v658_v0  ;;  %v926_v13 = vld [vmem:[%s15704_s12 + $0x60] sm:$0xe]  ;;  %v15010_v43 = vld [vmem:[%s18640_s1 + $0x138] sm:$0xff] }
 0x111   : > { %5442 = vmatpush.bf16.msra.mxu2 %v14981_v38  ;;  %v12792_v18 = vor.u32 %v14816_v48, %v12791_v47  ;;  %886 = vst [vmem:[#allocation2 + $0x244] sm:$0xf] %v659_v12  ;;  %v12788_v3 = vor.u32 %v14811_v51, %v12785_v54  ;;  %v12253_v24 = vrot.slane %v926_v13, 9  ;;  %v663_v34 = vor.u32 %v662_v21, %v658_v0 }
 0x112   : > { %v4052_v35 = vpop.f32.mrf.mxu3  ;;  %v3956_v32 = vpop.f32.mrf.mxu1  ;;  %v2670_v4 = vsel %vm15782_vm13, %v12533_v26, %v2669_v55  ;;  %v2671_v6 = vrot.slane %v2669_v55, 4  ;;  %v12796_v38 = vor.u32 %v14812_v1, %v12793_v2  ;;  %v14824_v26 = vld [vmem:[#allocation2 + $0x228] sm:$0xf0]  ;;  %v12489_v2 = vld [vmem:[%s15704_s12 + $0x28] sm:$0xf]  ;;  %5584 = vmatpush.bf16.msrb.mxu1 %v15010_v43 }
 0x113   : > { %v16381_v44 = vadd.f32 %v4052_v35, %v4004_v22  ;;  %v3957_v45 = vadd.f32 %v3956_v32, %v3908_v15  ;;  %2811 = vst [vmem:[#allocation2 + $0x20] sm:$0xf] %v2670_v4  ;;  %v927_v15 = vld [vmem:[%s15704_s12 + $0x64] sm:$0xf]  ;;  %v928_v22 = vld [vmem:[%s15704_s12 + $0x68] sm:$0x1] }
 0x114   : > { %5491 = vmatpush.bf16.msra.mxu3 %v14989_v40  ;;  %v2673_v19 = vsel %vm15782_vm13, %v2671_v6, %v2672_v56  ;;  %v1059_v27 = vrot.slane %v927_v15, 5  ;;  %v1062_v35 = vrot.slane %v928_v22, 5  ;;  %v664_v47 = vrot.slane %v663_v34, 4  ;;  %v12488_v6 = vld [vmem:[%s15704_s12 + $0x24] sm:$0xe] }
 0x115   : > { %5443 = vmatpush.bf16.msra.mxu2 %v14980_v49  ;;  %2812 = vst [vmem:[#allocation2 + $0x44] sm:$0xf] %v2673_v19  ;;  %v2676_v8 = vrot.slane %v12489_v2, 5  ;;  %v12534_v13 = vrot.slane %v12488_v6, 9  ;;  %v2679_v15 = vrot.slane %v12490_v7, 5 }
 0x116   : > { %v1060_v41 = vsel %vm15782_vm13, %v12253_v24, %v1059_v27  ;;  %v1061_v48 = vrot.slane %v1059_v27, 4  ;;  %v669_v51 = vsel %vm15774_vm12, %v664_v47, %v668_v36  ;;  %v12827_v24 = vld [vmem:[#allocation2 + $0x210] sm:$0xf]  ;;  %v14825_v27 = vld [vmem:[#allocation2 + $0x230] sm:$0xf0] }
 0x117   : > { %v3910_v46 = vpop.f32.mrf.mxu0  ;;  %v4005_v9 = vpop.f32.mrf.mxu2  ;;  %1161 = vst [vmem:[#allocation2 + $0x248] sm:$0xf] %v1060_v41  ;;  %v2677_v34 = vsel %vm15782_vm13, %v12534_v13, %v2676_v8  ;;  %v357_v36 = vld [vmem:[%s15704_s12 + $0x6c] sm:$0xf]  ;;  %v358_v41 = vld [vmem:[%s15704_s12 + $0x70] sm:$0xf] }
 0x118   : > { %v3911_v11 = vadd.f32 %v16329_v5, %v3910_v46  ;;  %v4006_v17 = vadd.f32 %v4005_v9, %v3957_v45  ;;  %5492 = vmatpush.bf16.msra.mxu3 %v14988_v50  ;;  %v430_v45 = vld [vmem:[%s15704_s12 + $0x6c] sm:$0xf]  ;;  %v431_v46 = vld [vmem:[%s15704_s12 + $0x70] sm:$0xf]  ;;  %v1063_v54 = vsel %vm15782_vm13, %v1061_v48, %v1062_v35  ;;  %887 = vst [vmem:[#allocation2 + $0x268] sm:$0xf] %v669_v51 }
 0x119   : > { %5444 = vmatpush.bf16.msra.mxu2 %v14979_v31  ;;  %v671_v49 = vshrl.u32 %v430_v45, 16  ;;  %v12819_v50 = vld [vmem:[#allocation2 + $0x208] sm:$0xf]  ;;  %v674_v55 = vshll.u32 %v430_v45, 16  ;;  %v680_v56 = vshll.u32 %v431_v46, 16  ;;  %v684_v0 = vshrl.u32 %v431_v46, 16 }
 0x11a   : > { %4105 = vmatmul.bf16.gmra.mxu0 %v12784_v30  ;;  %v4054_v28 = vpop.f32.mrf.mxu3  ;;  %v3959_v30 = vpop.f32.mrf.mxu1  ;;  %1162 = vst [vmem:[#allocation2 + $0x26c] sm:$0xf] %v1063_v54  ;;  %v12820_v4 = vor.u32 %v14824_v26, %v12819_v50  ;;  %v14820_v31 = vld [vmem:[#allocation2 + $0x20c] sm:$0xf]  ;;  %v930_v46 = vld [vmem:[%s15704_s12 + $0x70] sm:$0xf] }
 0x11b   : > { %v16409_v32 = vadd.f32 %v4054_v28, %v4006_v17  ;;  %v3960_v37 = vadd.f32 %v3959_v30, %v3911_v11  ;;  %v673_v9 = vrot.slane %v671_v49, 4  ;;  %v432_v17 = vld [vmem:[%s15704_s12 + $0x74] sm:$0x1]  ;;  %v682_v19 = vrot.slane %v680_v56, 5  ;;  %2813 = vst [vmem:[#allocation2 + $0x68] sm:$0xf] %v2677_v34 }
 0x11c   : > { %4203 = vmatmul.bf16.gmra.mxu2 %v12792_v18  ;;  %5493 = vmatpush.bf16.msra.mxu3 %v14987_v33  ;;  %v676_v18 = vrot.slane %v674_v55, 5  ;;  %v2678_v28 = vrot.slane %v2676_v8, 4  ;;  %v686_v30 = vrot.slane %v684_v0, 4  ;;  %v12821_v33 = vld [vmem:[#allocation2 + $0x22c] sm:$0xf0]  ;;  %v1066_v43 = vrot.slane %v930_v46, 5 }
 0x11d   : > { %4154 = vmatmul.bf16.gmra.mxu1 %v12788_v3  ;;  %v931_v49 = vld [vmem:[%s15704_s12 + $0x74] sm:$0x1]  ;;  %v14821_v51 = vld [vmem:[#allocation2 + $0x214] sm:$0xf]  ;;  %389 = vst [vmem:[#allocation2 + $0x288] sm:$0xf] %v357_v36  ;;  %v12824_v0 = vor.u32 %v14820_v31, %v12821_v33 }
 0x11e   : > { %v677_v35 = vor.u32 %v676_v18, %v673_v9  ;;  %v687_v45 = vor.u32 %v686_v30, %v682_v19  ;;  %390 = vst [vmem:[#allocation2 + $0x2ac] sm:$0xf] %v358_v41  ;;  %v1069_v2 = vrot.slane %v931_v49, 5  ;;  %v1068_v8 = vrot.slane %v1066_v43, 4  ;;  %v15001_v36 = vld [vmem:[%s18640_s1 + $0xf0] sm:$0xff] }
 0x11f   : > { %v3912_v40 = vpop.f32.mrf.mxu0  ;;  %4252 = vmatmul.bf16.gmra.mxu3 %v12796_v38  ;;  %v4008_v57 = vpop.f32.mrf.mxu2  ;;  %v929_v38 = vld [vmem:[%s15704_s12 + $0x6c] sm:$0xe]  ;;  %v12492_v41 = vld [vmem:[%s15704_s12 + $0x34] sm:$0xf]  ;;  %5536 = vmatpush.bf16.msrb.mxu0 %v15001_v36 }
 0x120   : > { %v3913_v61 = vadd.f32 %v16329_v5, %v3912_v40  ;;  %v4009_v1 = vadd.f32 %v4008_v57, %v3960_v37  ;;  %v690_v37 = vshll.u32 %v432_v17, 16  ;;  %v2680_v40 = vsel %vm15782_vm13, %v2678_v28, %v2679_v15  ;;  %v433_v15 = vld [vmem:[%s15704_s12 + $0x78] sm:$0xf]  ;;  %v434_v17 = vld [vmem:[%s15704_s12 + $0x7c] sm:$0xf] }
 0x121   : > { %2814 = vst [vmem:[#allocation2 + $0x8c] sm:$0xf] %v2680_v40  ;;  %v678_v47 = vrot.slane %v677_v35, 4  ;;  %v688_v54 = vrot.slane %v687_v45, 4  ;;  %v12254_v55 = vrot.slane %v929_v38, 9  ;;  %v12828_v57 = vor.u32 %v14825_v27, %v12827_v24  ;;  %v15009_v35 = vld [vmem:[%s18640_s1 + $0x130] sm:$0xff] }
 0x122   : > { %v4057_v11 = vpop.f32.mrf.mxu3  ;;  %v3961_v12 = vpop.f32.mrf.mxu1  ;;  %v692_v48 = vrot.slane %v690_v37, 5  ;;  %v1070_v18 = vsel %vm15782_vm13, %v1068_v8, %v1069_v2  ;;  %v708_v24 = vshrl.u32 %v434_v17, 16  ;;  %v12583_v27 = vld [vmem:[#allocation2 + $0x20] sm:$0xf]  ;;  %v14763_v28 = vld [vmem:[#allocation2 + $0x40] sm:$0xf0]  ;;  %5585 = vmatpush.bf16.msrb.mxu1 %v15009_v35 }
 0x123   : > { %v16430_v21 = vadd.f32 %v4057_v11, %v4009_v1  ;;  %v3962_v22 = vadd.f32 %v3961_v12, %v3913_v61  ;;  %v12829_v61 = vld [vmem:[#allocation2 + $0x234] sm:$0xf0]  ;;  %v683_v63 = vsel %vm15774_vm12, %v678_v47, %v682_v19  ;;  %v1067_v7 = vsel %vm15782_vm13, %v12254_v55, %v1066_v43  ;;  %1164 = vst [vmem:[#allocation2 + $0x2b4] sm:$0xf] %v1070_v18  ;;  %v12491_v47 = vld [vmem:[%s15704_s12 + $0x30] sm:$0xe] }
 0x124   : > { %v693_v1 = vsel %vm15774_vm12, %v688_v54, %v692_v48  ;;  %888 = vst [vmem:[#allocation2 + $0x28c] sm:$0xf] %v683_v63  ;;  %v12832_v12 = vor.u32 %v14821_v51, %v12829_v61  ;;  %v695_v19 = vshrl.u32 %v433_v15, 16  ;;  %v710_v38 = vrot.slane %v708_v24, 4  ;;  %v435_v48 = vld [vmem:[%s15704_s12 + $0x80] sm:$0x1] }
 0x125   : > { %889 = vst [vmem:[#allocation2 + $0x2b0] sm:$0xf] %v693_v1  ;;  %v12584_v46 = vor.u32 %v14763_v28, %v12583_v27  ;;  %v14899_v51 = vld [vmem:[#allocation2 + $0x244] sm:$0xf]  ;;  %v12535_v54 = vrot.slane %v12491_v47, 9  ;;  %v2683_v55 = vrot.slane %v12492_v41, 5 }
 0x126   : > { %1163 = vst [vmem:[#allocation2 + $0x290] sm:$0xf] %v1067_v7  ;;  %v697_v30 = vrot.slane %v695_v19, 4  ;;  %v932_v1 = vld [vmem:[%s15704_s12 + $0x78] sm:$0xe] }
 0x127   : > { %v3915_v3 = vpop.f32.mrf.mxu0  ;;  %v4010_v50 = vpop.f32.mrf.mxu2  ;;  %v933_v2 = vld [vmem:[%s15704_s12 + $0x7c] sm:$0xf]  ;;  %v14903_v7 = vld [vmem:[#allocation2 + $0x260] sm:$0xf0]  ;;  %v13129_v8 = vld [vmem:[#allocation2 + $0x264] sm:$0xf0] }
 0x128   : > { %v3916_v26 = vadd.f32 %v16329_v5, %v3915_v3  ;;  %v4011_v56 = vadd.f32 %v4010_v50, %v3962_v22  ;;  %v698_v22 = vshll.u32 %v433_v15, 16  ;;  %v704_v3 = vshll.u32 %v434_v17, 16  ;;  %v360_v17 = vld [vmem:[%s15704_s12 + $0x7c] sm:$0xf]  ;;  %v934_v19 = vld [vmem:[%s15704_s12 + $0x80] sm:$0x1] }
 0x129   : > { %v714_v15 = vshll.u32 %v435_v48, 16  ;;  %v1073_v24 = vrot.slane %v933_v2, 5  ;;  %v13132_v28 = vor.u32 %v14899_v51, %v13129_v8  ;;  %392 = vst [vmem:[#allocation2 + $0x2f4] sm:$0xf] %v360_v17  ;;  %v15008_v2 = vld [vmem:[%s18640_s1 + $0x128] sm:$0xff] }
 0x12a   : > { %4110 = vmatmul.bf16.gmra.mxu0 %v12820_v4  ;;  %v4059_v4 = vpop.f32.mrf.mxu3  ;;  %v3964_v6 = vpop.f32.mrf.mxu1  ;;  %v700_v31 = vrot.slane %v698_v22, 5  ;;  %v706_v37 = vrot.slane %v704_v3, 5  ;;  %v12255_v3 = vrot.slane %v932_v1, 9  ;;  %v12495_v8 = vld [vmem:[%s15704_s12 + $0x40] sm:$0xf]  ;;  %5586 = vmatpush.bf16.msrb.mxu1 %v15008_v2 }
 0x12b   : > { %v16448_v9 = vadd.f32 %v4059_v4, %v4011_v56  ;;  %v3965_v11 = vadd.f32 %v3964_v6, %v3916_v26  ;;  %v13127_v6 = vld [vmem:[#allocation2 + $0x240] sm:$0xf] }
 0x12c   : > { %4208 = vmatmul.bf16.gmra.mxu2 %v12828_v57  ;;  %v701_v45 = vor.u32 %v700_v31, %v697_v30  ;;  %v711_v49 = vor.u32 %v710_v38, %v706_v37  ;;  %v13135_v30 = vld [vmem:[#allocation2 + $0x248] sm:$0xf]  ;;  %v1076_v31 = vrot.slane %v934_v19, 5  ;;  %v1074_v35 = vsel %vm15782_vm13, %v12255_v3, %v1073_v24 }
 0x12d   : > { %4159 = vmatmul.bf16.gmra.mxu1 %v12824_v0  ;;  %v13128_v38 = vor.u32 %v14903_v7, %v13127_v6  ;;  %1165 = vst [vmem:[#allocation2 + $0x2d8] sm:$0xf] %v1074_v35  ;;  %v13163_v35 = vld [vmem:[#allocation2 + $0x288] sm:$0xf] }
 0x12e   : > { %v702_v43 = vrot.slane %v701_v45, 4  ;;  %v712_v0 = vrot.slane %v711_v49, 4  ;;  %v436_v49 = vld [vmem:[%s15704_s12 + $0x84] sm:$0xf] }
 0x12f   : > { %v3917_v13 = vpop.f32.mrf.mxu0  ;;  %4257 = vmatmul.bf16.gmra.mxu3 %v12832_v12  ;;  %v4013_v33 = vpop.f32.mrf.mxu2  ;;  %v2685_v12 = vrot.slane %v2683_v55, 4  ;;  %v719_v51 = vshrl.u32 %v436_v49, 16 }
 0x130   : > { %v3918_v34 = vadd.f32 %v16329_v5, %v3917_v13  ;;  %v4014_v40 = vadd.f32 %v4013_v33, %v3965_v11  ;;  %v12493_v5 = vld [vmem:[%s15704_s12 + $0x38] sm:$0x1]  ;;  %v2684_v11 = vsel %vm15782_vm13, %v12535_v54, %v2683_v55  ;;  %v707_v18 = vsel %vm15774_vm12, %v702_v43, %v706_v37 }
 0x131   : > { %v2686_v56 = vrot.slane %v12493_v5, 5  ;;  %v359_v13 = vld [vmem:[%s15704_s12 + $0x78] sm:$0xf]  ;;  %2815 = vst [vmem:[#allocation2 + $0xb0] sm:$0xf] %v2684_v11  ;;  %v1075_v37 = vrot.slane %v1073_v24, 4 }
 0x132   : > { %v4062_v50 = vpop.f32.mrf.mxu3  ;;  %v3966_v26 = vpop.f32.mrf.mxu1  ;;  %391 = vst [vmem:[#allocation2 + $0x2d0] sm:$0xf] %v359_v13  ;;  %v722_v54 = vshll.u32 %v436_v49, 16  ;;  %v721_v43 = vrot.slane %v719_v51, 4  ;;  %v12494_v13 = vld [vmem:[%s15704_s12 + $0x3c] sm:$0xe] }
 0x133   : > { %v16465_v57 = vadd.f32 %v4062_v50, %v4014_v40  ;;  %v3967_v61 = vadd.f32 %v3966_v26, %v3918_v34  ;;  %v2687_v22 = vsel %vm15782_vm13, %v2685_v12, %v2686_v56  ;;  %v14904_v34 = vld [vmem:[#allocation2 + $0x268] sm:$0xf0]  ;;  %890 = vst [vmem:[#allocation2 + $0x2d4] sm:$0xf] %v707_v18  ;;  %v1077_v45 = vsel %vm15782_vm13, %v1075_v37, %v1076_v31  ;;  %v437_v50 = vld [vmem:[%s15704_s12 + $0x88] sm:$0xf] }
 0x134   : > { %2816 = vst [vmem:[#allocation2 + $0xd4] sm:$0xf] %v2687_v22  ;;  %v13136_v5 = vor.u32 %v14904_v34, %v13135_v30  ;;  %v728_v55 = vshll.u32 %v437_v50, 16  ;;  %v732_v56 = vshrl.u32 %v437_v50, 16  ;;  %v12536_v22 = vrot.slane %v12494_v13, 9 }
 0x135   : > { %1166 = vst [vmem:[#allocation2 + $0x2fc] sm:$0xf] %v1077_v45  ;;  %v438_v24 = vld [vmem:[%s15704_s12 + $0x8c] sm:$0x1]  ;;  %v14908_v30 = vld [vmem:[#allocation2 + $0x28c] sm:$0xf] }
 0x136   : > { %v734_v6 = vrot.slane %v732_v56, 4  ;;  %v13165_v31 = vld [vmem:[#allocation2 + $0x2ac] sm:$0xf0]  ;;  %v935_v34 = vld [vmem:[%s15704_s12 + $0x84] sm:$0xe] }
 0x137   : > { %v4076_v63 = vpop.f32.mrf.mxu0  ;;  %v4015_v27 = vpop.f32.mrf.mxu2  ;;  %v14912_v37 = vld [vmem:[#allocation2 + $0x2a8] sm:$0xf0]  ;;  %v362_v45 = vld [vmem:[%s15704_s12 + $0x88] sm:$0xf]  ;;  %v12256_v49 = vrot.slane %v935_v34, 9 }
 0x138   : > { %v4077_v4 = vadd.f32 %v4076_v63, %v16143_v59  ;;  %v716_v59 = vrot.slane %v714_v15, 5  ;;  %v4016_v33 = vadd.f32 %v4015_v27, %v3967_v61  ;;  %v12619_v61 = vld [vmem:[#allocation2 + $0x68] sm:$0xf]  ;;  %v14772_v63 = vld [vmem:[#allocation2 + $0x88] sm:$0xf0]  ;;  %v13164_v2 = vor.u32 %v14912_v37, %v13163_v35 }
 0x139   : > { %v12620_v12 = vor.u32 %v14772_v63, %v12619_v61  ;;  %v12496_v15 = vld [vmem:[%s15704_s12 + $0x44] sm:$0x1]  ;;  %v937_v51 = vld [vmem:[%s15704_s12 + $0x8c] sm:$0x1]  ;;  %v13171_v56 = vld [vmem:[#allocation2 + $0x290] sm:$0xf] }
 0x13a   : > { %4271 = vmatmul.bf16.vlgmr.msra.gmra.mxu0 %v12584_v46  ;;  %v717_v36 = vsel %vm15774_vm12, %v712_v0, %v716_v59  ;;  %v4064_v40 = vpop.f32.mrf.mxu3  ;;  %v4125_v41 = vpop.f32.mrf.mxu1  ;;  %v724_v0 = vrot.slane %v722_v54, 5  ;;  %v2690_v59 = vrot.slane %v12495_v8, 5  ;;  %v2693_v3 = vrot.slane %v12496_v15, 5  ;;  %394 = vst [vmem:[#allocation2 + $0x33c] sm:$0xf] %v362_v45 }
 0x13b   : > { %891 = vst [vmem:[#allocation2 + $0x2f8] sm:$0xf] %v717_v36  ;;  %v16485_v46 = vadd.f32 %v4064_v40, %v4016_v33  ;;  %v4126_v47 = vadd.f32 %v4125_v41, %v4077_v4  ;;  %v730_v4 = vrot.slane %v728_v55, 5  ;;  %v361_v41 = vld [vmem:[%s15704_s12 + $0x84] sm:$0xf]  ;;  %v1083_v63 = vrot.slane %v937_v51, 5 }
 0x13c   : > { %5445 = vmatmul.bf16.vlgmr.msra.gmra.mxu2 %v13132_v28  ;;  %v725_v11 = vor.u32 %v724_v0, %v721_v43  ;;  %v2692_v40 = vrot.slane %v2690_v59, 4  ;;  %393 = vst [vmem:[#allocation2 + $0x318] sm:$0xf] %v361_v41  ;;  %v13168_v43 = vor.u32 %v14908_v30, %v13165_v31  ;;  %v14913_v0 = vld [vmem:[#allocation2 + $0x2b0] sm:$0xf0] }
 0x13d   : > { %5396 = vmatmul.bf16.vlgmr.msra.gmra.mxu1 %v13128_v38  ;;  %v735_v17 = vor.u32 %v734_v6, %v730_v4  ;;  %v2691_v38 = vsel %vm15782_vm13, %v12536_v22, %v2690_v59  ;;  %v8856_v15 = vld [vmem:[#allocation4 + $0x48] sm:$0xe]  ;;  %v12497_v45 = vld [vmem:[%s15704_s12 + $0x48] sm:$0xe] }
 0x13e   : > { %v726_v33 = vrot.slane %v725_v11, 4  ;;  %2817 = vst [vmem:[#allocation2 + $0xf8] sm:$0xf] %v2691_v38  ;;  %v2694_v50 = vsel %vm15782_vm13, %v2692_v40, %v2693_v3  ;;  %v13916_v22 = vrot.slane %v8856_v15, 9  ;;  %v12655_v3 = vld [vmem:[#allocation2 + $0xb0] sm:$0xf] }
 0x13f   : > { %v4078_v48 = vpop.f32.mrf.mxu0  ;;  %5494 = vmatmul.bf16.vlgmr.msra.gmra.mxu3 %v13136_v5  ;;  %v4174_v1 = vpop.f32.mrf.mxu2  ;;  %v738_v5 = vshll.u32 %v438_v24, 16  ;;  %2818 = vst [vmem:[#allocation2 + $0x11c] sm:$0xf] %v2694_v50  ;;  %v439_v24 = vld [vmem:[%s15704_s12 + $0x90] sm:$0xf]  ;;  %v12537_v50 = vrot.slane %v12497_v45, 9 }
 0x140   : > { %v16490_v26 = vadd.f32 %v4078_v48, %v16159_v39  ;;  %v15000_v39 = vld [vmem:[%s18640_s1 + $0xe8] sm:$0xff]  ;;  %v4175_v7 = vadd.f32 %v4174_v1, %v4126_v47  ;;  %v736_v47 = vrot.slane %v735_v17, 4  ;;  %v8857_v17 = vld [vmem:[#allocation4 + $0x4c] sm:$0x1]  ;;  %v743_v35 = vshrl.u32 %v439_v24, 16 }
 0x141   : > { %5537 = vmatpush.bf16.msrb.mxu0 %v15000_v39  ;;  %v936_v48 = vld [vmem:[%s15704_s12 + $0x88] sm:$0xf]  ;;  %v740_v61 = vrot.slane %v738_v5, 5  ;;  %v8904_v59 = vrot.slane %v8857_v17, 5  ;;  %v746_v37 = vshll.u32 %v439_v24, 16 }
 0x142   : > { %v4223_v18 = vpop.f32.mrf.mxu3  ;;  %v16501_v19 = vpop.f32.mrf.mxu1  ;;  %v1080_v54 = vrot.slane %v936_v48, 5  ;;  %v12498_v40 = vld [vmem:[%s15704_s12 + $0x4c] sm:$0xf]  ;;  %v364_v15 = vld [vmem:[%s15704_s12 + $0x94] sm:$0xf] }
 0x143   : > { %v16504_v27 = vadd.f32 %v4223_v18, %v4175_v7  ;;  %v741_v6 = vsel %vm15774_vm12, %v736_v47, %v740_v61  ;;  %v8905_v31 = vsel %vm15782_vm13, %v13916_v22, %v8904_v59  ;;  %v12499_v47 = vld [vmem:[%s15704_s12 + $0x50] sm:$0x1]  ;;  %v939_v24 = vld [vmem:[%s15704_s12 + $0x94] sm:$0xf]  ;;  %396 = vst [vmem:[#allocation2 + $0x384] sm:$0xf] %v364_v15 }
 0x144   : > { %v1081_v1 = vsel %vm15782_vm13, %v12256_v49, %v1080_v54  ;;  %v1082_v39 = vrot.slane %v1080_v54, 4  ;;  %893 = vst [vmem:[#allocation2 + $0x340] sm:$0xf] %v741_v6  ;;  %v2700_v51 = vrot.slane %v12499_v47, 5  ;;  %v441_v54 = vld [vmem:[%s15704_s12 + $0x98] sm:$0x1] }
 0x145   : > { %1167 = vst [vmem:[#allocation2 + $0x320] sm:$0xf] %v1081_v1  ;;  %v745_v1 = vrot.slane %v743_v35, 4  ;;  %v762_v59 = vshll.u32 %v441_v54, 16 }
 0x146   : > { %v1084_v8 = vsel %vm15782_vm13, %v1082_v39, %v1083_v63  ;;  %v16530_v30 = vld [vmem:[#allocation2 + $0x118] sm:$0xf0]  ;;  %v748_v39 = vrot.slane %v746_v37, 5 }
 0x147   : > { %v4081_v28 = vpop.f32.mrf.mxu0  ;;  %v16518_v55 = vpop.f32.mrf.mxu2  ;;  %1168 = vst [vmem:[#allocation2 + $0x344] sm:$0xf] %v1084_v8  ;;  %v14921_v8 = vld [vmem:[#allocation2 + $0x2f0] sm:$0xf0] }
 0x148   : > { %v4082_v36 = vadd.f32 %v4081_v28, %v16177_v16  ;;  %v731_v16 = vsel %vm15774_vm12, %v726_v33, %v730_v4  ;;  %v14781_v28 = vld [vmem:[#allocation2 + $0xd0] sm:$0xf0]  ;;  %v440_v33 = vld [vmem:[%s15704_s12 + $0x94] sm:$0xf]  ;;  %8921 = vst [vmem:[#allocation2 + $0x11c] sm:$0xf] %v8905_v31  ;;  %v749_v17 = vor.u32 %v748_v39, %v745_v1 }
 0x149   : > { %892 = vst [vmem:[#allocation2 + $0x31c] sm:$0xf] %v731_v16  ;;  %v12656_v41 = vor.u32 %v14781_v28, %v12655_v3  ;;  %v752_v5 = vshll.u32 %v440_v33, 16  ;;  %v2697_v16 = vrot.slane %v12498_v40, 5  ;;  %v756_v22 = vshrl.u32 %v440_v33, 16 }
 0x14a   : > { %4276 = vmatmul.bf16.gmra.mxu0 %v12620_v12  ;;  %v16524_v4 = vpop.f32.mrf.mxu3  ;;  %v4130_v7 = vpop.f32.mrf.mxu1  ;;  %v13172_v12 = vor.u32 %v14913_v0, %v13171_v56  ;;  %v13201_v0 = vld [vmem:[#allocation2 + $0x2f4] sm:$0xf0]  ;;  %v940_v28 = vld [vmem:[%s15704_s12 + $0x98] sm:$0x1]  ;;  %v1087_v40 = vrot.slane %v939_v24, 5 }
 0x14b   : > { %v4131_v11 = vadd.f32 %v4130_v7, %v4082_v36  ;;  %v15007_v36 = vld [vmem:[%s18640_s1 + $0x120] sm:$0xff]  ;;  %v13199_v7 = vld [vmem:[#allocation2 + $0x2d0] sm:$0xf] }
 0x14c   : > { %5450 = vmatmul.bf16.gmra.mxu2 %v13168_v43  ;;  %5587 = vmatpush.bf16.msrb.mxu1 %v15007_v36  ;;  %v14917_v43 = vld [vmem:[#allocation2 + $0x2d4] sm:$0xf]  ;;  %v13207_v3 = vld [vmem:[#allocation2 + $0x2d8] sm:$0xf]  ;;  %v13200_v33 = vor.u32 %v14921_v8, %v13199_v7  ;;  %v12501_v24 = vld [vmem:[%s15704_s12 + $0x58] sm:$0xf] }
 0x14d   : > { %5401 = vmatmul.bf16.gmra.mxu1 %v13164_v2  ;;  %v938_v2 = vld [vmem:[%s15704_s12 + $0x90] sm:$0xe]  ;;  %v13204_v37 = vor.u32 %v14917_v43, %v13201_v0  ;;  %v442_v0 = vld [vmem:[%s15704_s12 + $0x9c] sm:$0xf] }
 0x14e   : > { %v12257_v36 = vrot.slane %v938_v2, 9  ;;  %v443_v2 = vld [vmem:[%s15704_s12 + $0xa0] sm:$0xf]  ;;  %v767_v7 = vshrl.u32 %v442_v0, 16  ;;  %v770_v8 = vshll.u32 %v442_v0, 16 }
 0x14f   : > { %v4083_v13 = vpop.f32.mrf.mxu0  ;;  %5499 = vmatmul.bf16.gmra.mxu3 %v13172_v12  ;;  %v4179_v34 = vpop.f32.mrf.mxu2  ;;  %v2699_v12 = vrot.slane %v2697_v16, 4 }
 0x150   : > { %v4084_v18 = vadd.f32 %v4083_v13, %v16207_v10  ;;  %v14999_v10 = vld [vmem:[%s18640_s1 + $0xe0] sm:$0xff]  ;;  %v4180_v38 = vadd.f32 %v4179_v34, %v4131_v11  ;;  %v2698_v11 = vsel %vm15782_vm13, %v12537_v50, %v2697_v16  ;;  %v363_v13 = vld [vmem:[%s15704_s12 + $0x90] sm:$0xf]  ;;  %v750_v34 = vrot.slane %v749_v17, 4 }
 0x151   : > { %5538 = vmatpush.bf16.msrb.mxu0 %v14999_v10  ;;  %2819 = vst [vmem:[#allocation2 + $0x140] sm:$0xf] %v2698_v11  ;;  %v758_v10 = vrot.slane %v756_v22, 4  ;;  %v1088_v50 = vsel %vm15782_vm13, %v12257_v36, %v1087_v40  ;;  %v1089_v16 = vrot.slane %v1087_v40, 4  ;;  %v776_v11 = vshll.u32 %v443_v2, 16  ;;  %v15006_v22 = vld [vmem:[%s18640_s1 + $0x118] sm:$0xff] }
 0x152   : > { %v4228_v48 = vpop.f32.mrf.mxu3  ;;  %v4132_v49 = vpop.f32.mrf.mxu1  ;;  %395 = vst [vmem:[#allocation2 + $0x360] sm:$0xf] %v363_v13  ;;  %v12691_v13 = vld [vmem:[#allocation2 + $0xf8] sm:$0xf]  ;;  %v772_v15 = vrot.slane %v770_v8, 5  ;;  %5588 = vmatpush.bf16.msrb.mxu1 %v15006_v22 }
 0x153   : > { %v16545_v56 = vadd.f32 %v4228_v48, %v4180_v38  ;;  %v4133_v61 = vadd.f32 %v4132_v49, %v4084_v18  ;;  %v754_v18 = vrot.slane %v752_v5, 5  ;;  %v14922_v38 = vld [vmem:[#allocation2 + $0x2f8] sm:$0xf0]  ;;  %v764_v5 = vrot.slane %v762_v59, 5  ;;  %1169 = vst [vmem:[#allocation2 + $0x368] sm:$0xf] %v1088_v50 }
 0x154   : > { %v778_v59 = vrot.slane %v776_v11, 5  ;;  %v12502_v36 = vld [vmem:[%s15704_s12 + $0x5c] sm:$0x1]  ;;  %v942_v50 = vld [vmem:[%s15704_s12 + $0xa0] sm:$0xf] }
 0x155   : > { %v755_v45 = vsel %vm15774_vm12, %v750_v34, %v754_v18  ;;  %v759_v47 = vor.u32 %v758_v10, %v754_v18  ;;  %v14998_v18 = vld [vmem:[%s18640_s1 + $0xd8] sm:$0xff]  ;;  %v12692_v34 = vor.u32 %v16530_v30, %v12691_v13  ;;  %v12500_v10 = vld [vmem:[%s15704_s12 + $0x54] sm:$0xe]  ;;  %v14930_v8 = vld [vmem:[#allocation2 + $0x338] sm:$0xf0] }
 0x156   : > { %894 = vst [vmem:[#allocation2 + $0x364] sm:$0xf] %v755_v45  ;;  %5539 = vmatpush.bf16.msrb.mxu0 %v14998_v18  ;;  %v12538_v40 = vrot.slane %v12500_v10, 9  ;;  %v13243_v18 = vld [vmem:[#allocation2 + $0x320] sm:$0xf] }
 0x157   : > { %v4086_v63 = vpop.f32.mrf.mxu0  ;;  %v4181_v31 = vpop.f32.mrf.mxu2  ;;  %v760_v43 = vrot.slane %v759_v47, 4  ;;  %v14931_v22 = vld [vmem:[#allocation2 + $0x340] sm:$0xf0] }
 0x158   : > { %v4087_v6 = vadd.f32 %v4086_v63, %v16229_v58  ;;  %v2701_v58 = vsel %vm15782_vm13, %v2699_v12, %v2700_v51  ;;  %v4182_v35 = vadd.f32 %v4181_v31, %v4133_v61  ;;  %v13208_v61 = vor.u32 %v14922_v38, %v13207_v3 }
 0x159   : > { %2820 = vst [vmem:[#allocation2 + $0x164] sm:$0xf] %v2701_v58  ;;  %v780_v12 = vshrl.u32 %v443_v2, 16  ;;  %v13237_v2 = vld [vmem:[#allocation2 + $0x33c] sm:$0xf0]  ;;  %v13244_v10 = vor.u32 %v14931_v22, %v13243_v18 }
 0x15a   : > { %4281 = vmatmul.bf16.gmra.mxu0 %v12656_v41  ;;  %v1090_v41 = vrot.slane %v940_v28, 5  ;;  %v4230_v48 = vpop.f32.mrf.mxu3  ;;  %v4135_v49 = vpop.f32.mrf.mxu1  ;;  %v444_v28 = vld [vmem:[%s15704_s12 + $0xa4] sm:$0x1]  ;;  %v447_v18 = vld [vmem:[%s15704_s12 + $0xb0] sm:$0x1] }
 0x15b   : > { %v16561_v51 = vadd.f32 %v4230_v48, %v4182_v35  ;;  %v4136_v54 = vadd.f32 %v4135_v49, %v4087_v6  ;;  %v765_v6 = vsel %vm15774_vm12, %v760_v43, %v764_v5  ;;  %v782_v3 = vrot.slane %v780_v12, 4  ;;  %v14926_v5 = vld [vmem:[#allocation2 + $0x31c] sm:$0xf]  ;;  %v941_v49 = vld [vmem:[%s15704_s12 + $0x9c] sm:$0xe] }
 0x15c   : > { %5455 = vmatmul.bf16.gmra.mxu2 %v13204_v37  ;;  %v1091_v39 = vsel %vm15782_vm13, %v1089_v16, %v1090_v41  ;;  %895 = vst [vmem:[#allocation2 + $0x388] sm:$0xf] %v765_v6  ;;  %v2704_v41 = vrot.slane %v12501_v24, 5  ;;  %v786_v48 = vshll.u32 %v444_v28, 16  ;;  %v365_v43 = vld [vmem:[%s15704_s12 + $0x9c] sm:$0xf] }
 0x15d   : > { %5406 = vmatmul.bf16.gmra.mxu1 %v13200_v33  ;;  %1170 = vst [vmem:[#allocation2 + $0x38c] sm:$0xf] %v1091_v39  ;;  %v783_v35 = vor.u32 %v782_v3, %v778_v59  ;;  %v2707_v33 = vrot.slane %v12502_v36, 5  ;;  %v943_v39 = vld [vmem:[%s15704_s12 + $0xa4] sm:$0x1]  ;;  %v12258_v12 = vrot.slane %v941_v49, 9 }
 0x15e   : > { %397 = vst [vmem:[#allocation2 + $0x3a8] sm:$0xf] %v365_v43  ;;  %v788_v11 = vrot.slane %v786_v48, 5  ;;  %v12727_v48 = vld [vmem:[#allocation2 + $0x140] sm:$0xf] }
 0x15f   : > { %v4088_v63 = vpop.f32.mrf.mxu0  ;;  %5504 = vmatmul.bf16.gmra.mxu3 %v13208_v61  ;;  %v4184_v17 = vpop.f32.mrf.mxu2  ;;  %v2705_v61 = vsel %vm15782_vm13, %v12538_v40, %v2704_v41  ;;  %v784_v0 = vrot.slane %v783_v35, 4  ;;  %v446_v40 = vld [vmem:[%s15704_s12 + $0xac] sm:$0xf] }
 0x160   : > { %v16565_v1 = vadd.f32 %v4088_v63, %v16251_v42  ;;  %v769_v42 = vrot.slane %v767_v7, 4  ;;  %v4185_v58 = vadd.f32 %v4184_v17, %v4136_v54  ;;  %v13235_v54 = vld [vmem:[#allocation2 + $0x318] sm:$0xf]  ;;  %v2706_v63 = vrot.slane %v2704_v41, 4  ;;  %2821 = vst [vmem:[#allocation2 + $0x188] sm:$0xf] %v2705_v61 }
 0x161   : > { %v366_v7 = vld [vmem:[%s15704_s12 + $0xa0] sm:$0xf]  ;;  %v13240_v17 = vor.u32 %v14926_v5, %v13237_v2  ;;  %v789_v3 = vsel %vm15774_vm12, %v784_v0, %v788_v11  ;;  %v804_v5 = vshrl.u32 %v446_v40, 16  ;;  %v14799_v49 = vld [vmem:[#allocation2 + $0x160] sm:$0xf0]  ;;  %v14997_v61 = vld [vmem:[%s18640_s1 + $0xd0] sm:$0xff] }
 0x162   : > { %v773_v31 = vor.u32 %v772_v15, %v769_v42  ;;  %v4233_v37 = vpop.f32.mrf.mxu3  ;;  %v16583_v38 = vpop.f32.mrf.mxu1  ;;  %v2708_v6 = vsel %vm15782_vm13, %v2706_v63, %v2707_v33  ;;  %v1094_v42 = vrot.slane %v942_v50, 5  ;;  %v1097_v15 = vrot.slane %v943_v39, 5  ;;  %398 = vst [vmem:[#allocation2 + $0x3cc] sm:$0xf] %v366_v7  ;;  %v12504_v39 = vld [vmem:[%s15704_s12 + $0x64] sm:$0xf]  ;;  %5540 = vmatpush.bf16.msrb.mxu0 %v14997_v61 }
 0x163   : > { %v16585_v47 = vadd.f32 %v4233_v37, %v4185_v58  ;;  %2822 = vst [vmem:[#allocation2 + $0x1ac] sm:$0xf] %v2708_v6  ;;  %v13236_v58 = vor.u32 %v14930_v8, %v13235_v54  ;;  %v445_v37 = vld [vmem:[%s15704_s12 + $0xa8] sm:$0xf]  ;;  %v806_v43 = vrot.slane %v804_v5, 4  ;;  %v12728_v7 = vor.u32 %v14799_v49, %v12727_v48 }
 0x164   : > { %v774_v45 = vrot.slane %v773_v31, 4  ;;  %v1096_v24 = vrot.slane %v1094_v42, 4  ;;  %897 = vst [vmem:[#allocation2 + $0x3d0] sm:$0xf] %v789_v3  ;;  %v791_v33 = vshrl.u32 %v445_v37, 16 }
 0x165   : > { %v12503_v8 = vld [vmem:[%s15704_s12 + $0x60] sm:$0xe]  ;;  %v12505_v6 = vld [vmem:[%s15704_s12 + $0x68] sm:$0x1]  ;;  %v945_v5 = vld [vmem:[%s15704_s12 + $0xac] sm:$0xf] }
 0x166   : > { %v1098_v35 = vsel %vm15782_vm13, %v1096_v24, %v1097_v15  ;;  %v793_v50 = vrot.slane %v791_v33, 4  ;;  %v2711_v15 = vrot.slane %v12504_v39, 5  ;;  %v13273_v24 = vld [vmem:[#allocation2 + $0x384] sm:$0xf0]  ;;  %v367_v33 = vld [vmem:[%s15704_s12 + $0xa8] sm:$0xf] }
 0x167   : > { %v4091_v30 = vpop.f32.mrf.mxu0  ;;  %v16599_v13 = vpop.f32.mrf.mxu2  ;;  %1172 = vst [vmem:[#allocation2 + $0x3d4] sm:$0xf] %v1098_v35  ;;  %v14939_v35 = vld [vmem:[#allocation2 + $0x380] sm:$0xf0]  ;;  %v13279_v61 = vld [vmem:[#allocation2 + $0x368] sm:$0xf] }
 0x168   : > { %v4092_v16 = vadd.f32 %v4091_v30, %v16270_v23  ;;  %v779_v23 = vsel %vm15774_vm12, %v774_v45, %v778_v59  ;;  %v1095_v59 = vsel %vm15782_vm13, %v12258_v12, %v1094_v42  ;;  %v794_v45 = vshll.u32 %v445_v37, 16  ;;  %399 = vst [vmem:[#allocation2 + $0x3f0] sm:$0xf] %v367_v33 }
 0x169   : > { %896 = vst [vmem:[#allocation2 + $0x3ac] sm:$0xf] %v779_v23  ;;  %v800_v30 = vshll.u32 %v446_v40, 16  ;;  %v12539_v42 = vrot.slane %v12503_v8, 9  ;;  %v2713_v40 = vrot.slane %v2711_v15, 4 }
 0x16a   : > { %4286 = vmatmul.bf16.gmra.mxu0 %v12692_v34  ;;  %v16605_v28 = vpop.f32.mrf.mxu3  ;;  %v4140_v31 = vpop.f32.mrf.mxu1  ;;  %1171 = vst [vmem:[#allocation2 + $0x3b0] sm:$0xf] %v1095_v59  ;;  %v14935_v59 = vld [vmem:[#allocation2 + $0x364] sm:$0xf] }
 0x16b   : > { %v4141_v34 = vadd.f32 %v4140_v31, %v4092_v16  ;;  %v796_v16 = vrot.slane %v794_v45, 5  ;;  %v802_v63 = vrot.slane %v800_v30, 5  ;;  %v2712_v37 = vsel %vm15782_vm13, %v12539_v42, %v2711_v15  ;;  %v368_v45 = vld [vmem:[%s15704_s12 + $0xac] sm:$0xf] }
 0x16c   : > { %5460 = vmatmul.bf16.gmra.mxu2 %v13240_v17  ;;  %v2714_v17 = vrot.slane %v12505_v6, 5  ;;  %2823 = vst [vmem:[#allocation2 + $0x1d0] sm:$0xf] %v2712_v37  ;;  %v13276_v39 = vor.u32 %v14935_v59, %v13273_v24  ;;  %v14808_v37 = vld [vmem:[#allocation2 + $0x1a8] sm:$0xf0] }
 0x16d   : > { %5411 = vmatmul.bf16.gmra.mxu1 %v13236_v58  ;;  %v797_v2 = vor.u32 %v796_v16, %v793_v50  ;;  %v807_v23 = vor.u32 %v806_v43, %v802_v63  ;;  %v946_v50 = vld [vmem:[%s15704_s12 + $0xb0] sm:$0x1]  ;;  %v1101_v16 = vrot.slane %v945_v5, 5  ;;  %400 = vst [vmem:[#allocation2 + $0x414] sm:$0xf] %v368_v45 }
 0x16e   : > { %v2715_v49 = vsel %vm15782_vm13, %v2713_v40, %v2714_v17  ;;  %v1104_v43 = vrot.slane %v946_v50, 5  ;;  %v15026_v40 = vld [vmem:[%s18640_s1 + $0x1b8] sm:$0xff] }
 0x16f   : > { %v4093_v36 = vpop.f32.mrf.mxu0  ;;  %5509 = vmatmul.bf16.gmra.mxu3 %v13244_v10  ;;  %v4189_v54 = vpop.f32.mrf.mxu2  ;;  %v798_v31 = vrot.slane %v797_v2, 4  ;;  %v808_v30 = vrot.slane %v807_v23, 4  ;;  %2824 = vst [vmem:[#allocation2 + $0x1f4] sm:$0xf] %v2715_v49  ;;  %v14940_v2 = vld [vmem:[#allocation2 + $0x388] sm:$0xf0] }
 0x170   : > { %v4094_v41 = vadd.f32 %v4093_v36, %v16287_v14  ;;  %v15005_v14 = vld [vmem:[%s18640_s1 + $0x110] sm:$0xff]  ;;  %v4190_v0 = vadd.f32 %v4189_v54, %v4141_v34  ;;  %v944_v34 = vld [vmem:[%s15704_s12 + $0xa8] sm:$0xe]  ;;  %v1103_v8 = vrot.slane %v1101_v16, 4  ;;  %v13280_v17 = vor.u32 %v14940_v2, %v13279_v61  ;;  %5682 = vmatpush.bf16.msrb.mxu3 %v15026_v40 }
 0x171   : > { %5589 = vmatpush.bf16.msrb.mxu1 %v15005_v14  ;;  %v13271_v36 = vld [vmem:[#allocation2 + $0x360] sm:$0xf]  ;;  %v12259_v48 = vrot.slane %v944_v34, 9  ;;  %v12763_v34 = vld [vmem:[#allocation2 + $0x188] sm:$0xf] }
 0x172   : > { %v4238_v11 = vpop.f32.mrf.mxu3  ;;  %v4142_v12 = vpop.f32.mrf.mxu1  ;;  %v13272_v6 = vor.u32 %v14939_v35, %v13271_v36  ;;  %v12508_v61 = vld [vmem:[%s15704_s12 + $0x74] sm:$0x1]  ;;  %v947_v40 = vld [vmem:[%s15704_s12 + $0xb4] sm:$0xe] }
 0x173   : > { %v16622_v22 = vadd.f32 %v4238_v11, %v4190_v0  ;;  %v4143_v3 = vadd.f32 %v4142_v12, %v4094_v41  ;;  %v810_v41 = vshll.u32 %v447_v18, 16  ;;  %v1105_v12 = vsel %vm15782_vm13, %v1103_v8, %v1104_v43  ;;  %v15025_v2 = vld [vmem:[%s18640_s1 + $0x1b0] sm:$0xff] }
 0x174   : > { %1174 = vst [vmem:[#allocation2 + $0x41c] sm:$0xf] %v1105_v12  ;;  %v14944_v12 = vld [vmem:[#allocation2 + $0x3ac] sm:$0xf]  ;;  %5683 = vmatpush.bf16.msrb.mxu3 %v15025_v2 }
 0x175   : > { %v812_v14 = vrot.slane %v810_v41, 5  ;;  %v15004_v41 = vld [vmem:[%s18640_s1 + $0x108] sm:$0xff] }
 0x176   : > { %5590 = vmatpush.bf16.msrb.mxu1 %v15004_v41 }
 0x177   : > { %v4096_v58 = vpop.f32.mrf.mxu0  ;;  %v4191_v54 = vpop.f32.mrf.mxu2 }
 0x178   : > { %v4097_v10 = vadd.f32 %v4096_v58, %v16315_v62  ;;  %v803_v62 = vsel %vm15774_vm12, %v798_v31, %v802_v63  ;;  %v4192_v0 = vadd.f32 %v4191_v54, %v4143_v3  ;;  %v813_v63 = vsel %vm15774_vm12, %v808_v30, %v812_v14  ;;  %v448_v3 = vld [vmem:[%s15704_s12 + $0xb4] sm:$0xf]  ;;  %v449_v58 = vld [vmem:[%s15704_s12 + $0xb8] sm:$0xf]  ;;  %v14996_v30 = vld [vmem:[%s18640_s1 + $0xc8] sm:$0xff] }
 0x179   : > { %898 = vst [vmem:[#allocation2 + $0x3f4] sm:$0xf] %v803_v62  ;;  %v815_v24 = vshrl.u32 %v448_v3, 16  ;;  %v818_v31 = vshll.u32 %v448_v3, 16  ;;  %v824_v36 = vshll.u32 %v449_v58, 16  ;;  %v828_v35 = vshrl.u32 %v449_v58, 16  ;;  %5541 = vmatpush.bf16.msrb.mxu0 %v14996_v30 }
 0x17a   : > { %4291 = vmatmul.bf16.gmra.mxu0 %v12728_v7  ;;  %v1102_v7 = vsel %vm15782_vm13, %v12259_v48, %v1101_v16  ;;  %v4240_v23 = vpop.f32.mrf.mxu3  ;;  %v4145_v11 = vpop.f32.mrf.mxu1  ;;  %899 = vst [vmem:[#allocation2 + $0x418] sm:$0xf] %v813_v63  ;;  %v12507_v62 = vld [vmem:[%s15704_s12 + $0x70] sm:$0xf]  ;;  %v12764_v16 = vor.u32 %v14808_v37, %v12763_v34  ;;  %v12506_v54 = vld [vmem:[%s15704_s12 + $0x6c] sm:$0xe] }
 0x17b   : > { %v16642_v42 = vadd.f32 %v4240_v23, %v4192_v0  ;;  %v4146_v15 = vadd.f32 %v4145_v11, %v4097_v10  ;;  %1173 = vst [vmem:[#allocation2 + $0x3f8] sm:$0xf] %v1102_v7  ;;  %v15018_v10 = vld [vmem:[%s18640_s1 + $0x178] sm:$0xff]  ;;  %v817_v33 = vrot.slane %v815_v24, 4  ;;  %v16659_v5 = vrot.slane %v824_v36, 5 }
 0x17c   : > { %5465 = vmatmul.bf16.gmra.mxu2 %v13276_v39  ;;  %v830_v48 = vrot.slane %v828_v35, 4  ;;  %v15017_v39 = vld [vmem:[%s18640_s1 + $0x170] sm:$0xff]  ;;  %v12540_v7 = vrot.slane %v12506_v54, 9  ;;  %v2718_v8 = vrot.slane %v12507_v62, 5  ;;  %v370_v37 = vld [vmem:[%s15704_s12 + $0xb8] sm:$0xf] }
 0x17d   : > { %5416 = vmatmul.bf16.gmra.mxu1 %v13272_v6  ;;  %5633 = vmatpush.bf16.msrb.mxu2 %v15018_v10  ;;  %v450_v6 = vld [vmem:[%s15704_s12 + $0xbc] sm:$0x1]  ;;  %v13307_v24 = vld [vmem:[#allocation2 + $0x3a8] sm:$0xf]  ;;  %v369_v35 = vld [vmem:[%s15704_s12 + $0xb4] sm:$0xf] }
 0x17e   : > { %v831_v14 = vor.u32 %v830_v48, %v16659_v5  ;;  %v2719_v34 = vsel %vm15782_vm13, %v12540_v7, %v2718_v8  ;;  %v2720_v36 = vrot.slane %v2718_v8, 4  ;;  %401 = vst [vmem:[#allocation2 + $0x438] sm:$0xf] %v369_v35  ;;  %v949_v30 = vld [vmem:[%s15704_s12 + $0xbc] sm:$0x1]  ;;  %v15015_v8 = vld [vmem:[%s18640_s1 + $0x160] sm:$0xff] }
 0x17f   : > { %v4098_v18 = vpop.f32.mrf.mxu0  ;;  %5514 = vmatmul.bf16.gmra.mxu3 %v13280_v17  ;;  %v4194_v45 = vpop.f32.mrf.mxu2  ;;  %v15016_v17 = vld [vmem:[%s18640_s1 + $0x168] sm:$0xff]  ;;  %2825 = vst [vmem:[#allocation2 + $0x218] sm:$0xf] %v2719_v34  ;;  %v12799_v34 = vld [vmem:[#allocation2 + $0x1d0] sm:$0xf] }
 0x180   : > { %v4099_v59 = vadd.f32 %v4098_v18, %v16348_v52  ;;  %v820_v52 = vrot.slane %v818_v31, 5  ;;  %v4195_v49 = vadd.f32 %v4194_v45, %v4146_v15  ;;  %v13309_v15 = vld [vmem:[#allocation2 + $0x3cc] sm:$0xf0]  ;;  %v2721_v18 = vrot.slane %v12508_v61, 5  ;;  %v14948_v31 = vld [vmem:[#allocation2 + $0x3c8] sm:$0xf0] }
 0x181   : > { %5634 = vmatpush.bf16.msrb.mxu2 %v15017_v39  ;;  %v832_v10 = vrot.slane %v831_v14, 4  ;;  %v948_v45 = vld [vmem:[%s15704_s12 + $0xb8] sm:$0xf]  ;;  %v13312_v54 = vor.u32 %v14944_v12, %v13309_v15  ;;  %v14949_v14 = vld [vmem:[#allocation2 + $0x3d0] sm:$0xf0] }
 0x182   : > { %v821_v50 = vor.u32 %v820_v52, %v817_v33  ;;  %v4243_v43 = vpop.f32.mrf.mxu3  ;;  %v4147_v0 = vpop.f32.mrf.mxu1  ;;  %v2722_v33 = vsel %vm15782_vm13, %v2720_v36, %v2721_v18  ;;  %v1108_v62 = vrot.slane %v948_v45, 5  ;;  %v13315_v61 = vld [vmem:[#allocation2 + $0x3b0] sm:$0xf]  ;;  %402 = vst [vmem:[#allocation2 + $0x45c] sm:$0xf] %v370_v37 }
 0x183   : > { %v16672_v63 = vadd.f32 %v4243_v43, %v4195_v49  ;;  %v4148_v23 = vadd.f32 %v4147_v0, %v4099_v59  ;;  %v15024_v59 = vld [vmem:[%s18640_s1 + $0x1a8] sm:$0xff]  ;;  %2826 = vst [vmem:[#allocation2 + $0x23c] sm:$0xf] %v2722_v33  ;;  %v12260_v49 = vrot.slane %v947_v40, 9  ;;  %v13308_v43 = vor.u32 %v14948_v31, %v13307_v24  ;;  %v14817_v35 = vld [vmem:[#allocation2 + $0x1f0] sm:$0xf0] }
 0x184   : > { %v822_v3 = vrot.slane %v821_v50, 4  ;;  %v1111_v50 = vrot.slane %v949_v30, 5  ;;  %5684 = vmatpush.bf16.msrb.mxu3 %v15024_v59  ;;  %v1110_v39 = vrot.slane %v1108_v62, 4  ;;  %v13316_v12 = vor.u32 %v14949_v14, %v13315_v61  ;;  %v12317_v18 = vld [vmem:[%s15704_s12 + $0x6c] sm:$0xf]  ;;  %v15014_v37 = vld [vmem:[%s18640_s1 + $0x158] sm:$0xff] }
 0x185   : > { %5635 = vmatpush.bf16.msrb.mxu2 %v15016_v17  ;;  %v1109_v0 = vsel %vm15782_vm13, %v12260_v49, %v1108_v62  ;;  %v1483_v31 = vshrl.u32 %v12317_v18, 16  ;;  %v1486_v59 = vshll.u32 %v12317_v18, 16  ;;  %v14995_v33 = vld [vmem:[%s18640_s1 + $0xc0] sm:$0xff]  ;;  %v12366_v62 = vld [vmem:[%s15704_s12 + $0x70] sm:$0xf] }
 0x186   : > { %v827_v52 = vsel %vm15774_vm12, %v822_v3, %v16659_v5  ;;  %v1112_v17 = vsel %vm15782_vm13, %v1110_v39, %v1111_v50  ;;  %1175 = vst [vmem:[#allocation2 + $0x440] sm:$0xf] %v1109_v0  ;;  %v12318_v3 = vld [vmem:[%s15704_s12 + $0x70] sm:$0xf]  ;;  %v12800_v50 = vor.u32 %v14817_v35, %v12799_v34  ;;  %5542 = vmatpush.bf16.msrb.mxu0 %v14995_v33  ;;  %v12365_v61 = vld [vmem:[%s15704_s12 + $0x6c] sm:$0xe] }
 0x187   : > { %v4101_v11 = vpop.f32.mrf.mxu0  ;;  %v4196_v41 = vpop.f32.mrf.mxu2  ;;  %900 = vst [vmem:[#allocation2 + $0x43c] sm:$0xf] %v827_v52  ;;  %v1496_v36 = vshrl.u32 %v12318_v3, 16  ;;  %v15003_v52 = vld [vmem:[%s18640_s1 + $0x100] sm:$0xff]  ;;  %v1892_v14 = vrot.slane %v12366_v62, 5  ;;  %v15013_v0 = vld [vmem:[%s18640_s1 + $0x150] sm:$0xff] }
 0x188   : > { %v4102_v58 = vadd.f32 %v4101_v11, %v16381_v44  ;;  %v834_v44 = vshll.u32 %v450_v6, 16  ;;  %v15023_v6 = vld [vmem:[%s18640_s1 + $0x1a0] sm:$0xff]  ;;  %1176 = vst [vmem:[#allocation2 + $0x464] sm:$0xf] %v1112_v17  ;;  %5591 = vmatpush.bf16.msrb.mxu1 %v15003_v52  ;;  %v15021_v39 = vld [vmem:[%s18640_s1 + $0x190] sm:$0xff]  ;;  %v15020_v17 = vld [vmem:[%s18640_s1 + $0x188] sm:$0xff] }
 0x189   : > { %5685 = vmatpush.bf16.msrb.mxu3 %v15023_v6  ;;  %5636 = vmatpush.bf16.msrb.mxu2 %v15015_v8  ;;  %v1498_v30 = vrot.slane %v1496_v36, 4  ;;  %v12278_v34 = vld [vmem:[%s15704_s12 + $0x70] sm:$0xf]  ;;  %v12367_v36 = vld [vmem:[%s15704_s12 + $0x74] sm:$0x1] }
 0x18a   : > { %4296 = vmatmul.bf16.gmra.mxu0 %v12764_v16  ;;  %v836_v48 = vrot.slane %v834_v44, 5  ;;  %v4197_v16 = vadd.f32 %v4196_v41, %v4148_v23  ;;  %v4245_v2 = vpop.f32.mrf.mxu3  ;;  %v4150_v7 = vpop.f32.mrf.mxu1  ;;  %v1488_v44 = vrot.slane %v1486_v59, 5  ;;  %v12277_v59 = vld [vmem:[%s15704_s12 + $0x6c] sm:$0xf]  ;;  %1227 = vst [vmem:[#allocation2 + $0x270] sm:$0xf] %v12278_v34 }
 0x18b   : > { %v4151_v11 = vadd.f32 %v4150_v7, %v4102_v58  ;;  %v1492_v58 = vshll.u32 %v12318_v3, 16  ;;  %v12397_v7 = vrot.slane %v12365_v61, 9  ;;  %1226 = vst [vmem:[#allocation2 + $0x24c] sm:$0xf] %v12277_v59  ;;  %v13351_v33 = vld [vmem:[#allocation2 + $0x3f8] sm:$0xf] }
 0x18c   : > { %v837_v5 = vsel %vm15774_vm12, %v832_v10, %v836_v48  ;;  %v16703_v23 = vadd.f32 %v4245_v2, %v4197_v16  ;;  %5470 = vmatmul.bf16.gmra.mxu2 %v13312_v54  ;;  %v1485_v10 = vrot.slane %v1483_v31, 4  ;;  %v12319_v48 = vld [vmem:[%s15704_s12 + $0x74] sm:$0x1]  ;;  %v12422_v62 = vld [vmem:[%s15704_s12 + $0x7c] sm:$0xf]  ;;  %v15019_v61 = vld [vmem:[%s18640_s1 + $0x180] sm:$0xff] }
 0x18d   : > { %901 = vst [vmem:[#allocation2 + $0x460] sm:$0xf] %v837_v5  ;;  %5421 = vmatmul.bf16.gmra.mxu1 %v13308_v43  ;;  %v1494_v45 = vrot.slane %v1492_v58, 5  ;;  %5637 = vmatpush.bf16.msrb.mxu2 %v15014_v37  ;;  %v1502_v54 = vshll.u32 %v12319_v48, 16  ;;  %v1894_v37 = vrot.slane %v1892_v14, 4 }
 0x18e   : > { %v1489_v49 = vor.u32 %v1488_v44, %v1485_v10  ;;  %v14957_v10 = vld [vmem:[#allocation2 + $0x410] sm:$0xf0]  ;;  %v1893_v44 = vsel %vm15782_vm13, %v12397_v7, %v1892_v14  ;;  %v12421_v48 = vld [vmem:[%s15704_s12 + $0x78] sm:$0xf]  ;;  %2060 = vst [vmem:[#allocation2 + $0x27c] sm:$0xf] %v12422_v62 }
 0x18f   : > { %v4103_v15 = vpop.f32.mrf.mxu0  ;;  %5519 = vmatmul.bf16.gmra.mxu3 %v13316_v12  ;;  %v4199_v40 = vpop.f32.mrf.mxu2  ;;  %v1499_v16 = vor.u32 %v1498_v30, %v1494_v45  ;;  %v14953_v12 = vld [vmem:[#allocation2 + $0x3f4] sm:$0xf]  ;;  %v1504_v3 = vrot.slane %v1502_v54, 5  ;;  %1994 = vst [vmem:[#allocation2 + $0x254] sm:$0xf] %v1893_v44  ;;  %v15011_v54 = vld [vmem:[%s18640_s1 + $0x140] sm:$0xff] }
 0x190   : > { %v4104_v24 = vadd.f32 %v4103_v15, %v16409_v32  ;;  %v15022_v32 = vld [vmem:[%s18640_s1 + $0x198] sm:$0xff]  ;;  %v4200_v41 = vadd.f32 %v4199_v40, %v4151_v11  ;;  %v1490_v2 = vrot.slane %v1489_v49, 4  ;;  %v13345_v15 = vld [vmem:[#allocation2 + $0x414] sm:$0xf0]  ;;  %2059 = vst [vmem:[#allocation2 + $0x258] sm:$0xf] %v12421_v48 }
 0x191   : > { %5686 = vmatpush.bf16.msrb.mxu3 %v15022_v32  ;;  %v1500_v18 = vrot.slane %v1499_v16, 4  ;;  %5638 = vmatpush.bf16.msrb.mxu2 %v15013_v0  ;;  %v13343_v32 = vld [vmem:[#allocation2 + $0x3f0] sm:$0xf]  ;;  %v13348_v30 = vor.u32 %v14953_v12, %v13345_v15  ;;  %v12321_v7 = vld [vmem:[%s15704_s12 + $0x7c] sm:$0xf] }
 0x192   : > { %v4248_v43 = vpop.f32.mrf.mxu3  ;;  %v4152_v5 = vpop.f32.mrf.mxu1  ;;  %v1495_v58 = vsel %vm15774_vm12, %v1490_v2, %v1494_v45  ;;  %v13344_v49 = vor.u32 %v14957_v10, %v13343_v32  ;;  %v1516_v12 = vshll.u32 %v12321_v7, 16  ;;  %v1520_v15 = vshrl.u32 %v12321_v7, 16  ;;  %v12368_v10 = vld [vmem:[%s15704_s12 + $0x78] sm:$0xe] }
 0x193   : > { %v16731_v8 = vadd.f32 %v4248_v43, %v4200_v41  ;;  %v4153_v6 = vadd.f32 %v4152_v5, %v4104_v24  ;;  %v15012_v24 = vld [vmem:[%s18640_s1 + $0x148] sm:$0xff]  ;;  %v1505_v35 = vsel %vm15774_vm12, %v1500_v18, %v1504_v3  ;;  %1722 = vst [vmem:[#allocation2 + $0x250] sm:$0xf] %v1495_v58  ;;  %v14958_v41 = vld [vmem:[#allocation2 + $0x418] sm:$0xf0] }
 0x194   : > { %1723 = vst [vmem:[#allocation2 + $0x274] sm:$0xf] %v1505_v35  ;;  %v13352_v5 = vor.u32 %v14958_v41, %v13351_v33  ;;  %v14826_v18 = vld [vmem:[#allocation2 + $0x238] sm:$0xf0]  ;;  %v1522_v35 = vrot.slane %v1520_v15, 4 }
 0x195   : > { %5687 = vmatpush.bf16.msrb.mxu3 %v15021_v39  ;;  %5639 = vmatpush.bf16.msrb.mxu2 %v15012_v24  ;;  %v12320_v39 = vld [vmem:[%s15704_s12 + $0x78] sm:$0xf]  ;;  %v1518_v24 = vrot.slane %v1516_v12, 5  ;;  %v13387_v15 = vld [vmem:[#allocation2 + $0x440] sm:$0xf] }
 0x197   : > { %v4106_v11 = vpop.f32.mrf.mxu0  ;;  %v4201_v40 = vpop.f32.mrf.mxu2  ;;  %v1523_v33 = vor.u32 %v1522_v35, %v1518_v24 }
 0x198   : > { %v4107_v31 = vadd.f32 %v4106_v11, %v16430_v21  ;;  %v1895_v21 = vrot.slane %v12367_v36, 5  ;;  %v4202_v45 = vadd.f32 %v4201_v40, %v4153_v6  ;;  %v1507_v6 = vshrl.u32 %v12320_v39, 16  ;;  %v12322_v36 = vld [vmem:[%s15704_s12 + $0x80] sm:$0x1] }
 0x199   : > { %5688 = vmatpush.bf16.msrb.mxu3 %v15020_v17  ;;  %5640 = vmatpush.bf16.msrb.mxu2 %v15011_v54  ;;  %v1510_v11 = vshll.u32 %v12320_v39, 16  ;;  %v12835_v17 = vld [vmem:[#allocation2 + $0x218] sm:$0xf]  ;;  %v1526_v32 = vshll.u32 %v12322_v36, 16  ;;  %v12279_v54 = vld [vmem:[%s15704_s12 + $0x78] sm:$0xf] }
 0x19a   : > { %4301 = vmatmul.bf16.gmra.mxu0 %v12800_v50  ;;  %v1896_v52 = vsel %vm15782_vm13, %v1894_v37, %v1895_v21  ;;  %v4250_v50 = vpop.f32.mrf.mxu3  ;;  %v4155_v16 = vpop.f32.mrf.mxu1  ;;  %v1509_v59 = vrot.slane %v1507_v6, 4  ;;  %v12836_v37 = vor.u32 %v14826_v18, %v12835_v17  ;;  %1228 = vst [vmem:[#allocation2 + $0x294] sm:$0xf] %v12279_v54  ;;  %v12424_v36 = vld [vmem:[%s15704_s12 + $0x88] sm:$0xf] }
 0x19b   : > { %1995 = vst [vmem:[#allocation2 + $0x278] sm:$0xf] %v1896_v52  ;;  %v16759_v14 = vadd.f32 %v4250_v50, %v4202_v45  ;;  %v4156_v43 = vadd.f32 %v4155_v16, %v4107_v31  ;;  %v15034_v31 = vld [vmem:[%s18640_s1 + $0x1f8] sm:$0xff]  ;;  %v1512_v34 = vrot.slane %v1510_v11, 5  ;;  %v12370_v45 = vld [vmem:[%s15704_s12 + $0x80] sm:$0x1] }
 0x19c   : > { %5475 = vmatmul.bf16.gmra.mxu2 %v13348_v30  ;;  %5731 = vmatpush.bf16.msra.mxu0 %v15034_v31  ;;  %v12369_v52 = vld [vmem:[%s15704_s12 + $0x7c] sm:$0xf]  ;;  %v1528_v50 = vrot.slane %v1526_v32, 5  ;;  %v1902_v6 = vrot.slane %v12370_v45, 5  ;;  %v14966_v11 = vld [vmem:[#allocation2 + $0x458] sm:$0xf0] }
 0x19d   : > { %5689 = vmatpush.bf16.msrb.mxu3 %v15019_v61  ;;  %5426 = vmatmul.bf16.gmra.mxu1 %v13344_v49  ;;  %v1513_v21 = vor.u32 %v1512_v34, %v1509_v59  ;;  %v14962_v49 = vld [vmem:[#allocation2 + $0x43c] sm:$0xf]  ;;  %v12280_v61 = vld [vmem:[%s15704_s12 + $0x7c] sm:$0xf]  ;;  %v1899_v7 = vrot.slane %v12369_v52, 5 }
 0x19e   : > { %1229 = vst [vmem:[#allocation2 + $0x2b8] sm:$0xf] %v12280_v61  ;;  %v12423_v59 = vld [vmem:[%s15704_s12 + $0x84] sm:$0xf]  ;;  %v12324_v52 = vld [vmem:[%s15704_s12 + $0x88] sm:$0xf] }
 0x19f   : > { %v4108_v0 = vpop.f32.mrf.mxu0  ;;  %5524 = vmatmul.bf16.gmra.mxu3 %v13352_v5  ;;  %v4204_v3 = vpop.f32.mrf.mxu2  ;;  %v1514_v62 = vrot.slane %v1513_v21, 4  ;;  %v12398_v5 = vrot.slane %v12368_v10, 9  ;;  %v1901_v18 = vrot.slane %v1899_v7, 4  ;;  %2061 = vst [vmem:[#allocation2 + $0x2a0] sm:$0xf] %v12423_v59 }
 0x1a0   : > { %v4109_v2 = vadd.f32 %v4108_v0, %v16448_v9  ;;  %v15042_v9 = vld [vmem:[%s18640_s1 + $0x238] sm:$0xff]  ;;  %v4205_v58 = vadd.f32 %v4204_v3, %v4156_v43  ;;  %v1524_v43 = vrot.slane %v1523_v33, 4  ;;  %v13381_v0 = vld [vmem:[#allocation2 + $0x45c] sm:$0xf0]  ;;  %2062 = vst [vmem:[#allocation2 + $0x2c4] sm:$0xf] %v12424_v36 }
 0x1a1   : > { %5780 = vmatpush.bf16.msra.mxu1 %v15042_v9  ;;  %v1519_v39 = vsel %vm15774_vm12, %v1514_v62, %v1518_v24  ;;  %v1900_v17 = vsel %vm15782_vm13, %v12398_v5, %v1899_v7  ;;  %v13384_v31 = vor.u32 %v14962_v49, %v13381_v0  ;;  %v14967_v9 = vld [vmem:[#allocation2 + $0x460] sm:$0xf0]  ;;  %v12323_v33 = vld [vmem:[%s15704_s12 + $0x84] sm:$0xf]  ;;  %v1540_v49 = vshll.u32 %v12324_v52, 16  ;;  %v15041_v36 = vld [vmem:[%s18640_s1 + $0x230] sm:$0xff] }
 0x1a2   : > { %v4253_v44 = vpop.f32.mrf.mxu3  ;;  %v4157_v40 = vpop.f32.mrf.mxu1  ;;  %1724 = vst [vmem:[#allocation2 + $0x298] sm:$0xf] %v1519_v39  ;;  %v13388_v32 = vor.u32 %v14967_v9, %v13387_v15  ;;  %v1544_v62 = vshrl.u32 %v12324_v52, 16  ;;  %v12325_v7 = vld [vmem:[%s15704_s12 + $0x8c] sm:$0x1] }
 0x1a3   : > { %v16774_v30 = vadd.f32 %v4253_v44, %v4205_v58  ;;  %v4158_v41 = vadd.f32 %v4157_v40, %v4109_v2  ;;  %v13379_v2 = vld [vmem:[#allocation2 + $0x438] sm:$0xf]  ;;  %v1903_v58 = vsel %vm15782_vm13, %v1901_v18, %v1902_v6  ;;  %1996 = vst [vmem:[#allocation2 + $0x29c] sm:$0xf] %v1900_v17  ;;  %v14900_v44 = vld [vmem:[#allocation2 + $0x24c] sm:$0xf]  ;;  %v4128_v18 = vadd.f32 %v16501_v19, %v16490_v26 }
 0x1a4   : > { %v13380_v34 = vor.u32 %v14966_v11, %v13379_v2  ;;  %1997 = vst [vmem:[#allocation2 + $0x2c0] sm:$0xf] %v1903_v58  ;;  %v13137_v40 = vld [vmem:[#allocation2 + $0x26c] sm:$0xf0]  ;;  %v1546_v5 = vrot.slane %v1544_v62, 4  ;;  %v15033_v58 = vld [vmem:[%s18640_s1 + $0x1f0] sm:$0xff] }
 0x1a5   : > { %v12372_v6 = vld [vmem:[%s15704_s12 + $0x88] sm:$0xf]  ;;  %v12371_v9 = vld [vmem:[%s15704_s12 + $0x84] sm:$0xe]  ;;  %v12373_v59 = vld [vmem:[%s15704_s12 + $0x8c] sm:$0x1]  ;;  %v4177_v26 = vadd.f32 %v16518_v55, %v4128_v18  ;;  %5732 = vmatpush.bf16.msra.mxu0 %v15033_v58  ;;  %5781 = vmatpush.bf16.msra.mxu1 %v15041_v36 }
 0x1a6   : > { %v14905_v19 = vld [vmem:[#allocation2 + $0x270] sm:$0xf0]  ;;  %v12281_v52 = vld [vmem:[%s15704_s12 + $0x84] sm:$0xf] }
 0x1a7   : > { %v4111_v48 = vpop.f32.mrf.mxu0  ;;  %v4206_v12 = vpop.f32.mrf.mxu2  ;;  %v14906_v62 = vld [vmem:[#allocation2 + $0x278] sm:$0xf0]  ;;  %1230 = vst [vmem:[#allocation2 + $0x2dc] sm:$0xf] %v12281_v52  ;;  %v13187_v52 = vld [vmem:[#allocation2 + $0x2a0] sm:$0xf] }
 0x1a8   : > { %v4112_v16 = vadd.f32 %v4111_v48, %v16465_v57  ;;  %v1529_v57 = vsel %vm15774_vm12, %v1524_v43, %v1528_v50  ;;  %v4207_v3 = vadd.f32 %v4206_v12, %v4158_v41  ;;  %v1531_v41 = vshrl.u32 %v12323_v33, 16  ;;  %v13145_v12 = vld [vmem:[#allocation2 + $0x274] sm:$0xf0] }
 0x1a9   : > { %1725 = vst [vmem:[#allocation2 + $0x2bc] sm:$0xf] %v1529_v57  ;;  %v1534_v48 = vshll.u32 %v12323_v33, 16  ;;  %v1542_v43 = vrot.slane %v1540_v49, 5  ;;  %v14901_v57 = vld [vmem:[#allocation2 + $0x254] sm:$0xf] }
 0x1aa   : > { %4306 = vmatmul.bf16.gmra.mxu0 %v12836_v37  ;;  %v4255_v24 = vpop.f32.mrf.mxu3  ;;  %v4160_v35 = vpop.f32.mrf.mxu1  ;;  %v1533_v54 = vrot.slane %v1531_v41, 4  ;;  %v13151_v49 = vld [vmem:[#allocation2 + $0x258] sm:$0xf] }
 0x1ab   : > { %v16789_v37 = vadd.f32 %v4255_v24, %v4207_v3  ;;  %v4161_v21 = vadd.f32 %v4160_v35, %v4112_v16  ;;  %v13140_v16 = vor.u32 %v14900_v44, %v13137_v40  ;;  %v1536_v61 = vrot.slane %v1534_v48, 5  ;;  %v13143_v3 = vld [vmem:[#allocation2 + $0x250] sm:$0xf] }
 0x1ac   : > { %5480 = vmatmul.bf16.gmra.mxu2 %v13384_v31  ;;  %v1547_v17 = vor.u32 %v1546_v5, %v1542_v43  ;;  %v1550_v31 = vshll.u32 %v12325_v7, 16  ;;  %v1909_v40 = vrot.slane %v12373_v59, 5  ;;  %v13148_v48 = vor.u32 %v14901_v57, %v13145_v12  ;;  %v16826_v5 = vld [vmem:[#allocation6] ss:$0 sm:$0xff] }
 0x1ad   : > { %5431 = vmatmul.bf16.gmra.mxu1 %v13380_v34  ;;  %v1537_v15 = vor.u32 %v1536_v61, %v1533_v54  ;;  %v1906_v34 = vrot.slane %v12372_v6, 5  ;;  %v4226_v54 = vadd.f32 %v16524_v4, %v4177_v26  ;;  %v13152_v6 = vor.u32 %v14906_v62, %v13151_v49  ;;  %v12425_v12 = vld [vmem:[%s15704_s12 + $0x90] sm:$0xf]  ;;  %v14909_v4 = vld [vmem:[#allocation2 + $0x294] sm:$0xf] }
 0x1ae   : > { %v1548_v35 = vrot.slane %v1547_v17, 4  ;;  %v12426_v17 = vld [vmem:[%s15704_s12 + $0x94] sm:$0xf]  ;;  %2063 = vst [vmem:[#allocation2 + $0x2e8] sm:$0xf] %v12425_v12  ;;  %v4138_v49 = vadd.f32 %v16583_v38, %v16565_v1 }
 0x1af   : > { %v16791_v10 = vpop.f32.mrf.mxu0  ;;  %5529 = vmatmul.bf16.gmra.mxu3 %v13388_v32  ;;  %v4209_v45 = vpop.f32.mrf.mxu2  ;;  %v1538_v24 = vrot.slane %v1537_v15, 4  ;;  %v1552_v32 = vrot.slane %v1550_v31, 5  ;;  %v1908_v44 = vrot.slane %v1906_v34, 4  ;;  %2064 = vst [vmem:[#allocation2 + $0x30c] sm:$0xf] %v12426_v17 }
 0x1b0   : > { %v4210_v50 = vadd.f32 %v4209_v45, %v4161_v21  ;;  %v12399_v21 = vrot.slane %v12371_v9, 9  ;;  %v12282_v45 = vld [vmem:[%s15704_s12 + $0x88] sm:$0xf] }
 0x1b1   : > { %v1543_v41 = vsel %vm15774_vm12, %v1538_v24, %v1542_v43  ;;  %v1553_v55 = vsel %vm15774_vm12, %v1548_v35, %v1552_v32  ;;  %1231 = vst [vmem:[#allocation2 + $0x300] sm:$0xf] %v12282_v45  ;;  %v1910_v7 = vsel %vm15782_vm13, %v1908_v44, %v1909_v40  ;;  %v13181_v26 = vld [vmem:[#allocation2 + $0x2bc] sm:$0xf0]  ;;  %v14914_v32 = vld [vmem:[#allocation2 + $0x2b8] sm:$0xf0] }
 0x1b2   : > { %v4258_v0 = vpop.f32.mrf.mxu3  ;;  %v16795_v39 = vpop.f32.mrf.mxu1  ;;  %1726 = vst [vmem:[#allocation2 + $0x2e0] sm:$0xf] %v1543_v41  ;;  %v14915_v45 = vld [vmem:[#allocation2 + $0x2c0] sm:$0xf0] }
 0x1b3   : > { %v16799_v2 = vadd.f32 %v4258_v0, %v4210_v50  ;;  %v13144_v50 = vor.u32 %v14905_v19, %v13143_v3  ;;  %1727 = vst [vmem:[#allocation2 + $0x304] sm:$0xf] %v1553_v55  ;;  %v13173_v3 = vld [vmem:[#allocation2 + $0x2b4] sm:$0xf0] }
 0x1b4   : > { %1999 = vst [vmem:[#allocation2 + $0x308] sm:$0xf] %v1910_v7  ;;  %v13179_v19 = vld [vmem:[#allocation2 + $0x298] sm:$0xf] }
 0x1b7   : > { %v4272_v11 = vpop.f32.mrf.mxu0  ;;  %v16812_v33 = vpop.f32.mrf.mxu2 }
 0x1b8   : > { %v4273_v43 = vadd.f32 %v4272_v11, %v16504_v27 }
 0x1ba   : > { %5543 = vmatmul.bf16.vlgmr.msrb.gmra.mxu0 %v13140_v16  ;;  %v1907_v16 = vsel %vm15782_vm13, %v12399_v21, %v1906_v34  ;;  %v16823_v61 = vpop.f32.mrf.mxu3  ;;  %v5397_v0 = vpop.f32.mrf.mxu1  ;;  %v4312_v18 = vmax.f32 %v4273_v43, 0.0  ;;  %v13176_v34 = vor.u32 %v14909_v4, %v13173_v3  ;;  %v14910_v21 = vld [vmem:[#allocation2 + $0x29c] sm:$0xf]  ;;  %v16848_v4 = vld [vmem:[#allocation2 + $0x2e0] sm:$0xf] }
 0x1bb   : > { %1998 = vst [vmem:[#allocation2 + $0x2e4] sm:$0xf] %v1907_v16  ;;  %v5398_v27 = vadd.f32 %v16826_v5, %v5397_v0  ;;  %v13184_v40 = vor.u32 %v14910_v21, %v13181_v26  ;;  %v4187_v0 = vadd.f32 %v16599_v13, %v4138_v49 }
 0x1bc   : > { %5641 = vmatmul.bf16.vlgmr.msrb.gmra.mxu2 %v13148_v48  ;;  %v13180_v48 = vor.u32 %v14914_v32, %v13179_v19 }
 0x1bd   : > { %5592 = vmatmul.bf16.vlgmr.msrb.gmra.mxu1 %v13144_v50 }
 0x1bf   : > { %v4274_v57 = vpop.f32.mrf.mxu0  ;;  %5690 = vmatmul.bf16.vlgmr.msrb.gmra.mxu3 %v13152_v6  ;;  %v5446_v31 = vpop.f32.mrf.mxu2  ;;  %v14918_v6 = vld [vmem:[#allocation2 + $0x2dc] sm:$0xf] }
 0x1c0   : > { %v4275_v15 = vadd.f32 %v4274_v57, %v4226_v54  ;;  %v5447_v9 = vadd.f32 %v5446_v31, %v5398_v27  ;;  %v13188_v54 = vor.u32 %v14915_v45, %v13187_v52  ;;  %v13209_v57 = vld [vmem:[#allocation2 + $0x2fc] sm:$0xf0]  ;;  %v16855_v27 = vadd.f32 %v16605_v28, %v4187_v0  ;;  %v13217_v31 = vld [vmem:[#allocation2 + $0x304] sm:$0xf0] }
 0x1c1   : > { %v13212_v3 = vor.u32 %v14918_v6, %v13209_v57 }
 0x1c2   : > { %v4313_v11 = vmax.f32 %v4275_v15, 0.0  ;;  %v5495_v58 = vpop.f32.mrf.mxu3  ;;  %v16833_v36 = vpop.f32.mrf.mxu1  ;;  %v16852_v13 = vld [vmem:[#allocation2 + $0x2e4] sm:$0xf] }
 0x1c3   : > { %v16835_v24 = vadd.f32 %v5495_v58, %v5447_v9  ;;  %v16860_v9 = vld [vmem:[#allocation2 + $0x2e8] sm:$0xf] }
 0x1c4   : > { %v15235_v59 = vpack.c.bf16 %v4313_v11, %v4312_v18  ;;  %v16850_v18 = vld [vmem:[#allocation2 + $0x300] sm:$0xf0] }
 0x1c5   : > { %v13216_v32 = vor.u32 %v16850_v18, %v16848_v4 }
 0x1c6   : > { %15236 = vst [vmem:[#allocation3] sm:$0xff] %v15235_v59   ;;  %v16862_v59 = vld [vmem:[#allocation2 + $0x308] sm:$0xf0] }
 0x1c7   : > { %v4277_v35 = vpop.f32.mrf.mxu0  ;;  %v16837_v44 = vpop.f32.mrf.mxu2  ;;  %v13224_v49 = vor.u32 %v16862_v59, %v16860_v9 }
 0x1c8   : > { %v4278_v15 = vadd.f32 %v4277_v35, %v16545_v56 }
 0x1ca   : > { %5548 = vmatmul.bf16.gmra.mxu0 %v13176_v34  ;;  %v16841_v50 = vpop.f32.mrf.mxu3  ;;  %v5402_v16 = vpop.f32.mrf.mxu1  ;;  %v4314_v52 = vmax.f32 %v4278_v15, 0.0 }
 0x1cb   : > { %18672 = vst [vmem:[#allocation19_spill] sm:$0xff] %v16841_v50  ;;  %v5403_v28 = vadd.f32 %v16826_v5, %v5402_v16 }
 0x1cc   : > { %5646 = vmatmul.bf16.gmra.mxu2 %v13184_v40 }
 0x1cd   : > { %v5877_v41 = vld [vmem:[#allocation3] sm:$0xf]  ;;  %v5878_v62 = vld [vmem:[#allocation3 + $0x4] sm:$0xf]  ;;  %5597 = vmatmul.bf16.gmra.mxu1 %v13180_v48  ;;  %v13220_v48 = vor.u32 %v16852_v13, %v13217_v31 }
 0x1ce   : > { %v5941_v55 = vrot.slane %v5877_v41, 3  ;;  %v5942_v7 = vrot.slane %v5878_v62, 3 }
 0x1cf   : > { %v4279_v43 = vpop.f32.mrf.mxu0  ;;  %5695 = vmatmul.bf16.gmra.mxu3 %v13188_v54  ;;  %v5451_v17 = vpop.f32.mrf.mxu2 }
 0x1d0   : > { %v5978_v12 = vsel %vm5977_vm14, %v5877_v41, %v5941_v55  ;;  %v5982_v1 = vsel %vm5981_vm15, %v5877_v41, %v5941_v55  ;;  %v5986_v38 = vsel %vm5985_vm0, %v5877_v41, %v5941_v55  ;;  %v16858_v11 = vsel %vm5973_vm4, %v5877_v41, %v5941_v55 }
 0x1d1   : > { %v5980_v56 = vrot.slane %v5978_v12, 1  ;;  %v5984_v34 = vrot.slane %v5982_v1, 2  ;;  %v5992_v58 = vsel %vm5977_vm14, %v5878_v62, %v5942_v7  ;;  %v5995_v35 = vsel %vm5981_vm15, %v5878_v62, %v5942_v7  ;;  %v12326_v12 = vld [vmem:[%s15704_s12 + $0x90] sm:$0xf]  ;;  %v12327_v1 = vld [vmem:[%s15704_s12 + $0x94] sm:$0xf] }
 0x1d2   : > { %v5988_v21 = vrot.slane %v5986_v38, 3  ;;  %v5998_v26 = vsel %vm5985_vm0, %v5878_v62, %v5942_v7  ;;  %v5500_v19 = vpop.f32.mrf.mxu3  ;;  %v16871_v40 = vsel %vm5973_vm4, %v5878_v62, %v5942_v7  ;;  %v16873_v45 = vpop.f32.mrf.mxu1  ;;  %v5994_v55 = vrot.slane %v5992_v58, 1  ;;  %v12328_v58 = vld [vmem:[%s15704_s12 + $0x98] sm:$0x1] }
 0x1d3   : > { %18673 = vst [vmem:[#allocation20_spill] sm:$0xff] %v16873_v45  ;;  %v5997_v16 = vrot.slane %v5995_v35, 2  ;;  %v18647_v54 = vunpack.c.l.bf16 %v16858_v11  ;;  %v5452_v0 = vadd.f32 %v5451_v17, %v5403_v28  ;;  %v6000_v6 = vrot.slane %v5998_v26, 3 }
 0x1d4   : > { %v16879_v57 = vunpack.c.l.bf16 %v5980_v56  ;;  %v16881_v62 = vunpack.c.l.bf16 %v5984_v34  ;;  %v4280_v7 = vadd.f32 %v4279_v43, %v16561_v51  ;;  %v16886_v38 = vunpack.c.l.bf16 %v5988_v21 }
 0x1d5   : > { %v18650_v15 = vunpack.c.l.bf16 %v16871_v40  ;;  %v16889_v4 = vadd.f32 %v5500_v19, %v5452_v0  ;;  %v1555_v18 = vshrl.u32 %v12326_v12, 16  ;;  %v1558_v31 = vshll.u32 %v12326_v12, 16  ;;  %v12375_v12 = vld [vmem:[%s15704_s12 + $0x94] sm:$0xf] }
 0x1d6   : > { %v4315_v13 = vmax.f32 %v4280_v7, 0.0  ;;  %v1564_v9 = vshll.u32 %v12327_v1, 16  ;;  %v1568_v59 = vshrl.u32 %v12327_v1, 16  ;;  %v16893_v56 = vunpack.c.l.bf16 %v5994_v55 }
 0x1d7   : > { %v4282_v41 = vpop.f32.mrf.mxu0  ;;  %v16891_v17 = vpop.f32.mrf.mxu2  ;;  %v13701_v51 = vrot.slane %v18647_v54, 9  ;;  %v1560_v35 = vrot.slane %v1558_v31, 5  ;;  %v6495_v28 = vunpack.c.l.bf16 %v5997_v16  ;;  %v6496_v19 = vunpack.c.l.bf16 %v6000_v6  ;;  %v12374_v16 = vld [vmem:[%s15704_s12 + $0x90] sm:$0xe] }
 0x1d8   : > { %18674 = vst [vmem:[#allocation21_spill] sm:$0xff] %v16891_v17  ;;  %v4283_v43 = vadd.f32 %v4282_v41, %v16585_v47  ;;  %v15240_v34 = vpack.c.bf16 %v4315_v13, %v4314_v52  ;;  %v1566_v21 = vrot.slane %v1564_v9, 5  ;;  %v1570_v26 = vrot.slane %v1568_v59, 4  ;;  %v12376_v59 = vld [vmem:[%s15704_s12 + $0x98] sm:$0x1] }
 0x1d9   : > { %v13702_v0 = vrot.slane %v16879_v57, 9  ;;  %v1574_v55 = vshll.u32 %v12328_v58, 16  ;;  %v13703_v1 = vrot.slane %v16881_v62, 9  ;;  %v13704_v47 = vrot.slane %v16886_v38, 9  ;;  %v12284_v17 = vld [vmem:[%s15704_s12 + $0x94] sm:$0xf] }
 0x1da   : > { %5553 = vmatmul.bf16.gmra.mxu0 %v13212_v3  ;;  %v1557_v3 = vrot.slane %v1555_v18, 4  ;;  %v16900_v7 = vpop.f32.mrf.mxu3  ;;  %v13705_v52 = vrot.slane %v18650_v15, 9  ;;  %15337 = vst [vmem:[#allocation3 + $0x8] sm:$0xff] %v15240_v34   ;;  %v13706_v6 = vrot.slane %v16893_v56, 9  ;;  %v1571_v31 = vor.u32 %v1570_v26, %v1566_v21  ;;  %v5407_v54 = vpop.f32.mrf.mxu1 }
 0x1db   : > { %18675 = vst [vmem:[#allocation22_spill] sm:$0xff] %v16900_v7  ;;  %v1576_v9 = vrot.slane %v1574_v55, 5  ;;  %v4316_v58 = vmax.f32 %v4283_v43, 0.0  ;;  %v12400_v7 = vrot.slane %v12374_v16, 9  ;;  %v1913_v15 = vrot.slane %v12375_v12, 5 }
 0x1dc   : > { %v1561_v18 = vor.u32 %v1560_v35, %v1557_v3  ;;  %5651 = vmatmul.bf16.gmra.mxu2 %v13220_v48  ;;  %v5408_v34 = vadd.f32 %v16826_v5, %v5407_v54  ;;  %v12283_v35 = vld [vmem:[%s15704_s12 + $0x90] sm:$0xf]  ;;  %v1572_v45 = vrot.slane %v1571_v31, 4  ;;  %v13707_v50 = vrot.slane %v6495_v28, 9  ;;  %1233 = vst [vmem:[#allocation2 + $0x348] sm:$0xf] %v12284_v17 }
 0x1dd   : > { %5602 = vmatmul.bf16.gmra.mxu1 %v13216_v32  ;;  %1232 = vst [vmem:[#allocation2 + $0x324] sm:$0xf] %v12283_v35  ;;  %v1915_v26 = vrot.slane %v1913_v15, 4  ;;  %v1916_v43 = vrot.slane %v12376_v59, 5  ;;  %v13708_v55 = vrot.slane %v6496_v19, 9  ;;  %v1914_v12 = vsel %vm15782_vm13, %v12400_v7, %v1913_v15 }
 0x1de   : > { %v1562_v29 = vrot.slane %v1561_v18, 4  ;;  %v1577_v54 = vsel %vm15774_vm12, %v1572_v45, %v1576_v9  ;;  %v6810_v16 = vmax.f32 %v16879_v57, %v13702_v0  ;;  %v6812_v17 = vmax.f32 %v16886_v38, %v13704_v47  ;;  %2000 = vst [vmem:[#allocation2 + $0x32c] sm:$0xf] %v1914_v12 }
 0x1df   : > { %v4284_v41 = vpop.f32.mrf.mxu0  ;;  %5700 = vmatmul.bf16.gmra.mxu3 %v13224_v49  ;;  %v5456_v48 = vpop.f32.mrf.mxu2  ;;  %v18676_v49 = vunpack.c.l.bf16 %v16858_v11  ;;  %v1917_v45 = vsel %vm15782_vm13, %v1915_v26, %v1916_v43  ;;  %1729 = vst [vmem:[#allocation2 + $0x34c] sm:$0xf] %v1577_v54  ;;  %v18677_v11 = vunpack.c.l.bf16 %v16871_v40  ;;  %v6816_v0 = vmax.f32 %v6496_v19, %v13708_v55 }
 0x1e0   : > { %v4285_v13 = vadd.f32 %v4284_v41, %v16855_v27  ;;  %v1567_v27 = vsel %vm15774_vm12, %v1562_v29, %v1566_v21  ;;  %v5457_v32 = vadd.f32 %v5456_v48, %v5408_v34  ;;  %v16924_v29 = vmax.f32 %v16881_v62, %v13703_v1  ;;  %v12427_v1 = vld [vmem:[%s15704_s12 + $0x9c] sm:$0xf]  ;;  %2001 = vst [vmem:[#allocation2 + $0x350] sm:$0xf] %v1917_v45 }
 0x1e1   : > { %1728 = vst [vmem:[#allocation2 + $0x328] sm:$0xf] %v1567_v27  ;;  %v6809_v18 = vmax.f32 %v18676_v49, %v13701_v51  ;;  %v5879_v21 = vld [vmem:[#allocation3 + $0x8] sm:$0xf]  ;;  %v6813_v57 = vmax.f32 %v18677_v11, %v13705_v52  ;;  %v6814_v62 = vmax.f32 %v16893_v56, %v13706_v6  ;;  %v6815_v51 = vmax.f32 %v6495_v28, %v13707_v50  ;;  %v12428_v6 = vld [vmem:[%s15704_s12 + $0xa0] sm:$0xf] }
 0x1e2   : > { %v4317_v3 = vmax.f32 %v4285_v13, 0.0  ;;  %v5880_v13 = vld [vmem:[#allocation3 + $0xc] sm:$0xf]  ;;  %v5505_v31 = vpop.f32.mrf.mxu3  ;;  %v5943_v9 = vrot.slane %v5879_v21, 3  ;;  %2065 = vst [vmem:[#allocation2 + $0x330] sm:$0xf] %v12427_v1 }
 0x1e3   : > { %v5944_v15 = vrot.slane %v5880_v13, 3  ;;  %v16929_v7 = vadd.f32 %v5505_v31, %v5457_v32  ;;  %2066 = vst [vmem:[#allocation2 + $0x354] sm:$0xf] %v12428_v6 }
 0x1e4   : > { %v15245_v41 = vpack.c.bf16 %v4317_v3, %v4316_v58  ;;  %v6003_v59 = vsel %vm5973_vm4, %v5879_v21, %v5943_v9  ;;  %v6004_v58 = vsel %vm5977_vm14, %v5879_v21, %v5943_v9  ;;  %v6007_v38 = vsel %vm5981_vm15, %v5879_v21, %v5943_v9 }
 0x1e5   : > { %v6010_v47 = vsel %vm5985_vm0, %v5879_v21, %v5943_v9  ;;  %v6006_v34 = vrot.slane %v6004_v58, 1  ;;  %v6009_v3 = vrot.slane %v6007_v38, 2  ;;  %v6015_v52 = vsel %vm5973_vm4, %v5880_v13, %v5944_v15 }
 0x1e6   : > { %15338 = vst [vmem:[#allocation3 + $0x10] sm:$0xff] %v15245_v41   ;;  %v6012_v40 = vrot.slane %v6010_v47, 3  ;;  %v6016_v50 = vsel %vm5977_vm14, %v5880_v13, %v5944_v15  ;;  %v6019_v56 = vsel %vm5981_vm15, %v5880_v13, %v5944_v15  ;;  %v6022_v28 = vsel %vm5985_vm0, %v5880_v13, %v5944_v15 }
 0x1e7   : > { %v6937_v19 = vunpack.c.l.bf16 %v6003_v59  ;;  %v6018_v35 = vrot.slane %v6016_v50, 1  ;;  %v6021_v48 = vrot.slane %v6019_v56, 2  ;;  %v6024_v27 = vrot.slane %v6022_v28, 3  ;;  %v15032_v56 = vld [vmem:[%s18640_s1 + $0x1e8] sm:$0xff] }
 0x1e8   : > { %v6938_v26 = vunpack.c.l.bf16 %v6006_v34  ;;  %v6939_v43 = vunpack.c.l.bf16 %v6009_v3  ;;  %v6940_v55 = vunpack.c.l.bf16 %v6012_v40  ;;  %v6941_v32 = vunpack.c.l.bf16 %v6015_v52  ;;  %v15040_v28 = vld [vmem:[%s18640_s1 + $0x228] sm:$0xff]  ;;  %5733 = vmatpush.bf16.msra.mxu0 %v15032_v56 }
 0x1e9   : > { %v13765_v41 = vrot.slane %v6937_v19, 9  ;;  %v6942_v54 = vunpack.c.l.bf16 %v6018_v35  ;;  %v6943_v12 = vunpack.c.l.bf16 %v6021_v48  ;;  %v6944_v49 = vunpack.c.l.bf16 %v6024_v27  ;;  %5782 = vmatpush.bf16.msra.mxu1 %v15040_v28 }
 0x1ea   : > { %v13766_v21 = vrot.slane %v6938_v26, 9  ;;  %v13767_v31 = vrot.slane %v6939_v43, 9  ;;  %v13768_v45 = vrot.slane %v6940_v55, 9  ;;  %v13769_v9 = vrot.slane %v6941_v32, 9 }
 0x1eb   : > { %v7257_v13 = vmax.f32 %v6937_v19, %v13765_v41  ;;  %v13770_v15 = vrot.slane %v6942_v54, 9  ;;  %v13771_v11 = vrot.slane %v6943_v12, 9  ;;  %v13772_v1 = vrot.slane %v6944_v49, 9 }
 0x1ec   : > { %v7258_v59 = vmax.f32 %v6938_v26, %v13766_v21  ;;  %v7259_v58 = vmax.f32 %v6939_v43, %v13767_v31  ;;  %v7260_v38 = vmax.f32 %v6940_v55, %v13768_v45  ;;  %v7261_v47 = vmax.f32 %v6941_v32, %v13769_v9  ;;  %v15031_v55 = vld [vmem:[%s18640_s1 + $0x1e0] sm:$0xff]  ;;  %v12285_v32 = vld [vmem:[%s15704_s12 + $0x9c] sm:$0xf]  ;;  %v16961_v21 = vpop.f32.mrf.mxu2 }
 0x1ed   : > { %v7513_v34 = vmax.f32 %v6809_v18, %v7257_v13  ;;  %v7262_v3 = vmax.f32 %v6942_v54, %v13770_v15  ;;  %v7263_v40 = vmax.f32 %v6943_v12, %v13771_v11  ;;  %v7264_v52 = vmax.f32 %v6944_v49, %v13772_v1  ;;  %1234 = vst [vmem:[#allocation2 + $0x36c] sm:$0xf] %v12285_v32 }
 0x1ee   : > { %v7514_v50 = vmax.f32 %v6810_v16, %v7258_v59  ;;  %v7515_v19 = vmax.f32 %v16924_v29, %v7259_v58  ;;  %v7516_v6 = vmax.f32 %v6812_v17, %v7260_v38  ;;  %v7517_v35 = vmax.f32 %v6813_v57, %v7261_v47  ;;  %v16951_v16 = vpop.f32.mrf.mxu1  ;;  %v15039_v17 = vld [vmem:[%s18640_s1 + $0x220] sm:$0xff]  ;;  %18678 = vst [vmem:[#allocation23_spill] sm:$0xff] %v16961_v21  ;;  %v16963_v59 = vpop.f32.mrf.mxu3 }
 0x1ef   : > { %v7577_v48 = vpack.c.bf16 %v7513_v34, %v7513_v34  ;;  %v7518_v18 = vmax.f32 %v6814_v62, %v7262_v3  ;;  %v7519_v27 = vmax.f32 %v6815_v51, %v7263_v40  ;;  %v7520_v26 = vmax.f32 %v6816_v0, %v7264_v52  ;;  %v12286_v57 = vld [vmem:[%s15704_s12 + $0xa0] sm:$0xf]  ;;  %18679 = vst [vmem:[#allocation24_spill] sm:$0xff] %v16963_v59  ;;  %v16965_v58 = vpop.f32.mrf.mxu0 }
 0x1f0   : > { %v7578_v43 = vpack.c.bf16 %v7514_v50, %v7514_v50  ;;  %v7579_v41 = vpack.c.bf16 %v7515_v19, %v7515_v19  ;;  %v7580_v54 = vpack.c.bf16 %v7516_v6, %v7516_v6  ;;  %v7581_v12 = vpack.c.bf16 %v7517_v35, %v7517_v35  ;;  %1235 = vst [vmem:[#allocation2 + $0x390] sm:$0xf] %v12286_v57  ;;  %v5881_v35 = vld [vmem:[#allocation3 + $0x10] sm:$0xf] }
 0x1f1   : > { %v7705_v29 = vunpack.c.l.b16 %v7577_v48  ;;  %v7582_v62 = vpack.c.bf16 %v7518_v18, %v7518_v18  ;;  %v7583_v51 = vpack.c.bf16 %v7519_v27, %v7519_v27  ;;  %v7584_v0 = vpack.c.bf16 %v7520_v26, %v7520_v26  ;;  %5734 = vmatpush.bf16.msra.mxu0 %v15031_v55  ;;  %5783 = vmatpush.bf16.msra.mxu1 %v15039_v17 }
 0x1f2   : > { %v7706_v49 = vunpack.c.l.b16 %v7578_v43  ;;  %v7707_v31 = vunpack.c.l.b16 %v7579_v41  ;;  %v7708_v45 = vunpack.c.l.b16 %v7580_v54  ;;  %v7709_v9 = vunpack.c.l.b16 %v7581_v12  ;;  %v5882_v43 = vld [vmem:[#allocation3 + $0x14] sm:$0xf] }
 0x1f3   : > { %v7710_v13 = vunpack.c.l.b16 %v7582_v62  ;;  %v7711_v15 = vunpack.c.l.b16 %v7583_v51  ;;  %v7712_v11 = vunpack.c.l.b16 %v7584_v0  ;;  %v13829_v3 = vunpack.i.l.s16 %v7705_v29 }
 0x1f4   : > { %v13830_v1 = vunpack.i.l.s16 %v7706_v49  ;;  %v13831_v38 = vunpack.i.l.s16 %v7707_v31  ;;  %v13832_v47 = vunpack.i.l.s16 %v7708_v45  ;;  %v13833_v34 = vunpack.i.l.s16 %v7709_v9  ;;  %v5461_v17 = vpop.f32.mrf.mxu2 }
 0x1f5   : > { %v13834_v40 = vunpack.i.l.s16 %v7710_v13  ;;  %v13835_v50 = vunpack.i.l.s16 %v7711_v15  ;;  %v13836_v28 = vunpack.i.l.s16 %v7712_v11  ;;  %v5945_v54 = vrot.slane %v5881_v35, 3 }
 0x1f6   : > { %v7897_v52 = vrot.slane %v13830_v1, 7  ;;  %v7899_v56 = vrot.slane %v13831_v38, 6  ;;  %v7901_v6 = vrot.slane %v13832_v47, 5  ;;  %v7903_v18 = vrot.slane %v13833_v34, 4  ;;  %v5412_v55 = vpop.f32.mrf.mxu1  ;;  %v5510_v0 = vpop.f32.mrf.mxu3  ;;  %v14927_v47 = vld [vmem:[#allocation2 + $0x324] sm:$0xf] }
 0x1f7   : > { %v7906_v26 = vrot.slane %v13834_v40, 3  ;;  %v7909_v41 = vrot.slane %v13835_v50, 2  ;;  %v7912_v29 = vrot.slane %v13836_v28, 1  ;;  %v5946_v62 = vrot.slane %v5882_v43, 3  ;;  %v4289_v49 = vpop.f32.mrf.mxu0  ;;  %v13245_v34 = vld [vmem:[#allocation2 + $0x344] sm:$0xf0] }
 0x1f8   : > { %v7898_v19 = vsel %vm5977_vm14, %v7897_v52, %v13829_v3  ;;  %v6028_v45 = vsel %vm5977_vm14, %v5881_v35, %v5945_v54  ;;  %v6031_v9 = vsel %vm5981_vm15, %v5881_v35, %v5945_v54  ;;  %v6034_v13 = vsel %vm5985_vm0, %v5881_v35, %v5945_v54  ;;  %v13251_v3 = vld [vmem:[#allocation2 + $0x328] sm:$0xf]  ;;  %v14932_v40 = vld [vmem:[#allocation2 + $0x348] sm:$0xf0]  ;;  %v13253_v50 = vld [vmem:[#allocation2 + $0x34c] sm:$0xf0] }
 0x1f9   : > { %v7900_v48 = vsel %vm5981_vm15, %v7899_v56, %v7898_v19  ;;  %v6040_v11 = vsel %vm5977_vm14, %v5882_v43, %v5946_v62  ;;  %v6043_v1 = vsel %vm5981_vm15, %v5882_v43, %v5946_v62  ;;  %v6046_v38 = vsel %vm5985_vm0, %v5882_v43, %v5946_v62  ;;  %v14928_v52 = vld [vmem:[#allocation2 + $0x32c] sm:$0xf]  ;;  %v13259_v56 = vld [vmem:[#allocation2 + $0x330] sm:$0xf]  ;;  %v14933_v28 = vld [vmem:[#allocation2 + $0x350] sm:$0xf0] }
 0x1fa   : > { %v7902_v27 = vsel %vm5985_vm0, %v7901_v6, %v7900_v48  ;;  %v16981_v19 = vsel %vm5973_vm4, %v5881_v35, %v5945_v54  ;;  %v6030_v6 = vrot.slane %v6028_v45, 1  ;;  %v6033_v48 = vrot.slane %v6031_v9, 2 }
 0x1fb   : > { %v7905_v32 = vsel %vm7904_vm1, %v7903_v18, %v7902_v27  ;;  %v6036_v18 = vrot.slane %v6034_v13, 3  ;;  %v12429_v27 = vld [vmem:[%s15704_s12 + $0xa8] sm:$0xf]  ;;  %v6497_v35 = vunpack.c.l.bf16 %v16981_v19  ;;  %v4288_v54 = vadd.f32 %v16965_v58, %v16622_v22 }
 0x1fc   : > { %v7908_v12 = vsel %vm7907_vm2, %v7906_v26, %v7905_v32  ;;  %2067 = vst [vmem:[#allocation2 + $0x378] sm:$0xf] %v12429_v27  ;;  %v5413_v45 = vadd.f32 %v16826_v5, %v5412_v55  ;;  %v13252_v9 = vor.u32 %v14932_v40, %v13251_v3  ;;  %v13256_v13 = vor.u32 %v14928_v52, %v13253_v50  ;;  %v12329_v3 = vld [vmem:[%s15704_s12 + $0x9c] sm:$0xf] }
 0x1fd   : > { %v7911_v57 = vsel %vm7910_vm3, %v7909_v41, %v7908_v12  ;;  %v12430_v41 = vld [vmem:[%s15704_s12 + $0xac] sm:$0xf]  ;;  %v16986_v12 = vsel %vm5973_vm4, %v5882_v43, %v5946_v62  ;;  %v13260_v43 = vor.u32 %v14933_v28, %v13259_v56  ;;  %v16994_v62 = vpop.f32.mrf.mxu2  ;;  %v17004_v58 = vunpack.c.l.bf16 %v6036_v18  ;;  %v12330_v56 = vld [vmem:[%s15704_s12 + $0xa0] sm:$0xf]  ;;  %v12377_v18 = vld [vmem:[%s15704_s12 + $0x9c] sm:$0xe] }
 0x1fe   : > { %v7914_v51 = vsel %vm7913_vm5, %v7912_v29, %v7911_v57  ;;  %v6042_v29 = vrot.slane %v6040_v11, 1  ;;  %v6045_v57 = vrot.slane %v6043_v1, 2  ;;  %v16988_v59 = vpop.f32.mrf.mxu1  ;;  %2068 = vst [vmem:[#allocation2 + $0x39c] sm:$0xf] %v12430_v41  ;;  %v16998_v11 = vunpack.c.l.bf16 %v6030_v6  ;;  %5607 = vmatmul.bf16.gmra.mxu1 %v13252_v9  ;;  %5656 = vmatmul.bf16.gmra.mxu2 %v13256_v13 }
 0x1ff   : > { %v8013_v31 = vpack.c.b16 %v7914_v51, %v7914_v51  ;;  %v6048_v51 = vrot.slane %v6046_v38, 3  ;;  %18680 = vst [vmem:[#allocation25_spill] sm:$0xff] %v16994_v62  ;;  %v17000_v1 = vunpack.c.l.bf16 %v6033_v48  ;;  %v5462_v38 = vadd.f32 %v5461_v17, %v5413_v45  ;;  %5705 = vmatmul.bf16.gmra.mxu3 %v13260_v43  ;;  %v12331_v48 = vld [vmem:[%s15704_s12 + $0xa4] sm:$0x1] }
 0x200   : > { %v18651_v55 = vunpack.c.l.bf16 %v16986_v12  ;;  %v17011_v52 = vunpack.c.l.bf16 %v6042_v29  ;;  %v17016_v28 = vunpack.c.l.bf16 %v6045_v57  ;;  %v1582_v41 = vshll.u32 %v12329_v3, 16  ;;  %v12378_v29 = vld [vmem:[%s15704_s12 + $0xa0] sm:$0xf]  ;;  %v12379_v45 = vld [vmem:[%s15704_s12 + $0xa4] sm:$0x1] }
 0x201   : > { %v8029_v15 = vshrl.u32 %v8013_v31, 16  ;;  %v8032_v32 = vshll.u32 %v8013_v31, 16  ;;  %v13248_v31 = vor.u32 %v14927_v47, %v13245_v34  ;;  %v4290_v47 = vadd.f32 %v4289_v49, %v16642_v42  ;;  %v4292_v34 = vpop.f32.mrf.mxu0 }
 0x202   : > { %v17013_v50 = vadd.f32 %v5510_v0, %v5462_v38  ;;  %v17018_v6 = vunpack.c.l.bf16 %v6048_v51  ;;  %v4318_v42 = vmax.f32 %v4288_v54, 0.0  ;;  %v1588_v9 = vshll.u32 %v12330_v56, 16 }
 0x203   : > { %v8031_v26 = vrot.slane %v8029_v15, 7  ;;  %5558 = vmatmul.bf16.gmra.mxu0 %v13248_v31  ;;  %v4319_v49 = vmax.f32 %v4290_v47, 0.0  ;;  %v13709_v31 = vrot.slane %v6497_v35, 9  ;;  %v1592_v13 = vshrl.u32 %v12330_v56, 16  ;;  %v14936_v56 = vld [vmem:[#allocation2 + $0x36c] sm:$0xf] }
 0x204   : > { %v1584_v51 = vrot.slane %v1582_v41, 5  ;;  %v1598_v43 = vshll.u32 %v12331_v48, 16  ;;  %v12401_v54 = vrot.slane %v12377_v18, 9  ;;  %v1590_v38 = vrot.slane %v1588_v9, 5 }
 0x205   : > { %v8034_v21 = vor.u32 %v8032_v32, %v8031_v26  ;;  %v1579_v32 = vshrl.u32 %v12329_v3, 16  ;;  %v15250_v0 = vpack.c.bf16 %v4319_v49, %v4318_v42  ;;  %v1920_v47 = vrot.slane %v12378_v29, 5 }
 0x206   : > { %v13710_v3 = vrot.slane %v16998_v11, 9  ;;  %v13712_v41 = vrot.slane %v17004_v58, 9  ;;  %v4293_v29 = vadd.f32 %v4292_v34, %v16672_v63 }
 0x207   : > { %v8097_v15 = vsel %vm15722_vm8, 0, %v8034_v21  ;;  %v17008_v21 = vpop.f32.mrf.mxu3  ;;  %v1581_v57 = vrot.slane %v1579_v32, 4  ;;  %15339 = vst [vmem:[#allocation3 + $0x18] sm:$0xff] %v15250_v0   ;;  %v1600_v32 = vrot.slane %v1598_v43, 5  ;;  %v1921_v48 = vsel %vm15782_vm13, %v12401_v54, %v1920_v47  ;;  %v14942_v43 = vld [vmem:[#allocation2 + $0x398] sm:$0xf0] }
 0x208   : > { %v8109_v22 = vsel %vm15737_vm9, %v8097_v15, 0  ;;  %18681 = vst [vmem:[#allocation26_spill] sm:$0xff] %v17008_v21  ;;  %v5417_v15 = vpop.f32.mrf.mxu1  ;;  %v1922_v18 = vrot.slane %v1920_v47, 4 }
 0x209   : > { %v8128_v40 = vunpack.c.l.b16 %v8109_v22  ;;  %v8129_v17 = vunpack.c.h.b16 %v8109_v22  ;;  %v1594_v22 = vrot.slane %v1592_v13, 4  ;;  %v5418_v42 = vadd.f32 %v16826_v5, %v5417_v15  ;;  %2002 = vst [vmem:[#allocation2 + $0x374] sm:$0xf] %v1921_v48  ;;  %v4294_v15 = vpop.f32.mrf.mxu0 }
 0x20a   : > { %v1585_v49 = vor.u32 %v1584_v51, %v1581_v57  ;;  %v13713_v5 = vrot.slane %v18651_v55, 9  ;;  %v13295_v51 = vld [vmem:[#allocation2 + $0x378] sm:$0xf]  ;;  %v4295_v47 = vadd.f32 %v4294_v15, %v16703_v23  ;;  %v6817_v23 = vmax.f32 %v6497_v35, %v13709_v31 }
 0x20b   : > { %v8146_v27 = vpack.c.b16 %v8128_v40, %v8128_v40  ;;  %v8147_v26 = vpack.c.b16 %v8129_v17, %v8129_v17  ;;  %v1923_v40 = vrot.slane %v12379_v45, 5  ;;  %v13711_v17 = vrot.slane %v17000_v1, 9  ;;  %v13281_v45 = vld [vmem:[#allocation2 + $0x38c] sm:$0xf0] }
 0x20c   : > { %v1586_v9 = vrot.slane %v1585_v49, 4  ;;  %v13715_v49 = vrot.slane %v17016_v28, 9  ;;  %v13296_v55 = vor.u32 %v14942_v43, %v13295_v51 }
 0x20d   : > { %8182 = vst [vmem:[#allocation4 + $0x8] sm:$0xf] %v8146_v27  ;;  %v1595_v27 = vor.u32 %v1594_v22, %v1590_v38  ;;  %v1924_v57 = vsel %vm15782_vm13, %v1922_v18, %v1923_v40  ;;  %v13714_v22 = vrot.slane %v17011_v52, 9  ;;  %v13716_v40 = vrot.slane %v17018_v6, 9  ;;  %v12288_v18 = vld [vmem:[%s15704_s12 + $0xac] sm:$0xf] }
 0x20e   : > { %8183 = vst [vmem:[#allocation4 + $0xc] sm:$0x1] %v8147_v26  ;;  %v5466_v26 = vpop.f32.mrf.mxu2  ;;  %v1591_v63 = vsel %vm15774_vm12, %v1586_v9, %v1590_v38  ;;  %v4321_v38 = vmax.f32 %v4295_v47, 0.0  ;;  %v17050_v9 = vld [vmem:[%s15704_s12 + $0xa8] sm:$0xf]  ;;  %v6823_v19 = vmax.f32 %v17016_v28, %v13715_v49 }
 0x20f   : > { %v5467_v0 = vadd.f32 %v5466_v26, %v5418_v42  ;;  %v1596_v13 = vrot.slane %v1595_v27, 4  ;;  %v5515_v54 = vpop.f32.mrf.mxu3  ;;  %2003 = vst [vmem:[#allocation2 + $0x398] sm:$0xf] %v1924_v57  ;;  %v12287_v42 = vld [vmem:[%s15704_s12 + $0xa8] sm:$0xf]  ;;  %v13284_v27 = vor.u32 %v14936_v56, %v13281_v45  ;;  %v4320_v26 = vmax.f32 %v4293_v29, 0.0  ;;  %5710 = vmatmul.bf16.gmra.mxu3 %v13296_v55 }
 0x210   : > { %1730 = vst [vmem:[#allocation2 + $0x370] sm:$0xf] %v1591_v63  ;;  %v6819_v57 = vmax.f32 %v17000_v1, %v13711_v17  ;;  %v6820_v56 = vmax.f32 %v17004_v58, %v13712_v41  ;;  %v5883_v45 = vld [vmem:[#allocation3 + $0x18] sm:$0xf]  ;;  %v6822_v15 = vmax.f32 %v17011_v52, %v13714_v22  ;;  %v6824_v35 = vmax.f32 %v17018_v6, %v13716_v40 }
 0x211   : > { %v17040_v34 = vadd.f32 %v5515_v54, %v5467_v0  ;;  %v1601_v48 = vsel %vm15774_vm12, %v1596_v13, %v1600_v32  ;;  %v6818_v0 = vmax.f32 %v16998_v11, %v13710_v3  ;;  %v5884_v54 = vld [vmem:[#allocation3 + $0x1c] sm:$0xf]  ;;  %1236 = vst [vmem:[#allocation2 + $0x3b4] sm:$0xf] %v12287_v42  ;;  %v18682_v32 = vunpack.c.l.bf16 %v16986_v12 }
 0x212   : > { %1731 = vst [vmem:[#allocation2 + $0x394] sm:$0xf] %v1601_v48  ;;  %v5947_v13 = vrot.slane %v5883_v45, 3  ;;  %v5948_v51 = vrot.slane %v5884_v54, 3  ;;  %v15255_v43 = vpack.c.bf16 %v4321_v38, %v4320_v26  ;;  %v1603_v11 = vshrl.u32 %v17050_v9, 16 }
 0x213   : > { %v6821_v29 = vmax.f32 %v18682_v32, %v13713_v5  ;;  %1237 = vst [vmem:[#allocation2 + $0x3d8] sm:$0xf] %v12288_v18  ;;  %5563 = vmatmul.bf16.gmra.mxu0 %v13284_v27 }
 0x214   : > { %v6051_v1 = vsel %vm5973_vm4, %v5883_v45, %v5947_v13  ;;  %v6052_v58 = vsel %vm5977_vm14, %v5883_v45, %v5947_v13  ;;  %v6055_v12 = vsel %vm5981_vm15, %v5883_v45, %v5947_v13  ;;  %v6058_v31 = vsel %vm5985_vm0, %v5883_v45, %v5947_v13  ;;  %15340 = vst [vmem:[#allocation3 + $0x20] sm:$0xff] %v15255_v43  }
 0x215   : > { %v6054_v3 = vrot.slane %v6052_v58, 1  ;;  %v6057_v17 = vrot.slane %v6055_v12, 2  ;;  %v6060_v41 = vrot.slane %v6058_v31, 3  ;;  %v6063_v52 = vsel %vm5973_vm4, %v5884_v54, %v5948_v51 }
 0x216   : > { %v6064_v28 = vsel %vm5977_vm14, %v5884_v54, %v5948_v51  ;;  %v6067_v6 = vsel %vm5981_vm15, %v5884_v54, %v5948_v51  ;;  %v6070_v5 = vsel %vm5985_vm0, %v5884_v54, %v5948_v51  ;;  %v6945_v22 = vunpack.c.l.bf16 %v6051_v1 }
 0x217   : > { %v6066_v63 = vrot.slane %v6064_v28, 1  ;;  %v6069_v47 = vrot.slane %v6067_v6, 2  ;;  %v6072_v42 = vrot.slane %v6070_v5, 3  ;;  %v6946_v49 = vunpack.c.l.bf16 %v6054_v3 }
 0x218   : > { %v6947_v40 = vunpack.c.l.bf16 %v6057_v17  ;;  %v6948_v27 = vunpack.c.l.bf16 %v6060_v41  ;;  %v6949_v55 = vunpack.c.l.bf16 %v6063_v52  ;;  %v13773_v48 = vrot.slane %v6945_v22, 9 }
 0x219   : > { %v6950_v18 = vunpack.c.l.bf16 %v6066_v63  ;;  %v6951_v26 = vunpack.c.l.bf16 %v6069_v47  ;;  %v6952_v38 = vunpack.c.l.bf16 %v6072_v42  ;;  %v13774_v45 = vrot.slane %v6946_v49, 9  ;;  %v15030_v63 = vld [vmem:[%s18640_s1 + $0x1d8] sm:$0xff] }
 0x21a   : > { %v13775_v32 = vrot.slane %v6947_v40, 9  ;;  %v13776_v13 = vrot.slane %v6948_v27, 9  ;;  %v13777_v43 = vrot.slane %v6949_v55, 9  ;;  %v7265_v58 = vmax.f32 %v6945_v22, %v13773_v48  ;;  %v15038_v22 = vld [vmem:[%s18640_s1 + $0x218] sm:$0xff]  ;;  %5735 = vmatpush.bf16.msra.mxu0 %v15030_v63 }
 0x21b   : > { %v13778_v12 = vrot.slane %v6950_v18, 9  ;;  %v13779_v31 = vrot.slane %v6951_v26, 9  ;;  %v13780_v54 = vrot.slane %v6952_v38, 9  ;;  %v7266_v51 = vmax.f32 %v6946_v49, %v13774_v45  ;;  %5784 = vmatpush.bf16.msra.mxu1 %v15038_v22 }
 0x21c   : > { %v7267_v1 = vmax.f32 %v6947_v40, %v13775_v32  ;;  %v7268_v3 = vmax.f32 %v6948_v27, %v13776_v13  ;;  %v7269_v17 = vmax.f32 %v6949_v55, %v13777_v43  ;;  %v7521_v41 = vmax.f32 %v6817_v23, %v7265_v58  ;;  %v12431_v40 = vld [vmem:[%s15704_s12 + $0xb4] sm:$0xf]  ;;  %v12432_v27 = vld [vmem:[%s15704_s12 + $0xb8] sm:$0xf]  ;;  %v17079_v13 = vpop.f32.mrf.mxu1 }
 0x21d   : > { %v7270_v52 = vmax.f32 %v6950_v18, %v13778_v12  ;;  %v7271_v28 = vmax.f32 %v6951_v26, %v13779_v31  ;;  %v7272_v6 = vmax.f32 %v6952_v38, %v13780_v54  ;;  %v7522_v5 = vmax.f32 %v6818_v0, %v7266_v51  ;;  %18683 = vst [vmem:[#allocation27_spill] sm:$0xff] %v17079_v13  ;;  %v13287_v58 = vld [vmem:[#allocation2 + $0x370] sm:$0xf]  ;;  %v14941_v12 = vld [vmem:[#allocation2 + $0x390] sm:$0xf0] }
 0x21e   : > { %v7523_v47 = vmax.f32 %v6819_v57, %v7267_v1  ;;  %v7524_v42 = vmax.f32 %v6820_v56, %v7268_v3  ;;  %v7525_v49 = vmax.f32 %v6821_v29, %v7269_v17  ;;  %v7585_v48 = vpack.c.bf16 %v7521_v41, %v7521_v41  ;;  %2069 = vst [vmem:[#allocation2 + $0x3c0] sm:$0xf] %v12431_v40  ;;  %v14937_v17 = vld [vmem:[#allocation2 + $0x374] sm:$0xf]  ;;  %v13289_v41 = vld [vmem:[#allocation2 + $0x394] sm:$0xf0]  ;;  %v17086_v40 = vpop.f32.mrf.mxu0 }
 0x21f   : > { %v7526_v55 = vmax.f32 %v6822_v15, %v7270_v52  ;;  %v7527_v23 = vmax.f32 %v6823_v19, %v7271_v28  ;;  %v7528_v18 = vmax.f32 %v6824_v35, %v7272_v6  ;;  %v7586_v26 = vpack.c.bf16 %v7522_v5, %v7522_v5  ;;  %2070 = vst [vmem:[#allocation2 + $0x3e4] sm:$0xf] %v12432_v27  ;;  %v17082_v52 = vpop.f32.mrf.mxu2  ;;  %v14945_v27 = vld [vmem:[#allocation2 + $0x3b4] sm:$0xf] }
 0x220   : > { %v7587_v0 = vpack.c.bf16 %v7523_v47, %v7523_v47  ;;  %v7588_v38 = vpack.c.bf16 %v7524_v42, %v7524_v42  ;;  %v7589_v45 = vpack.c.bf16 %v7525_v49, %v7525_v49  ;;  %v7713_v32 = vunpack.c.l.b16 %v7585_v48  ;;  %18684 = vst [vmem:[#allocation28_spill] sm:$0xff] %v17082_v52  ;;  %v5885_v49 = vld [vmem:[#allocation3 + $0x20] sm:$0xf]  ;;  %v17084_v48 = vpop.f32.mrf.mxu3 }
 0x221   : > { %v7590_v43 = vpack.c.bf16 %v7526_v55, %v7526_v55  ;;  %v7591_v57 = vpack.c.bf16 %v7527_v23, %v7527_v23  ;;  %v7592_v56 = vpack.c.bf16 %v7528_v18, %v7528_v18  ;;  %v7714_v29 = vunpack.c.l.b16 %v7586_v26  ;;  %18685 = vst [vmem:[#allocation29_spill] sm:$0xff] %v17084_v48  ;;  %v5886_v26 = vld [vmem:[#allocation3 + $0x24] sm:$0xf] }
 0x222   : > { %v7715_v15 = vunpack.c.l.b16 %v7587_v0  ;;  %v7716_v19 = vunpack.c.l.b16 %v7588_v38  ;;  %v7717_v35 = vunpack.c.l.b16 %v7589_v45  ;;  %v1606_v31 = vshll.u32 %v17050_v9, 16  ;;  %v13317_v0 = vld [vmem:[#allocation2 + $0x3d4] sm:$0xf0]  ;;  %v15029_v9 = vld [vmem:[%s18640_s1 + $0x1d0] sm:$0xff] }
 0x223   : > { %v7718_v54 = vunpack.c.l.b16 %v7590_v43  ;;  %v7719_v51 = vunpack.c.l.b16 %v7591_v57  ;;  %v7720_v1 = vunpack.c.l.b16 %v7592_v56  ;;  %v13838_v3 = vunpack.i.l.s16 %v7714_v29  ;;  %v12333_v57 = vld [vmem:[%s15704_s12 + $0xac] sm:$0xf]  ;;  %5736 = vmatpush.bf16.msra.mxu0 %v15029_v9 }
 0x224   : > { %v13839_v28 = vunpack.i.l.s16 %v7715_v15  ;;  %v13840_v6 = vunpack.i.l.s16 %v7716_v19  ;;  %v13841_v5 = vunpack.i.l.s16 %v7717_v35  ;;  %v13288_v63 = vor.u32 %v14941_v12, %v13287_v58 }
 0x225   : > { %v13837_v22 = vunpack.i.l.s16 %v7713_v32  ;;  %v13842_v47 = vunpack.i.l.s16 %v7718_v54  ;;  %v7915_v42 = vrot.slane %v13838_v3, 7  ;;  %v13843_v55 = vunpack.i.l.s16 %v7719_v51  ;;  %v5422_v3 = vpop.f32.mrf.mxu1 }
 0x226   : > { %v7917_v23 = vrot.slane %v13839_v28, 6  ;;  %5612 = vmatmul.bf16.gmra.mxu1 %v13288_v63  ;;  %v13292_v18 = vor.u32 %v14937_v17, %v13289_v41  ;;  %v1605_v38 = vrot.slane %v1603_v11, 4  ;;  %v13844_v45 = vunpack.i.l.s16 %v7720_v1  ;;  %v15037_v11 = vld [vmem:[%s18640_s1 + $0x210] sm:$0xff] }
 0x227   : > { %v7916_v32 = vsel %vm5977_vm14, %v7915_v42, %v13837_v22  ;;  %v7919_v43 = vrot.slane %v13840_v6, 5  ;;  %v1608_v56 = vrot.slane %v1606_v31, 5  ;;  %v7921_v58 = vrot.slane %v13841_v5, 4  ;;  %5785 = vmatpush.bf16.msra.mxu1 %v15037_v11 }
 0x228   : > { %v7918_v29 = vsel %vm5981_vm15, %v7917_v23, %v7916_v32  ;;  %5661 = vmatmul.bf16.gmra.mxu2 %v13292_v18  ;;  %v5949_v12 = vrot.slane %v5885_v49, 3  ;;  %v7923_v19 = vrot.slane %v13842_v47, 3  ;;  %v5950_v35 = vrot.slane %v5886_v26, 3  ;;  %v17108_v23 = vpop.f32.mrf.mxu2  ;;  %v12289_v32 = vld [vmem:[%s15704_s12 + $0xb4] sm:$0xf] }
 0x229   : > { %v7920_v15 = vsel %vm5985_vm0, %v7919_v43, %v7918_v29  ;;  %v13320_v54 = vor.u32 %v14945_v27, %v13317_v0  ;;  %v7925_v51 = vrot.slane %v13843_v55, 2  ;;  %v1612_v17 = vshll.u32 %v12333_v57, 16  ;;  %v12290_v43 = vld [vmem:[%s15704_s12 + $0xb8] sm:$0xf]  ;;  %v17116_v29 = vpop.f32.mrf.mxu3  ;;  %1238 = vst [vmem:[#allocation2 + $0x3fc] sm:$0xf] %v12289_v32 }
 0x22a   : > { %v7922_v31 = vsel %vm7904_vm1, %v7921_v58, %v7920_v15  ;;  %v6076_v1 = vsel %vm5977_vm14, %v5885_v49, %v5949_v12  ;;  %v7927_v28 = vrot.slane %v13844_v45, 1  ;;  %v6079_v6 = vsel %vm5981_vm15, %v5885_v49, %v5949_v12  ;;  %v17118_v58 = vpop.f32.mrf.mxu0  ;;  %1239 = vst [vmem:[#allocation2 + $0x420] sm:$0xf] %v12290_v43  ;;  %v12382_v32 = vld [vmem:[%s15704_s12 + $0xb0] sm:$0x1] }
 0x22b   : > { %v7924_v41 = vsel %vm7907_vm2, %v7923_v19, %v7922_v31  ;;  %5568 = vmatmul.bf16.gmra.mxu0 %v13320_v54  ;;  %v1609_v5 = vor.u32 %v1608_v56, %v1605_v38  ;;  %v1616_v22 = vshrl.u32 %v12333_v57, 16  ;;  %v6078_v42 = vrot.slane %v6076_v1, 1 }
 0x22c   : > { %v7926_v63 = vsel %vm7910_vm3, %v7925_v51, %v7924_v41  ;;  %v6082_v27 = vsel %vm5985_vm0, %v5885_v49, %v5949_v12  ;;  %v6088_v55 = vsel %vm5977_vm14, %v5886_v26, %v5950_v35  ;;  %v17111_v0 = vsel %vm5973_vm4, %v5885_v49, %v5949_v12  ;;  %v12334_v41 = vld [vmem:[%s15704_s12 + $0xb0] sm:$0x1] }
 0x22d   : > { %v7928_v47 = vsel %vm7913_vm5, %v7927_v28, %v7926_v63  ;;  %v6081_v45 = vrot.slane %v6079_v6, 2  ;;  %v6091_v38 = vsel %vm5981_vm15, %v5886_v26, %v5950_v35  ;;  %v1610_v57 = vrot.slane %v1609_v5, 4  ;;  %v17136_v5 = vld [vmem:[#allocation6] ss:$0 sm:$0xff]  ;;  %v12433_v63 = vld [vmem:[%s15704_s12 + $0xc0] sm:$0xf] }
 0x22e   : > { %v8014_v18 = vpack.c.b16 %v7928_v47, %v7928_v47  ;;  %v1614_v56 = vrot.slane %v1612_v17, 5  ;;  %v6084_v19 = vrot.slane %v6082_v27, 3  ;;  %v17121_v54 = vsel %vm5973_vm4, %v5886_v26, %v5950_v35  ;;  %v12434_v47 = vld [vmem:[%s15704_s12 + $0xc4] sm:$0xf]  ;;  %2071 = vst [vmem:[#allocation2 + $0x408] sm:$0xf] %v12433_v63 }
 0x22f   : > { %v6090_v49 = vrot.slane %v6088_v55, 1  ;;  %v6093_v12 = vrot.slane %v6091_v38, 2  ;;  %v17124_v9 = vsel %vm5985_vm0, %v5886_v26, %v5950_v35  ;;  %v18652_v11 = vunpack.c.l.bf16 %v17111_v0  ;;  %v12381_v35 = vld [vmem:[%s15704_s12 + $0xac] sm:$0xf]  ;;  %2072 = vst [vmem:[#allocation2 + $0x42c] sm:$0xf] %v12434_v47 }
 0x230   : > { %v8036_v15 = vshrl.u32 %v8014_v18, 16  ;;  %v17127_v31 = vunpack.c.l.bf16 %v6078_v42  ;;  %v8039_v1 = vshll.u32 %v8014_v18, 16  ;;  %v17129_v17 = vunpack.c.l.bf16 %v6081_v45  ;;  %v17147_v45 = vpop.f32.mrf.mxu1  ;;  %v17166_v47 = vpop.f32.mrf.mxu2 }
 0x231   : > { %v1618_v28 = vrot.slane %v1616_v22, 4  ;;  %v17134_v6 = vadd.f32 %v17086_v40, %v16731_v8  ;;  %v5423_v26 = vadd.f32 %v17136_v5, %v5422_v3  ;;  %v6096_v27 = vrot.slane %v17124_v9, 3  ;;  %v12380_v22 = vld [vmem:[%s15704_s12 + $0xa8] sm:$0xe]  ;;  %18686 = vst [vmem:[#allocation30_spill] sm:$0xff] %v17147_v45 }
 0x232   : > { %v8038_v51 = vrot.slane %v8036_v15, 7  ;;  %v17143_v55 = vunpack.c.l.bf16 %v6084_v19  ;;  %v17149_v8 = vunpack.c.l.bf16 %v6090_v49  ;;  %v17151_v40 = vunpack.c.l.bf16 %v6093_v12  ;;  %v13331_v12 = vld [vmem:[#allocation2 + $0x3c0] sm:$0xf]  ;;  %v14951_v9 = vld [vmem:[#allocation2 + $0x3e0] sm:$0xf0]  ;;  %18687 = vst [vmem:[#allocation31_spill] sm:$0xff] %v17166_v47 }
 0x233   : > { %v17155_v3 = vrot.slane %v18652_v11, 9  ;;  %v1615_v19 = vsel %vm15774_vm12, %v1610_v57, %v1614_v56  ;;  %v1619_v49 = vor.u32 %v1618_v28, %v1614_v56  ;;  %v12402_v63 = vrot.slane %v12380_v22, 9  ;;  %v12335_v45 = vld [vmem:[%s15704_s12 + $0xb4] sm:$0xf]  ;;  %v13353_v22 = vld [vmem:[#allocation2 + $0x41c] sm:$0xf0] }
 0x234   : > { %v8041_v42 = vor.u32 %v8039_v1, %v8038_v51  ;;  %v1622_v1 = vshll.u32 %v12334_v41, 16  ;;  %1732 = vst [vmem:[#allocation2 + $0x3b8] sm:$0xf] %v1615_v19  ;;  %v1927_v38 = vrot.slane %v12381_v35, 5  ;;  %v1930_v15 = vrot.slane %v12382_v32, 5  ;;  %v4302_v41 = vpop.f32.mrf.mxu0 }
 0x235   : > { %v1620_v18 = vrot.slane %v1619_v49, 4  ;;  %v13332_v48 = vor.u32 %v14951_v9, %v13331_v12  ;;  %v14954_v35 = vld [vmem:[#allocation2 + $0x3fc] sm:$0xf]  ;;  %v5472_v32 = vadd.f32 %v17108_v23, %v5423_v26  ;;  %v4300_v49 = vadd.f32 %v17118_v58, %v16759_v14  ;;  %v12384_v23 = vld [vmem:[%s15704_s12 + $0xb8] sm:$0xf] }
 0x236   : > { %v8098_v43 = vsel %vm15722_vm8, 0, %v8041_v42  ;;  %v1624_v57 = vrot.slane %v1622_v1, 5  ;;  %v1928_v56 = vsel %vm15782_vm13, %v12402_v63, %v1927_v38  ;;  %v1929_v28 = vrot.slane %v1927_v38, 4  ;;  %v12336_v1 = vld [vmem:[%s15704_s12 + $0xb8] sm:$0xf] }
 0x237   : > { %v8110_v51 = vsel %vm15737_vm9, %v8098_v43, 0  ;;  %v17171_v43 = vpop.f32.mrf.mxu3  ;;  %2004 = vst [vmem:[#allocation2 + $0x3bc] sm:$0xf] %v1928_v56  ;;  %v12337_v63 = vld [vmem:[%s15704_s12 + $0xbc] sm:$0x1]  ;;  %v18689_v12 = vunpack.c.l.bf16 %v17121_v54  ;;  %5715 = vmatmul.bf16.gmra.mxu3 %v13332_v48  ;;  %v17191_v58 = vadd.f32 %v17116_v29, %v5472_v32  ;;  %v4323_v26 = vmax.f32 %v4300_v49, 0.0 }
 0x238   : > { %v8130_v11 = vunpack.c.l.b16 %v8110_v51  ;;  %v8131_v42 = vunpack.c.h.b16 %v8110_v51  ;;  %18688 = vst [vmem:[#allocation32_spill] sm:$0xff] %v17171_v43  ;;  %v4322_v43 = vmax.f32 %v17134_v6, 0.0  ;;  %v1931_v14 = vsel %vm15782_vm13, %v1929_v28, %v1930_v15  ;;  %v12385_v38 = vld [vmem:[%s15704_s12 + $0xbc] sm:$0x1]  ;;  %v15086_v48 = vld [vmem:[#allocation8 + $0x38] sm:$0xff]  ;;  %v5427_v52 = vpop.f32.mrf.mxu1 }
 0x239   : > { %v17181_v9 = vrot.slane %v18689_v12, 9  ;;  %v13356_v56 = vor.u32 %v14954_v35, %v13353_v22  ;;  %v17194_v12 = vunpack.c.l.bf16 %v6096_v27  ;;  %v1627_v47 = vshrl.u32 %v12335_v45, 16  ;;  %2005 = vst [vmem:[#allocation2 + $0x3e0] sm:$0xf] %v1931_v14  ;;  %9726 = vmatpush.bf16.msra.mxu2 %v15086_v48  ;;  %v15085_v14 = vld [vmem:[#allocation8 + $0x30] sm:$0xff] }
 0x23a   : > { %v8148_v19 = vpack.c.b16 %v8130_v11, %v8130_v11  ;;  %v8149_v51 = vpack.c.b16 %v8131_v42, %v8131_v42  ;;  %v1625_v11 = vsel %vm15774_vm12, %v1620_v18, %v1624_v57  ;;  %v12383_v42 = vld [vmem:[%s15704_s12 + $0xb4] sm:$0xe]  ;;  %v1630_v18 = vshll.u32 %v12335_v45, 16  ;;  %v15093_v57 = vld [vmem:[#allocation8 + $0x70] sm:$0xff] }
 0x23b   : > { %1733 = vst [vmem:[#allocation2 + $0x3dc] sm:$0xf] %v1625_v11  ;;  %5573 = vmatmul.bf16.gmra.mxu0 %v13356_v56  ;;  %v1636_v15 = vshll.u32 %v12336_v1, 16  ;;  %v1640_v29 = vshrl.u32 %v12336_v1, 16  ;;  %v5428_v28 = vadd.f32 %v17136_v5, %v5427_v52  ;;  %v1629_v35 = vrot.slane %v1627_v47, 4  ;;  %v5476_v1 = vpop.f32.mrf.mxu2 }
 0x23c   : > { %8184 = vst [vmem:[#allocation4 + $0x10] sm:$0xf] %v8148_v19  ;;  %v15260_v19 = vpack.c.bf16 %v4323_v26, %v4322_v43  ;;  %v1632_v22 = vrot.slane %v1630_v18, 5  ;;  %v1646_v27 = vshll.u32 %v12337_v63, 16  ;;  %v12403_v49 = vrot.slane %v12383_v42, 9 }
 0x23d   : > { %8185 = vst [vmem:[#allocation4 + $0x14] sm:$0x1] %v8149_v51  ;;  %v15094_v51 = vld [vmem:[#allocation8 + $0x78] sm:$0xff]  ;;  %v1638_v32 = vrot.slane %v1636_v15, 5  ;;  %v1642_v45 = vrot.slane %v1640_v29, 4  ;;  %v1934_v6 = vrot.slane %v12384_v23, 5  ;;  %v4303_v11 = vadd.f32 %v4302_v41, %v16774_v30  ;;  %9727 = vmatpush.bf16.msra.mxu2 %v15085_v14 }
 0x23e   : > { %15341 = vst [vmem:[#allocation3 + $0x28] sm:$0xff] %v15260_v19   ;;  %v1633_v43 = vor.u32 %v1632_v22, %v1629_v35  ;;  %v1648_v26 = vrot.slane %v1646_v27, 5  ;;  %v1937_v56 = vrot.slane %v12385_v38, 5  ;;  %9755 = vmatpush.bf16.msra.mxu3 %v15094_v51  ;;  %v13323_v52 = vld [vmem:[#allocation2 + $0x3b8] sm:$0xf]  ;;  %v5477_v19 = vadd.f32 %v5476_v1, %v5428_v28  ;;  %v4304_v35 = vpop.f32.mrf.mxu0 }
 0x23f   : > { %v14946_v47 = vld [vmem:[#allocation2 + $0x3bc] sm:$0xf]  ;;  %v1643_v63 = vor.u32 %v1642_v45, %v1638_v32  ;;  %v1935_v18 = vsel %vm15782_vm13, %v12403_v49, %v1934_v6  ;;  %v1936_v48 = vrot.slane %v1934_v6, 4  ;;  %v13367_v42 = vld [vmem:[#allocation2 + $0x408] sm:$0xf]  ;;  %v13724_v30 = vrot.slane %v17194_v12, 9  ;;  %v5525_v29 = vpop.f32.mrf.mxu3 }
 0x240   : > { %v14960_v23 = vld [vmem:[#allocation2 + $0x428] sm:$0xf0]  ;;  %v18690_v41 = vunpack.c.l.bf16 %v17111_v0  ;;  %v1634_v15 = vrot.slane %v1633_v43, 4  ;;  %2006 = vst [vmem:[#allocation2 + $0x404] sm:$0xf] %v1935_v18  ;;  %v17211_v51 = vadd.f32 %v5525_v29, %v5477_v19  ;;  %v4305_v28 = vadd.f32 %v4304_v35, %v16789_v37  ;;  %v15084_v14 = vld [vmem:[#allocation8 + $0x28] sm:$0xff] }
 0x241   : > { %v12291_v22 = vld [vmem:[%s15704_s12 + $0xc0] sm:$0xf]  ;;  %v1644_v27 = vrot.slane %v1643_v63, 4  ;;  %v1938_v6 = vsel %vm15782_vm13, %v1936_v48, %v1937_v56  ;;  %v12292_v45 = vld [vmem:[%s15704_s12 + $0xc4] sm:$0xf]  ;;  %v18691_v0 = vrot.slane %v17127_v31, 9  ;;  %9728 = vmatpush.bf16.msra.mxu2 %v15084_v14 }
 0x242   : > { %v17206_v38 = vmax.f32 %v18690_v41, %v17155_v3  ;;  %1240 = vst [vmem:[#allocation2 + $0x444] sm:$0xf] %v12291_v22  ;;  %v18692_v49 = vrot.slane %v17129_v17, 9  ;;  %v14950_v1 = vld [vmem:[#allocation2 + $0x3d8] sm:$0xf0]  ;;  %v1639_v56 = vsel %vm15774_vm12, %v1634_v15, %v1638_v32  ;;  %9756 = vmatpush.bf16.msra.mxu3 %v15093_v57  ;;  %v15092_v37 = vld [vmem:[#allocation8 + $0x68] sm:$0xff]  ;;  %v13368_v57 = vor.u32 %v14960_v23, %v13367_v42 }
 0x243   : > { %v17218_v3 = vmax.f32 %v17127_v31, %v18691_v0  ;;  %2007 = vst [vmem:[#allocation2 + $0x428] sm:$0xf] %v1938_v6  ;;  %v13324_v63 = vor.u32 %v14950_v1, %v13323_v52  ;;  %v13325_v18 = vld [vmem:[#allocation2 + $0x3dc] sm:$0xf0]  ;;  %v4324_v48 = vmax.f32 %v4303_v11, 0.0  ;;  %v1649_v31 = vsel %vm15774_vm12, %v1644_v27, %v1648_v26 }
 0x244   : > { %v17223_v43 = vmax.f32 %v17129_v17, %v18692_v49  ;;  %1734 = vst [vmem:[#allocation2 + $0x400] sm:$0xf] %v1639_v56  ;;  %v4325_v19 = vmax.f32 %v4305_v28, 0.0  ;;  %v18693_v41 = vrot.slane %v17143_v55, 9  ;;  %v13328_v29 = vor.u32 %v14946_v47, %v13325_v18 }
 0x245   : > { %v5887_v35 = vld [vmem:[#allocation3 + $0x28] sm:$0xf]  ;;  %v5888_v32 = vld [vmem:[#allocation3 + $0x2c] sm:$0xf]  ;;  %1735 = vst [vmem:[#allocation2 + $0x424] sm:$0xf] %v1649_v31  ;;  %v18694_v52 = vunpack.c.l.bf16 %v17121_v54  ;;  %5617 = vmatmul.bf16.gmra.mxu1 %v13324_v63  ;;  %v6832_v42 = vmax.f32 %v17194_v12, %v13724_v30 }
 0x246   : > { %v17232_v17 = vmax.f32 %v17143_v55, %v18693_v41  ;;  %v5951_v26 = vrot.slane %v5887_v35, 3  ;;  %v5952_v15 = vrot.slane %v5888_v32, 3  ;;  %v15265_v22 = vpack.c.bf16 %v4325_v19, %v4324_v48  ;;  %1241 = vst [vmem:[#allocation2 + $0x468] sm:$0xf] %v12292_v45  ;;  %5666 = vmatmul.bf16.gmra.mxu2 %v13328_v29  ;;  %9757 = vmatpush.bf16.msra.mxu3 %v15092_v37  ;;  %v15083_v54 = vld [vmem:[#allocation8 + $0x20] sm:$0xff] }
 0x247   : > { %v17237_v11 = vmax.f32 %v18694_v52, %v17181_v9  ;;  %v18695_v27 = vrot.slane %v17149_v8, 9  ;;  %v18696_v47 = vrot.slane %v17151_v40, 9  ;;  %v15091_v9 = vld [vmem:[#allocation8 + $0x60] sm:$0xff]  ;;  %5720 = vmatmul.bf16.gmra.mxu3 %v13368_v57  ;;  %9729 = vmatpush.bf16.msra.mxu2 %v15083_v54 }
 0x248   : > { %v6099_v23 = vsel %vm5973_vm4, %v5887_v35, %v5951_v26  ;;  %v6100_v28 = vsel %vm5977_vm14, %v5887_v35, %v5951_v26  ;;  %v6103_v45 = vsel %vm5981_vm15, %v5887_v35, %v5951_v26  ;;  %v6106_v0 = vsel %vm5985_vm0, %v5887_v35, %v5951_v26  ;;  %15342 = vst [vmem:[#allocation3 + $0x30] sm:$0xff] %v15265_v22   ;;  %v8201_v37 = vld [vmem:[#allocation4 + $0x8] sm:$0xf] }
 0x249   : > { %v6830_v55 = vmax.f32 %v17149_v8, %v18695_v27  ;;  %v6831_v6 = vmax.f32 %v17151_v40, %v18696_v47  ;;  %v6102_v8 = vrot.slane %v6100_v28, 1  ;;  %v6105_v49 = vrot.slane %v6103_v45, 2  ;;  %8209 = vst [vmem:[#allocation2 + $0x24] sm:$0xf] %v8201_v37 }
 0x24a   : > { %v6108_v1 = vrot.slane %v6106_v0, 3  ;;  %v6111_v40 = vsel %vm5973_vm4, %v5888_v32, %v5952_v15  ;;  %v6112_v12 = vsel %vm5977_vm14, %v5888_v32, %v5952_v15  ;;  %v6115_v30 = vsel %vm5981_vm15, %v5888_v32, %v5952_v15  ;;  %9758 = vmatpush.bf16.msra.mxu3 %v15091_v9 }
 0x24b   : > { %v6118_v56 = vsel %vm5985_vm0, %v5888_v32, %v5952_v15  ;;  %v6953_v14 = vunpack.c.l.bf16 %v6099_v23  ;;  %v6114_v63 = vrot.slane %v6112_v12, 1  ;;  %v6117_v18 = vrot.slane %v6115_v30, 2 }
 0x24c   : > { %v6120_v48 = vrot.slane %v6118_v56, 3  ;;  %v6954_v31 = vunpack.c.l.bf16 %v6102_v8  ;;  %v6955_v19 = vunpack.c.l.bf16 %v6105_v49  ;;  %v6956_v41 = vunpack.c.l.bf16 %v6108_v1  ;;  %v15028_v56 = vld [vmem:[%s18640_s1 + $0x1c8] sm:$0xff] }
 0x24d   : > { %v6957_v29 = vunpack.c.l.bf16 %v6111_v40  ;;  %v13781_v35 = vrot.slane %v6953_v14, 9  ;;  %v6958_v57 = vunpack.c.l.bf16 %v6114_v63  ;;  %v6959_v52 = vunpack.c.l.bf16 %v6117_v18  ;;  %5737 = vmatpush.bf16.msra.mxu0 %v15028_v56  ;;  %v14963_v56 = vld [vmem:[#allocation2 + $0x444] sm:$0xf] }
 0x24e   : > { %v6960_v26 = vunpack.c.l.bf16 %v6120_v48  ;;  %v13782_v22 = vrot.slane %v6954_v31, 9  ;;  %v13783_v27 = vrot.slane %v6955_v19, 9  ;;  %v13784_v47 = vrot.slane %v6956_v41, 9 }
 0x24f   : > { %v13785_v54 = vrot.slane %v6957_v29, 9  ;;  %v7273_v32 = vmax.f32 %v6953_v14, %v13781_v35  ;;  %v13786_v15 = vrot.slane %v6958_v57, 9  ;;  %v13787_v23 = vrot.slane %v6959_v52, 9  ;;  %v15036_v14 = vld [vmem:[%s18640_s1 + $0x208] sm:$0xff] }
 0x250   : > { %v13788_v28 = vrot.slane %v6960_v26, 9  ;;  %v7274_v45 = vmax.f32 %v6954_v31, %v13782_v22  ;;  %v7275_v0 = vmax.f32 %v6955_v19, %v13783_v27  ;;  %v7276_v8 = vmax.f32 %v6956_v41, %v13784_v47  ;;  %5786 = vmatpush.bf16.msra.mxu1 %v15036_v14 }
 0x251   : > { %v7277_v9 = vmax.f32 %v6957_v29, %v13785_v54  ;;  %v7529_v49 = vmax.f32 %v17206_v38, %v7273_v32  ;;  %v7278_v1 = vmax.f32 %v6958_v57, %v13786_v15  ;;  %v7279_v40 = vmax.f32 %v6959_v52, %v13787_v23  ;;  %v17265_v52 = vpop.f32.mrf.mxu1  ;;  %v14959_v54 = vld [vmem:[#allocation2 + $0x420] sm:$0xf0] }
 0x252   : > { %v7280_v12 = vmax.f32 %v6960_v26, %v13788_v28  ;;  %v7530_v30 = vmax.f32 %v17218_v3, %v7274_v45  ;;  %v7531_v37 = vmax.f32 %v17223_v43, %v7275_v0  ;;  %v7532_v63 = vmax.f32 %v17232_v17, %v7276_v8  ;;  %18697 = vst [vmem:[#allocation33_spill] sm:$0xff] %v17265_v52  ;;  %v12435_v26 = vld [vmem:[%s15704_s12 + $0xcc] sm:$0xf]  ;;  %v12436_v43 = vld [vmem:[%s15704_s12 + $0xd0] sm:$0xf] }
 0x253   : > { %v7533_v38 = vmax.f32 %v17237_v11, %v7277_v9  ;;  %v7593_v18 = vpack.c.bf16 %v7529_v49, %v7529_v49  ;;  %v7534_v48 = vmax.f32 %v6830_v55, %v7278_v1  ;;  %v7535_v31 = vmax.f32 %v6831_v6, %v7279_v40  ;;  %v13359_v11 = vld [vmem:[#allocation2 + $0x400] sm:$0xf]  ;;  %2073 = vst [vmem:[#allocation2 + $0x450] sm:$0xf] %v12435_v26  ;;  %v14955_v45 = vld [vmem:[#allocation2 + $0x404] sm:$0xf] }
 0x254   : > { %v7536_v3 = vmax.f32 %v6832_v42, %v7280_v12  ;;  %v7594_v19 = vpack.c.bf16 %v7530_v30, %v7530_v30  ;;  %v7595_v41 = vpack.c.bf16 %v7531_v37, %v7531_v37  ;;  %v7596_v29 = vpack.c.bf16 %v7532_v63, %v7532_v63  ;;  %2074 = vst [vmem:[#allocation2 + $0x474] sm:$0xf] %v12436_v43  ;;  %v13361_v0 = vld [vmem:[#allocation2 + $0x424] sm:$0xf0] }
 0x255   : > { %v7597_v35 = vpack.c.bf16 %v7533_v38, %v7533_v38  ;;  %v7721_v57 = vunpack.c.l.b16 %v7593_v18  ;;  %v7598_v22 = vpack.c.bf16 %v7534_v48, %v7534_v48  ;;  %v7599_v27 = vpack.c.bf16 %v7535_v31, %v7535_v31  ;;  %v5889_v38 = vld [vmem:[#allocation3 + $0x30] sm:$0xf]  ;;  %v17269_v18 = vpop.f32.mrf.mxu0  ;;  %v13389_v48 = vld [vmem:[#allocation2 + $0x464] sm:$0xf0] }
 0x256   : > { %v7600_v17 = vpack.c.bf16 %v7536_v3, %v7536_v3  ;;  %v7722_v47 = vunpack.c.l.b16 %v7594_v19  ;;  %v7723_v55 = vunpack.c.l.b16 %v7595_v41  ;;  %v7724_v6 = vunpack.c.l.b16 %v7596_v29  ;;  %v5890_v41 = vld [vmem:[#allocation3 + $0x34] sm:$0xf] }
 0x257   : > { %v7725_v42 = vunpack.c.l.b16 %v7597_v35  ;;  %v7726_v32 = vunpack.c.l.b16 %v7598_v22  ;;  %v7727_v15 = vunpack.c.l.b16 %v7599_v27  ;;  %v13360_v1 = vor.u32 %v14959_v54, %v13359_v11 }
 0x258   : > { %v7728_v23 = vunpack.c.l.b16 %v7600_v17  ;;  %v13846_v28 = vunpack.i.l.s16 %v7722_v47  ;;  %v13847_v8 = vunpack.i.l.s16 %v7723_v55  ;;  %v13848_v9 = vunpack.i.l.s16 %v7724_v6  ;;  %v15082_v55 = vld [vmem:[#allocation8 + $0x18] sm:$0xff] }
 0x259   : > { %v13849_v49 = vunpack.i.l.s16 %v7725_v42  ;;  %v13845_v40 = vunpack.i.l.s16 %v7721_v57  ;;  %v13850_v12 = vunpack.i.l.s16 %v7726_v32  ;;  %v13851_v14 = vunpack.i.l.s16 %v7727_v15  ;;  %5622 = vmatmul.bf16.gmra.mxu1 %v13360_v1  ;;  %v5432_v54 = vpop.f32.mrf.mxu1  ;;  %v15090_v6 = vld [vmem:[#allocation8 + $0x58] sm:$0xff]  ;;  %v15035_v32 = vld [vmem:[%s18640_s1 + $0x200] sm:$0xff]  ;;  %9730 = vmatpush.bf16.msra.mxu2 %v15082_v55 }
 0x25a   : > { %v7929_v30 = vrot.slane %v13846_v28, 7  ;;  %v7931_v37 = vrot.slane %v13847_v8, 6  ;;  %v13364_v63 = vor.u32 %v14955_v45, %v13361_v0  ;;  %v13852_v31 = vunpack.i.l.s16 %v7728_v23  ;;  %v12338_v23 = vld [vmem:[%s15704_s12 + $0xc0] sm:$0xf]  ;;  %9759 = vmatpush.bf16.msra.mxu3 %v15090_v6  ;;  %5787 = vmatpush.bf16.msra.mxu1 %v15035_v32 }
 0x25b   : > { %v7933_v19 = vrot.slane %v13848_v9, 5  ;;  %v4114_v29 = vadd.f32 %v16791_v10, %v16485_v46  ;;  %v7935_v57 = vrot.slane %v13849_v49, 4  ;;  %v7937_v43 = vrot.slane %v13850_v12, 3  ;;  %v15027_v10 = vld [vmem:[%s18640_s1 + $0x1c0] sm:$0xff] }
 0x25c   : > { %v7930_v3 = vsel %vm5977_vm14, %v7929_v30, %v13845_v40  ;;  %5671 = vmatmul.bf16.gmra.mxu2 %v13364_v63  ;;  %v5953_v22 = vrot.slane %v5889_v38, 3  ;;  %v13392_v27 = vor.u32 %v14963_v56, %v13389_v48  ;;  %v7939_v47 = vrot.slane %v13851_v14, 2  ;;  %5738 = vmatpush.bf16.msra.mxu0 %v15027_v10  ;;  %v17292_v40 = vpop.f32.mrf.mxu2  ;;  %v15081_v12 = vld [vmem:[#allocation8 + $0x10] sm:$0xff] }
 0x25d   : > { %v7932_v35 = vsel %vm5981_vm15, %v7931_v37, %v7930_v3  ;;  %v5954_v11 = vrot.slane %v5890_v41, 3  ;;  %v7941_v46 = vrot.slane %v13852_v31, 1  ;;  %v4163_v28 = vadd.f32 %v16795_v39, %v4114_v29  ;;  %18698 = vst [vmem:[#allocation34_spill] sm:$0xff] %v17292_v40  ;;  %v15089_v30 = vld [vmem:[#allocation8 + $0x50] sm:$0xff]  ;;  %v17299_v3 = vpop.f32.mrf.mxu0  ;;  %9731 = vmatpush.bf16.msra.mxu2 %v15081_v12  ;;  %v15079_v12 = vld [vmem:[#allocation8] sm:$0xff] }
 0x25e   : > { %v7934_v26 = vsel %vm5985_vm0, %v7933_v19, %v7932_v35  ;;  %5578 = vmatmul.bf16.gmra.mxu0 %v13392_v27  ;;  %v6124_v0 = vsel %vm5977_vm14, %v5889_v38, %v5953_v22  ;;  %v6127_v9 = vsel %vm5981_vm15, %v5889_v38, %v5953_v22  ;;  %v6130_v49 = vsel %vm5985_vm0, %v5889_v38, %v5953_v22  ;;  %v15080_v27 = vld [vmem:[#allocation8 + $0x8] sm:$0xff] }
 0x25f   : > { %v7936_v17 = vsel %vm7904_vm1, %v7935_v57, %v7934_v26  ;;  %v6136_v1 = vsel %vm5977_vm14, %v5890_v41, %v5954_v11  ;;  %v4212_v56 = vadd.f32 %v16812_v33, %v4163_v28  ;;  %v6139_v39 = vsel %vm5981_vm15, %v5890_v41, %v5954_v11  ;;  %9760 = vmatpush.bf16.msra.mxu3 %v15089_v30  ;;  %v15087_v30 = vld [vmem:[#allocation8 + $0x40] sm:$0xff] }
 0x260   : > { %v7938_v42 = vsel %vm7907_vm2, %v7937_v43, %v7936_v17  ;;  %v1651_v14 = vshrl.u32 %v12338_v23, 16  ;;  %v17297_v63 = vsel %vm5973_vm4, %v5889_v38, %v5953_v22  ;;  %v6126_v48 = vrot.slane %v6124_v0, 1  ;;  %v17305_v22 = vpop.f32.mrf.mxu3  ;;  %v15088_v17 = vld [vmem:[#allocation8 + $0x48] sm:$0xff] }
 0x261   : > { %v7940_v15 = vsel %vm7910_vm3, %v7939_v47, %v7938_v42  ;;  %v1654_v31 = vshll.u32 %v12338_v23, 16  ;;  %v6129_v19 = vrot.slane %v6127_v9, 2  ;;  %v6132_v29 = vrot.slane %v6130_v49, 3  ;;  %18699 = vst [vmem:[#allocation35_spill] sm:$0xff] %v17305_v22  ;;  %v12339_v42 = vld [vmem:[%s15704_s12 + $0xc4] sm:$0xf]  ;;  %v17319_v28 = vpop.f32.mrf.mxu1  ;;  %9732 = vmatpush.bf16.msra.mxu2 %v15080_v27 }
 0x262   : > { %v7942_v45 = vsel %vm7913_vm5, %v7941_v46, %v7940_v15  ;;  %v6138_v35 = vrot.slane %v6136_v1, 1  ;;  %v6142_v57 = vsel %vm5985_vm0, %v5890_v41, %v5954_v11  ;;  %v17303_v43 = vsel %vm5973_vm4, %v5890_v41, %v5954_v11  ;;  %v12340_v15 = vld [vmem:[%s15704_s12 + $0xc8] sm:$0x1]  ;;  %v12386_v23 = vld [vmem:[%s15704_s12 + $0xc0] sm:$0xe]  ;;  %18700 = vst [vmem:[#allocation36_spill] sm:$0xff] %v17319_v28 }
 0x263   : > { %v8015_v8 = vpack.c.b16 %v7942_v45, %v7942_v45  ;;  %v6141_v38 = vrot.slane %v6139_v39, 2  ;;  %v4261_v47 = vadd.f32 %v16823_v61, %v4212_v56  ;;  %v17310_v55 = vadd.f32 %v17269_v18, %v16799_v2  ;;  %v12388_v45 = vld [vmem:[%s15704_s12 + $0xc8] sm:$0x1]  ;;  %v13403_v0 = vld [vmem:[#allocation2 + $0x450] sm:$0xf]  ;;  %9761 = vmatpush.bf16.msra.mxu3 %v15088_v17 }
 0x264   : > { %v5433_v6 = vadd.f32 %v17136_v5, %v5432_v54  ;;  %v1653_v46 = vrot.slane %v1651_v14, 4  ;;  %v6144_v41 = vrot.slane %v6142_v57, 3  ;;  %v6513_v11 = vunpack.c.l.bf16 %v17297_v63  ;;  %v12387_v54 = vld [vmem:[%s15704_s12 + $0xc4] sm:$0xf]  ;;  %v12461_v17 = vld [vmem:[%s15704_s12 + $0x78] sm:$0xf] }
 0x265   : > { %v8043_v37 = vshrl.u32 %v8015_v8, 16  ;;  %v8046_v26 = vshll.u32 %v8015_v8, 16  ;;  %v17315_v32 = vunpack.c.l.bf16 %v6126_v48  ;;  %v17321_v61 = vunpack.c.l.bf16 %v6129_v19  ;;  %v14969_v48 = vld [vmem:[#allocation2 + $0x470] sm:$0xf0]  ;;  %9733 = vmatpush.bf16.msra.mxu2 %v15079_v12 }
 0x266   : > { %v17323_v2 = vunpack.c.l.bf16 %v6132_v29  ;;  %v6517_v5 = vunpack.c.l.bf16 %v17303_v43  ;;  %v17326_v18 = vunpack.c.l.bf16 %v6138_v35  ;;  %v17332_v9 = vunpack.c.l.bf16 %v6141_v38  ;;  %v12462_v12 = vld [vmem:[%s15704_s12 + $0x7c] sm:$0xf] }
 0x267   : > { %v8045_v33 = vrot.slane %v8043_v37, 7  ;;  %v1656_v49 = vrot.slane %v1654_v31, 5  ;;  %v1660_v1 = vshll.u32 %v12339_v42, 16  ;;  %v1664_v39 = vshrl.u32 %v12339_v42, 16  ;;  %9762 = vmatpush.bf16.msra.mxu3 %v15087_v30 }
 0x268   : > { %v1670_v14 = vshll.u32 %v12340_v15, 16  ;;  %v12404_v37 = vrot.slane %v12386_v23, 9  ;;  %v1941_v38 = vrot.slane %v12387_v54, 5  ;;  %v1944_v27 = vrot.slane %v12388_v45, 5  ;;  %v5530_v30 = vpop.f32.mrf.mxu3 }
 0x269   : > { %v8048_v10 = vor.u32 %v8046_v26, %v8045_v33  ;;  %v1657_v35 = vor.u32 %v1656_v49, %v1653_v46  ;;  %v1662_v57 = vrot.slane %v1660_v1, 5  ;;  %v5481_v33 = vpop.f32.mrf.mxu2  ;;  %v17336_v26 = vunpack.c.l.bf16 %v6144_v41  ;;  %v12463_v41 = vld [vmem:[%s15704_s12 + $0x80] sm:$0x1] }
 0x26a   : > { %v1666_v31 = vrot.slane %v1664_v39, 4  ;;  %v13404_v23 = vor.u32 %v14969_v48, %v13403_v0  ;;  %v1672_v46 = vrot.slane %v1670_v14, 5  ;;  %v1943_v49 = vrot.slane %v1941_v38, 4  ;;  %v12510_v48 = vld [vmem:[%s15704_s12 + $0x7c] sm:$0xf] }
 0x26b   : > { %v8099_v8 = vsel %vm15722_vm8, 0, %v8048_v10  ;;  %v1658_v15 = vrot.slane %v1657_v35, 4  ;;  %v5482_v1 = vadd.f32 %v5481_v33, %v5433_v6  ;;  %v1942_v45 = vsel %vm15782_vm13, %v12404_v37, %v1941_v38  ;;  %v12509_v35 = vld [vmem:[%s15704_s12 + $0x78] sm:$0xe]  ;;  %v5593_v33 = vpop.f32.mrf.mxu1 }
 0x26c   : > { %v8111_v56 = vsel %vm15737_vm9, %v8099_v8, 0  ;;  %v5544_v8 = vpop.f32.mrf.mxu0  ;;  %5725 = vmatmul.bf16.gmra.mxu3 %v13404_v23  ;;  %v4310_v39 = vadd.f32 %v17299_v3, %v4261_v47  ;;  %v2316_v0 = vshrl.u32 %v12461_v17, 16  ;;  %v4326_v14 = vmax.f32 %v17310_v55, 0.0  ;;  %v8218_v47 = vld [vmem:[#allocation4 + $0x8] sm:$0xf] }
 0x26d   : > { %v8132_v19 = vunpack.c.l.b16 %v8111_v56  ;;  %v8133_v29 = vunpack.c.h.b16 %v8111_v56  ;;  %v1667_v56 = vor.u32 %v1666_v31, %v1662_v57  ;;  %v1663_v54 = vsel %vm15774_vm12, %v1658_v15, %v1662_v57  ;;  %2008 = vst [vmem:[#allocation2 + $0x44c] sm:$0xf] %v1942_v45  ;;  %v12511_v15 = vld [vmem:[%s15704_s12 + $0x80] sm:$0x1] }
 0x26e   : > { %1736 = vst [vmem:[#allocation2 + $0x448] sm:$0xf] %v1663_v54  ;;  %v1945_v37 = vsel %vm15782_vm13, %v1943_v49, %v1944_v27  ;;  %v4327_v57 = vmax.f32 %v4310_v39, 0.0  ;;  %v2318_v31 = vrot.slane %v2316_v0, 4  ;;  %v2319_v3 = vshll.u32 %v12461_v17, 16 }
 0x26f   : > { %v8150_v10 = vpack.c.b16 %v8132_v19, %v8132_v19  ;;  %v8151_v42 = vpack.c.b16 %v8133_v29, %v8133_v29  ;;  %v1668_v6 = vrot.slane %v1667_v56, 4  ;;  %v17348_v19 = vadd.f32 %v5530_v30, %v5482_v1  ;;  %2009 = vst [vmem:[#allocation2 + $0x470] sm:$0xf] %v1945_v37 }
 0x270   : > { %v5545_v29 = vadd.f32 %v5544_v8, %v16835_v24  ;;  %v13725_v24 = vrot.slane %v6513_v11, 9  ;;  %v15270_v23 = vpack.c.bf16 %v4327_v57, %v4326_v14  ;;  %v2321_v27 = vrot.slane %v2319_v3, 5 }
 0x271   : > { %8186 = vst [vmem:[#allocation4 + $0x18] sm:$0xf] %v8150_v10  ;;  %v1673_v38 = vsel %vm15774_vm12, %v1668_v6, %v1672_v46  ;;  %v2325_v10 = vshll.u32 %v12462_v12, 16  ;;  %v2335_v8 = vshll.u32 %v12463_v41, 16  ;;  %v12541_v49 = vrot.slane %v12509_v35, 9 }
 0x272   : > { %8187 = vst [vmem:[#allocation4 + $0x1c] sm:$0x1] %v8151_v42  ;;  %v17356_v55 = vadd.f32 %v5593_v33, %v5545_v29  ;;  %v2329_v42 = vshrl.u32 %v12462_v12, 16  ;;  %v2725_v1 = vrot.slane %v12510_v48, 5  ;;  %v13726_v46 = vrot.slane %v17315_v32, 9 }
 0x273   : > { %1737 = vst [vmem:[#allocation2 + $0x46c] sm:$0xf] %v1673_v38  ;;  %v2327_v56 = vrot.slane %v2325_v10, 5  ;;  %v2322_v54 = vor.u32 %v2321_v27, %v2318_v31  ;;  %v2337_v45 = vrot.slane %v2335_v8, 5  ;;  %v2728_v30 = vrot.slane %v12511_v15, 5  ;;  %v17420_v52 = vpop.f32.mrf.mxu1 }
 0x274   : > { %v2331_v17 = vrot.slane %v2329_v42, 4  ;;  %15343 = vst [vmem:[#allocation3 + $0x38] sm:$0xff] %v15270_v23   ;;  %v2726_v39 = vsel %vm15782_vm13, %v12541_v49, %v2725_v1  ;;  %v2727_v0 = vrot.slane %v2725_v1, 4  ;;  %v8247_v6 = vshrl.u32 %v8218_v47, 16  ;;  %v14964_v10 = vld [vmem:[#allocation2 + $0x44c] sm:$0xf] }
 0x275   : > { %v13727_v14 = vrot.slane %v17321_v61, 9  ;;  %v13728_v41 = vrot.slane %v17323_v2, 9  ;;  %v2323_v29 = vrot.slane %v2322_v54, 4  ;;  %2827 = vst [vmem:[#allocation2 + $0x260] sm:$0xf] %v2726_v39  ;;  %v8250_v35 = vshll.u32 %v8218_v47, 16 }
 0x276   : > { %v2332_v12 = vor.u32 %v2331_v17, %v2327_v56  ;;  %v13729_v48 = vrot.slane %v6517_v5, 9  ;;  %v13730_v37 = vrot.slane %v17326_v18, 9  ;;  %v13395_v57 = vld [vmem:[#allocation2 + $0x448] sm:$0xf]  ;;  %v2729_v31 = vsel %vm15782_vm13, %v2727_v0, %v2728_v30  ;;  %v17375_v47 = vld [vmem:[#allocation2] sm:$0xf] }
 0x277   : > { %v13731_v3 = vrot.slane %v17332_v9, 9  ;;  %v13732_v38 = vrot.slane %v17336_v26, 9  ;;  %v2328_v42 = vsel %vm15774_vm12, %v2323_v29, %v2327_v56  ;;  %2828 = vst [vmem:[#allocation2 + $0x284] sm:$0xf] %v2729_v31  ;;  %v17377_v15 = vld [vmem:[#allocation4 + $0xc] sm:$0x1]  ;;  %v6833_v49 = vmax.f32 %v6513_v11, %v13725_v24 }
 0x278   : > { %v2333_v33 = vrot.slane %v2332_v12, 4  ;;  %2555 = vst [vmem:[#allocation2 + $0x25c] sm:$0xf] %v2328_v42  ;;  %v17381_v8 = vrot.slane %v8247_v6, 4  ;;  %v17383_v17 = vrot.slane %v8250_v35, 5  ;;  %v6834_v1 = vmax.f32 %v17315_v32, %v13726_v46  ;;  %v17397_v35 = vpop.f32.mrf.mxu2 }
 0x279   : > { %v13397_v54 = vld [vmem:[#allocation2 + $0x46c] sm:$0xf0]  ;;  %v17388_v30 = vld [vmem:[#allocation2 + $0x20] sm:$0xf0]  ;;  %v6835_v12 = vmax.f32 %v17321_v61, %v13727_v14  ;;  %v6836_v39 = vmax.f32 %v17323_v2, %v13728_v41  ;;  %v6838_v63 = vmax.f32 %v17326_v18, %v13730_v37  ;;  %v6839_v11 = vmax.f32 %v17332_v9, %v13731_v3  ;;  %18701 = vst [vmem:[#allocation37_spill] sm:$0xff] %v17397_v35  ;;  %v17399_v61 = vpop.f32.mrf.mxu3 }
 0x27a   : > { %v14968_v23 = vld [vmem:[#allocation2 + $0x468] sm:$0xf0]  ;;  %v2338_v27 = vsel %vm15774_vm12, %v2333_v33, %v2337_v45  ;;  %v6837_v45 = vmax.f32 %v6517_v5, %v13729_v48  ;;  %v13400_v0 = vor.u32 %v14964_v10, %v13397_v54  ;;  %v6840_v46 = vmax.f32 %v17336_v26, %v13732_v38  ;;  %18702 = vst [vmem:[#allocation38_spill] sm:$0xff] %v17399_v61 }
 0x27b   : > { %v13396_v56 = vor.u32 %v14968_v23, %v13395_v57  ;;  %2556 = vst [vmem:[#allocation2 + $0x280] sm:$0xf] %v2338_v27  ;;  %v5891_v6 = vld [vmem:[#allocation3 + $0x38] sm:$0xf]  ;;  %v5892_v29 = vld [vmem:[#allocation3 + $0x3c] sm:$0xf] }
 0x27c   : > { %v5955_v32 = vrot.slane %v5891_v6, 3  ;;  %v5956_v24 = vrot.slane %v5892_v29, 3  ;;  %5676 = vmatmul.bf16.gmra.mxu2 %v13400_v0 }
 0x27d   : > { %5627 = vmatmul.bf16.gmra.mxu1 %v13396_v56 }
 0x27e   : > { %v6147_v18 = vsel %vm5973_vm4, %v5891_v6, %v5955_v32  ;;  %v6148_v9 = vsel %vm5977_vm14, %v5891_v6, %v5955_v32  ;;  %v6151_v14 = vsel %vm5981_vm15, %v5891_v6, %v5955_v32  ;;  %v6154_v26 = vsel %vm5985_vm0, %v5891_v6, %v5955_v32 }
 0x27f   : > { %v6150_v41 = vrot.slane %v6148_v9, 1  ;;  %v6153_v48 = vrot.slane %v6151_v14, 2  ;;  %v6156_v37 = vrot.slane %v6154_v26, 3  ;;  %v6159_v57 = vsel %vm5973_vm4, %v5892_v29, %v5956_v24 }
 0x280   : > { %v6160_v33 = vsel %vm5977_vm14, %v5892_v29, %v5956_v24  ;;  %v6163_v31 = vsel %vm5981_vm15, %v5892_v29, %v5956_v24  ;;  %v6166_v3 = vsel %vm5985_vm0, %v5892_v29, %v5956_v24  ;;  %v6961_v38 = vunpack.c.l.bf16 %v6147_v18 }
 0x281   : > { %v6162_v10 = vrot.slane %v6160_v33, 1  ;;  %v6165_v42 = vrot.slane %v6163_v31, 2  ;;  %v6168_v23 = vrot.slane %v6166_v3, 3  ;;  %v6962_v27 = vunpack.c.l.bf16 %v6150_v41 }
 0x282   : > { %v6963_v56 = vunpack.c.l.bf16 %v6153_v48  ;;  %v6964_v54 = vunpack.c.l.bf16 %v6156_v37  ;;  %v6965_v0 = vunpack.c.l.bf16 %v6159_v57  ;;  %v13789_v6 = vrot.slane %v6961_v38, 9 }
 0x283   : > { %v6966_v32 = vunpack.c.l.bf16 %v6162_v10  ;;  %v6967_v9 = vunpack.c.l.bf16 %v6165_v42  ;;  %v6968_v14 = vunpack.c.l.bf16 %v6168_v23  ;;  %v13790_v26 = vrot.slane %v6962_v27, 9  ;;  %v17414_v10 = vpop.f32.mrf.mxu2  ;;  %v17416_v42 = vpop.f32.mrf.mxu3 }
 0x284   : > { %v13791_v5 = vrot.slane %v6963_v56, 9  ;;  %v13792_v43 = vrot.slane %v6964_v54, 9  ;;  %v13793_v2 = vrot.slane %v6965_v0, 9  ;;  %v7281_v61 = vmax.f32 %v6961_v38, %v13789_v6  ;;  %v17418_v6 = vpop.f32.mrf.mxu0 }
 0x285   : > { %v13794_v35 = vrot.slane %v6966_v32, 9  ;;  %v13795_v28 = vrot.slane %v6967_v9, 9  ;;  %v13796_v29 = vrot.slane %v6968_v14, 9  ;;  %v7282_v24 = vmax.f32 %v6962_v27, %v13790_v26 }
 0x286   : > { %v7283_v18 = vmax.f32 %v6963_v56, %v13791_v5  ;;  %v7284_v33 = vmax.f32 %v6964_v54, %v13792_v43  ;;  %v7285_v31 = vmax.f32 %v6965_v0, %v13793_v2  ;;  %v7537_v41 = vmax.f32 %v6833_v49, %v7281_v61 }
 0x287   : > { %v7286_v48 = vmax.f32 %v6966_v32, %v13794_v35  ;;  %v7287_v37 = vmax.f32 %v6967_v9, %v13795_v28  ;;  %v7288_v57 = vmax.f32 %v6968_v14, %v13796_v29  ;;  %v7538_v3 = vmax.f32 %v6834_v1, %v7282_v24  ;;  %v13159_v29 = vld [vmem:[#allocation2 + $0x260] sm:$0xf]  ;;  %v14907_v24 = vld [vmem:[#allocation2 + $0x280] sm:$0xf0] }
 0x288   : > { %v7539_v23 = vmax.f32 %v6835_v12, %v7283_v18  ;;  %v7540_v22 = vmax.f32 %v6836_v39, %v7284_v33  ;;  %v7541_v40 = vmax.f32 %v6837_v45, %v7285_v31  ;;  %v7601_v38 = vpack.c.bf16 %v7537_v41, %v7537_v41  ;;  %v14902_v12 = vld [vmem:[#allocation2 + $0x25c] sm:$0xf]  ;;  %v13153_v39 = vld [vmem:[#allocation2 + $0x27c] sm:$0xf0]  ;;  %v8202_v45 = vld [vmem:[#allocation4 + $0x10] sm:$0xf] }
 0x289   : > { %v7542_v5 = vmax.f32 %v6838_v63, %v7286_v48  ;;  %v7543_v43 = vmax.f32 %v6839_v11, %v7287_v37  ;;  %v7544_v2 = vmax.f32 %v6840_v46, %v7288_v57  ;;  %v7602_v49 = vpack.c.bf16 %v7538_v3, %v7538_v3  ;;  %8210 = vst [vmem:[#allocation2 + $0x48] sm:$0xf] %v8202_v45 }
 0x28a   : > { %v7603_v35 = vpack.c.bf16 %v7539_v23, %v7539_v23  ;;  %v7604_v28 = vpack.c.bf16 %v7540_v22, %v7540_v22  ;;  %v7605_v61 = vpack.c.bf16 %v7541_v40, %v7541_v40  ;;  %v7729_v1 = vunpack.c.l.b16 %v7601_v38 }
 0x28b   : > { %v7606_v27 = vpack.c.bf16 %v7542_v5, %v7542_v5  ;;  %v7607_v56 = vpack.c.bf16 %v7543_v43, %v7543_v43  ;;  %v7608_v54 = vpack.c.bf16 %v7544_v2, %v7544_v2  ;;  %v7730_v0 = vunpack.c.l.b16 %v7602_v49  ;;  %v17430_v23 = vpop.f32.mrf.mxu2  ;;  %v17432_v38 = vpop.f32.mrf.mxu3 }
 0x28c   : > { %v7731_v32 = vunpack.c.l.b16 %v7603_v35  ;;  %v7732_v9 = vunpack.c.l.b16 %v7604_v28  ;;  %v7733_v14 = vunpack.c.l.b16 %v7605_v61  ;;  %v18703_v63 = vor.u32 %v17383_v17, %v17381_v8  ;;  %v5549_v2 = vpop.f32.mrf.mxu0  ;;  %v5598_v49 = vpop.f32.mrf.mxu1  ;;  %v12464_v35 = vld [vmem:[%s15704_s12 + $0x84] sm:$0xf] }
 0x28d   : > { %v7734_v46 = vunpack.c.l.b16 %v7606_v27  ;;  %v7735_v26 = vunpack.c.l.b16 %v7607_v56  ;;  %v7736_v22 = vunpack.c.l.b16 %v7608_v54  ;;  %v13854_v40 = vunpack.i.l.s16 %v7730_v0 }
 0x28e   : > { %v8254_v11 = vrot.slane %v18703_v63, 4  ;;  %v18704_v18 = vor.u32 %v17388_v30, %v17375_v47  ;;  %v13855_v33 = vunpack.i.l.s16 %v7731_v32  ;;  %v13856_v31 = vunpack.i.l.s16 %v7732_v9 }
 0x28f   : > { %v13857_v41 = vunpack.i.l.s16 %v7733_v14  ;;  %v13156_v48 = vor.u32 %v14902_v12, %v13153_v39  ;;  %v13853_v37 = vunpack.i.l.s16 %v7729_v1  ;;  %v13858_v8 = vunpack.i.l.s16 %v7734_v46  ;;  %v12465_v1 = vld [vmem:[%s15704_s12 + $0x88] sm:$0xf]  ;;  %v12466_v39 = vld [vmem:[%s15704_s12 + $0x8c] sm:$0x1] }
 0x290   : > { %9734 = vmatmul.bf16.vlgmr.msra.gmra.mxu2 %v18704_v18  ;;  %v7943_v17 = vrot.slane %v13854_v40, 7  ;;  %v18705_v57 = vshll.u32 %v17377_v15, 16  ;;  %v13859_v5 = vunpack.i.l.s16 %v7735_v26  ;;  %v13860_v43 = vunpack.i.l.s16 %v7736_v22  ;;  %v12512_v26 = vld [vmem:[%s15704_s12 + $0x84] sm:$0xe]  ;;  %v17449_v18 = vld [vmem:[#allocation4 + $0x8] sm:$0xf] }
 0x291   : > { %v7945_v47 = vrot.slane %v13855_v33, 6  ;;  %5739 = vmatmul.bf16.vlgmr.msra.gmra.mxu0 %v13156_v48  ;;  %v13160_v30 = vor.u32 %v14907_v24, %v13159_v29  ;;  %v7947_v61 = vrot.slane %v13856_v31, 5  ;;  %v7949_v27 = vrot.slane %v13857_v41, 4  ;;  %v12513_v24 = vld [vmem:[%s15704_s12 + $0x88] sm:$0xf] }
 0x292   : > { %v8258_v3 = vrot.slane %v18705_v57, 5  ;;  %v7944_v28 = vsel %vm5977_vm14, %v7943_v17, %v13853_v37  ;;  %v7951_v56 = vrot.slane %v13858_v8, 3  ;;  %v5550_v12 = vadd.f32 %v5549_v2, %v16889_v4  ;;  %v12514_v41 = vld [vmem:[%s15704_s12 + $0x8c] sm:$0x1] }
 0x293   : > { %v7946_v15 = vsel %vm5981_vm15, %v7945_v47, %v7944_v28  ;;  %5788 = vmatmul.bf16.vlgmr.msra.gmra.mxu1 %v13160_v30  ;;  %v2340_v45 = vshrl.u32 %v12464_v35, 16  ;;  %v2343_v32 = vshll.u32 %v12464_v35, 16  ;;  %v7953_v14 = vrot.slane %v13859_v5, 2  ;;  %v17454_v57 = vpop.f32.mrf.mxu2 }
 0x294   : > { %v8259_v54 = vsel %vm15774_vm12, %v8254_v11, %v8258_v3  ;;  %v7948_v0 = vsel %vm5985_vm0, %v7947_v61, %v7946_v15  ;;  %v7955_v63 = vrot.slane %v13860_v43, 1  ;;  %v2349_v46 = vshll.u32 %v12465_v1, 16  ;;  %v17456_v3 = vpop.f32.mrf.mxu3  ;;  %v15043_v43 = vld [vmem:[#allocation2 + $0x4] sm:$0xf]  ;;  %v17458_v2 = vpop.f32.mrf.mxu0  ;;  %v12468_v15 = vld [vmem:[%s15704_s12 + $0x94] sm:$0xf] }
 0x295   : > { %8353 = vst [vmem:[#allocation2 + $0x28] sm:$0xf] %v8259_v54  ;;  %v7950_v9 = vsel %vm7904_vm1, %v7949_v27, %v7948_v0  ;;  %v17446_v40 = vadd.f32 %v5598_v49, %v5550_v12  ;;  %v2342_v11 = vrot.slane %v2340_v45, 4  ;;  %v2345_v29 = vrot.slane %v2343_v32, 5  ;;  %v17460_v49 = vpop.f32.mrf.mxu1 }
 0x296   : > { %v7952_v22 = vsel %vm7907_vm2, %v7951_v56, %v7950_v9  ;;  %v2351_v33 = vrot.slane %v2349_v46, 5  ;;  %v2353_v31 = vshrl.u32 %v12465_v1, 16  ;;  %v2359_v8 = vshll.u32 %v12466_v39, 16  ;;  %v12467_v1 = vld [vmem:[%s15704_s12 + $0x90] sm:$0xf] }
 0x297   : > { %v7954_v4 = vsel %vm7910_vm3, %v7953_v14, %v7952_v22  ;;  %v2346_v37 = vor.u32 %v2345_v29, %v2342_v11  ;;  %v12542_v17 = vrot.slane %v12512_v26, 9  ;;  %v2732_v30 = vrot.slane %v12513_v24, 5  ;;  %v12469_v39 = vld [vmem:[%s15704_s12 + $0x98] sm:$0x1]  ;;  %v12515_v14 = vld [vmem:[%s15704_s12 + $0x90] sm:$0xe] }
 0x298   : > { %v7956_v48 = vsel %vm7913_vm5, %v7955_v63, %v7954_v4  ;;  %v2355_v47 = vrot.slane %v2353_v31, 4  ;;  %v8474_v35 = vshrl.u32 %v17449_v18, 16  ;;  %v2735_v61 = vrot.slane %v12514_v41, 5  ;;  %v12516_v63 = vld [vmem:[%s15704_s12 + $0x94] sm:$0xf] }
 0x299   : > { %v8016_v5 = vpack.c.b16 %v7956_v48, %v7956_v48  ;;  %v2347_v28 = vrot.slane %v2346_v37, 4  ;;  %v2361_v0 = vrot.slane %v2359_v8, 5  ;;  %v2733_v12 = vsel %vm15782_vm13, %v12542_v17, %v2732_v30  ;;  %v8203_v48 = vld [vmem:[#allocation4 + $0x18] sm:$0xf] }
 0x29a   : > { %v2356_v54 = vor.u32 %v2355_v47, %v2351_v33  ;;  %v2734_v9 = vrot.slane %v2732_v30, 4  ;;  %2829 = vst [vmem:[#allocation2 + $0x2a8] sm:$0xf] %v2733_v12  ;;  %v8477_v46 = vshll.u32 %v17449_v18, 16  ;;  %v2364_v29 = vshrl.u32 %v12467_v1, 16 }
 0x29b   : > { %v8050_v27 = vshrl.u32 %v8016_v5, 16  ;;  %v2352_v32 = vsel %vm15774_vm12, %v2347_v28, %v2351_v33  ;;  %v8053_v22 = vshll.u32 %v8016_v5, 16  ;;  %v2367_v4 = vshll.u32 %v12467_v1, 16  ;;  %v17477_v18 = vld [vmem:[#allocation4 + $0xc] sm:$0x1]  ;;  %v17481_v5 = vpop.f32.mrf.mxu2 }
 0x29c   : > { %v13921_v56 = vld [vmem:[#allocation2 + $0x24] sm:$0xf0]  ;;  %v2357_v11 = vrot.slane %v2356_v54, 4  ;;  %2557 = vst [vmem:[#allocation2 + $0x2a4] sm:$0xf] %v2352_v32  ;;  %v2736_v24 = vsel %vm15782_vm13, %v2734_v9, %v2735_v61  ;;  %v2373_v31 = vshll.u32 %v12468_v15, 16 }
 0x29d   : > { %v13924_v45 = vor.u32 %v15043_v43, %v13921_v56  ;;  %v8052_v26 = vrot.slane %v8050_v27, 7  ;;  %v2377_v41 = vshrl.u32 %v12468_v15, 16  ;;  %2830 = vst [vmem:[#allocation2 + $0x2cc] sm:$0xf] %v2736_v24  ;;  %v2366_v8 = vrot.slane %v2364_v29, 4  ;;  %v17483_v43 = vpop.f32.mrf.mxu3  ;;  %v5554_v15 = vpop.f32.mrf.mxu0 }
 0x29e   : > { %v2362_v37 = vsel %vm15774_vm12, %v2357_v11, %v2361_v0  ;;  %v17479_v17 = vrot.slane %v8474_v35, 4  ;;  %v2369_v47 = vrot.slane %v2367_v4, 5  ;;  %v2375_v30 = vrot.slane %v2373_v31, 5  ;;  %v5603_v27 = vpop.f32.mrf.mxu1  ;;  %8211 = vst [vmem:[#allocation2 + $0x6c] sm:$0xf] %v8203_v48 }
 0x29f   : > { %9763 = vmatmul.bf16.vlgmr.msra.gmra.mxu3 %v13924_v45  ;;  %v8055_v33 = vor.u32 %v8053_v22, %v8052_v26  ;;  %2558 = vst [vmem:[#allocation2 + $0x2c8] sm:$0xf] %v2362_v37  ;;  %v2379_v28 = vrot.slane %v2377_v41, 4  ;;  %v2383_v61 = vshll.u32 %v12469_v39, 16  ;;  %v12543_v56 = vrot.slane %v12515_v14, 9 }
 0x2a0   : > { %v2739_v54 = vrot.slane %v12516_v63, 5  ;;  %v17487_v35 = vrot.slane %v8477_v46, 5  ;;  %v5555_v12 = vadd.f32 %v5554_v15, %v16929_v7  ;;  %v2370_v45 = vor.u32 %v2369_v47, %v2366_v8  ;;  %v12517_v9 = vld [vmem:[%s15704_s12 + $0x98] sm:$0x1]  ;;  %v8221_v29 = vld [vmem:[#allocation4 + $0x14] sm:$0x1] }
 0x2a1   : > { %v8100_v1 = vsel %vm15722_vm8, 0, %v8055_v33  ;;  %v2380_v32 = vor.u32 %v2379_v28, %v2375_v30  ;;  %v2385_v22 = vrot.slane %v2383_v61, 5  ;;  %v8220_v11 = vld [vmem:[#allocation4 + $0x10] sm:$0xf]  ;;  %v13195_v14 = vld [vmem:[#allocation2 + $0x2a8] sm:$0xf] }
 0x2a2   : > { %v8112_v0 = vsel %vm15737_vm9, %v8100_v1, 0  ;;  %v17494_v63 = vadd.f32 %v5603_v27, %v5555_v12  ;;  %v2371_v46 = vrot.slane %v2370_v45, 4  ;;  %v2740_v7 = vsel %vm15782_vm13, %v12543_v56, %v2739_v54  ;;  %v8222_v31 = vld [vmem:[#allocation4 + $0x18] sm:$0xf]  ;;  %v13955_v61 = vld [vmem:[#allocation2 + $0x48] sm:$0xf] }
 0x2a3   : > { %v8134_v26 = vunpack.c.l.b16 %v8112_v0  ;;  %v8135_v39 = vunpack.c.h.b16 %v8112_v0  ;;  %v2381_v4 = vrot.slane %v2380_v32, 4  ;;  %v14911_v33 = vld [vmem:[#allocation2 + $0x2a4] sm:$0xf]  ;;  %v2741_v37 = vrot.slane %v2739_v54, 4  ;;  %2831 = vst [vmem:[#allocation2 + $0x2f0] sm:$0xf] %v2740_v7 }
 0x2a4   : > { %v2742_v8 = vrot.slane %v12517_v9, 5  ;;  %v14916_v47 = vld [vmem:[#allocation2 + $0x2c8] sm:$0xf0]  ;;  %v2376_v28 = vsel %vm15774_vm12, %v2371_v46, %v2375_v30  ;;  %v8261_v1 = vshrl.u32 %v8220_v11, 16  ;;  %v8264_v15 = vshll.u32 %v8220_v11, 16  ;;  %v17508_v11 = vpop.f32.mrf.mxu2 }
 0x2a5   : > { %v8152_v41 = vpack.c.b16 %v8134_v26, %v8134_v26  ;;  %v8153_v48 = vpack.c.b16 %v8135_v39, %v8135_v39  ;;  %v12470_v27 = vld [vmem:[%s15704_s12 + $0x9c] sm:$0xf]  ;;  %v12471_v0 = vld [vmem:[%s15704_s12 + $0xa0] sm:$0xf]  ;;  %v8480_v12 = vor.u32 %v17487_v35, %v17479_v17  ;;  %v13196_v45 = vor.u32 %v14916_v47, %v13195_v14  ;;  %v15056_v39 = vld [vmem:[#allocation2 + $0x68] sm:$0xf0]  ;;  %v17510_v46 = vpop.f32.mrf.mxu3 }
 0x2a6   : > { %v13189_v56 = vld [vmem:[#allocation2 + $0x2c4] sm:$0xf0]  ;;  %v2386_v54 = vsel %vm15774_vm12, %v2381_v4, %v2385_v22  ;;  %v8270_v32 = vshll.u32 %v8221_v29, 16  ;;  %v8275_v9 = vshrl.u32 %v8222_v31, 16  ;;  %v2743_v30 = vsel %vm15782_vm13, %v2741_v37, %v2742_v8  ;;  %2559 = vst [vmem:[#allocation2 + $0x2ec] sm:$0xf] %v2376_v28  ;;  %v17512_v22 = vpop.f32.mrf.mxu0  ;;  %v17514_v29 = vpop.f32.mrf.mxu1 }
 0x2a7   : > { %8188 = vst [vmem:[#allocation4 + $0x20] sm:$0xf] %v8152_v41  ;;  %v13192_v26 = vor.u32 %v14911_v33, %v13189_v56  ;;  %v8263_v17 = vrot.slane %v8261_v1, 4  ;;  %v8266_v35 = vrot.slane %v8264_v15, 5  ;;  %5793 = vmatmul.bf16.gmra.mxu1 %v13196_v45  ;;  %v13956_v14 = vor.u32 %v15056_v39, %v13955_v61  ;;  %v8223_v4 = vld [vmem:[#allocation4 + $0x1c] sm:$0x1] }
 0x2a8   : > { %8189 = vst [vmem:[#allocation4 + $0x24] sm:$0x1] %v8153_v48  ;;  %v12472_v7 = vld [vmem:[%s15704_s12 + $0xa4] sm:$0x1]  ;;  %v8277_v48 = vrot.slane %v8275_v9, 4  ;;  %v8278_v33 = vshll.u32 %v8222_v31, 16 }
 0x2a9   : > { %5744 = vmatmul.bf16.gmra.mxu0 %v13192_v26  ;;  %2560 = vst [vmem:[#allocation2 + $0x310] sm:$0xf] %v2386_v54  ;;  %v8267_v41 = vor.u32 %v8266_v35, %v8263_v17  ;;  %v12518_v37 = vld [vmem:[%s15704_s12 + $0x9c] sm:$0xe]  ;;  %9739 = vmatmul.bf16.gmra.mxu2 %v13956_v14  ;;  %v2388_v8 = vshrl.u32 %v12470_v27, 16  ;;  %v2391_v47 = vshll.u32 %v12470_v27, 16 }
 0x2aa   : > { %2832 = vst [vmem:[#allocation2 + $0x314] sm:$0xf] %v2743_v30  ;;  %v2397_v28 = vshll.u32 %v12471_v0, 16  ;;  %v17518_v61 = vrot.slane %v8480_v12, 4  ;;  %v8272_v15 = vrot.slane %v8270_v32, 5  ;;  %v8280_v56 = vrot.slane %v8278_v33, 5 }
 0x2ab   : > { %v8268_v1 = vrot.slane %v8267_v41, 4  ;;  %v8284_v45 = vshll.u32 %v8223_v4, 16  ;;  %v2390_v39 = vrot.slane %v2388_v8, 4  ;;  %v2393_v26 = vrot.slane %v2391_v47, 5  ;;  %v12519_v31 = vld [vmem:[%s15704_s12 + $0xa0] sm:$0xf] }
 0x2ac   : > { %v2399_v54 = vrot.slane %v2397_v28, 5  ;;  %v2401_v17 = vshrl.u32 %v12471_v0, 16  ;;  %v8281_v30 = vor.u32 %v8280_v56, %v8277_v48  ;;  %v2407_v35 = vshll.u32 %v12472_v7, 16  ;;  %v12520_v14 = vld [vmem:[%s15704_s12 + $0xa4] sm:$0x1]  ;;  %v17524_v8 = vpop.f32.mrf.mxu2 }
 0x2ad   : > { %v8273_v9 = vsel %vm15774_vm12, %v8268_v1, %v8272_v15  ;;  %v12544_v27 = vrot.slane %v12518_v37, 9  ;;  %v13231_v24 = vld [vmem:[#allocation2 + $0x2f0] sm:$0xf]  ;;  %v2394_v12 = vor.u32 %v2393_v26, %v2390_v39  ;;  %v2746_v4 = vrot.slane %v12519_v31, 5  ;;  %v12473_v47 = vld [vmem:[%s15704_s12 + $0xa8] sm:$0xf] }
 0x2ae   : > { %8354 = vst [vmem:[#allocation2 + $0x4c] sm:$0xf] %v8273_v9  ;;  %v2403_v32 = vrot.slane %v2401_v17, 4  ;;  %v8282_v41 = vrot.slane %v8281_v30, 4  ;;  %v8286_v33 = vrot.slane %v8284_v45, 5  ;;  %v2749_v0 = vrot.slane %v12520_v14, 5  ;;  %v5559_v7 = vpop.f32.mrf.mxu0  ;;  %v5608_v15 = vpop.f32.mrf.mxu1 }
 0x2af   : > { %v18706_v28 = vshll.u32 %v17477_v18, 16  ;;  %v14920_v48 = vld [vmem:[#allocation2 + $0x2ec] sm:$0xf]  ;;  %v2395_v37 = vrot.slane %v2394_v12, 4  ;;  %v2409_v9 = vrot.slane %v2407_v35, 5  ;;  %v2747_v39 = vsel %vm15782_vm13, %v12544_v27, %v2746_v4  ;;  %v17535_v30 = vpop.f32.mrf.mxu3 }
 0x2b0   : > { %v2404_v56 = vor.u32 %v2403_v32, %v2399_v54  ;;  %v12474_v26 = vld [vmem:[%s15704_s12 + $0xac] sm:$0xf]  ;;  %v12475_v17 = vld [vmem:[%s15704_s12 + $0xb0] sm:$0x1]  ;;  %v8287_v45 = vsel %vm15774_vm12, %v8282_v41, %v8286_v33  ;;  %v5560_v18 = vadd.f32 %v5559_v7, %v17013_v50  ;;  %v2748_v14 = vrot.slane %v2746_v4, 4 }
 0x2b1   : > { %v8485_v1 = vrot.slane %v18706_v28, 5  ;;  %v14925_v31 = vld [vmem:[#allocation2 + $0x310] sm:$0xf0]  ;;  %2833 = vst [vmem:[#allocation2 + $0x338] sm:$0xf] %v2747_v39  ;;  %v2400_v35 = vsel %vm15774_vm12, %v2395_v37, %v2399_v54  ;;  %v2412_v4 = vshrl.u32 %v12473_v47, 16 }
 0x2b2   : > { %v8459_v28 = vld [vmem:[#allocation4 + $0x10] sm:$0xf]  ;;  %v13232_v12 = vor.u32 %v14925_v31, %v13231_v24  ;;  %8355 = vst [vmem:[#allocation2 + $0x70] sm:$0xf] %v8287_v45  ;;  %v2405_v27 = vrot.slane %v2404_v56, 4  ;;  %v17543_v25 = vadd.f32 %v5608_v15, %v5560_v18  ;;  %v2750_v50 = vsel %vm15782_vm13, %v2748_v14, %v2749_v0 }
 0x2b3   : > { %v13225_v13 = vld [vmem:[#allocation2 + $0x30c] sm:$0xf0]  ;;  %v8486_v32 = vsel %vm15774_vm12, %v17518_v61, %v8485_v1  ;;  %2561 = vst [vmem:[#allocation2 + $0x334] sm:$0xf] %v2400_v35  ;;  %v2415_v41 = vshll.u32 %v12473_v47, 16  ;;  %v2421_v7 = vshll.u32 %v12474_v26, 16 }
 0x2b4   : > { %18707 = vst [vmem:[#allocation39_spill] sm:$0xff] %v17543_v25  ;;  %v8460_v33 = vld [vmem:[#allocation4 + $0x14] sm:$0x1]  ;;  %v2410_v24 = vsel %vm15774_vm12, %v2405_v27, %v2409_v9  ;;  %v2425_v54 = vshrl.u32 %v12474_v26, 16  ;;  %v2431_v37 = vshll.u32 %v12475_v17, 16  ;;  %v13228_v56 = vor.u32 %v14920_v48, %v13225_v13  ;;  %v17549_v0 = vpop.f32.mrf.mxu2 }
 0x2b5   : > { %2834 = vst [vmem:[#allocation2 + $0x35c] sm:$0xf] %v2750_v50  ;;  %v2414_v39 = vrot.slane %v2412_v4, 4  ;;  %v2417_v61 = vrot.slane %v2415_v41, 5  ;;  %v8601_v1 = vld [vmem:[#allocation4 + $0x8] sm:$0xe] }
 0x2b6   : > { %2562 = vst [vmem:[#allocation2 + $0x358] sm:$0xf] %v2410_v24  ;;  %v2423_v15 = vrot.slane %v2421_v7, 5  ;;  %v2427_v31 = vrot.slane %v2425_v54, 4  ;;  %v8488_v45 = vshrl.u32 %v8459_v28, 16  ;;  %v2433_v18 = vrot.slane %v2431_v37, 5  ;;  %v17551_v17 = vpop.f32.mrf.mxu0  ;;  %v17553_v13 = vpop.f32.mrf.mxu1 }
 0x2b7   : > { %8593 = vst [vmem:[#allocation2 + $0x10] sm:$0xf] %v8486_v32  ;;  %v2418_v47 = vor.u32 %v2417_v61, %v2414_v39  ;;  %v8491_v14 = vshll.u32 %v8459_v28, 16  ;;  %v8602_v9 = vld [vmem:[#allocation4 + $0xc] sm:$0x1]  ;;  %5798 = vmatmul.bf16.gmra.mxu1 %v13232_v12  ;;  %v8497_v27 = vshll.u32 %v8460_v33, 16  ;;  %v17557_v39 = vpop.f32.mrf.mxu3 }
 0x2b8   : > { %18708 = vst [vmem:[#allocation40_spill] sm:$0xff] %v17549_v0  ;;  %v15052_v26 = vld [vmem:[#allocation2 + $0x4c] sm:$0xf]  ;;  %v2428_v48 = vor.u32 %v2427_v31, %v2423_v15  ;;  %v8490_v35 = vrot.slane %v8488_v45, 4  ;;  %v13901_v50 = vrot.slane %v8601_v1, 9  ;;  %v8635_v37 = vrot.slane %v8602_v9, 5 }
 0x2b9   : > { %18709 = vst [vmem:[#allocation41_spill] sm:$0xff] %v17551_v17  ;;  %5749 = vmatmul.bf16.gmra.mxu0 %v13228_v56  ;;  %v13957_v32 = vld [vmem:[#allocation2 + $0x6c] sm:$0xf0]  ;;  %v2419_v4 = vrot.slane %v2418_v47, 4  ;;  %v12521_v41 = vld [vmem:[%s15704_s12 + $0xa8] sm:$0xe] }
 0x2ba   : > { %18710 = vst [vmem:[#allocation42_spill] sm:$0xff] %v17553_v13  ;;  %v8493_v24 = vrot.slane %v8491_v14, 5  ;;  %v13960_v7 = vor.u32 %v15052_v26, %v13957_v32  ;;  %v2429_v28 = vrot.slane %v2428_v48, 4  ;;  %v12522_v54 = vld [vmem:[%s15704_s12 + $0xac] sm:$0xf]  ;;  %v12545_v12 = vrot.slane %v12521_v41, 9 }
 0x2bb   : > { %18711 = vst [vmem:[#allocation43_spill] sm:$0xff] %v17557_v39  ;;  %v2424_v61 = vsel %vm15774_vm12, %v2419_v4, %v2423_v15  ;;  %v12523_v31 = vld [vmem:[%s15704_s12 + $0xb0] sm:$0x1]  ;;  %v2753_v33 = vrot.slane %v12522_v54, 5  ;;  %v8499_v47 = vrot.slane %v8497_v27, 5 }
 0x2bc   : > { %v8494_v56 = vor.u32 %v8493_v24, %v8490_v35  ;;  %9768 = vmatmul.bf16.gmra.mxu3 %v13960_v7  ;;  %v2434_v1 = vsel %vm15774_vm12, %v2429_v28, %v2433_v18  ;;  %2563 = vst [vmem:[#allocation2 + $0x37c] sm:$0xf] %v2424_v61  ;;  %v2756_v45 = vrot.slane %v12523_v31, 5  ;;  %v12476_v26 = vld [vmem:[%s15704_s12 + $0xb4] sm:$0xf]  ;;  %v8636_v35 = vsel %vm15782_vm13, %v13901_v50, %v8635_v37  ;;  %v17571_v28 = vpop.f32.mrf.mxu2 }
 0x2bd   : > { %2564 = vst [vmem:[#allocation2 + $0x3a0] sm:$0xf] %v2434_v1  ;;  %v2754_v14 = vsel %vm15782_vm13, %v12545_v12, %v2753_v33  ;;  %v2755_v9 = vrot.slane %v2753_v33, 4  ;;  %v8603_v15 = vld [vmem:[#allocation4 + $0x10] sm:$0xe]  ;;  %v2436_v54 = vshrl.u32 %v12476_v26, 16 }
 0x2be   : > { %v8495_v48 = vrot.slane %v8494_v56, 4  ;;  %2835 = vst [vmem:[#allocation2 + $0x380] sm:$0xf] %v2754_v14  ;;  %v12477_v32 = vld [vmem:[%s15704_s12 + $0xb8] sm:$0xf]  ;;  %v2439_v12 = vshll.u32 %v12476_v26, 16  ;;  %v5564_v56 = vpop.f32.mrf.mxu0  ;;  %v5613_v1 = vpop.f32.mrf.mxu1 }
 0x2bf   : > { %v12478_v4 = vld [vmem:[%s15704_s12 + $0xbc] sm:$0x1]  ;;  %v8362_v24 = vld [vmem:[#allocation4 + $0x8] sm:$0xe]  ;;  %v13267_v18 = vld [vmem:[#allocation2 + $0x338] sm:$0xf]  ;;  %v2757_v27 = vsel %vm15782_vm13, %v2755_v9, %v2756_v45  ;;  %v5565_v20 = vadd.f32 %v5564_v56, %v17040_v34  ;;  %v17580_v34 = vpop.f32.mrf.mxu3 }
 0x2c0   : > { %v8604_v41 = vld [vmem:[#allocation4 + $0x14] sm:$0x1]  ;;  %v14934_v7 = vld [vmem:[#allocation2 + $0x358] sm:$0xf0]  ;;  %18712 = vst [vmem:[#allocation44_spill] sm:$0xff] %v17571_v28  ;;  %v2445_v61 = vshll.u32 %v12477_v32, 16  ;;  %v8500_v50 = vsel %vm15774_vm12, %v8495_v48, %v8499_v47 }
 0x2c1   : > { %v8363_v31 = vld [vmem:[#allocation4 + $0xc] sm:$0x1]  ;;  %v14929_v33 = vld [vmem:[#allocation2 + $0x334] sm:$0xf]  ;;  %2836 = vst [vmem:[#allocation2 + $0x3a4] sm:$0xf] %v2757_v27  ;;  %v17578_v13 = vadd.f32 %v5613_v1, %v5565_v20 }
 0x2c2   : > { %v2449_v14 = vshrl.u32 %v12477_v32, 16  ;;  %v2455_v39 = vshll.u32 %v12478_v4, 16  ;;  %v8441_v37 = vld [vmem:[#allocation4 + $0x8] sm:$0xf]  ;;  %v2438_v28 = vrot.slane %v2436_v54, 4  ;;  %v2441_v0 = vrot.slane %v2439_v12, 5 }
 0x2c3   : > { %v2447_v25 = vrot.slane %v2445_v61, 5  ;;  %8594 = vst [vmem:[#allocation2 + $0x34] sm:$0xf] %v8500_v50  ;;  %v13261_v45 = vld [vmem:[#allocation2 + $0x354] sm:$0xf0]  ;;  %v13902_v26 = vrot.slane %v8603_v15, 9  ;;  %v13268_v4 = vor.u32 %v14934_v7, %v13267_v18 }
 0x2c4   : > { %v2451_v9 = vrot.slane %v2449_v14, 4  ;;  %8673 = vst [vmem:[#allocation2 + $0x14] sm:$0xf] %v8636_v35  ;;  %v2442_v17 = vor.u32 %v2441_v0, %v2438_v28  ;;  %v8639_v27 = vrot.slane %v8604_v41, 5  ;;  %v13894_v32 = vrot.slane %v8362_v24, 9  ;;  %v17596_v18 = vpop.f32.mrf.mxu2 }
 0x2c5   : > { %8449 = vst [vmem:[#allocation2 + $0xc] sm:$0xf] %v8441_v37  ;;  %v2457_v47 = vrot.slane %v2455_v39, 5  ;;  %v8398_v48 = vrot.slane %v8363_v31, 5  ;;  %v13264_v62 = vor.u32 %v14929_v33, %v13261_v45  ;;  %v12525_v24 = vld [vmem:[%s15704_s12 + $0xb8] sm:$0xf] }
 0x2c6   : > { %v2452_v21 = vor.u32 %v2451_v9, %v2447_v25  ;;  %v2443_v54 = vrot.slane %v2442_v17, 4  ;;  %v8640_v15 = vsel %vm15782_vm13, %v13902_v26, %v8639_v27  ;;  %v17588_v41 = vpop.f32.mrf.mxu0  ;;  %v17590_v17 = vpop.f32.mrf.mxu1  ;;  %18715 = vst [vmem:[#allocation47_spill] sm:$0xff] %v17596_v18  ;;  %v12526_v7 = vld [vmem:[%s15704_s12 + $0xbc] sm:$0x1]  ;;  %v2760_v28 = vrot.slane %v12525_v24, 5 }
 0x2c7   : > { %8674 = vst [vmem:[#allocation2 + $0x38] sm:$0xf] %v8640_v15  ;;  %v8399_v0 = vsel %vm15782_vm13, %v13894_v32, %v8398_v48  ;;  %5803 = vmatmul.bf16.gmra.mxu1 %v13268_v4  ;;  %v12479_v12 = vld [vmem:[%s15704_s12 + $0xc0] sm:$0xf]  ;;  %v2763_v61 = vrot.slane %v12526_v7, 5 }
 0x2c8   : > { %v2453_v20 = vrot.slane %v2452_v21, 4  ;;  %v2448_v39 = vsel %vm15774_vm12, %v2443_v54, %v2447_v25  ;;  %8433 = vst [vmem:[#allocation2 + $0x2c] sm:$0xf] %v8399_v0  ;;  %v12524_v21 = vld [vmem:[%s15704_s12 + $0xb4] sm:$0xe]  ;;  %v2460_v56 = vshrl.u32 %v12479_v12, 16 }
 0x2c9   : > { %18713 = vst [vmem:[#allocation45_spill] sm:$0xff] %v17588_v41  ;;  %5754 = vmatmul.bf16.gmra.mxu0 %v13264_v62  ;;  %v12546_v25 = vrot.slane %v12524_v21, 9  ;;  %v12480_v31 = vld [vmem:[%s15704_s12 + $0xc4] sm:$0xf]  ;;  %v12481_v33 = vld [vmem:[%s15704_s12 + $0xc8] sm:$0x1] }
 0x2ca   : > { %18714 = vst [vmem:[#allocation46_spill] sm:$0xff] %v17590_v17  ;;  %v2458_v35 = vsel %vm15774_vm12, %v2453_v20, %v2457_v47  ;;  %v2762_v14 = vrot.slane %v2760_v28, 4  ;;  %v2463_v50 = vshll.u32 %v12479_v12, 16  ;;  %v2469_v37 = vshll.u32 %v12480_v31, 16  ;;  %v8442_v62 = vld [vmem:[#allocation4 + $0x10] sm:$0xf]  ;;  %v17606_v47 = vpop.f32.mrf.mxu3 }
 0x2cb   : > { %2565 = vst [vmem:[#allocation2 + $0x3c4] sm:$0xf] %v2448_v39  ;;  %v2761_v1 = vsel %vm15782_vm13, %v12546_v25, %v2760_v28  ;;  %v2462_v45 = vrot.slane %v2460_v56, 4  ;;  %v2473_v9 = vshrl.u32 %v12480_v31, 16  ;;  %v2479_v26 = vshll.u32 %v12481_v33, 16 }
 0x2cc   : > { %2566 = vst [vmem:[#allocation2 + $0x3e8] sm:$0xf] %v2458_v35  ;;  %v2764_v27 = vsel %vm15782_vm13, %v2762_v14, %v2763_v61  ;;  %v2465_v32 = vrot.slane %v2463_v50, 5  ;;  %v2471_v4 = vrot.slane %v2469_v37, 5  ;;  %v14938_v54 = vld [vmem:[#allocation2 + $0x37c] sm:$0xf]  ;;  %v17611_v50 = vpop.f32.mrf.mxu2 }
 0x2cd   : > { %2837 = vst [vmem:[#allocation2 + $0x3c8] sm:$0xf] %v2761_v1  ;;  %v2475_v48 = vrot.slane %v2473_v9, 4  ;;  %v13303_v15 = vld [vmem:[#allocation2 + $0x380] sm:$0xf]  ;;  %v2481_v7 = vrot.slane %v2479_v26, 5 }
 0x2ce   : > { %18716 = vst [vmem:[#allocation48_spill] sm:$0xff] %v17606_v47  ;;  %v14943_v20 = vld [vmem:[#allocation2 + $0x3a0] sm:$0xf0]  ;;  %v5569_v0 = vpop.f32.mrf.mxu0  ;;  %v5618_v39 = vpop.f32.mrf.mxu1  ;;  %v2466_v35 = vor.u32 %v2465_v32, %v2462_v45  ;;  %v8364_v25 = vld [vmem:[#allocation4 + $0x10] sm:$0xe] }
 0x2cf   : > { %2838 = vst [vmem:[#allocation2 + $0x3ec] sm:$0xf] %v2764_v27  ;;  %v5570_v21 = vadd.f32 %v5569_v0, %v17191_v58  ;;  %v2476_v24 = vor.u32 %v2475_v48, %v2471_v4  ;;  %v8365_v28 = vld [vmem:[#allocation4 + $0x14] sm:$0x1]  ;;  %v13297_v12 = vld [vmem:[#allocation2 + $0x39c] sm:$0xf0]  ;;  %v13304_v14 = vor.u32 %v14943_v20, %v13303_v15 }
 0x2d0   : > { %8450 = vst [vmem:[#allocation2 + $0x30] sm:$0xf] %v8442_v62  ;;  %v2467_v61 = vrot.slane %v2466_v35, 4  ;;  %v13895_v31 = vrot.slane %v8364_v25, 9  ;;  %v8402_v33 = vrot.slane %v8365_v28, 5  ;;  %v13300_v62 = vor.u32 %v14938_v54, %v13297_v12  ;;  %v15118_v28 = vld [vmem:[#allocation8 + $0x138] sm:$0xff] }
 0x2d1   : > { %v17609_v56 = vadd.f32 %v5618_v39, %v5570_v21  ;;  %v2477_v1 = vrot.slane %v2476_v24, 4  ;;  %18718 = vst [vmem:[#allocation50_spill] sm:$0xff] %v17611_v50  ;;  %v8842_v9 = vld [vmem:[#allocation4 + $0x10] sm:$0xe]  ;;  %v8843_v26 = vld [vmem:[#allocation4 + $0x14] sm:$0x1]  ;;  %9842 = vmatpush.bf16.msrb.mxu0 %v15118_v28 }
 0x2d2   : > { %v2472_v37 = vsel %vm15774_vm12, %v2467_v61, %v2471_v4  ;;  %v8403_v58 = vsel %vm15782_vm13, %v13895_v31, %v8402_v33  ;;  %v13909_v27 = vrot.slane %v8842_v9, 9  ;;  %v8876_v32 = vrot.slane %v8843_v26, 5  ;;  %v8682_v48 = vld [vmem:[#allocation4 + $0x10] sm:$0xf]  ;;  %v12527_v0 = vld [vmem:[%s15704_s12 + $0xc0] sm:$0xe]  ;;  %v17630_v21 = vpop.f32.mrf.mxu3 }
 0x2d3   : > { %18717 = vst [vmem:[#allocation49_spill] sm:$0xff] %v17609_v56  ;;  %v2482_v45 = vsel %vm15774_vm12, %v2477_v1, %v2481_v7  ;;  %v17625_v20 = vld [vmem:[#allocation4 + $0x10] sm:$0xf]  ;;  %v12528_v39 = vld [vmem:[%s15704_s12 + $0xc4] sm:$0xf]  ;;  %v12547_v24 = vrot.slane %v12527_v0, 9 }
 0x2d4   : > { %2567 = vst [vmem:[#allocation2 + $0x40c] sm:$0xf] %v2472_v37  ;;  %v8877_v54 = vsel %vm15782_vm13, %v13909_v27, %v8876_v32  ;;  %v12529_v35 = vld [vmem:[%s15704_s12 + $0xc8] sm:$0x1]  ;;  %v2767_v7 = vrot.slane %v12528_v39, 5  ;;  %v15126_v12 = vld [vmem:[#allocation8 + $0x178] sm:$0xff] }
 0x2d5   : > { %2568 = vst [vmem:[#allocation2 + $0x430] sm:$0xf] %v2482_v45  ;;  %v2770_v25 = vrot.slane %v12529_v35, 5  ;;  %9871 = vmatpush.bf16.msrb.mxu1 %v15126_v12  ;;  %v15117_v33 = vld [vmem:[#allocation8 + $0x130] sm:$0xff]  ;;  %v13339_v37 = vld [vmem:[#allocation2 + $0x3c8] sm:$0xf]  ;;  %v17636_v45 = vpop.f32.mrf.mxu2 }
 0x2d6   : > { %8434 = vst [vmem:[#allocation2 + $0x50] sm:$0xf] %v8403_v58  ;;  %v17619_v4 = vpop.f32.mrf.mxu0  ;;  %v17621_v15 = vpop.f32.mrf.mxu1  ;;  %v2768_v61 = vsel %vm15782_vm13, %v12547_v24, %v2767_v7  ;;  %v2769_v31 = vrot.slane %v2767_v7, 4  ;;  %v15125_v1 = vld [vmem:[#allocation8 + $0x170] sm:$0xff]  ;;  %v14952_v58 = vld [vmem:[#allocation2 + $0x3e8] sm:$0xf0]  ;;  %9843 = vmatpush.bf16.msrb.mxu0 %v15117_v33 }
 0x2d7   : > { %5808 = vmatmul.bf16.gmra.mxu1 %v13304_v14  ;;  %18719 = vst [vmem:[#allocation51_spill] sm:$0xff] %v17619_v4  ;;  %v8715_v14 = vshrl.u32 %v17625_v20, 16  ;;  %v12483_v26 = vld [vmem:[%s15704_s12 + $0xd0] sm:$0xf]  ;;  %v12484_v27 = vld [vmem:[%s15704_s12 + $0xd4] sm:$0x1] }
 0x2d8   : > { %18720 = vst [vmem:[#allocation52_spill] sm:$0xff] %v17621_v15  ;;  %v2771_v9 = vsel %vm15782_vm13, %v2769_v31, %v2770_v25  ;;  %v2497_v0 = vshrl.u32 %v12483_v26, 16  ;;  %v2503_v39 = vshll.u32 %v12484_v27, 16  ;;  %v14947_v35 = vld [vmem:[#allocation2 + $0x3c4] sm:$0xf]  ;;  %v15116_v28 = vld [vmem:[#allocation8 + $0x128] sm:$0xff]  ;;  %v13340_v27 = vor.u32 %v14952_v58, %v13339_v37 }
 0x2d9   : > { %8690 = vst [vmem:[#allocation2 + $0x18] sm:$0xf] %v8682_v48  ;;  %5759 = vmatmul.bf16.gmra.mxu0 %v13300_v62  ;;  %v12482_v62 = vld [vmem:[%s15704_s12 + $0xcc] sm:$0xf]  ;;  %v13333_v24 = vld [vmem:[#allocation2 + $0x3e4] sm:$0xf0]  ;;  %9872 = vmatpush.bf16.msrb.mxu1 %v15125_v1 }
 0x2da   : > { %18721 = vst [vmem:[#allocation53_spill] sm:$0xff] %v17630_v21  ;;  %v2484_v32 = vshrl.u32 %v12482_v62, 16  ;;  %v2487_v48 = vshll.u32 %v12482_v62, 16  ;;  %v15124_v12 = vld [vmem:[#allocation8 + $0x168] sm:$0xff]  ;;  %v17642_v56 = vrot.slane %v8715_v14, 4  ;;  %v8718_v25 = vshll.u32 %v17625_v20, 16  ;;  %v17648_v18 = vpop.f32.mrf.mxu3  ;;  %9844 = vmatpush.bf16.msrb.mxu0 %v15116_v28 }
 0x2db   : > { %8914 = vst [vmem:[#allocation2 + $0x20] sm:$0xf] %v8877_v54  ;;  %v2493_v54 = vshll.u32 %v12483_v26, 16  ;;  %v2505_v15 = vrot.slane %v2503_v39, 5  ;;  %v8461_v26 = vld [vmem:[#allocation4 + $0x18] sm:$0xf] }
 0x2dc   : > { %2839 = vst [vmem:[#allocation2 + $0x410] sm:$0xf] %v2768_v61  ;;  %v2486_v61 = vrot.slane %v2484_v32, 4  ;;  %v8462_v50 = vld [vmem:[#allocation4 + $0x1c] sm:$0x1]  ;;  %v8502_v33 = vshrl.u32 %v8461_v26, 16 }
 0x2dd   : > { %18722 = vst [vmem:[#allocation54_spill] sm:$0xff] %v17636_v45  ;;  %v2489_v45 = vrot.slane %v2487_v48, 5  ;;  %v2495_v62 = vrot.slane %v2493_v54, 5  ;;  %v8505_v1 = vshll.u32 %v8461_v26, 16  ;;  %v8605_v17 = vld [vmem:[#allocation4 + $0x18] sm:$0xe]  ;;  %9873 = vmatpush.bf16.msrb.mxu1 %v15124_v12 }
 0x2de   : > { %2840 = vst [vmem:[#allocation2 + $0x434] sm:$0xf] %v2771_v9  ;;  %v5574_v7 = vpop.f32.mrf.mxu0  ;;  %v2499_v9 = vrot.slane %v2497_v0, 4  ;;  %v5623_v4 = vpop.f32.mrf.mxu1  ;;  %v8511_v14 = vshll.u32 %v8462_v50, 16  ;;  %v8606_v48 = vld [vmem:[#allocation4 + $0x1c] sm:$0x1]  ;;  %v13336_v0 = vor.u32 %v14947_v35, %v13333_v24 }
 0x2df   : > { %v5575_v31 = vadd.f32 %v5574_v7, %v17211_v51  ;;  %v2490_v21 = vor.u32 %v2489_v45, %v2486_v61  ;;  %v13903_v41 = vrot.slane %v8605_v17, 9  ;;  %v8699_v20 = vld [vmem:[#allocation4 + $0x14] sm:$0x1]  ;;  %v15115_v51 = vld [vmem:[#allocation8 + $0x120] sm:$0xff]  ;;  %v8504_v37 = vrot.slane %v8502_v33, 4 }
 0x2e0   : > { %v2500_v32 = vor.u32 %v2499_v9, %v2495_v62  ;;  %v8507_v58 = vrot.slane %v8505_v1, 5  ;;  %v8643_v45 = vrot.slane %v8606_v48, 5  ;;  %v15123_v39 = vld [vmem:[#allocation8 + $0x160] sm:$0xff]  ;;  %v8720_v61 = vrot.slane %v8718_v25, 5  ;;  %9845 = vmatpush.bf16.msrb.mxu0 %v15115_v51  ;;  %v15122_v48 = vld [vmem:[#allocation8 + $0x158] sm:$0xff] }
 0x2e1   : > { %v17646_v47 = vadd.f32 %v5623_v4, %v5575_v31  ;;  %v2491_v54 = vrot.slane %v2490_v21, 4  ;;  %v8724_v28 = vshll.u32 %v8699_v20, 16  ;;  %v17654_v21 = vpop.f32.mrf.mxu2  ;;  %v8513_v24 = vrot.slane %v8511_v14, 5  ;;  %v8366_v31 = vld [vmem:[#allocation4 + $0x18] sm:$0xe]  ;;  %9874 = vmatpush.bf16.msrb.mxu1 %v15123_v39 }
 0x2e2   : > { %v2501_v7 = vrot.slane %v2500_v32, 4  ;;  %v8508_v50 = vor.u32 %v8507_v58, %v8504_v37  ;;  %v8644_v25 = vsel %vm15782_vm13, %v13903_v41, %v8643_v45  ;;  %v12531_v9 = vld [vmem:[%s15704_s12 + $0xd0] sm:$0xf]  ;;  %v12532_v26 = vld [vmem:[%s15704_s12 + $0xd4] sm:$0x1]  ;;  %v15113_v20 = vld [vmem:[#allocation8 + $0x110] sm:$0xff] }
 0x2e3   : > { %v2496_v4 = vsel %vm15774_vm12, %v2491_v54, %v2495_v62  ;;  %v8721_v62 = vor.u32 %v8720_v61, %v17642_v56  ;;  %v2774_v33 = vrot.slane %v12531_v9, 5  ;;  %v2777_v1 = vrot.slane %v12532_v26, 5  ;;  %v15114_v32 = vld [vmem:[#allocation8 + $0x118] sm:$0xff]  ;;  %8675 = vst [vmem:[#allocation2 + $0x5c] sm:$0xf] %v8644_v25  ;;  %v15121_v45 = vld [vmem:[#allocation8 + $0x150] sm:$0xff] }
 0x2e4   : > { %v2506_v17 = vsel %vm15774_vm12, %v2501_v7, %v2505_v15  ;;  %2569 = vst [vmem:[#allocation2 + $0x454] sm:$0xf] %v2496_v4  ;;  %v8509_v35 = vrot.slane %v8508_v50, 4  ;;  %v12530_v15 = vld [vmem:[%s15704_s12 + $0xcc] sm:$0xe]  ;;  %v13896_v51 = vrot.slane %v8366_v31, 9  ;;  %9846 = vmatpush.bf16.msrb.mxu0 %v15114_v32  ;;  %v17668_v7 = vpop.f32.mrf.mxu3  ;;  %s337_s12 = scalar_lea.vmem %s18646_s7, %s12244_s14 }
 0x2e5   : > { %2570 = vst [vmem:[#allocation2 + $0x478] sm:$0xf] %v2506_v17  ;;  %v8726_v41 = vrot.slane %v8724_v28, 5  ;;  %v2776_v54 = vrot.slane %v2774_v33, 4  ;;  %v8367_v37 = vld [vmem:[#allocation4 + $0x1c] sm:$0x1]  ;;  %9875 = vmatpush.bf16.msrb.mxu1 %v15122_v48 }
 0x2e6   : > { %v17656_v12 = vpop.f32.mrf.mxu0  ;;  %v8514_v14 = vsel %vm15774_vm12, %v8509_v35, %v8513_v24  ;;  %v8722_v58 = vrot.slane %v8721_v62, 4  ;;  %v8443_v39 = vld [vmem:[#allocation4 + $0x18] sm:$0xf]  ;;  %v17674_v50 = vpop.f32.mrf.mxu1  ;;  %v13375_v28 = vld [vmem:[#allocation2 + $0x410] sm:$0xf] }
 0x2e7   : > { %5813 = vmatmul.bf16.gmra.mxu1 %v13340_v27  ;;  %v12548_v27 = vrot.slane %v12530_v15, 9  ;;  %8595 = vst [vmem:[#allocation2 + $0x58] sm:$0xf] %v8514_v14  ;;  %v2778_v61 = vsel %vm15782_vm13, %v2776_v54, %v2777_v1  ;;  %v15112_v24 = vld [vmem:[#allocation8 + $0x108] sm:$0xff]  ;;  %v14956_v15 = vld [vmem:[#allocation2 + $0x40c] sm:$0xf] }
 0x2e8   : > { %8451 = vst [vmem:[#allocation2 + $0x54] sm:$0xf] %v8443_v39  ;;  %v8727_v4 = vsel %vm15774_vm12, %v8722_v58, %v8726_v41  ;;  %9847 = vmatpush.bf16.msrb.mxu0 %v15113_v20  ;;  %v14961_v25 = vld [vmem:[#allocation2 + $0x430] sm:$0xf0]  ;;  %v13369_v9 = vld [vmem:[#allocation2 + $0x42c] sm:$0xf0] }
 0x2e9   : > { %5764 = vmatmul.bf16.gmra.mxu0 %v13336_v0  ;;  %v2775_v56 = vsel %vm15782_vm13, %v12548_v27, %v2774_v33  ;;  %v8406_v0 = vrot.slane %v8367_v37, 5  ;;  %2842 = vst [vmem:[#allocation2 + $0x47c] sm:$0xf] %v2778_v61  ;;  %9876 = vmatpush.bf16.msrb.mxu1 %v15121_v45  ;;  %v15120_v62 = vld [vmem:[#allocation8 + $0x148] sm:$0xff]  ;;  %v17679_v26 = vpop.f32.mrf.mxu2  ;;  %v13376_v27 = vor.u32 %v14961_v25, %v13375_v28  ;;  %v15111_v33 = vld [vmem:[#allocation8 + $0x100] sm:$0xff] }
 0x2ea   : > { %2841 = vst [vmem:[#allocation2 + $0x458] sm:$0xf] %v2775_v56  ;;  %v13372_v1 = vor.u32 %v14956_v15, %v13369_v9  ;;  %v15119_v32 = vld [vmem:[#allocation8 + $0x140] sm:$0xff]  ;;  %v8844_v48 = vld [vmem:[#allocation4 + $0x18] sm:$0xe] }
 0x2eb   : > { %v8407_v17 = vsel %vm15782_vm13, %v13896_v51, %v8406_v0  ;;  %8834 = vst [vmem:[#allocation2 + $0x1c] sm:$0xf] %v8727_v4  ;;  %v8845_v20 = vld [vmem:[#allocation4 + $0x1c] sm:$0x1]  ;;  %v13910_v14 = vrot.slane %v8844_v48, 9 }
 0x2ec   : > { %8435 = vst [vmem:[#allocation2 + $0x74] sm:$0xf] %v8407_v17  ;;  %9848 = vmatpush.bf16.msrb.mxu0 %v15112_v24  ;;  %v8880_v51 = vrot.slane %v8845_v20, 5  ;;  %v8683_v41 = vld [vmem:[#allocation4 + $0x18] sm:$0xf] }
 0x2ed   : > { %9877 = vmatpush.bf16.msrb.mxu1 %v15120_v62  ;;  %v8700_v56 = vld [vmem:[#allocation4 + $0x18] sm:$0xf]  ;;  %8691 = vst [vmem:[#allocation2 + $0x3c] sm:$0xf] %v8683_v41  ;;  %v8701_v0 = vld [vmem:[#allocation4 + $0x1c] sm:$0x1] }
 0x2ee   : > { %v5579_v35 = vpop.f32.mrf.mxu0  ;;  %v8881_v54 = vsel %vm15782_vm13, %v13910_v14, %v8880_v51  ;;  %v8729_v37 = vshrl.u32 %v8700_v56, 16  ;;  %v8732_v58 = vshll.u32 %v8700_v56, 16  ;;  %v14965_v25 = vld [vmem:[#allocation2 + $0x454] sm:$0xf]  ;;  %v13405_v20 = vld [vmem:[#allocation2 + $0x474] sm:$0xf0] }
 0x2ef   : > { %v5580_v31 = vadd.f32 %v5579_v35, %v17348_v19  ;;  %v17681_v19 = vpop.f32.mrf.mxu3  ;;  %8915 = vst [vmem:[#allocation2 + $0x44] sm:$0xf] %v8881_v54  ;;  %v8738_v35 = vshll.u32 %v8701_v0, 16  ;;  %v8608_v41 = vld [vmem:[#allocation4 + $0x24] sm:$0x1] }
 0x2f0   : > { %9849 = vmatpush.bf16.msrb.mxu0 %v15111_v33  ;;  %v8731_v61 = vrot.slane %v8729_v37, 4  ;;  %v8734_v4 = vrot.slane %v8732_v58, 5  ;;  %v14970_v15 = vld [vmem:[#allocation2 + $0x478] sm:$0xf0]  ;;  %v8647_v0 = vrot.slane %v8608_v41, 5 }
 0x2f1   : > { %9878 = vmatpush.bf16.msrb.mxu1 %v15119_v32  ;;  %v17687_v17 = vpop.f32.mrf.mxu2  ;;  %v13411_v62 = vld [vmem:[#allocation2 + $0x458] sm:$0xf]  ;;  %v8740_v9 = vrot.slane %v8738_v35, 5  ;;  %v8464_v32 = vld [vmem:[#allocation4 + $0x24] sm:$0x1] }
 0x2f2   : > { %v8735_v28 = vor.u32 %v8734_v4, %v8731_v61  ;;  %v13412_v37 = vor.u32 %v14970_v15, %v13411_v62  ;;  %v8224_v61 = vld [vmem:[#allocation4 + $0x20] sm:$0xf]  ;;  %v8525_v35 = vshll.u32 %v8464_v32, 16 }
 0x2f4   : > { %v8736_v24 = vrot.slane %v8735_v28, 4 }
 0x2f6   : > { %v8741_v56 = vsel %vm15774_vm12, %v8736_v24, %v8740_v9  ;;  %v17698_v58 = vpop.f32.mrf.mxu0  ;;  %v8225_v9 = vld [vmem:[#allocation4 + $0x24] sm:$0x1] }
 0x2f7   : > { %5818 = vmatmul.bf16.gmra.mxu1 %v13376_v27  ;;  %v17689_v27 = vld [vmem:[#allocation6] ss:$0 sm:$0xff]  ;;  %v17693_v48 = vpop.f32.mrf.mxu3  ;;  %8835 = vst [vmem:[#allocation2 + $0x40] sm:$0xf] %v8741_v56 }
 0x2f8   : > { %v5400_v33 = vadd.f32 %v17689_v27, %v16833_v36  ;;  %18724 = vst [vmem:[#allocation56_spill] sm:$0xff] %v17693_v48  ;;  %v8204_v36 = vld [vmem:[#allocation4 + $0x20] sm:$0xf]  ;;  %v13408_v48 = vor.u32 %v14965_v25, %v13405_v20  ;;  %v8527_v25 = vrot.slane %v8525_v35, 5 }
 0x2f9   : > { %5769 = vmatmul.bf16.gmra.mxu0 %v13372_v1  ;;  %v8463_v1 = vld [vmem:[#allocation4 + $0x20] sm:$0xf]  ;;  %8212 = vst [vmem:[#allocation2 + $0x90] sm:$0xf] %v8204_v36 }
 0x2fa   : > { %v5628_v45 = vpop.f32.mrf.mxu1  ;;  %v8516_v14 = vshrl.u32 %v8463_v1, 16  ;;  %v8519_v51 = vshll.u32 %v8463_v1, 16  ;;  %v5449_v54 = vadd.f32 %v16837_v44, %v5400_v33  ;;  %v8292_v44 = vshll.u32 %v8224_v61, 16  ;;  %v8444_v20 = vld [vmem:[#allocation4 + $0x20] sm:$0xf] }
 0x2fb   : > { %v17685_v39 = vadd.f32 %v5628_v45, %v5580_v31  ;;  %v8607_v31 = vld [vmem:[#allocation4 + $0x20] sm:$0xe]  ;;  %8452 = vst [vmem:[#allocation2 + $0x78] sm:$0xf] %v8444_v20 }
 0x2fc   : > { %v13904_v45 = vrot.slane %v8607_v31, 9  ;;  %v8518_v4 = vrot.slane %v8516_v14, 4  ;;  %v8521_v28 = vrot.slane %v8519_v51, 5  ;;  %v8294_v31 = vrot.slane %v8292_v44, 5  ;;  %v18726_v51 = vld [vmem:[#allocation19_spill] sm:$0xff] }
 0x2fd   : > { %18723 = vst [vmem:[#allocation55_spill] sm:$0xff] %v17685_v39  ;;  %v8289_v39 = vshrl.u32 %v8224_v61, 16  ;;  %v8298_v14 = vshll.u32 %v8225_v9, 16  ;;  %v5498_v32 = vadd.f32 %v18726_v51, %v5449_v54  ;;  %v8368_v36 = vld [vmem:[#allocation4 + $0x20] sm:$0xe]  ;;  %v5643_v54 = vadd.f32 %v17414_v10, %v17356_v55 }
 0x2fe   : > { %v8648_v24 = vsel %vm15782_vm13, %v13904_v45, %v8647_v0  ;;  %v8522_v15 = vor.u32 %v8521_v28, %v8518_v4  ;;  %v8369_v45 = vld [vmem:[#allocation4 + $0x24] sm:$0x1]  ;;  %v13897_v0 = vrot.slane %v8368_v36, 9  ;;  %v13937_v10 = vld [vmem:[#allocation2 + $0x34] sm:$0xf0] }
 0x2ff   : > { %v17704_v62 = vpop.f32.mrf.mxu2  ;;  %8676 = vst [vmem:[#allocation2 + $0x80] sm:$0xf] %v8648_v24  ;;  %v8291_v33 = vrot.slane %v8289_v39, 4  ;;  %v5547_v56 = vadd.f32 %v17418_v6, %v5498_v32  ;;  %v8410_v39 = vrot.slane %v8369_v45, 5  ;;  %v8300_v28 = vrot.slane %v8298_v14, 5 }
 0x300   : > { %v8523_v41 = vrot.slane %v8522_v15, 4  ;;  %v15045_v14 = vld [vmem:[#allocation2 + $0x14] sm:$0xf]  ;;  %v13935_v36 = vld [vmem:[#allocation2 + $0x10] sm:$0xf] }
 0x301   : > { %v5596_v6 = vadd.f32 %v17420_v52, %v5547_v56  ;;  %v13940_v51 = vor.u32 %v15045_v14, %v13937_v10 }
 0x302   : > { %v17700_v1 = vpop.f32.mrf.mxu1  ;;  %v8528_v61 = vsel %vm15774_vm12, %v8523_v41, %v8527_v25  ;;  %v8846_v41 = vld [vmem:[#allocation4 + $0x20] sm:$0xe]  ;;  %v8847_v25 = vld [vmem:[#allocation4 + $0x24] sm:$0x1] }
 0x303   : > { %18725 = vst [vmem:[#allocation57_spill] sm:$0xff] %v17700_v1  ;;  %v8295_v1 = vor.u32 %v8294_v31, %v8291_v33  ;;  %v5645_v44 = vadd.f32 %v17430_v23, %v5596_v6  ;;  %v15049_v31 = vld [vmem:[#allocation2 + $0x30] sm:$0xf0] }
 0x304   : > { %8596 = vst [vmem:[#allocation2 + $0x7c] sm:$0xf] %v8528_v61  ;;  %v13936_v23 = vor.u32 %v15049_v31, %v13935_v36  ;;  %v8684_v61 = vld [vmem:[#allocation4 + $0x20] sm:$0xf] }
 0x305   : > { %v8296_v4 = vrot.slane %v8295_v1, 4  ;;  %v5692_v1 = vadd.f32 %v17416_v42, %v5643_v54  ;;  %v5694_v33 = vadd.f32 %v17432_v38, %v5645_v44  ;;  %v13911_v42 = vrot.slane %v8846_v41, 9  ;;  %8692 = vst [vmem:[#allocation2 + $0x60] sm:$0xf] %v8684_v61 }
 0x307   : > { %5823 = vmatmul.bf16.gmra.mxu1 %v13412_v37  ;;  %v17712_v37 = vpop.f32.mrf.mxu3  ;;  %v8301_v24 = vsel %vm15774_vm12, %v8296_v4, %v8300_v28  ;;  %v17721_v15 = vpop.f32.mrf.mxu2  ;;  %v17728_v4 = vld [vmem:[#allocation10] ss:$0 sm:$0xff] }
 0x308   : > { %18727 = vst [vmem:[#allocation19_spill] sm:$0xff] %v17712_v37 }
 0x309   : > { %5774 = vmatmul.bf16.gmra.mxu0 %v13408_v48  ;;  %v8411_v48 = vsel %vm15782_vm13, %v13897_v0, %v8410_v39  ;;  %8356 = vst [vmem:[#allocation2 + $0x94] sm:$0xf] %v8301_v24  ;;  %v8884_v0 = vrot.slane %v8847_v25, 5  ;;  %v8703_v24 = vld [vmem:[#allocation4 + $0x24] sm:$0x1] }
 0x30a   : > { %8436 = vst [vmem:[#allocation2 + $0x98] sm:$0xf] %v8411_v48  ;;  %v8752_v14 = vshll.u32 %v8703_v24, 16  ;;  %v5648_v24 = vadd.f32 %v17454_v57, %v17446_v40 }
 0x30b   : > { %v8885_v38 = vsel %vm15782_vm13, %v13911_v42, %v8884_v0  ;;  %v13973_v42 = vld [vmem:[#allocation2 + $0x7c] sm:$0xf0] }
 0x30c   : > { %8916 = vst [vmem:[#allocation2 + $0x68] sm:$0xf] %v8885_v38  ;;  %v18732_v0 = vld [vmem:[#allocation22_spill] sm:$0xff] }
 0x30e   : > { %v5740_v35 = vpop.f32.mrf.mxu0 }
 0x30f   : > { %v5741_v55 = vadd.f32 %v5740_v35, %v5692_v1  ;;  %v17724_v20 = vpop.f32.mrf.mxu3  ;;  %v8702_v35 = vld [vmem:[#allocation4 + $0x20] sm:$0xf] }
 0x310   : > { %v5789_v9 = vpop.f32.mrf.mxu1  ;;  %18728 = vst [vmem:[#allocation58_spill] sm:$0xff] %v17724_v20  ;;  %v8746_v1 = vshll.u32 %v8702_v35, 16 }
 0x311   : > { %v5790_v52 = vadd.f32 %v5789_v9, %v5741_v55  ;;  %v8743_v9 = vshrl.u32 %v8702_v35, 16  ;;  %v18729_v55 = vld [vmem:[#allocation20_spill] sm:$0xff] }
 0x312   : > { %v5405_v10 = vadd.f32 %v17689_v27, %v18729_v55  ;;  %v8748_v31 = vrot.slane %v8746_v1, 5 }
 0x313   : > { %v5829_v28 = vmax.f32 %v5790_v52, 0.0  ;;  %v9735_v54 = vpop.f32.mrf.mxu2  ;;  %v13987_v60 = vld [vmem:[#allocation2 + $0x68] sm:$0xf] }
 0x314   : > { %v9736_v44 = vadd.f32 %v17728_v4, %v9735_v54  ;;  %v13971_v54 = vld [vmem:[#allocation2 + $0x58] sm:$0xf] }
 0x316   : > { %v5742_v32 = vpop.f32.mrf.mxu0 }
 0x317   : > { %v5743_v45 = vadd.f32 %v5742_v32, %v5694_v33  ;;  %9879 = vmatmul.bf16.vlgmr.msrb.gmra.mxu1 %v13940_v51  ;;  %v8745_v33 = vrot.slane %v8743_v9, 4  ;;  %v18730_v51 = vld [vmem:[#allocation21_spill] sm:$0xff] }
 0x318   : > { %v5791_v56 = vpop.f32.mrf.mxu1  ;;  %v5454_v32 = vadd.f32 %v18730_v51, %v5405_v10 }
 0x319   : > { %v5792_v39 = vadd.f32 %v5791_v56, %v5743_v45  ;;  %9850 = vmatmul.bf16.vlgmr.msrb.gmra.mxu0 %v13936_v23  ;;  %v8749_v25 = vor.u32 %v8748_v31, %v8745_v33  ;;  %v8754_v45 = vrot.slane %v8752_v14, 5  ;;  %v15058_v56 = vld [vmem:[#allocation2 + $0x78] sm:$0xf0] }
 0x31a   : > { %v5503_v23 = vadd.f32 %v18732_v0, %v5454_v32  ;;  %v13972_v35 = vor.u32 %v15058_v56, %v13971_v54 }
 0x31b   : > { %v5830_v48 = vmax.f32 %v5792_v39, 0.0  ;;  %v8750_v36 = vrot.slane %v8749_v25, 4  ;;  %v15054_v39 = vld [vmem:[#allocation2 + $0x5c] sm:$0xf] }
 0x31c   : > { %v5552_v38 = vadd.f32 %v17458_v2, %v5503_v23 }
 0x31d   : > { %v15275_v6 = vpack.c.bf16 %v5830_v48, %v5829_v28  ;;  %v8755_v61 = vsel %vm15774_vm12, %v8750_v36, %v8754_v45  ;;  %v13976_v48 = vor.u32 %v15054_v39, %v13973_v42  ;;  %v18733_v42 = vld [vmem:[#allocation23_spill] sm:$0xff] }
 0x31e   : > { %8836 = vst [vmem:[#allocation2 + $0x64] sm:$0xf] %v8755_v61  ;;  %v5601_v9 = vadd.f32 %v17460_v49, %v5552_v38 }
 0x31f   : > { %15344 = vst [vmem:[#allocation3 + $0x40] sm:$0xff] %v15275_v6  }
 0x320   : > { %v5650_v55 = vadd.f32 %v17481_v5, %v5601_v9 }
 0x322   : > { %v9764_v41 = vpop.f32.mrf.mxu3  ;;  %v5699_v14 = vadd.f32 %v17483_v43, %v5650_v55 }
 0x323   : > { %v17734_v52 = vadd.f32 %v9764_v41, %v9736_v44  ;;  %v5697_v44 = vadd.f32 %v17456_v3, %v5648_v24  ;;  %v5410_v41 = vadd.f32 %v17689_v27, %v16951_v16 }
 0x324   : > { %v5794_v6 = vpop.f32.mrf.mxu1 }
 0x325   : > { %18731 = vst [vmem:[#allocation20_spill] sm:$0xff] %v17734_v52  ;;  %v5459_v0 = vadd.f32 %v18733_v42, %v5410_v41 }
 0x326   : > { %v5745_v28 = vpop.f32.mrf.mxu0  ;;  %v5893_v1 = vld [vmem:[#allocation3 + $0x40] sm:$0xf]  ;;  %v5894_v10 = vld [vmem:[#allocation3 + $0x44] sm:$0xf] }
 0x327   : > { %9884 = vmatmul.bf16.gmra.mxu1 %v13976_v48  ;;  %v5957_v33 = vrot.slane %v5893_v1, 3  ;;  %v5746_v2 = vadd.f32 %v5745_v28, %v5697_v44  ;;  %v5958_v51 = vrot.slane %v5894_v10, 3  ;;  %v18734_v44 = vld [vmem:[#allocation24_spill] sm:$0xff] }
 0x328   : > { %v5508_v55 = vadd.f32 %v18734_v44, %v5459_v0 }
 0x329   : > { %9855 = vmatmul.bf16.gmra.mxu0 %v13972_v35  ;;  %v6172_v32 = vsel %vm5977_vm14, %v5893_v1, %v5957_v33  ;;  %v5795_v40 = vadd.f32 %v5794_v6, %v5746_v2  ;;  %v6175_v49 = vsel %vm5981_vm15, %v5893_v1, %v5957_v33  ;;  %v6178_v3 = vsel %vm5985_vm0, %v5893_v1, %v5957_v33 }
 0x32a   : > { %v6184_v5 = vsel %vm5977_vm14, %v5894_v10, %v5958_v51  ;;  %v6187_v36 = vsel %vm5981_vm15, %v5894_v10, %v5958_v51  ;;  %v6190_v45 = vsel %vm5985_vm0, %v5894_v10, %v5958_v51  ;;  %v6171_v23 = vsel %vm5973_vm4, %v5893_v1, %v5957_v33 }
 0x32b   : > { %v6174_v56 = vrot.slane %v6172_v32, 1  ;;  %v6177_v61 = vrot.slane %v6175_v49, 2  ;;  %v6180_v39 = vrot.slane %v6178_v3, 3  ;;  %v5831_v16 = vmax.f32 %v5795_v40, 0.0 }
 0x32c   : > { %v5796_v25 = vpop.f32.mrf.mxu1  ;;  %v6186_v28 = vrot.slane %v6184_v5, 1  ;;  %v6189_v54 = vrot.slane %v6187_v36, 2  ;;  %v6192_v48 = vrot.slane %v6190_v45, 3  ;;  %v6183_v35 = vsel %vm5973_vm4, %v5894_v10, %v5958_v51 }
 0x32d   : > { %v6521_v6 = vunpack.c.l.bf16 %v6171_v23  ;;  %v6522_v9 = vunpack.c.l.bf16 %v6174_v56  ;;  %v6523_v2 = vunpack.c.l.bf16 %v6177_v61  ;;  %v5653_v40 = vadd.f32 %v17508_v11, %v17494_v63 }
 0x32e   : > { %v5747_v31 = vpop.f32.mrf.mxu0  ;;  %v6526_v1 = vunpack.c.l.bf16 %v6186_v28  ;;  %v6527_v33 = vunpack.c.l.bf16 %v6189_v54  ;;  %v6528_v32 = vunpack.c.l.bf16 %v6192_v48 }
 0x32f   : > { %v5748_v57 = vadd.f32 %v5747_v31, %v5699_v14  ;;  %v6524_v31 = vunpack.c.l.bf16 %v6180_v39  ;;  %v6525_v14 = vunpack.c.l.bf16 %v6183_v35  ;;  %v13733_v41 = vrot.slane %v6521_v6, 9 }
 0x330   : > { %v13734_v49 = vrot.slane %v6522_v9, 9  ;;  %v13735_v10 = vrot.slane %v6523_v2, 9  ;;  %v13739_v5 = vrot.slane %v6527_v33, 9  ;;  %v13740_v36 = vrot.slane %v6528_v32, 9 }
 0x331   : > { %v5797_v43 = vadd.f32 %v5796_v25, %v5748_v57  ;;  %v5557_v57 = vadd.f32 %v17512_v22, %v5508_v55  ;;  %v13736_v51 = vrot.slane %v6524_v31, 9  ;;  %v13737_v3 = vrot.slane %v6525_v14, 9 }
 0x332   : > { %v13738_v25 = vrot.slane %v6526_v1, 9  ;;  %v17762_v45 = vadd.f32 %v17510_v46, %v5653_v40  ;;  %v6841_v42 = vmax.f32 %v6521_v6, %v13733_v41  ;;  %v6842_v0 = vmax.f32 %v6522_v9, %v13734_v49 }
 0x333   : > { %v5832_v38 = vmax.f32 %v5797_v43, 0.0  ;;  %v17765_v43 = vadd.f32 %v17514_v29, %v5557_v57  ;;  %v6843_v11 = vmax.f32 %v6523_v2, %v13735_v10  ;;  %v6844_v22 = vmax.f32 %v6524_v31, %v13736_v51 }
 0x334   : > { %v6845_v39 = vmax.f32 %v6525_v14, %v13737_v3  ;;  %v6848_v28 = vmax.f32 %v6528_v32, %v13740_v36 }
 0x335   : > { %v15280_v24 = vpack.c.bf16 %v5832_v38, %v5831_v16  ;;  %v6846_v16 = vmax.f32 %v6526_v1, %v13738_v25  ;;  %v6847_v38 = vmax.f32 %v6527_v33, %v13739_v5 }
 0x337   : > { %15345 = vst [vmem:[#allocation3 + $0x48] sm:$0xff] %v15280_v24  }
 0x33e   : > { %v5895_v23 = vld [vmem:[#allocation3 + $0x48] sm:$0xf]  ;;  %v5896_v63 = vld [vmem:[#allocation3 + $0x4c] sm:$0xf] }
 0x33f   : > { %v5959_v56 = vrot.slane %v5895_v23, 3  ;;  %v5960_v61 = vrot.slane %v5896_v63, 3 }
 0x341   : > { %v6195_v54 = vsel %vm5973_vm4, %v5895_v23, %v5959_v56  ;;  %v6196_v46 = vsel %vm5977_vm14, %v5895_v23, %v5959_v56  ;;  %v6199_v48 = vsel %vm5981_vm15, %v5895_v23, %v5959_v56  ;;  %v6202_v29 = vsel %vm5985_vm0, %v5895_v23, %v5959_v56 }
 0x342   : > { %v6198_v35 = vrot.slane %v6196_v46, 1  ;;  %v6201_v24 = vrot.slane %v6199_v48, 2  ;;  %v6204_v6 = vrot.slane %v6202_v29, 3  ;;  %v6207_v9 = vsel %vm5973_vm4, %v5896_v63, %v5960_v61 }
 0x343   : > { %v6208_v44 = vsel %vm5977_vm14, %v5896_v63, %v5960_v61  ;;  %v6211_v55 = vsel %vm5981_vm15, %v5896_v63, %v5960_v61  ;;  %v6214_v2 = vsel %vm5985_vm0, %v5896_v63, %v5960_v61  ;;  %v6969_v31 = vunpack.c.l.bf16 %v6195_v54 }
 0x344   : > { %v6210_v14 = vrot.slane %v6208_v44, 1  ;;  %v6213_v1 = vrot.slane %v6211_v55, 2  ;;  %v6216_v33 = vrot.slane %v6214_v2, 3  ;;  %v6970_v32 = vunpack.c.l.bf16 %v6198_v35 }
 0x345   : > { %v6971_v40 = vunpack.c.l.bf16 %v6201_v24  ;;  %v6972_v57 = vunpack.c.l.bf16 %v6204_v6  ;;  %v6973_v41 = vunpack.c.l.bf16 %v6207_v9  ;;  %v13797_v49 = vrot.slane %v6969_v31, 9  ;;  %v17775_v24 = vpop.f32.mrf.mxu2 }
 0x346   : > { %v6974_v10 = vunpack.c.l.bf16 %v6210_v14  ;;  %v6975_v51 = vunpack.c.l.bf16 %v6213_v1  ;;  %v6976_v3 = vunpack.c.l.bf16 %v6216_v33  ;;  %v13798_v25 = vrot.slane %v6970_v32, 9  ;;  %18735 = vst [vmem:[#allocation21_spill] sm:$0xff] %v17775_v24  ;;  %v5750_v14 = vpop.f32.mrf.mxu0 }
 0x347   : > { %v13799_v5 = vrot.slane %v6971_v40, 9  ;;  %v13800_v36 = vrot.slane %v6972_v57, 9  ;;  %v13801_v23 = vrot.slane %v6973_v41, 9  ;;  %v7289_v56 = vmax.f32 %v6969_v31, %v13797_v49  ;;  %v17777_v31 = vpop.f32.mrf.mxu3 }
 0x348   : > { %v13802_v46 = vrot.slane %v6974_v10, 9  ;;  %v13803_v48 = vrot.slane %v6975_v51, 9  ;;  %v13804_v63 = vrot.slane %v6976_v3, 9  ;;  %v7290_v61 = vmax.f32 %v6970_v32, %v13798_v25  ;;  %18736 = vst [vmem:[#allocation22_spill] sm:$0xff] %v17777_v31 }
 0x349   : > { %v7291_v54 = vmax.f32 %v6971_v40, %v13799_v5  ;;  %v7292_v29 = vmax.f32 %v6972_v57, %v13800_v36  ;;  %v7293_v44 = vmax.f32 %v6973_v41, %v13801_v23  ;;  %v7545_v35 = vmax.f32 %v6841_v42, %v7289_v56  ;;  %v5799_v57 = vpop.f32.mrf.mxu1 }
 0x34a   : > { %v7294_v6 = vmax.f32 %v6974_v10, %v13802_v46  ;;  %v7295_v9 = vmax.f32 %v6975_v51, %v13803_v48  ;;  %v7296_v55 = vmax.f32 %v6976_v3, %v13804_v63  ;;  %v7546_v2 = vmax.f32 %v6842_v0, %v7290_v61 }
 0x34b   : > { %v7547_v1 = vmax.f32 %v6843_v11, %v7291_v54  ;;  %v7548_v33 = vmax.f32 %v6844_v22, %v7292_v29  ;;  %v7549_v52 = vmax.f32 %v6845_v39, %v7293_v44  ;;  %v7609_v20 = vpack.c.bf16 %v7545_v35, %v7545_v35 }
 0x34c   : > { %v7550_v49 = vmax.f32 %v6846_v16, %v7294_v6  ;;  %v7551_v37 = vmax.f32 %v6847_v38, %v7295_v9  ;;  %v7552_v32 = vmax.f32 %v6848_v28, %v7296_v55  ;;  %v7610_v40 = vpack.c.bf16 %v7546_v2, %v7546_v2 }
 0x34d   : > { %v7611_v41 = vpack.c.bf16 %v7547_v1, %v7547_v1  ;;  %v7612_v42 = vpack.c.bf16 %v7548_v33, %v7548_v33  ;;  %v7613_v25 = vpack.c.bf16 %v7549_v52, %v7549_v52  ;;  %v7737_v5 = vunpack.c.l.b16 %v7609_v20  ;;  %v9740_v61 = vpop.f32.mrf.mxu2 }
 0x34e   : > { %v7614_v10 = vpack.c.bf16 %v7550_v49, %v7550_v49  ;;  %v7615_v51 = vpack.c.bf16 %v7551_v37, %v7551_v37  ;;  %v7616_v3 = vpack.c.bf16 %v7552_v32, %v7552_v32  ;;  %v7738_v0 = vunpack.c.l.b16 %v7610_v40  ;;  %v5752_v54 = vpop.f32.mrf.mxu0  ;;  %v18737_v49 = vld [vmem:[#allocation25_spill] sm:$0xff] }
 0x34f   : > { %v5655_v11 = vadd.f32 %v17524_v8, %v17765_v43  ;;  %v7739_v22 = vunpack.c.l.b16 %v7611_v41  ;;  %v7740_v39 = vunpack.c.l.b16 %v7612_v42  ;;  %v7741_v36 = vunpack.c.l.b16 %v7613_v25  ;;  %v9769_v2 = vpop.f32.mrf.mxu3 }
 0x350   : > { %v7742_v23 = vunpack.c.l.b16 %v7614_v10  ;;  %v7743_v16 = vunpack.c.l.b16 %v7615_v51  ;;  %v7744_v38 = vunpack.c.l.b16 %v7616_v3  ;;  %v13862_v28 = vunpack.i.l.s16 %v7738_v0  ;;  %v18738_v0 = vld [vmem:[#allocation26_spill] sm:$0xff] }
 0x351   : > { %v13863_v56 = vunpack.i.l.s16 %v7739_v22  ;;  %v13864_v46 = vunpack.i.l.s16 %v7740_v39  ;;  %v13865_v48 = vunpack.i.l.s16 %v7741_v36  ;;  %v5751_v52 = vadd.f32 %v5750_v14, %v17762_v45 }
 0x352   : > { %v13861_v20 = vunpack.i.l.s16 %v7737_v5  ;;  %v13866_v63 = vunpack.i.l.s16 %v7742_v23  ;;  %v7957_v37 = vrot.slane %v13862_v28, 7  ;;  %v5415_v8 = vadd.f32 %v17689_v27, %v16988_v59 }
 0x353   : > { %v5704_v43 = vadd.f32 %v17535_v30, %v5655_v11  ;;  %v13867_v29 = vunpack.i.l.s16 %v7743_v16  ;;  %v7959_v44 = vrot.slane %v13863_v56, 6  ;;  %v13868_v35 = vunpack.i.l.s16 %v7744_v38  ;;  %v5801_v30 = vpop.f32.mrf.mxu1  ;;  %v18739_v16 = vld [vmem:[#allocation41_spill] sm:$0xff] }
 0x354   : > { %v7958_v6 = vsel %vm5977_vm14, %v7957_v37, %v13861_v20  ;;  %v7961_v9 = vrot.slane %v13864_v46, 5  ;;  %v7963_v55 = vrot.slane %v13865_v48, 4  ;;  %v5800_v14 = vadd.f32 %v5799_v57, %v5751_v52  ;;  %v18740_v48 = vld [vmem:[#allocation42_spill] sm:$0xff]  ;;  %v18741_v20 = vld [vmem:[#allocation39_spill] sm:$0xff] }
 0x355   : > { %v7960_v45 = vsel %vm5981_vm15, %v7959_v44, %v7958_v6  ;;  %v9741_v1 = vadd.f32 %v17728_v4, %v9740_v61  ;;  %v5753_v33 = vadd.f32 %v5752_v54, %v5704_v43  ;;  %v5464_v32 = vadd.f32 %v18737_v49, %v5415_v8  ;;  %v18743_v8 = vld [vmem:[#allocation44_spill] sm:$0xff] }
 0x356   : > { %v7962_v59 = vsel %vm5985_vm0, %v7961_v9, %v7960_v45  ;;  %v7965_v40 = vrot.slane %v13866_v63, 3  ;;  %v7967_v42 = vrot.slane %v13867_v29, 2  ;;  %v7969_v51 = vrot.slane %v13868_v35, 1  ;;  %v5755_v23 = vpop.f32.mrf.mxu0  ;;  %v18742_v63 = vld [vmem:[#allocation40_spill] sm:$0xff]  ;;  %v18746_v9 = vld [vmem:[#allocation43_spill] sm:$0xff]  ;;  %v15212_v29 = vld [vmem:[%s18644_s5 + $0x1a0] sm:$0xff] }
 0x357   : > { %v7964_v41 = vsel %vm7904_vm1, %v7963_v55, %v7962_v59  ;;  %v5802_v25 = vadd.f32 %v5801_v30, %v5753_v33  ;;  %v17791_v5 = vadd.f32 %v9769_v2, %v9741_v1  ;;  %v5833_v3 = vmax.f32 %v5800_v14, 0.0  ;;  %v15144_v35 = vld [vmem:[#allocation8 + $0x208] sm:$0xff] }
 0x358   : > { %v7966_v10 = vsel %vm7907_vm2, %v7965_v40, %v7964_v41  ;;  %v5513_v11 = vadd.f32 %v18738_v0, %v5464_v32  ;;  %v5658_v37 = vadd.f32 %v18742_v63, %v18741_v20 }
 0x359   : > { %v7968_v57 = vsel %vm7910_vm3, %v7967_v42, %v7966_v10  ;;  %v5834_v4 = vmax.f32 %v5802_v25, 0.0 }
 0x35a   : > { %v7970_v22 = vsel %vm7913_vm5, %v7969_v51, %v7968_v57  ;;  %v5562_v38 = vadd.f32 %v18739_v16, %v5513_v11  ;;  %v5707_v55 = vadd.f32 %v18746_v9, %v5658_v37 }
 0x35b   : > { %v8017_v39 = vpack.c.b16 %v7970_v22, %v7970_v22  ;;  %v15285_v36 = vpack.c.bf16 %v5834_v4, %v5833_v3  ;;  %v5804_v54 = vpop.f32.mrf.mxu1  ;;  %v18747_v3 = vld [vmem:[#allocation27_spill] sm:$0xff] }
 0x35c   : > { %v5611_v52 = vadd.f32 %v18740_v48, %v5562_v38  ;;  %v5756_v40 = vadd.f32 %v5755_v23, %v5707_v55  ;;  %v5420_v4 = vadd.f32 %v17689_v27, %v18747_v3 }
 0x35d   : > { %v8057_v28 = vshrl.u32 %v8017_v39, 16  ;;  %15346 = vst [vmem:[#allocation3 + $0x50] sm:$0xff] %v15285_v36   ;;  %v8060_v46 = vshll.u32 %v8017_v39, 16  ;;  %v18748_v36 = vld [vmem:[#allocation28_spill] sm:$0xff] }
 0x35e   : > { %v5660_v43 = vadd.f32 %v18743_v8, %v5611_v52  ;;  %v5757_v1 = vpop.f32.mrf.mxu0  ;;  %v5805_v25 = vadd.f32 %v5804_v54, %v5756_v40  ;;  %v5469_v23 = vadd.f32 %v18748_v36, %v5420_v4  ;;  %v18753_v4 = vld [vmem:[#allocation31_spill] sm:$0xff] }
 0x35f   : > { %v8059_v56 = vrot.slane %v8057_v28, 7 }
 0x360   : > { %v5709_v33 = vadd.f32 %v17580_v34, %v5660_v43  ;;  %v5835_v38 = vmax.f32 %v5805_v25, 0.0  ;;  %v18749_v43 = vld [vmem:[#allocation29_spill] sm:$0xff] }
 0x361   : > { %v8062_v61 = vor.u32 %v8060_v46, %v8059_v56 }
 0x362   : > { %v5758_v41 = vadd.f32 %v5757_v1, %v5709_v33  ;;  %v18750_v1 = vld [vmem:[#allocation47_spill] sm:$0xff] }
 0x363   : > { %v8101_v44 = vsel %vm15722_vm8, 0, %v8062_v61  ;;  %v5806_v10 = vpop.f32.mrf.mxu1  ;;  %v5663_v33 = vadd.f32 %v18750_v1, %v17578_v13  ;;  %v18755_v13 = vld [vmem:[#allocation46_spill] sm:$0xff] }
 0x364   : > { %v8113_v6 = vsel %vm15737_vm9, %v8101_v44, 0  ;;  %v5897_v14 = vld [vmem:[#allocation3 + $0x50] sm:$0xf]  ;;  %v5898_v59 = vld [vmem:[#allocation3 + $0x54] sm:$0xf]  ;;  %v5807_v57 = vadd.f32 %v5806_v10, %v5758_v41  ;;  %v5518_v44 = vadd.f32 %v18749_v43, %v5469_v23 }
 0x365   : > { %v8136_v2 = vunpack.c.l.b16 %v8113_v6  ;;  %v8137_v45 = vunpack.c.h.b16 %v8113_v6  ;;  %v5961_v30 = vrot.slane %v5897_v14, 3  ;;  %v5962_v42 = vrot.slane %v5898_v59, 3 }
 0x366   : > { %v5836_v48 = vmax.f32 %v5807_v57, 0.0 }
 0x367   : > { %v8154_v49 = vpack.c.b16 %v8136_v2, %v8136_v2  ;;  %v8155_v32 = vpack.c.b16 %v8137_v45, %v8137_v45  ;;  %v6220_v51 = vsel %vm5977_vm14, %v5897_v14, %v5961_v30  ;;  %v6223_v0 = vsel %vm5981_vm15, %v5897_v14, %v5961_v30 }
 0x368   : > { %v6226_v34 = vsel %vm5985_vm0, %v5897_v14, %v5961_v30  ;;  %v6232_v11 = vsel %vm5977_vm14, %v5898_v59, %v5962_v42  ;;  %v6235_v22 = vsel %vm5981_vm15, %v5898_v59, %v5962_v42  ;;  %v6238_v39 = vsel %vm5985_vm0, %v5898_v59, %v5962_v42 }
 0x369   : > { %8190 = vst [vmem:[#allocation4 + $0x28] sm:$0xf] %v8154_v49  ;;  %v6222_v16 = vrot.slane %v6220_v51, 1  ;;  %v6219_v28 = vsel %vm5973_vm4, %v5897_v14, %v5961_v30  ;;  %v6225_v56 = vrot.slane %v6223_v0, 2  ;;  %v6228_v46 = vrot.slane %v6226_v34, 3  ;;  %v18751_v49 = vld [vmem:[#allocation45_spill] sm:$0xff] }
 0x36a   : > { %8191 = vst [vmem:[#allocation4 + $0x2c] sm:$0x1] %v8155_v32  ;;  %v6234_v52 = vrot.slane %v6232_v11, 1  ;;  %v6237_v20 = vrot.slane %v6235_v22, 2  ;;  %v6240_v63 = vrot.slane %v6238_v39, 3  ;;  %v6231_v37 = vsel %vm5973_vm4, %v5898_v59, %v5962_v42  ;;  %v18752_v59 = vld [vmem:[#allocation30_spill] sm:$0xff] }
 0x36b   : > { %v15290_v61 = vpack.c.bf16 %v5836_v48, %v5835_v38  ;;  %v6529_v54 = vunpack.c.l.bf16 %v6219_v28  ;;  %v6530_v8 = vunpack.c.l.bf16 %v6222_v16  ;;  %v6531_v6 = vunpack.c.l.bf16 %v6225_v56  ;;  %v18754_v34 = vld [vmem:[#allocation48_spill] sm:$0xff] }
 0x36c   : > { %v6532_v9 = vunpack.c.l.bf16 %v6228_v46  ;;  %v6533_v55 = vunpack.c.l.bf16 %v6231_v37  ;;  %v6534_v2 = vunpack.c.l.bf16 %v6234_v52  ;;  %v6535_v45 = vunpack.c.l.bf16 %v6237_v20 }
 0x36d   : > { %15347 = vst [vmem:[#allocation3 + $0x58] sm:$0xff] %v15290_v61   ;;  %v6536_v14 = vunpack.c.l.bf16 %v6240_v63  ;;  %v5567_v32 = vadd.f32 %v18751_v49, %v5518_v44  ;;  %v13741_v40 = vrot.slane %v6529_v54, 9  ;;  %v13742_v30 = vrot.slane %v6530_v8, 9 }
 0x36e   : > { %v5425_v41 = vadd.f32 %v17689_v27, %v18752_v59  ;;  %v13743_v42 = vrot.slane %v6531_v6, 9  ;;  %v13744_v25 = vrot.slane %v6532_v9, 9  ;;  %v13745_v10 = vrot.slane %v6533_v55, 9 }
 0x36f   : > { %v13746_v51 = vrot.slane %v6534_v2, 9  ;;  %v13747_v57 = vrot.slane %v6535_v45, 9  ;;  %v13748_v3 = vrot.slane %v6536_v14, 9  ;;  %v17829_v11 = vadd.f32 %v18754_v34, %v5663_v33 }
 0x370   : > { %v17826_v0 = vadd.f32 %v18753_v4, %v5425_v41  ;;  %v17832_v22 = vadd.f32 %v18755_v13, %v5567_v32  ;;  %v6849_v39 = vmax.f32 %v6529_v54, %v13741_v40  ;;  %v6850_v36 = vmax.f32 %v6530_v8, %v13742_v30 }
 0x371   : > { %v6851_v38 = vmax.f32 %v6531_v6, %v13743_v42  ;;  %v6852_v28 = vmax.f32 %v6532_v9, %v13744_v25  ;;  %v6853_v48 = vmax.f32 %v6533_v55, %v13745_v10  ;;  %v6854_v52 = vmax.f32 %v6534_v2, %v13746_v51 }
 0x372   : > { %v6855_v20 = vmax.f32 %v6535_v45, %v13747_v57  ;;  %v6856_v63 = vmax.f32 %v6536_v14, %v13748_v3 }
 0x374   : > { %v5899_v23 = vld [vmem:[#allocation3 + $0x58] sm:$0xf]  ;;  %v5900_v16 = vld [vmem:[#allocation3 + $0x5c] sm:$0xf] }
 0x375   : > { %v5963_v56 = vrot.slane %v5899_v23, 3  ;;  %v5964_v46 = vrot.slane %v5900_v16, 3 }
 0x377   : > { %v6243_v37 = vsel %vm5973_vm4, %v5899_v23, %v5963_v56  ;;  %v6244_v61 = vsel %vm5977_vm14, %v5899_v23, %v5963_v56  ;;  %v6247_v43 = vsel %vm5981_vm15, %v5899_v23, %v5963_v56  ;;  %v6250_v44 = vsel %vm5985_vm0, %v5899_v23, %v5963_v56 }
 0x378   : > { %v6246_v54 = vrot.slane %v6244_v61, 1  ;;  %v6249_v8 = vrot.slane %v6247_v43, 2  ;;  %v6252_v1 = vrot.slane %v6250_v44, 3  ;;  %v6255_v6 = vsel %vm5973_vm4, %v5900_v16, %v5964_v46  ;;  %v5760_v44 = vpop.f32.mrf.mxu0 }
 0x379   : > { %v6256_v9 = vsel %vm5977_vm14, %v5900_v16, %v5964_v46  ;;  %v6259_v55 = vsel %vm5981_vm15, %v5900_v16, %v5964_v46  ;;  %v6262_v2 = vsel %vm5985_vm0, %v5900_v16, %v5964_v46  ;;  %v6977_v45 = vunpack.c.l.bf16 %v6243_v37 }
 0x37a   : > { %v6258_v14 = vrot.slane %v6256_v9, 1  ;;  %v6261_v33 = vrot.slane %v6259_v55, 2  ;;  %v6264_v49 = vrot.slane %v6262_v2, 3  ;;  %v6978_v32 = vunpack.c.l.bf16 %v6246_v54  ;;  %v5809_v54 = vpop.f32.mrf.mxu1 }
 0x37b   : > { %v6979_v40 = vunpack.c.l.bf16 %v6249_v8  ;;  %v6980_v30 = vunpack.c.l.bf16 %v6252_v1  ;;  %v6981_v59 = vunpack.c.l.bf16 %v6255_v6  ;;  %v13805_v41 = vrot.slane %v6977_v45, 9 }
 0x37c   : > { %v6982_v42 = vunpack.c.l.bf16 %v6258_v14  ;;  %v6983_v25 = vunpack.c.l.bf16 %v6261_v33  ;;  %v6984_v10 = vunpack.c.l.bf16 %v6264_v49  ;;  %v13806_v51 = vrot.slane %v6978_v32, 9 }
 0x37d   : > { %v13807_v57 = vrot.slane %v6979_v40, 9  ;;  %v13808_v3 = vrot.slane %v6980_v30, 9  ;;  %v13809_v4 = vrot.slane %v6981_v59, 9  ;;  %v7297_v34 = vmax.f32 %v6977_v45, %v13805_v41 }
 0x37e   : > { %v13810_v13 = vrot.slane %v6982_v42, 9  ;;  %v13811_v23 = vrot.slane %v6983_v25, 9  ;;  %v13812_v16 = vrot.slane %v6984_v10, 9  ;;  %v7298_v56 = vmax.f32 %v6978_v32, %v13806_v51 }
 0x37f   : > { %v7299_v46 = vmax.f32 %v6979_v40, %v13807_v57  ;;  %v7300_v37 = vmax.f32 %v6980_v30, %v13808_v3  ;;  %v7301_v61 = vmax.f32 %v6981_v59, %v13809_v4  ;;  %v7553_v43 = vmax.f32 %v6849_v39, %v7297_v34 }
 0x380   : > { %v7302_v8 = vmax.f32 %v6982_v42, %v13810_v13  ;;  %v7303_v1 = vmax.f32 %v6983_v25, %v13811_v23  ;;  %v7304_v6 = vmax.f32 %v6984_v10, %v13812_v16  ;;  %v7554_v9 = vmax.f32 %v6850_v36, %v7298_v56  ;;  %v18756_v42 = vld [vmem:[#allocation50_spill] sm:$0xff]  ;;  %v5762_v13 = vpop.f32.mrf.mxu0 }
 0x381   : > { %v7555_v55 = vmax.f32 %v6851_v38, %v7299_v46  ;;  %v7556_v2 = vmax.f32 %v6852_v28, %v7300_v37  ;;  %v7557_v14 = vmax.f32 %v6853_v48, %v7301_v61  ;;  %v7617_v33 = vpack.c.bf16 %v7553_v43, %v7553_v43  ;;  %v18757_v46 = vld [vmem:[#allocation53_spill] sm:$0xff]  ;;  %v18758_v61 = vld [vmem:[#allocation32_spill] sm:$0xff] }
 0x382   : > { %v7558_v49 = vmax.f32 %v6854_v52, %v7302_v8  ;;  %v7559_v45 = vmax.f32 %v6855_v20, %v7303_v1  ;;  %v7560_v41 = vmax.f32 %v6856_v63, %v7304_v6  ;;  %v7618_v31 = vpack.c.bf16 %v7554_v9, %v7554_v9  ;;  %v5811_v23 = vpop.f32.mrf.mxu1 }
 0x383   : > { %v7619_v24 = vpack.c.bf16 %v7555_v55, %v7555_v55  ;;  %v7620_v32 = vpack.c.bf16 %v7556_v2, %v7556_v2  ;;  %v7621_v40 = vpack.c.bf16 %v7557_v14, %v7557_v14  ;;  %v7745_v30 = vunpack.c.l.b16 %v7617_v33  ;;  %v18759_v2 = vld [vmem:[#allocation51_spill] sm:$0xff] }
 0x384   : > { %v7622_v59 = vpack.c.bf16 %v7558_v49, %v7558_v49  ;;  %v7623_v39 = vpack.c.bf16 %v7559_v45, %v7559_v45  ;;  %v7624_v51 = vpack.c.bf16 %v7560_v41, %v7560_v41  ;;  %v7746_v57 = vunpack.c.l.b16 %v7618_v31 }
 0x385   : > { %v5665_v25 = vadd.f32 %v18756_v42, %v17832_v22  ;;  %v7747_v36 = vunpack.c.l.b16 %v7619_v24  ;;  %v7748_v38 = vunpack.c.l.b16 %v7620_v32  ;;  %v7749_v28 = vunpack.c.l.b16 %v7621_v40 }
 0x386   : > { %v7750_v48 = vunpack.c.l.b16 %v7622_v59  ;;  %v7751_v10 = vunpack.c.l.b16 %v7623_v39  ;;  %v7752_v52 = vunpack.c.l.b16 %v7624_v51  ;;  %v13870_v20 = vunpack.i.l.s16 %v7746_v57 }
 0x387   : > { %v13871_v63 = vunpack.i.l.s16 %v7747_v36  ;;  %v13872_v3 = vunpack.i.l.s16 %v7748_v38  ;;  %v13873_v4 = vunpack.i.l.s16 %v7749_v28  ;;  %v5761_v34 = vadd.f32 %v5760_v44, %v17829_v11 }
 0x388   : > { %v13869_v16 = vunpack.i.l.s16 %v7745_v30  ;;  %v13874_v56 = vunpack.i.l.s16 %v7750_v48  ;;  %v7971_v31 = vrot.slane %v13870_v20, 7  ;;  %v5714_v37 = vadd.f32 %v18757_v46, %v5665_v25  ;;  %v5765_v51 = vpop.f32.mrf.mxu0  ;;  %v18761_v25 = vld [vmem:[#allocation52_spill] sm:$0xff]  ;;  %v18763_v20 = vld [vmem:[#allocation49_spill] sm:$0xff] }
 0x389   : > { %v13875_v22 = vunpack.i.l.s16 %v7751_v10  ;;  %v7973_v24 = vrot.slane %v13871_v63, 6  ;;  %v5523_v43 = vadd.f32 %v18758_v61, %v17826_v0  ;;  %v13876_v8 = vunpack.i.l.s16 %v7752_v52  ;;  %v18762_v10 = vld [vmem:[#allocation34_spill] sm:$0xff] }
 0x38a   : > { %v7972_v1 = vsel %vm5977_vm14, %v7971_v31, %v13869_v16  ;;  %v7975_v6 = vrot.slane %v13872_v3, 5  ;;  %v7977_v55 = vrot.slane %v13873_v4, 4  ;;  %v5810_v11 = vadd.f32 %v5809_v54, %v5761_v34  ;;  %v5814_v57 = vpop.f32.mrf.mxu1  ;;  %v18760_v54 = vld [vmem:[#allocation33_spill] sm:$0xff]  ;;  %v18764_v63 = vld [vmem:[#allocation54_spill] sm:$0xff]  ;;  %v18765_v16 = vld [vmem:[#allocation35_spill] sm:$0xff] }
 0x38b   : > { %v7974_v9 = vsel %vm5981_vm15, %v7973_v24, %v7972_v1  ;;  %v5763_v44 = vadd.f32 %v5762_v13, %v5714_v37  ;;  %v5572_v14 = vadd.f32 %v18759_v2, %v5523_v43  ;;  %v7979_v49 = vrot.slane %v13874_v56, 3  ;;  %v8205_v1 = vld [vmem:[#allocation4 + $0x28] sm:$0xf] }
 0x38c   : > { %v7976_v33 = vsel %vm5985_vm0, %v7975_v6, %v7974_v9  ;;  %v7981_v41 = vrot.slane %v13875_v22, 2  ;;  %v7983_v40 = vrot.slane %v13876_v8, 1  ;;  %v5837_v59 = vmax.f32 %v5810_v11, 0.0  ;;  %v18766_v6 = vld [vmem:[#allocation36_spill] sm:$0xff]  ;;  %8213 = vst [vmem:[#allocation2 + $0xb4] sm:$0xf] %v8205_v1 }
 0x38d   : > { %v7978_v45 = vsel %vm7904_vm1, %v7977_v55, %v7976_v33  ;;  %v5812_v32 = vadd.f32 %v5811_v23, %v5763_v44  ;;  %v5430_v42 = vadd.f32 %v17689_v27, %v18760_v54  ;;  %v5621_v36 = vadd.f32 %v18761_v25, %v5572_v14 }
 0x38e   : > { %v7980_v0 = vsel %vm7907_vm2, %v7979_v49, %v7978_v45  ;;  %v5668_v3 = vadd.f32 %v18764_v63, %v18763_v20  ;;  %v5435_v9 = vadd.f32 %v17689_v27, %v18766_v6  ;;  %v8227_v63 = vld [vmem:[#allocation4 + $0x2c] sm:$0x1] }
 0x38f   : > { %v7982_v30 = vsel %vm7910_vm3, %v7981_v41, %v7980_v0  ;;  %v5838_v39 = vmax.f32 %v5812_v32, 0.0  ;;  %v5479_v52 = vadd.f32 %v18762_v10, %v5430_v42  ;;  %v5670_v4 = vadd.f32 %v17654_v21, %v5621_v36 }
 0x390   : > { %v7984_v38 = vsel %vm7913_vm5, %v7983_v40, %v7982_v30  ;;  %v5717_v31 = vadd.f32 %v17648_v18, %v5668_v3  ;;  %v5767_v22 = vpop.f32.mrf.mxu0  ;;  %v8226_v40 = vld [vmem:[#allocation4 + $0x28] sm:$0xf] }
 0x391   : > { %v8018_v28 = vpack.c.b16 %v7984_v38, %v7984_v38  ;;  %v15295_v48 = vpack.c.bf16 %v5838_v39, %v5837_v59  ;;  %v5528_v56 = vadd.f32 %v18765_v16, %v5479_v52  ;;  %v5719_v46 = vadd.f32 %v17668_v7, %v5670_v4 }
 0x392   : > { %v5816_v24 = vpop.f32.mrf.mxu1  ;;  %v5766_v43 = vadd.f32 %v5765_v51, %v5717_v31 }
 0x393   : > { %v8064_v34 = vshrl.u32 %v8018_v28, 16  ;;  %15348 = vst [vmem:[#allocation3 + $0x60] sm:$0xff] %v15295_v48   ;;  %v8067_v23 = vshll.u32 %v8018_v28, 16  ;;  %v5577_v61 = vadd.f32 %v17656_v12, %v5528_v56  ;;  %v5768_v8 = vadd.f32 %v5767_v22, %v5719_v46  ;;  %v13991_v22 = vld [vmem:[#allocation2 + $0x90] sm:$0xf] }
 0x394   : > { %v5673_v12 = vadd.f32 %v17679_v26, %v17646_v47  ;;  %v5815_v49 = vadd.f32 %v5814_v57, %v5766_v43  ;;  %v8303_v28 = vshrl.u32 %v8226_v40, 16  ;;  %v8312_v43 = vshll.u32 %v8227_v63, 16 }
 0x395   : > { %v8066_v13 = vrot.slane %v8064_v34, 7  ;;  %v5626_v33 = vadd.f32 %v17674_v50, %v5577_v61  ;;  %v5817_v45 = vadd.f32 %v5816_v24, %v5768_v8  ;;  %v15065_v24 = vld [vmem:[#allocation2 + $0xb0] sm:$0xf0] }
 0x396   : > { %v5722_v56 = vadd.f32 %v17681_v19, %v5673_v12  ;;  %v8305_v61 = vrot.slane %v8303_v28, 4  ;;  %v18768_v8 = vld [vmem:[#allocation56_spill] sm:$0xff] }
 0x397   : > { %v8069_v37 = vor.u32 %v8067_v23, %v8066_v13  ;;  %v5675_v48 = vadd.f32 %v17687_v17, %v5626_v33  ;;  %v5840_v13 = vmax.f32 %v5817_v45, 0.0  ;;  %v18767_v23 = vld [vmem:[#allocation37_spill] sm:$0xff]  ;;  %v8306_v17 = vshll.u32 %v8226_v40, 16 }
 0x398   : > { %v5770_v54 = vpop.f32.mrf.mxu0  ;;  %v17896_v16 = vadd.f32 %v18767_v23, %v5435_v9  ;;  %v8609_v9 = vld [vmem:[#allocation4 + $0x28] sm:$0xe]  ;;  %v13992_v33 = vor.u32 %v15065_v24, %v13991_v22 }
 0x399   : > { %v8102_v21 = vsel %vm15722_vm8, 0, %v8069_v37  ;;  %v5839_v37 = vmax.f32 %v5815_v49, 0.0  ;;  %v5771_v12 = vadd.f32 %v5770_v54, %v5722_v56  ;;  %v8308_v45 = vrot.slane %v8306_v17, 5 }
 0x39a   : > { %v8114_v55 = vsel %vm15737_vm9, %v8102_v21, 0  ;;  %v5901_v18 = vld [vmem:[#allocation3 + $0x60] sm:$0xf]  ;;  %v5902_v11 = vld [vmem:[#allocation3 + $0x64] sm:$0xf]  ;;  %v5819_v42 = vpop.f32.mrf.mxu1  ;;  %v5724_v21 = vadd.f32 %v18768_v8, %v5675_v48  ;;  %9744 = vmatmul.bf16.gmra.mxu2 %v13992_v33  ;;  %v8314_v54 = vrot.slane %v8312_v43, 5 }
 0x39b   : > { %v8138_v7 = vunpack.c.l.b16 %v8114_v55  ;;  %v8139_v44 = vunpack.c.h.b16 %v8114_v55  ;;  %v5965_v2 = vrot.slane %v5901_v18, 3  ;;  %v5966_v14 = vrot.slane %v5902_v11, 3  ;;  %v8849_v43 = vld [vmem:[#allocation4 + $0x2c] sm:$0x1] }
 0x39d   : > { %v8156_v41 = vpack.c.b16 %v8138_v7, %v8138_v7  ;;  %v8157_v32 = vpack.c.b16 %v8139_v44, %v8139_v44  ;;  %v17877_v27 = vsel %vm5973_vm4, %v5901_v18, %v5965_v2  ;;  %v6268_v0 = vsel %vm5977_vm14, %v5901_v18, %v5965_v2 }
 0x39e   : > { %v6270_v30 = vrot.slane %v6268_v0, 1  ;;  %v6271_v59 = vsel %vm5981_vm15, %v5901_v18, %v5965_v2  ;;  %v6274_v39 = vsel %vm5985_vm0, %v5901_v18, %v5965_v2  ;;  %v17883_v51 = vsel %vm5973_vm4, %v5902_v11, %v5966_v14  ;;  %v8610_v18 = vld [vmem:[#allocation4 + $0x2c] sm:$0x1]  ;;  %v8465_v2 = vld [vmem:[#allocation4 + $0x28] sm:$0xf] }
 0x39f   : > { %8192 = vst [vmem:[#allocation4 + $0x30] sm:$0xf] %v8156_v41  ;;  %v6273_v47 = vrot.slane %v6271_v59, 2  ;;  %v6276_v50 = vrot.slane %v6274_v39, 3  ;;  %v6280_v26 = vsel %vm5977_vm14, %v5902_v11, %v5966_v14  ;;  %v6283_v57 = vsel %vm5981_vm15, %v5902_v11, %v5966_v14  ;;  %v8370_v41 = vld [vmem:[#allocation4 + $0x28] sm:$0xe] }
 0x3a0   : > { %8193 = vst [vmem:[#allocation4 + $0x34] sm:$0x1] %v8157_v32  ;;  %v6282_v25 = vrot.slane %v6280_v26, 1  ;;  %v6285_v36 = vrot.slane %v6283_v57, 2  ;;  %v6286_v38 = vsel %vm5985_vm0, %v5902_v11, %v5966_v14  ;;  %v6537_v52 = vunpack.c.l.bf16 %v17877_v27  ;;  %v5772_v49 = vpop.f32.mrf.mxu0  ;;  %v8371_v57 = vld [vmem:[#allocation4 + $0x2c] sm:$0x1] }
 0x3a1   : > { %v6288_v10 = vrot.slane %v6286_v38, 3  ;;  %v6538_v20 = vunpack.c.l.bf16 %v6270_v30  ;;  %v17890_v3 = vunpack.c.l.bf16 %v6273_v47  ;;  %v17892_v4 = vunpack.c.l.bf16 %v6276_v50  ;;  %v8466_v30 = vld [vmem:[#allocation4 + $0x2c] sm:$0x1] }
 0x3a2   : > { %v6541_v34 = vunpack.c.l.bf16 %v17883_v51  ;;  %v17899_v31 = vunpack.c.l.bf16 %v6282_v25  ;;  %v17901_v46 = vunpack.c.l.bf16 %v6285_v36  ;;  %v13749_v6 = vrot.slane %v6537_v52, 9  ;;  %v5821_v39 = vpop.f32.mrf.mxu1 }
 0x3a3   : > { %v17904_v1 = vunpack.c.l.bf16 %v6288_v10  ;;  %v13750_v55 = vrot.slane %v6538_v20, 9  ;;  %v13751_v19 = vrot.slane %v17890_v3, 9  ;;  %v13752_v11 = vrot.slane %v17892_v4, 9 }
 0x3a4   : > { %v13753_v7 = vrot.slane %v6541_v34, 9  ;;  %v15300_v44 = vpack.c.bf16 %v5840_v13, %v5839_v37  ;;  %v13754_v14 = vrot.slane %v17899_v31, 9  ;;  %v13755_v32 = vrot.slane %v17901_v46, 9 }
 0x3a5   : > { %v5773_v27 = vadd.f32 %v5772_v49, %v5724_v21  ;;  %v13905_v0 = vrot.slane %v8609_v9, 9  ;;  %v8651_v40 = vrot.slane %v8610_v18, 5  ;;  %v5820_v59 = vadd.f32 %v5819_v42, %v5771_v12 }
 0x3a6   : > { %15349 = vst [vmem:[#allocation3 + $0x68] sm:$0xff] %v15300_v44   ;;  %v8309_v47 = vor.u32 %v8308_v45, %v8305_v61  ;;  %v8530_v50 = vshrl.u32 %v8465_v2, 16  ;;  %v8533_v26 = vshll.u32 %v8465_v2, 16  ;;  %v13898_v38 = vrot.slane %v8370_v41, 9  ;;  %v8848_v61 = vld [vmem:[#allocation4 + $0x28] sm:$0xe] }
 0x3a7   : > { %v5822_v25 = vadd.f32 %v5821_v39, %v5773_v27  ;;  %v8652_v36 = vsel %vm15782_vm13, %v13905_v0, %v8651_v40  ;;  %v8539_v63 = vshll.u32 %v8466_v30, 16  ;;  %v17914_v13 = vmax.f32 %v6537_v52, %v13749_v6  ;;  %v8445_v41 = vld [vmem:[#allocation4 + $0x28] sm:$0xf] }
 0x3a8   : > { %v8310_v28 = vrot.slane %v8309_v47, 4  ;;  %8677 = vst [vmem:[#allocation2 + $0xa4] sm:$0xf] %v8652_v36  ;;  %v8532_v48 = vrot.slane %v8530_v50, 4  ;;  %v8535_v10 = vrot.slane %v8533_v26, 5  ;;  %v5841_v42 = vmax.f32 %v5820_v59, 0.0 }
 0x3a9   : > { %v5842_v23 = vmax.f32 %v5822_v25, 0.0  ;;  %v8414_v56 = vrot.slane %v8371_v57, 5  ;;  %v13756_v17 = vrot.slane %v17904_v1, 9  ;;  %v17917_v37 = vmax.f32 %v6538_v20, %v13750_v55  ;;  %8453 = vst [vmem:[#allocation2 + $0x9c] sm:$0xf] %v8445_v41 }
 0x3aa   : > { %v8315_v22 = vsel %vm15774_vm12, %v8310_v28, %v8314_v54  ;;  %v8536_v24 = vor.u32 %v8535_v10, %v8532_v48  ;;  %v13912_v52 = vrot.slane %v8848_v61, 9  ;;  %v8888_v6 = vrot.slane %v8849_v43, 5 }
 0x3ab   : > { %v15305_v8 = vpack.c.bf16 %v5842_v23, %v5841_v42  ;;  %8357 = vst [vmem:[#allocation2 + $0xb8] sm:$0xf] %v8315_v22  ;;  %v8415_v21 = vsel %vm15782_vm13, %v13898_v38, %v8414_v56  ;;  %v6859_v9 = vmax.f32 %v17890_v3, %v13751_v19  ;;  %v6860_v18 = vmax.f32 %v17892_v4, %v13752_v11  ;;  %v8685_v11 = vld [vmem:[#allocation4 + $0x28] sm:$0xf] }
 0x3ac   : > { %v8537_v55 = vrot.slane %v8536_v24, 4  ;;  %v8541_v2 = vrot.slane %v8539_v63, 5  ;;  %v6861_v12 = vmax.f32 %v6541_v34, %v13753_v7  ;;  %v6862_v33 = vmax.f32 %v17899_v31, %v13754_v14  ;;  %8437 = vst [vmem:[#allocation2 + $0xbc] sm:$0xf] %v8415_v21 }
 0x3ad   : > { %v5903_v44 = vld [vmem:[#allocation3 + $0x68] sm:$0xf]  ;;  %v5904_v20 = vld [vmem:[#allocation3 + $0x6c] sm:$0xf]  ;;  %15350 = vst [vmem:[#allocation3 + $0x70] sm:$0xff] %v15305_v8   ;;  %v6863_v27 = vmax.f32 %v17901_v46, %v13755_v32  ;;  %v6864_v0 = vmax.f32 %v17904_v1, %v13756_v17  ;;  %v8889_v4 = vsel %vm15782_vm13, %v13912_v52, %v8888_v6 }
 0x3ae   : > { %v5967_v49 = vrot.slane %v5903_v44, 3  ;;  %v5968_v45 = vrot.slane %v5904_v20, 3  ;;  %v8542_v3 = vsel %vm15774_vm12, %v8537_v55, %v8541_v2  ;;  %8917 = vst [vmem:[#allocation2 + $0x8c] sm:$0xf] %v8889_v4 }
 0x3af   : > { %8597 = vst [vmem:[#allocation2 + $0xa0] sm:$0xf] %v8542_v3 }
 0x3b0   : > { %v6291_v51 = vsel %vm5973_vm4, %v5903_v44, %v5967_v49  ;;  %v6292_v34 = vsel %vm5977_vm14, %v5903_v44, %v5967_v49  ;;  %v6295_v31 = vsel %vm5981_vm15, %v5903_v44, %v5967_v49  ;;  %v6298_v19 = vsel %vm5985_vm0, %v5903_v44, %v5967_v49  ;;  %8693 = vst [vmem:[#allocation2 + $0x84] sm:$0xf] %v8685_v11 }
 0x3b1   : > { %v6294_v46 = vrot.slane %v6292_v34, 1  ;;  %v6297_v7 = vrot.slane %v6295_v31, 2  ;;  %v6300_v1 = vrot.slane %v6298_v19, 3  ;;  %v6303_v14 = vsel %vm5973_vm4, %v5904_v20, %v5968_v45 }
 0x3b2   : > { %v6304_v32 = vsel %vm5977_vm14, %v5904_v20, %v5968_v45  ;;  %v6307_v40 = vsel %vm5981_vm15, %v5904_v20, %v5968_v45  ;;  %v6310_v30 = vsel %vm5985_vm0, %v5904_v20, %v5968_v45  ;;  %v6985_v59 = vunpack.c.l.bf16 %v6291_v51 }
 0x3b3   : > { %v6306_v39 = vrot.slane %v6304_v32, 1  ;;  %v6309_v47 = vrot.slane %v6307_v40, 2  ;;  %v6312_v50 = vrot.slane %v6310_v30, 3  ;;  %v6986_v26 = vunpack.c.l.bf16 %v6294_v46 }
 0x3b4   : > { %v6987_v57 = vunpack.c.l.bf16 %v6297_v7  ;;  %v6988_v25 = vunpack.c.l.bf16 %v6300_v1  ;;  %v6989_v54 = vunpack.c.l.bf16 %v6303_v14  ;;  %v13813_v36 = vrot.slane %v6985_v59, 9 }
 0x3b5   : > { %v6990_v38 = vunpack.c.l.bf16 %v6306_v39  ;;  %v6991_v28 = vunpack.c.l.bf16 %v6309_v47  ;;  %v6992_v48 = vunpack.c.l.bf16 %v6312_v50  ;;  %v13814_v10 = vrot.slane %v6986_v26, 9  ;;  %v18769_v47 = vld [vmem:[#allocation38_spill] sm:$0xff] }
 0x3b6   : > { %v13815_v63 = vrot.slane %v6987_v57, 9  ;;  %v13816_v42 = vrot.slane %v6988_v25, 9  ;;  %v13817_v23 = vrot.slane %v6989_v54, 9  ;;  %v7305_v56 = vmax.f32 %v6985_v59, %v13813_v36  ;;  %v5905_v59 = vld [vmem:[#allocation3 + $0x70] sm:$0xf] }
 0x3b7   : > { %v13818_v17 = vrot.slane %v6990_v38, 9  ;;  %v13819_v22 = vrot.slane %v6991_v28, 9  ;;  %v13820_v24 = vrot.slane %v6992_v48, 9  ;;  %v7306_v61 = vmax.f32 %v6986_v26, %v13814_v10 }
 0x3b8   : > { %v7307_v43 = vmax.f32 %v6987_v57, %v13815_v63  ;;  %v7308_v8 = vmax.f32 %v6988_v25, %v13816_v42  ;;  %v7309_v21 = vmax.f32 %v6989_v54, %v13817_v23  ;;  %v7561_v52 = vmax.f32 %v17914_v13, %v7305_v56  ;;  %v5906_v54 = vld [vmem:[#allocation3 + $0x74] sm:$0xf]  ;;  %v5775_v23 = vpop.f32.mrf.mxu0 }
 0x3b9   : > { %v7310_v6 = vmax.f32 %v6990_v38, %v13818_v17  ;;  %v7311_v44 = vmax.f32 %v6991_v28, %v13819_v22  ;;  %v7312_v20 = vmax.f32 %v6992_v48, %v13820_v24  ;;  %v7562_v55 = vmax.f32 %v17917_v37, %v7306_v61 }
 0x3ba   : > { %v7563_v2 = vmax.f32 %v6859_v9, %v7307_v43  ;;  %v7564_v49 = vmax.f32 %v6860_v18, %v7308_v8  ;;  %v7565_v45 = vmax.f32 %v6861_v12, %v7309_v21  ;;  %v7625_v41 = vpack.c.bf16 %v7561_v52, %v7561_v52  ;;  %v18770_v21 = vld [vmem:[#allocation57_spill] sm:$0xff] }
 0x3bb   : > { %v7566_v3 = vmax.f32 %v6862_v33, %v7310_v6  ;;  %v7567_v4 = vmax.f32 %v6863_v27, %v7311_v44  ;;  %v7568_v51 = vmax.f32 %v6864_v0, %v7312_v20  ;;  %v7626_v34 = vpack.c.bf16 %v7562_v55, %v7562_v55  ;;  %v8206_v33 = vld [vmem:[#allocation4 + $0x30] sm:$0xf]  ;;  %v5824_v20 = vpop.f32.mrf.mxu1 }
 0x3bc   : > { %v7627_v31 = vpack.c.bf16 %v7563_v2, %v7563_v2  ;;  %v7628_v19 = vpack.c.bf16 %v7564_v49, %v7564_v49  ;;  %v7629_v11 = vpack.c.bf16 %v7565_v45, %v7565_v45  ;;  %v7753_v46 = vunpack.c.l.b16 %v7625_v41  ;;  %8214 = vst [vmem:[#allocation2 + $0xd8] sm:$0xf] %v8206_v33  ;;  %v18771_v41 = vld [vmem:[#allocation55_spill] sm:$0xff]  ;;  %v8611_v33 = vld [vmem:[#allocation4 + $0x30] sm:$0xe] }
 0x3bd   : > { %v7630_v7 = vpack.c.bf16 %v7566_v3, %v7566_v3  ;;  %v7631_v1 = vpack.c.bf16 %v7567_v4, %v7567_v4  ;;  %v7632_v13 = vpack.c.bf16 %v7568_v51, %v7568_v51  ;;  %v7754_v14 = vunpack.c.l.b16 %v7626_v34 }
 0x3be   : > { %v7755_v32 = vunpack.c.l.b16 %v7627_v31  ;;  %v7756_v40 = vunpack.c.l.b16 %v7628_v19  ;;  %v7757_v30 = vunpack.c.l.b16 %v7629_v11  ;;  %v5533_v50 = vadd.f32 %v18769_v47, %v17896_v16 }
 0x3bf   : > { %v7758_v37 = vunpack.c.l.b16 %v7630_v7  ;;  %v7759_v9 = vunpack.c.l.b16 %v7631_v1  ;;  %v7760_v18 = vunpack.c.l.b16 %v7632_v13  ;;  %v13878_v12 = vunpack.i.l.s16 %v7754_v14  ;;  %v8446_v14 = vld [vmem:[#allocation4 + $0x30] sm:$0xf] }
 0x3c0   : > { %v13879_v27 = vunpack.i.l.s16 %v7755_v32  ;;  %v13880_v0 = vunpack.i.l.s16 %v7756_v40  ;;  %v13881_v39 = vunpack.i.l.s16 %v7757_v30  ;;  %v13877_v26 = vunpack.i.l.s16 %v7753_v46  ;;  %8454 = vst [vmem:[#allocation2 + $0xc0] sm:$0xf] %v8446_v14  ;;  %v18773_v30 = vld [vmem:[#allocation58_spill] sm:$0xff]  ;;  %v8850_v14 = vld [vmem:[#allocation4 + $0x30] sm:$0xe] }
 0x3c1   : > { %v13882_v57 = vunpack.i.l.s16 %v7758_v37  ;;  %v7985_v25 = vrot.slane %v13878_v12, 7  ;;  %v13883_v36 = vunpack.i.l.s16 %v7759_v9  ;;  %v5969_v28 = vrot.slane %v5905_v59, 3  ;;  %v13993_v12 = vld [vmem:[#allocation2 + $0xb4] sm:$0xf0] }
 0x3c2   : > { %v7987_v38 = vrot.slane %v13879_v27, 6  ;;  %v5582_v48 = vadd.f32 %v17698_v58, %v5533_v50  ;;  %v13884_v10 = vunpack.i.l.s16 %v7760_v18  ;;  %v7989_v42 = vrot.slane %v13880_v0, 5  ;;  %v8612_v50 = vld [vmem:[#allocation4 + $0x34] sm:$0x1] }
 0x3c3   : > { %v7986_v63 = vsel %vm5977_vm14, %v7985_v25, %v13877_v26  ;;  %v7991_v17 = vrot.slane %v13881_v39, 4  ;;  %v5970_v22 = vrot.slane %v5906_v54, 3  ;;  %v7993_v24 = vrot.slane %v13882_v57, 3  ;;  %v8467_v26 = vld [vmem:[#allocation4 + $0x30] sm:$0xf] }
 0x3c4   : > { %v7988_v56 = vsel %vm5981_vm15, %v7987_v38, %v7986_v63  ;;  %v7995_v43 = vrot.slane %v13883_v36, 2  ;;  %v6316_v8 = vsel %vm5977_vm14, %v5905_v59, %v5969_v28  ;;  %v5631_v52 = vadd.f32 %v18770_v21, %v5582_v48  ;;  %v15061_v38 = vld [vmem:[#allocation2 + $0x94] sm:$0xf] }
 0x3c5   : > { %v7990_v16 = vsel %vm5985_vm0, %v7989_v42, %v7988_v56  ;;  %v7997_v6 = vrot.slane %v13884_v10, 1  ;;  %v6319_v44 = vsel %vm5981_vm15, %v5905_v59, %v5969_v28  ;;  %v17957_v2 = vsel %vm5973_vm4, %v5905_v59, %v5969_v28  ;;  %v5826_v56 = vpop.f32.mrf.mxu1 }
 0x3c6   : > { %v7992_v61 = vsel %vm7904_vm1, %v7991_v17, %v7990_v16  ;;  %v6322_v49 = vsel %vm5985_vm0, %v5905_v59, %v5969_v28  ;;  %v6328_v45 = vsel %vm5977_vm14, %v5906_v54, %v5970_v22  ;;  %v5678_v3 = vadd.f32 %v17704_v62, %v18771_v41  ;;  %v5777_v59 = vpop.f32.mrf.mxu0  ;;  %v8468_v28 = vld [vmem:[#allocation4 + $0x34] sm:$0x1] }
 0x3c7   : > { %v7994_v58 = vsel %vm7907_vm2, %v7993_v24, %v7992_v61  ;;  %v5680_v4 = vadd.f32 %v17721_v15, %v5631_v52  ;;  %v6318_v34 = vrot.slane %v6316_v8, 1  ;;  %v6321_v19 = vrot.slane %v6319_v44, 2  ;;  %v18772_v15 = vld [vmem:[#allocation19_spill] sm:$0xff]  ;;  %v8228_v52 = vld [vmem:[#allocation4 + $0x30] sm:$0xf] }
 0x3c8   : > { %v7996_v55 = vsel %vm7910_vm3, %v7995_v43, %v7994_v58  ;;  %v6331_v11 = vsel %vm5981_vm15, %v5906_v54, %v5970_v22  ;;  %v17967_v46 = vsel %vm5985_vm0, %v5906_v54, %v5970_v22  ;;  %v6324_v7 = vrot.slane %v6322_v49, 3 }
 0x3c9   : > { %v7998_v51 = vsel %vm7913_vm5, %v7997_v6, %v7996_v55  ;;  %v6330_v1 = vrot.slane %v6328_v45, 1  ;;  %v6545_v13 = vunpack.c.l.bf16 %v17957_v2  ;;  %v17971_v62 = vsel %vm5973_vm4, %v5906_v54, %v5970_v22  ;;  %v8229_v55 = vld [vmem:[#allocation4 + $0x34] sm:$0x1] }
 0x3ca   : > { %v8019_v31 = vpack.c.b16 %v7998_v51, %v7998_v51  ;;  %v5727_v40 = vadd.f32 %v18772_v15, %v5678_v3  ;;  %v5729_v37 = vadd.f32 %v18773_v30, %v5680_v4  ;;  %v6333_v9 = vrot.slane %v6331_v11, 2  ;;  %v15100_v2 = vld [vmem:[#allocation8 + $0xa8] sm:$0xff] }
 0x3cb   : > { %v6336_v18 = vrot.slane %v17967_v46, 3  ;;  %v17976_v39 = vunpack.c.l.bf16 %v6318_v34  ;;  %v17978_v47 = vunpack.c.l.bf16 %v6321_v19  ;;  %v17980_v57 = vunpack.c.l.bf16 %v6324_v7  ;;  %v8373_v19 = vld [vmem:[#allocation4 + $0x34] sm:$0x1] }
 0x3cc   : > { %v8071_v32 = vshrl.u32 %v8019_v31, 16  ;;  %v8074_v0 = vshll.u32 %v8019_v31, 16  ;;  %v6549_v25 = vunpack.c.l.bf16 %v17971_v62  ;;  %v17983_v54 = vunpack.c.l.bf16 %v6330_v1  ;;  %v8372_v31 = vld [vmem:[#allocation4 + $0x30] sm:$0xe] }
 0x3cd   : > { %v17987_v36 = vrot.slane %v6545_v13, 9  ;;  %v13996_v10 = vor.u32 %v15061_v38, %v13993_v12  ;;  %v5776_v63 = vadd.f32 %v5775_v23, %v5727_v40  ;;  %v5778_v42 = vadd.f32 %v5777_v59, %v5729_v37  ;;  %v8851_v12 = vld [vmem:[#allocation4 + $0x34] sm:$0x1] }
 0x3ce   : > { %v8073_v27 = vrot.slane %v8071_v32, 7  ;;  %v13906_v17 = vrot.slane %v8611_v33, 9  ;;  %v8655_v22 = vrot.slane %v8612_v50, 5  ;;  %v8544_v16 = vshrl.u32 %v8467_v26, 16  ;;  %v8704_v32 = vld [vmem:[#allocation4 + $0x28] sm:$0xf] }
 0x3cf   : > { %v8547_v24 = vshll.u32 %v8467_v26, 16  ;;  %9773 = vmatmul.bf16.gmra.mxu3 %v13996_v10  ;;  %v5825_v43 = vadd.f32 %v5824_v20, %v5776_v63  ;;  %v5827_v8 = vadd.f32 %v5826_v56, %v5778_v42  ;;  %v8553_v21 = vshll.u32 %v8468_v28, 16  ;;  %v15102_v33 = vld [vmem:[#allocation8 + $0xb8] sm:$0xff]  ;;  %v8705_v42 = vld [vmem:[#allocation4 + $0x2c] sm:$0x1] }
 0x3d0   : > { %v8076_v48 = vor.u32 %v8074_v0, %v8073_v27  ;;  %v8656_v23 = vsel %vm15782_vm13, %v13906_v17, %v8655_v22  ;;  %v8546_v6 = vrot.slane %v8544_v16, 4  ;;  %v17995_v4 = vunpack.c.l.bf16 %v6333_v9  ;;  %v15063_v26 = vld [vmem:[#allocation2 + $0xa4] sm:$0xf]  ;;  %9784 = vmatpush.bf16.msrb.mxu2 %v15102_v33 }
 0x3d1   : > { %v8549_v44 = vrot.slane %v8547_v24, 5  ;;  %v5843_v41 = vmax.f32 %v5825_v43, 0.0  ;;  %v5844_v3 = vmax.f32 %v5827_v8, 0.0  ;;  %8678 = vst [vmem:[#allocation2 + $0xc8] sm:$0xf] %v8656_v23  ;;  %v8317_v51 = vshrl.u32 %v8228_v52, 16 }
 0x3d2   : > { %v8103_v61 = vsel %vm15722_vm8, 0, %v8076_v48  ;;  %v8320_v34 = vshll.u32 %v8228_v52, 16  ;;  %v8326_v1 = vshll.u32 %v8229_v55, 16  ;;  %v8555_v40 = vrot.slane %v8553_v21, 5  ;;  %v15101_v43 = vld [vmem:[#allocation8 + $0xb0] sm:$0xff] }
 0x3d3   : > { %v8115_v58 = vsel %vm15737_vm9, %v8103_v61, 0  ;;  %v8550_v20 = vor.u32 %v8549_v44, %v8546_v6  ;;  %v15310_v7 = vpack.c.bf16 %v5844_v3, %v5843_v41  ;;  %v8319_v30 = vrot.slane %v8317_v51, 4 }
 0x3d4   : > { %v8140_v49 = vunpack.c.l.b16 %v8115_v58  ;;  %v8141_v45 = vunpack.c.h.b16 %v8115_v58  ;;  %v8322_v37 = vrot.slane %v8320_v34, 5  ;;  %v6552_v59 = vunpack.c.l.bf16 %v6336_v18  ;;  %9785 = vmatpush.bf16.msrb.mxu2 %v15101_v43 }
 0x3d5   : > { %v8551_v15 = vrot.slane %v8550_v20, 4  ;;  %v13758_v9 = vrot.slane %v17976_v39, 9  ;;  %v13899_v27 = vrot.slane %v8372_v31, 9  ;;  %v8418_v0 = vrot.slane %v8373_v19, 5  ;;  %15351 = vst [vmem:[#allocation3 + $0x78] sm:$0xff] %v15310_v7  }
 0x3d6   : > { %v8158_v11 = vpack.c.b16 %v8140_v49, %v8140_v49  ;;  %v8159_v46 = vpack.c.b16 %v8141_v45, %v8141_v45  ;;  %v13759_v50 = vrot.slane %v17978_v47, 9  ;;  %v8323_v28 = vor.u32 %v8322_v37, %v8319_v30 }
 0x3d7   : > { %v8556_v38 = vsel %vm15774_vm12, %v8551_v15, %v8555_v40  ;;  %v13913_v48 = vrot.slane %v8850_v14, 9  ;;  %v8328_v10 = vrot.slane %v8326_v1, 5  ;;  %v8419_v18 = vsel %vm15782_vm13, %v13899_v27, %v8418_v0  ;;  %v15110_v1 = vld [vmem:[#allocation8 + $0xf8] sm:$0xff]  ;;  %v15099_v27 = vld [vmem:[#allocation8 + $0xa0] sm:$0xff] }
 0x3d8   : > { %8194 = vst [vmem:[#allocation4 + $0x38] sm:$0xf] %v8158_v11  ;;  %v8892_v63 = vrot.slane %v8851_v12, 5  ;;  %v8757_v56 = vshrl.u32 %v8704_v32, 16  ;;  %v14009_v17 = vld [vmem:[#allocation2 + $0xc4] sm:$0xf0]  ;;  %v18019_v45 = vmax.f32 %v6545_v13, %v17987_v36  ;;  %v18022_v41 = vmax.f32 %v17976_v39, %v13758_v9  ;;  %9786 = vmatpush.bf16.msrb.mxu2 %v15100_v2  ;;  %9813 = vmatpush.bf16.msrb.mxu3 %v15110_v1 }
 0x3d9   : > { %8195 = vst [vmem:[#allocation4 + $0x3c] sm:$0x1] %v8159_v46  ;;  %v8324_v22 = vrot.slane %v8323_v28, 4  ;;  %v8760_v16 = vshll.u32 %v8704_v32, 16  ;;  %v13760_v24 = vrot.slane %v17980_v57, 9  ;;  %v13761_v61 = vrot.slane %v6549_v25, 9 }
 0x3da   : > { %8598 = vst [vmem:[#allocation2 + $0xc4] sm:$0xf] %v8556_v38  ;;  %v14012_v8 = vor.u32 %v15063_v26, %v14009_v17  ;;  %v8893_v21 = vsel %vm15782_vm13, %v13913_v48, %v8892_v63  ;;  %v13762_v52 = vrot.slane %v17983_v54, 9  ;;  %v13763_v58 = vrot.slane %v17995_v4, 9  ;;  %v14007_v13 = vld [vmem:[#allocation2 + $0xa0] sm:$0xf] }
 0x3db   : > { %8438 = vst [vmem:[#allocation2 + $0xe0] sm:$0xf] %v8419_v18  ;;  %v13764_v23 = vrot.slane %v6552_v59, 9  ;;  %v8329_v6 = vsel %vm15774_vm12, %v8324_v22, %v8328_v10  ;;  %v18012_v44 = vrot.slane %v8757_v56, 4  ;;  %v18014_v55 = vrot.slane %v8760_v16, 5  ;;  %v15109_v28 = vld [vmem:[#allocation8 + $0xf0] sm:$0xff] }
 0x3dc   : > { %8918 = vst [vmem:[#allocation2 + $0xb0] sm:$0xf] %v8893_v21  ;;  %9889 = vmatmul.bf16.gmra.mxu1 %v14012_v8  ;;  %v8766_v49 = vshll.u32 %v8705_v42, 16  ;;  %v18027_v34 = vmax.f32 %v17978_v47, %v13759_v50  ;;  %v18030_v31 = vmax.f32 %v17980_v57, %v13760_v24  ;;  %v18034_v19 = vmax.f32 %v6549_v25, %v13761_v61  ;;  %v5907_v57 = vld [vmem:[#allocation3 + $0x78] sm:$0xf]  ;;  %v15098_v8 = vld [vmem:[#allocation8 + $0x98] sm:$0xff] }
 0x3dd   : > { %8358 = vst [vmem:[#allocation2 + $0xdc] sm:$0xf] %v8329_v6  ;;  %v18039_v11 = vmax.f32 %v17983_v54, %v13762_v52  ;;  %v18042_v46 = vmax.f32 %v17995_v4, %v13763_v58  ;;  %v18044_v47 = vmax.f32 %v6552_v59, %v13764_v23  ;;  %v5908_v7 = vld [vmem:[#allocation3 + $0x7c] sm:$0xf]  ;;  %v5971_v25 = vrot.slane %v5907_v57, 3  ;;  %9787 = vmatpush.bf16.msrb.mxu2 %v15099_v27  ;;  %v15108_v6 = vld [vmem:[#allocation8 + $0xe8] sm:$0xff] }
 0x3de   : > { %v5972_v14 = vrot.slane %v5908_v7, 3  ;;  %v18048_v40 = vrot.slane %v8766_v49, 5  ;;  %9814 = vmatpush.bf16.msrb.mxu3 %v15109_v28  ;;  %v15107_v27 = vld [vmem:[#allocation8 + $0xe0] sm:$0xff]  ;;  %v15096_v28 = vld [vmem:[#allocation8 + $0x88] sm:$0xff] }
 0x3df   : > { %v8207_v3 = vld [vmem:[#allocation4 + $0x38] sm:$0xf]  ;;  %v6339_v12 = vsel %vm5973_vm4, %v5907_v57, %v5971_v25  ;;  %v6340_v59 = vsel %vm5977_vm14, %v5907_v57, %v5971_v25  ;;  %v6343_v9 = vsel %vm5981_vm15, %v5907_v57, %v5971_v25  ;;  %v6346_v33 = vsel %vm5985_vm0, %v5907_v57, %v5971_v25 }
 0x3e0   : > { %v8230_v20 = vld [vmem:[#allocation4 + $0x38] sm:$0xf]  ;;  %8215 = vst [vmem:[#allocation2 + $0xfc] sm:$0xf] %v8207_v3  ;;  %v18036_v36 = vld [vmem:[#allocation4 + $0x3c] sm:$0x1]  ;;  %v6351_v38 = vsel %vm5973_vm4, %v5908_v7, %v5972_v14  ;;  %v6352_v48 = vsel %vm5977_vm14, %v5908_v7, %v5972_v14  ;;  %v6355_v10 = vsel %vm5981_vm15, %v5908_v7, %v5972_v14  ;;  %v6358_v18 = vsel %vm5985_vm0, %v5908_v7, %v5972_v14 }
 0x3e1   : > { %v18024_v51 = vld [vmem:[#allocation4 + $0x38] sm:$0xe]  ;;  %v8331_v39 = vshrl.u32 %v8230_v20, 16  ;;  %v8334_v62 = vshll.u32 %v8230_v20, 16  ;;  %v15067_v32 = vld [vmem:[#allocation2 + $0xc0] sm:$0xf0]  ;;  %v6993_v63 = vunpack.c.l.bf16 %v6339_v12  ;;  %v6997_v61 = vunpack.c.l.bf16 %v6351_v38  ;;  %9788 = vmatpush.bf16.msrb.mxu2 %v15098_v8 }
 0x3e2   : > { %v14008_v54 = vor.u32 %v15067_v32, %v14007_v13  ;;  %v8340_v4 = vshll.u32 %v18036_v36, 16  ;;  %v13907_v37 = vrot.slane %v18024_v51, 9  ;;  %v6342_v0 = vrot.slane %v6340_v59, 1  ;;  %9815 = vmatpush.bf16.msrb.mxu3 %v15108_v6  ;;  %v15097_v32 = vld [vmem:[#allocation8 + $0x90] sm:$0xff] }
 0x3e3   : > { %v18046_v15 = vrot.slane %v8331_v39, 4  ;;  %v18050_v30 = vrot.slane %v8334_v62, 5  ;;  %v6345_v50 = vrot.slane %v6343_v9, 2  ;;  %v6348_v26 = vrot.slane %v6346_v33, 3 }
 0x3e4   : > { %9860 = vmatmul.bf16.gmra.mxu0 %v14008_v54  ;;  %v6354_v42 = vrot.slane %v6352_v48, 1  ;;  %v6357_v56 = vrot.slane %v6355_v10, 2  ;;  %v6360_v17 = vrot.slane %v6358_v18, 3  ;;  %v6994_v22 = vunpack.c.l.bf16 %v6342_v0  ;;  %v8447_v54 = vld [vmem:[#allocation4 + $0x38] sm:$0xf] }
 0x3e5   : > { %v6995_v16 = vunpack.c.l.bf16 %v6345_v50  ;;  %v6996_v24 = vunpack.c.l.bf16 %v6348_v26  ;;  %v13821_v43 = vrot.slane %v6993_v63, 9  ;;  %v13825_v20 = vrot.slane %v6997_v61, 9  ;;  %8455 = vst [vmem:[#allocation2 + $0xe4] sm:$0xf] %v8447_v54  ;;  %9789 = vmatpush.bf16.msrb.mxu2 %v15097_v32 }
 0x3e6   : > { %v6998_v21 = vunpack.c.l.bf16 %v6354_v42  ;;  %v6999_v52 = vunpack.c.l.bf16 %v6357_v56  ;;  %v7000_v58 = vunpack.c.l.bf16 %v6360_v17  ;;  %v13822_v23 = vrot.slane %v6994_v22, 9  ;;  %9816 = vmatpush.bf16.msrb.mxu3 %v15107_v27 }
 0x3e7   : > { %v13823_v49 = vrot.slane %v6995_v16, 9  ;;  %v13824_v3 = vrot.slane %v6996_v24, 9  ;;  %v7313_v2 = vmax.f32 %v6993_v63, %v13821_v43  ;;  %v7317_v25 = vmax.f32 %v6997_v61, %v13825_v20 }
 0x3e8   : > { %v13826_v13 = vrot.slane %v6998_v21, 9  ;;  %v13827_v39 = vrot.slane %v6999_v52, 9  ;;  %v13828_v57 = vrot.slane %v7000_v58, 9  ;;  %v7314_v7 = vmax.f32 %v6994_v22, %v13822_v23  ;;  %v15095_v23 = vld [vmem:[#allocation8 + $0x80] sm:$0xff] }
 0x3e9   : > { %v7315_v1 = vmax.f32 %v6995_v16, %v13823_v49  ;;  %v7316_v62 = vmax.f32 %v6996_v24, %v13824_v3  ;;  %v7569_v14 = vmax.f32 %v18019_v45, %v7313_v2  ;;  %v7573_v26 = vmax.f32 %v18034_v19, %v7317_v25  ;;  %v15074_v16 = vld [vmem:[#allocation2 + $0xf8] sm:$0xf0]  ;;  %9790 = vmatpush.bf16.msrb.mxu2 %v15096_v28  ;;  %v15134_v2 = vld [vmem:[#allocation8 + $0x1b8] sm:$0xff]  ;;  %v8469_v25 = vld [vmem:[#allocation4 + $0x38] sm:$0xf] }
 0x3ea   : > { %v7318_v12 = vmax.f32 %v6998_v21, %v13826_v13  ;;  %v7319_v59 = vmax.f32 %v6999_v52, %v13827_v39  ;;  %v7320_v9 = vmax.f32 %v7000_v58, %v13828_v57  ;;  %v7570_v33 = vmax.f32 %v18022_v41, %v7314_v7  ;;  %v15106_v41 = vld [vmem:[#allocation8 + $0xd8] sm:$0xff]  ;;  %v14027_v52 = vld [vmem:[#allocation2 + $0xd8] sm:$0xf] }
 0x3eb   : > { %v7571_v0 = vmax.f32 %v18027_v34, %v7315_v1  ;;  %v7572_v50 = vmax.f32 %v18030_v31, %v7316_v62  ;;  %v7633_v38 = vpack.c.bf16 %v7569_v14, %v7569_v14  ;;  %v7637_v56 = vpack.c.bf16 %v7573_v26, %v7573_v26  ;;  %9817 = vmatpush.bf16.msrb.mxu3 %v15106_v41  ;;  %v15105_v58 = vld [vmem:[#allocation8 + $0xd0] sm:$0xff]  ;;  %v15150_v1 = vld [vmem:[#allocation8 + $0x238] sm:$0xff]  ;;  %v15104_v26 = vld [vmem:[#allocation8 + $0xc8] sm:$0xff] }
 0x3ec   : > { %v7574_v45 = vmax.f32 %v18039_v11, %v7318_v12  ;;  %v7575_v48 = vmax.f32 %v18042_v46, %v7319_v59  ;;  %v7576_v10 = vmax.f32 %v18044_v47, %v7320_v9  ;;  %v7634_v18 = vpack.c.bf16 %v7570_v33, %v7570_v33  ;;  %v8614_v62 = vld [vmem:[#allocation4 + $0x3c] sm:$0x1]  ;;  %v8374_v59 = vld [vmem:[#allocation4 + $0x38] sm:$0xe]  ;;  %9958 = vmatpush.bf16.msra.mxu0 %v15150_v1 }
 0x3ed   : > { %v7635_v63 = vpack.c.bf16 %v7571_v0, %v7571_v0  ;;  %v7636_v42 = vpack.c.bf16 %v7572_v50, %v7572_v50  ;;  %v7761_v34 = vunpack.c.l.b16 %v7633_v38  ;;  %v7765_v43 = vunpack.c.l.b16 %v7637_v56  ;;  %v8470_v12 = vld [vmem:[#allocation4 + $0x3c] sm:$0x1]  ;;  %9791 = vmatpush.bf16.msrb.mxu2 %v15095_v23  ;;  %v8852_v28 = vld [vmem:[#allocation4 + $0x38] sm:$0xe] }
 0x3ee   : > { %v7638_v17 = vpack.c.bf16 %v7574_v45, %v7574_v45  ;;  %v7639_v31 = vpack.c.bf16 %v7575_v48, %v7575_v48  ;;  %v7640_v22 = vpack.c.bf16 %v7576_v10, %v7576_v10  ;;  %v7762_v19 = vunpack.c.l.b16 %v7634_v18  ;;  %v8375_v38 = vld [vmem:[#allocation4 + $0x3c] sm:$0x1] }
 0x3ef   : > { %v7763_v24 = vunpack.c.l.b16 %v7635_v63  ;;  %v7764_v61 = vunpack.c.l.b16 %v7636_v42  ;;  %v13885_v11 = vunpack.i.l.s16 %v7761_v34  ;;  %v13889_v3 = vunpack.i.l.s16 %v7765_v43  ;;  %9818 = vmatpush.bf16.msrb.mxu3 %v15105_v58  ;;  %v8853_v42 = vld [vmem:[#allocation4 + $0x3c] sm:$0x1]  ;;  %v8707_v58 = vld [vmem:[#allocation4 + $0x34] sm:$0x1] }
 0x3f0   : > { %v7766_v46 = vunpack.c.l.b16 %v7638_v17  ;;  %v7767_v8 = vunpack.c.l.b16 %v7639_v31  ;;  %v7768_v47 = vunpack.c.l.b16 %v7640_v22  ;;  %v13886_v21 = vunpack.i.l.s16 %v7762_v19  ;;  %v15103_v17 = vld [vmem:[#allocation8 + $0xc0] sm:$0xff] }
 0x3f1   : > { %v13887_v6 = vunpack.i.l.s16 %v7763_v24  ;;  %v13888_v49 = vunpack.i.l.s16 %v7764_v61  ;;  %v14028_v20 = vor.u32 %v15074_v16, %v14027_v52  ;;  %v8337_v54 = vor.u32 %v18050_v30, %v18046_v15  ;;  %9900 = vmatpush.bf16.msra.mxu2 %v15134_v2  ;;  %v15149_v30 = vld [vmem:[#allocation8 + $0x230] sm:$0xff]  ;;  %v8686_v31 = vld [vmem:[#allocation4 + $0x30] sm:$0xf]  ;;  %v15142_v16 = vld [vmem:[#allocation8 + $0x1f8] sm:$0xff] }
 0x3f2   : > { %v13890_v13 = vunpack.i.l.s16 %v7766_v46  ;;  %v13891_v39 = vunpack.i.l.s16 %v7767_v8  ;;  %v13892_v57 = vunpack.i.l.s16 %v7768_v47  ;;  %v7999_v7 = vrot.slane %v13886_v21, 7  ;;  %v8706_v22 = vld [vmem:[#allocation4 + $0x30] sm:$0xf]  ;;  %9959 = vmatpush.bf16.msra.mxu0 %v15149_v30  ;;  %8694 = vst [vmem:[#allocation2 + $0xa8] sm:$0xf] %v8686_v31 }
 0x3f3   : > { %v8001_v14 = vrot.slane %v13887_v6, 6  ;;  %v8003_v32 = vrot.slane %v13888_v49, 5  ;;  %9749 = vmatmul.bf16.gmra.mxu2 %v14028_v20  ;;  %v8763_v9 = vor.u32 %v18014_v55, %v18012_v44  ;;  %v8005_v27 = vrot.slane %v13889_v3, 4  ;;  %v15133_v44 = vld [vmem:[#allocation8 + $0x1b0] sm:$0xff]  ;;  %9819 = vmatpush.bf16.msrb.mxu3 %v15104_v26  ;;  %v15148_v46 = vld [vmem:[#allocation8 + $0x228] sm:$0xff] }
 0x3f4   : > { %v8000_v33 = vsel %vm5977_vm14, %v7999_v7, %v13885_v11  ;;  %v8007_v0 = vrot.slane %v13890_v13, 3  ;;  %v8009_v50 = vrot.slane %v13891_v39, 2  ;;  %v8338_v48 = vrot.slane %v8337_v54, 4  ;;  %v13927_v2 = vld [vmem:[#allocation2 + $0x8] sm:$0xf] }
 0x3f5   : > { %v8002_v45 = vsel %vm5981_vm15, %v8001_v14, %v8000_v33  ;;  %v8342_v15 = vrot.slane %v8340_v4, 5  ;;  %v8659_v55 = vrot.slane %v8614_v62, 5  ;;  %v8011_v18 = vrot.slane %v13892_v57, 1  ;;  %9901 = vmatpush.bf16.msra.mxu2 %v15133_v44  ;;  %v15141_v62 = vld [vmem:[#allocation8 + $0x1f0] sm:$0xff]  ;;  %v15048_v54 = vld [vmem:[#allocation2 + $0x28] sm:$0xf0] }
 0x3f6   : > { %v8004_v10 = vsel %vm5985_vm0, %v8003_v32, %v8002_v45  ;;  %v8558_v41 = vshrl.u32 %v8469_v25, 16  ;;  %v8561_v63 = vshll.u32 %v8469_v25, 16  ;;  %v13900_v4 = vrot.slane %v8374_v59, 9  ;;  %9960 = vmatpush.bf16.msra.mxu0 %v15148_v46  ;;  %v15070_v32 = vld [vmem:[#allocation2 + $0xdc] sm:$0xf] }
 0x3f7   : > { %v8006_v56 = vsel %vm7904_vm1, %v8005_v27, %v8004_v10  ;;  %v8343_v34 = vsel %vm15774_vm12, %v8338_v48, %v8342_v15  ;;  %v8660_v36 = vsel %vm15782_vm13, %v13907_v37, %v8659_v55  ;;  %v8567_v43 = vshll.u32 %v8470_v12, 16  ;;  %9820 = vmatpush.bf16.msrb.mxu3 %v15103_v17  ;;  %v15147_v27 = vld [vmem:[#allocation8 + $0x220] sm:$0xff]  ;;  %v15140_v10 = vld [vmem:[#allocation8 + $0x1e8] sm:$0xff]  ;;  %v15130_v17 = vld [vmem:[#allocation8 + $0x198] sm:$0xff] }
 0x3f8   : > { %v8008_v19 = vsel %vm7907_vm2, %v8007_v0, %v8006_v56  ;;  %8359 = vst [vmem:[#allocation2 + $0x100] sm:$0xf] %v8343_v34  ;;  %v8560_v24 = vrot.slane %v8558_v41, 4  ;;  %v8563_v61 = vrot.slane %v8561_v63, 5  ;;  %v8422_v51 = vrot.slane %v8375_v38, 5  ;;  %v15132_v0 = vld [vmem:[#allocation8 + $0x1a8] sm:$0xff] }
 0x3f9   : > { %v8010_v11 = vsel %vm7910_vm3, %v8009_v50, %v8008_v19  ;;  %8679 = vst [vmem:[#allocation2 + $0xec] sm:$0xf] %v8660_v36  ;;  %v13914_v8 = vrot.slane %v8852_v28, 9  ;;  %v8896_v37 = vrot.slane %v8853_v42, 5  ;;  %v8764_v52 = vrot.slane %v8763_v9, 4  ;;  %9902 = vmatpush.bf16.msra.mxu2 %v15132_v0  ;;  %v15131_v41 = vld [vmem:[#allocation8 + $0x1a0] sm:$0xff] }
 0x3fa   : > { %v8012_v47 = vsel %vm7913_vm5, %v8011_v18, %v8010_v11  ;;  %v8564_v21 = vor.u32 %v8563_v61, %v8560_v24  ;;  %v8771_v23 = vshrl.u32 %v8706_v22, 16  ;;  %v8423_v49 = vsel %vm15782_vm13, %v13900_v4, %v8422_v51  ;;  %9961 = vmatpush.bf16.msra.mxu0 %v15147_v27  ;;  %v15146_v18 = vld [vmem:[#allocation8 + $0x218] sm:$0xff]  ;;  %v15145_v56 = vld [vmem:[#allocation8 + $0x210] sm:$0xff]  ;;  %v15139_v34 = vld [vmem:[#allocation8 + $0x1e0] sm:$0xff] }
 0x3fb   : > { %v8020_v6 = vpack.c.b16 %v8012_v47, %v8012_v47  ;;  %v8897_v3 = vsel %vm15782_vm13, %v13914_v8, %v8896_v37  ;;  %v8774_v20 = vshll.u32 %v8706_v22, 16  ;;  %v8569_v39 = vrot.slane %v8567_v43, 5  ;;  %8439 = vst [vmem:[#allocation2 + $0x104] sm:$0xf] %v8423_v49  ;;  %9929 = vmatpush.bf16.msra.mxu3 %v15142_v16  ;;  %v13929_v36 = vld [vmem:[#allocation2 + $0x2c] sm:$0xf0] }
 0x3fc   : > { %v8565_v13 = vrot.slane %v8564_v21, 4  ;;  %v8769_v57 = vsel %vm15774_vm12, %v8764_v52, %v18048_v40  ;;  %v8773_v7 = vrot.slane %v8771_v23, 4  ;;  %8919 = vst [vmem:[#allocation2 + $0xd4] sm:$0xf] %v8897_v3  ;;  %v8780_v14 = vshll.u32 %v8707_v58, 16  ;;  %v15143_v19 = vld [vmem:[#allocation8 + $0x200] sm:$0xff] }
 0x3fd   : > { %v8078_v1 = vshrl.u32 %v8020_v6, 16  ;;  %v8776_v25 = vrot.slane %v8774_v20, 5  ;;  %8837 = vst [vmem:[#allocation2 + $0x88] sm:$0xf] %v8769_v57  ;;  %v8081_v9 = vshll.u32 %v8020_v6, 16  ;;  %v13928_v38 = vor.u32 %v15048_v54, %v13927_v2  ;;  %9903 = vmatpush.bf16.msra.mxu2 %v15131_v41  ;;  %v15138_v52 = vld [vmem:[#allocation8 + $0x1d8] sm:$0xff] }
 0x3fe   : > { %v8570_v12 = vsel %vm15774_vm12, %v8565_v13, %v8569_v39  ;;  %v8782_v45 = vrot.slane %v8780_v14, 5  ;;  %9962 = vmatpush.bf16.msra.mxu0 %v15146_v18  ;;  %v15057_v4 = vld [vmem:[#allocation2 + $0x70] sm:$0xf0]  ;;  %v15044_v31 = vld [vmem:[#allocation2 + $0xc] sm:$0xf]  ;;  %v15129_v3 = vld [vmem:[#allocation8 + $0x190] sm:$0xff] }
 0x3ff   : > { %v8080_v59 = vrot.slane %v8078_v1, 7  ;;  %v14029_v33 = vld [vmem:[#allocation2 + $0xfc] sm:$0xf0]  ;;  %v8777_v40 = vor.u32 %v8776_v25, %v8773_v7  ;;  %8599 = vst [vmem:[#allocation2 + $0xe8] sm:$0xf] %v8570_v12  ;;  %9930 = vmatpush.bf16.msra.mxu3 %v15141_v62  ;;  %v13932_v16 = vor.u32 %v15044_v31, %v13929_v36  ;;  %v15128_v13 = vld [vmem:[#allocation8 + $0x188] sm:$0xff] }
 0x400   : > { %v14032_v50 = vor.u32 %v15070_v32, %v14029_v33  ;;  %v13963_v22 = vld [vmem:[#allocation2 + $0x50] sm:$0xf]  ;;  %v15137_v20 = vld [vmem:[#allocation8 + $0x1d0] sm:$0xff]  ;;  %vm10656_vm5 = vsmask.f32 7448 }
 0x401   : > { %v8083_v26 = vor.u32 %v8081_v9, %v8080_v59  ;;  %v8778_v28 = vrot.slane %v8777_v40, 4  ;;  %9904 = vmatpush.bf16.msra.mxu2 %v15130_v17  ;;  %v13964_v11 = vor.u32 %v15057_v4, %v13963_v22  ;;  %v8687_v39 = vld [vmem:[#allocation4 + $0x38] sm:$0xf]  ;;  %v8709_v7 = vld [vmem:[#allocation4 + $0x3c] sm:$0x1]  ;;  %v15127_v31 = vld [vmem:[#allocation8 + $0x180] sm:$0xff] }
 0x402   : > { %9778 = vmatmul.bf16.gmra.mxu3 %v14032_v50  ;;  %9963 = vmatpush.bf16.msra.mxu0 %v15145_v56  ;;  %v8708_v57 = vld [vmem:[#allocation4 + $0x38] sm:$0xf]  ;;  %8695 = vst [vmem:[#allocation2 + $0xcc] sm:$0xf] %v8687_v39  ;;  %v8794_v59 = vshll.u32 %v8709_v7, 16  ;;  %v15135_v22 = vld [vmem:[#allocation8 + $0x1c0] sm:$0xff] }
 0x403   : > { %v8104_v48 = vsel %vm15722_vm8, 0, %v8083_v26  ;;  %9792 = vmatmul.bf16.vlgmr.msrb.gmra.mxu2 %v13928_v38  ;;  %v8783_v15 = vsel %vm15774_vm12, %v8778_v28, %v8782_v45  ;;  %9931 = vmatpush.bf16.msra.mxu3 %v15140_v10  ;;  %v8785_v25 = vshrl.u32 %v8708_v57, 16  ;;  %v8788_v14 = vshll.u32 %v8708_v57, 16  ;;  %v15072_v9 = vld [vmem:[#allocation2 + $0xec] sm:$0xf]  ;;  %v15136_v10 = vld [vmem:[#allocation8 + $0x1c8] sm:$0xff] }
 0x404   : > { %v8116_v30 = vsel %vm15737_vm9, %v8104_v48, 0  ;;  %8838 = vst [vmem:[#allocation2 + $0xac] sm:$0xf] %v8783_v15  ;;  %v13965_v40 = vld [vmem:[#allocation2 + $0x74] sm:$0xf0]  ;;  %v8796_v38 = vrot.slane %v8794_v59, 5 }
 0x405   : > { %v8142_v44 = vunpack.c.l.b16 %v8116_v30  ;;  %v8143_v55 = vunpack.c.h.b16 %v8116_v30  ;;  %9905 = vmatpush.bf16.msra.mxu2 %v15129_v3  ;;  %v8787_v54 = vrot.slane %v8785_v25, 4  ;;  %v8790_v12 = vrot.slane %v8788_v14, 5  ;;  %v15066_v50 = vld [vmem:[#allocation2 + $0xb8] sm:$0xf0]  ;;  %v15053_v28 = vld [vmem:[#allocation2 + $0x54] sm:$0xf]  ;;  %v18116_v25 = vpop.f32.mrf.mxu3 }
 0x406   : > { %9964 = vmatpush.bf16.msra.mxu0 %v15144_v35  ;;  %v13968_v45 = vor.u32 %v15053_v28, %v13965_v40  ;;  %v13999_v48 = vld [vmem:[#allocation2 + $0x98] sm:$0xf]  ;;  %v14001_v41 = vld [vmem:[#allocation2 + $0xbc] sm:$0xf0]  ;;  %v13981_v28 = vld [vmem:[#allocation2 + $0x84] sm:$0xf0] }
 0x407   : > { %v8160_v63 = vpack.c.b16 %v8142_v44, %v8142_v44  ;;  %v8161_v42 = vpack.c.b16 %v8143_v55, %v8143_v55  ;;  %9932 = vmatpush.bf16.msra.mxu3 %v15139_v34  ;;  %v8791_v27 = vor.u32 %v8790_v12, %v8787_v54  ;;  %v14000_v30 = vor.u32 %v15066_v50, %v13999_v48  ;;  %v14043_v44 = vld [vmem:[#allocation2 + $0xe8] sm:$0xf]  ;;  %v15051_v34 = vld [vmem:[#allocation2 + $0x40] sm:$0xf0]  ;;  %v14035_v17 = vld [vmem:[#allocation2 + $0xe0] sm:$0xf] }
 0x408   : > { %v13951_v36 = vld [vmem:[#allocation2 + $0x20] sm:$0xf]  ;;  %v13943_v39 = vld [vmem:[#allocation2 + $0x18] sm:$0xf]  ;;  %v15059_v54 = vld [vmem:[#allocation2 + $0x80] sm:$0xf0] }
 0x409   : > { %8196 = vst [vmem:[#allocation4 + $0x40] sm:$0xf] %v8160_v63  ;;  %9906 = vmatpush.bf16.msra.mxu2 %v15128_v13  ;;  %v8792_v26 = vrot.slane %v8791_v27, 4  ;;  %v15075_v63 = vld [vmem:[#allocation2 + $0x100] sm:$0xf0]  ;;  %v13952_v4 = vor.u32 %v15051_v34, %v13951_v36 }
 0x40a   : > { %8197 = vst [vmem:[#allocation4 + $0x44] sm:$0x1] %v8161_v42  ;;  %9965 = vmatpush.bf16.msra.mxu0 %v15143_v19  ;;  %v15062_v42 = vld [vmem:[#allocation2 + $0x9c] sm:$0xf]  ;;  %v14036_v35 = vor.u32 %v15075_v63, %v14035_v17  ;;  %v15060_v13 = vld [vmem:[#allocation2 + $0x88] sm:$0xf0] }
 0x40b   : > { %9933 = vmatpush.bf16.msra.mxu3 %v15138_v52  ;;  %v8797_v15 = vsel %vm15774_vm12, %v8792_v26, %v8796_v38  ;;  %v14004_v56 = vor.u32 %v15062_v42, %v14001_v41  ;;  %v13945_v14 = vld [vmem:[#allocation2 + $0x3c] sm:$0xf0]  ;;  %v15046_v12 = vld [vmem:[#allocation2 + $0x1c] sm:$0xf]  ;;  %v18118_v27 = vld [vmem:[#allocation10] ss:$0 sm:$0xff] }
 0x40c   : > { %8839 = vst [vmem:[#allocation2 + $0xd0] sm:$0xf] %v8797_v15  ;;  %v13948_v59 = vor.u32 %v15046_v12, %v13945_v14  ;;  %v14023_v50 = vld [vmem:[#allocation2 + $0xb0] sm:$0xf]  ;;  %v15055_v48 = vld [vmem:[#allocation2 + $0x64] sm:$0xf] }
 0x40d   : > { %9907 = vmatpush.bf16.msra.mxu2 %v15127_v31  ;;  %v13984_v15 = vor.u32 %v15055_v48, %v13981_v28  ;;  %v15064_v34 = vld [vmem:[#allocation2 + $0xac] sm:$0xf]  ;;  %vm10651_vm9 = vsmask.f32 1280 }
 0x40f   : > { %9934 = vmatpush.bf16.msra.mxu3 %v15137_v20 }
 0x410   : > { %v8615_v24 = vld [vmem:[#allocation4 + $0x40] sm:$0xe] }
 0x411   : > { %v8471_v61 = vld [vmem:[#allocation4 + $0x40] sm:$0xf]  ;;  %v8616_v46 = vld [vmem:[#allocation4 + $0x44] sm:$0x1]  ;;  %v13908_v51 = vrot.slane %v8615_v24, 9 }
 0x412   : > { %v8448_v43 = vld [vmem:[#allocation4 + $0x40] sm:$0xf]  ;;  %v8472_v8 = vld [vmem:[#allocation4 + $0x44] sm:$0x1]  ;;  %v8572_v37 = vshrl.u32 %v8471_v61, 16  ;;  %9821 = vmatmul.bf16.vlgmr.msrb.gmra.mxu3 %v13932_v16  ;;  %v8663_v47 = vrot.slane %v8616_v46, 5 }
 0x413   : > { %v8575_v21 = vshll.u32 %v8471_v61, 16  ;;  %8456 = vst [vmem:[#allocation2 + $0x108] sm:$0xf] %v8448_v43  ;;  %9797 = vmatmul.bf16.gmra.mxu2 %v13964_v11  ;;  %v8581_v49 = vshll.u32 %v8472_v8, 16  ;;  %9935 = vmatpush.bf16.msra.mxu3 %v15136_v10  ;;  %v8854_v19 = vld [vmem:[#allocation4 + $0x40] sm:$0xe] }
 0x414   : > { %v8574_v58 = vrot.slane %v8572_v37, 4  ;;  %v8664_v23 = vsel %vm15782_vm13, %v13908_v51, %v8663_v47  ;;  %v8855_v16 = vld [vmem:[#allocation4 + $0x44] sm:$0x1]  ;;  %v8688_v24 = vld [vmem:[#allocation4 + $0x40] sm:$0xf]  ;;  %v13915_v61 = vrot.slane %v8854_v19, 9 }
 0x415   : > { %v8577_v6 = vrot.slane %v8575_v21, 5  ;;  %8680 = vst [vmem:[#allocation2 + $0x110] sm:$0xf] %v8664_v23  ;;  %v8583_v62 = vrot.slane %v8581_v49, 5  ;;  %v8900_v43 = vrot.slane %v8855_v16, 5 }
 0x416   : > { %8696 = vst [vmem:[#allocation2 + $0xf0] sm:$0xf] %v8688_v24  ;;  %v8710_v11 = vld [vmem:[#allocation4 + $0x40] sm:$0xf]  ;;  %v8711_v46 = vld [vmem:[#allocation4 + $0x44] sm:$0x1] }
 0x417   : > { %v8578_v2 = vor.u32 %v8577_v6, %v8574_v58  ;;  %9936 = vmatpush.bf16.msra.mxu3 %v15135_v22  ;;  %v8799_v51 = vshrl.u32 %v8710_v11, 16  ;;  %v8802_v8 = vshll.u32 %v8710_v11, 16  ;;  %v8901_v37 = vsel %vm15782_vm13, %v13915_v61, %v8900_v43  ;;  %v15050_v6 = vld [vmem:[#allocation2 + $0x38] sm:$0xf0]  ;;  %v15071_v49 = vld [vmem:[#allocation2 + $0xe4] sm:$0xf] }
 0x418   : > { %8920 = vst [vmem:[#allocation2 + $0xf8] sm:$0xf] %v8901_v37  ;;  %v8808_v52 = vshll.u32 %v8711_v46, 16  ;;  %v13944_v57 = vor.u32 %v15050_v6, %v13943_v39  ;;  %v14017_v41 = vld [vmem:[#allocation2 + $0xcc] sm:$0xf0] }
 0x419   : > { %v8579_v1 = vrot.slane %v8578_v2, 4  ;;  %v8801_v47 = vrot.slane %v8799_v51, 4  ;;  %v8804_v21 = vrot.slane %v8802_v8, 5  ;;  %v14020_v17 = vor.u32 %v15064_v34, %v14017_v41  ;;  %v14053_v22 = vld [vmem:[#allocation2 + $0x114] sm:$0xf0]  ;;  %v18774_v46 = vld [vmem:[#allocation20_spill] sm:$0xff]  ;;  %v9851_v8 = vpop.f32.mrf.mxu0 }
 0x41a   : > { %v14037_v58 = vld [vmem:[#allocation2 + $0x104] sm:$0xf0]  ;;  %v8810_v20 = vrot.slane %v8808_v52, 5  ;;  %v18775_v41 = vld [vmem:[#allocation21_spill] sm:$0xff]  ;;  %v18776_v34 = vld [vmem:[#allocation22_spill] sm:$0xff] }
 0x41b   : > { %v8584_v32 = vsel %vm15774_vm12, %v8579_v1, %v8583_v62  ;;  %v8805_v23 = vor.u32 %v8804_v21, %v8801_v47  ;;  %v14040_v2 = vor.u32 %v15071_v49, %v14037_v58  ;;  %v13988_v1 = vor.u32 %v15060_v13, %v13987_v60  ;;  %v18114_v62 = vpop.f32.mrf.mxu2 }
 0x41c   : > { %8600 = vst [vmem:[#allocation2 + $0x10c] sm:$0xf] %v8584_v32  ;;  %v14045_v33 = vld [vmem:[#allocation2 + $0x10c] sm:$0xf0]  ;;  %vm10654_vm13 = vsmask.f32 5392 }
 0x41d   : > { %v14048_v0 = vor.u32 %v15072_v9, %v14045_v33  ;;  %v8806_v3 = vrot.slane %v8805_v23, 4  ;;  %v15069_v9 = vld [vmem:[#allocation2 + $0xd0] sm:$0xf0]  ;;  %v13979_v33 = vld [vmem:[#allocation2 + $0x60] sm:$0xf] }
 0x41e   : > { %v14024_v38 = vor.u32 %v15069_v9, %v14023_v50  ;;  %v14051_v42 = vld [vmem:[#allocation2 + $0xf0] sm:$0xf] }
 0x41f   : > { %9894 = vmatmul.bf16.gmra.mxu1 %v14048_v0  ;;  %v8811_v7 = vsel %vm15774_vm12, %v8806_v3, %v8810_v20  ;;  %v13980_v0 = vor.u32 %v15059_v54, %v13979_v33  ;;  %vm10653_vm12 = vmor %vm10651_vm9, %vm10652_vm11 }
 0x420   : > { %8840 = vst [vmem:[#allocation2 + $0xf4] sm:$0xf] %v8811_v7  ;;  %vm10655_vm2 = vmor %vm10653_vm12, %vm10654_vm13 }
 0x421   : > { %v9853_v58 = vpop.f32.mrf.mxu0  ;;  %vm18175_vm9 = vmor %vm10655_vm2, %vm10656_vm5 }
 0x422   : > { %9826 = vmatmul.bf16.gmra.mxu3 %v13968_v45  ;;  %v15068_v45 = vld [vmem:[#allocation2 + $0xc8] sm:$0xf0]  ;;  %vm10768_vm11 = vmor %vm5973_vm4, %vm5981_vm15 }
 0x423   : > { %v15076_v55 = vld [vmem:[#allocation2 + $0x108] sm:$0xf0]  ;;  %9802 = vmatmul.bf16.gmra.mxu2 %v14000_v30  ;;  %v9745_v32 = vpop.f32.mrf.mxu2  ;;  %v14059_v30 = vld [vmem:[#allocation2 + $0xf8] sm:$0xf]  ;;  %vm10770_vm12 = vmor %vm10768_vm11, %vm7904_vm1 }
 0x424   : > { %v14044_v18 = vor.u32 %v15076_v55, %v14043_v44  ;;  %v9746_v53 = vadd.f32 %v18118_v27, %v9745_v32  ;;  %v15078_v44 = vld [vmem:[#allocation2 + $0x118] sm:$0xf0]  ;;  %v14015_v55 = vld [vmem:[#allocation2 + $0xa8] sm:$0xf]  ;;  %v9743_v32 = vadd.f32 %v18118_v27, %v18114_v62  ;;  %vm18227_vm13 = vmor %vm10770_vm12, %vm7910_vm3 }
 0x425   : > { %v14016_v10 = vor.u32 %v15068_v45, %v14015_v55 }
 0x426   : > { %9865 = vmatmul.bf16.gmra.mxu0 %v14044_v18  ;;  %v14060_v18 = vor.u32 %v15078_v44, %v14059_v30  ;;  %v9772_v54 = vadd.f32 %v18116_v25, %v9743_v32 }
 0x427   : > { %v15073_v31 = vld [vmem:[#allocation2 + $0xf4] sm:$0xf] }
 0x428   : > { %v14056_v16 = vor.u32 %v15073_v31, %v14053_v22 }
 0x42b   : > { %v9747_v63 = vpop.f32.mrf.mxu2 }
 0x42c   : > { %v9748_v12 = vadd.f32 %v18118_v27, %v9747_v63  ;;  %v9738_v63 = vadd.f32 %v18118_v27, %v18775_v41 }
 0x432   : > { %9831 = vmatmul.bf16.gmra.mxu3 %v14004_v56  ;;  %v15077_v56 = vld [vmem:[#allocation2 + $0x110] sm:$0xf0] }
 0x433   : > { %9807 = vmatmul.bf16.gmra.mxu2 %v14036_v35  ;;  %v14052_v35 = vor.u32 %v15077_v56, %v14051_v42 }
 0x436   : > { %9966 = vmatmul.bf16.vlgmr.msra.gmra.mxu0 %v13952_v4 }
 0x442   : > { %9836 = vmatmul.bf16.gmra.mxu3 %v14040_v2  ;;  %v18125_v2 = vpop.f32.mrf.mxu0 }
 0x443   : > { %9908 = vmatmul.bf16.vlgmr.msra.gmra.mxu2 %v13944_v57 }
 0x446   : > { %9971 = vmatmul.bf16.gmra.mxu0 %v13988_v1 }
 0x44a   : > { %v18129_v1 = vpop.f32.mrf.mxu0 }
 0x452   : > { %v9774_v40 = vpop.f32.mrf.mxu3  ;;  %9937 = vmatmul.bf16.vlgmr.msra.gmra.mxu3 %v13948_v59 }
 0x453   : > { %v9775_v26 = vadd.f32 %v9774_v40, %v9746_v53  ;;  %9913 = vmatmul.bf16.gmra.mxu2 %v13980_v0 }
 0x456   : > { %9976 = vmatmul.bf16.gmra.mxu0 %v14024_v38 }
 0x45a   : > { %v9776_v4 = vpop.f32.mrf.mxu3 }
 0x45b   : > { %v9777_v59 = vadd.f32 %v9776_v4, %v9748_v12 }
 0x461   : > { %v18137_v0 = vpop.f32.mrf.mxu0 }
 0x462   : > { %9942 = vmatmul.bf16.gmra.mxu3 %v13984_v15 }
 0x463   : > { %9918 = vmatmul.bf16.gmra.mxu2 %v14016_v10 }
 0x466   : > { %9981 = vmatmul.bf16.gmra.mxu0 %v14060_v18 }
 0x469   : > { %v9863_v45 = vpop.f32.mrf.mxu0 }
 0x472   : > { %9947 = vmatmul.bf16.gmra.mxu3 %v14020_v17  ;;  %v9767_v17 = vadd.f32 %v18776_v34, %v9738_v63 }
 0x473   : > { %9923 = vmatmul.bf16.gmra.mxu2 %v14052_v35 }
 0x476   : > { %v9750_v36 = vpop.f32.mrf.mxu2 }
 0x477   : > { %v9751_v24 = vadd.f32 %v18118_v27, %v9750_v36  ;;  %v9880_v36 = vpop.f32.mrf.mxu1 }
 0x47e   : > { %v9752_v19 = vpop.f32.mrf.mxu2 }
 0x47f   : > { %v9753_v37 = vadd.f32 %v18118_v27, %v9752_v19 }
 0x482   : > { %9952 = vmatmul.bf16.gmra.mxu3 %v14056_v16 }
 0x485   : > { %v9779_v61 = vpop.f32.mrf.mxu3 }
 0x486   : > { %v9780_v43 = vadd.f32 %v9779_v61, %v9751_v24  ;;  %v9793_v11 = vpop.f32.mrf.mxu2 }
 0x487   : > { %v9794_v51 = vadd.f32 %v9793_v11, %v18774_v46  ;;  %v9882_v46 = vpop.f32.mrf.mxu1 }
 0x48d   : > { %v9781_v47 = vpop.f32.mrf.mxu3 }
 0x48e   : > { %v9782_v21 = vadd.f32 %v9781_v47, %v9753_v37  ;;  %v9795_v52 = vpop.f32.mrf.mxu2 }
 0x48f   : > { %v9796_v31 = vadd.f32 %v9795_v52, %v9767_v17 }
 0x495   : > { %v9822_v23 = vpop.f32.mrf.mxu3 }
 0x496   : > { %v9823_v6 = vadd.f32 %v9822_v23, %v9794_v51  ;;  %v9798_v49 = vpop.f32.mrf.mxu2 }
 0x497   : > { %v9799_v3 = vadd.f32 %v9798_v49, %v17791_v5 }
 0x498   : > { %v9852_v20 = vadd.f32 %v9851_v8, %v9823_v6 }
 0x49d   : > { %v9824_v13 = vpop.f32.mrf.mxu3 }
 0x49e   : > { %v9800_v39 = vpop.f32.mrf.mxu2  ;;  %v9825_v19 = vadd.f32 %v9824_v13, %v9796_v31 }
 0x49f   : > { %v9801_v5 = vadd.f32 %v9800_v39, %v9772_v54 }
 0x4a0   : > { %v9854_v61 = vadd.f32 %v9853_v58, %v9825_v19 }
 0x4a2   : > { %v9883_v8 = vadd.f32 %v9882_v46, %v9854_v61 }
 0x4a3   : > { %v9866_v44 = vpop.f32.mrf.mxu0 }
 0x4a5   : > { %v9827_v57 = vpop.f32.mrf.mxu3 }
 0x4a6   : > { %v18127_v7 = vadd.f32 %v9827_v57, %v9799_v3  ;;  %v9803_v60 = vpop.f32.mrf.mxu2 }
 0x4a7   : > { %v9804_v14 = vadd.f32 %v9803_v60, %v9775_v26 }
 0x4ab   : > { %v9868_v42 = vpop.f32.mrf.mxu0 }
 0x4ad   : > { %v9829_v9 = vpop.f32.mrf.mxu3 }
 0x4ae   : > { %v18135_v33 = vadd.f32 %v9829_v9, %v9801_v5  ;;  %v9805_v53 = vpop.f32.mrf.mxu2 }
 0x4af   : > { %v9806_v40 = vadd.f32 %v9805_v53, %v9777_v59 }
 0x4b3   : > { %v9967_v16 = vpop.f32.mrf.mxu0 }
 0x4b5   : > { %v9832_v50 = vpop.f32.mrf.mxu3 }
 0x4b6   : > { %v18139_v38 = vadd.f32 %v9832_v50, %v9804_v14  ;;  %v9808_v26 = vpop.f32.mrf.mxu2 }
 0x4b7   : > { %v9809_v28 = vadd.f32 %v9808_v26, %v9780_v43  ;;  %v9881_v43 = vadd.f32 %v9880_v36, %v9852_v20 }
 0x4bb   : > { %v9969_v6 = vpop.f32.mrf.mxu0 }
 0x4bd   : > { %v9834_v62 = vpop.f32.mrf.mxu3 }
 0x4be   : > { %v9835_v48 = vadd.f32 %v9834_v62, %v9806_v40  ;;  %v9810_v25 = vpop.f32.mrf.mxu2 }
 0x4bf   : > { %v9811_v15 = vadd.f32 %v9810_v25, %v9782_v21 }
 0x4c0   : > { %v18141_v30 = vadd.f32 %v9863_v45, %v9835_v48 }
 0x4c5   : > { %v9837_v55 = vpop.f32.mrf.mxu3 }
 0x4c6   : > { %v9838_v10 = vadd.f32 %v9837_v55, %v9809_v28  ;;  %v9909_v4 = vpop.f32.mrf.mxu2 }
 0x4c7   : > { %v9910_v11 = vadd.f32 %v9909_v4, %v9881_v43 }
 0x4c8   : > { %v18143_v18 = vadd.f32 %v9866_v44, %v9838_v10 }
 0x4cd   : > { %v9839_v56 = vpop.f32.mrf.mxu3 }
 0x4ce   : > { %v9840_v35 = vadd.f32 %v9839_v56, %v9811_v15  ;;  %v9911_v51 = vpop.f32.mrf.mxu2 }
 0x4cf   : > { %v9912_v37 = vadd.f32 %v9911_v51, %v9883_v8 }
 0x4d0   : > { %v18148_v22 = vadd.f32 %v9868_v42, %v9840_v35 }
 0x4d5   : > { %v9938_v24 = vpop.f32.mrf.mxu3 }
 0x4d6   : > { %v9939_v27 = vadd.f32 %v9938_v24, %v9910_v11 }
 0x4d8   : > { %v9968_v21 = vadd.f32 %v9967_v16, %v9939_v27 }
 0x4da   : > { %v9987_v3 = vmax.f32 %v9968_v21, 0.0 }
 0x4dd   : > { %v9940_v47 = vpop.f32.mrf.mxu3 }
 0x4de   : > { %v9941_v23 = vadd.f32 %v9940_v47, %v9912_v37 }
 0x4e0   : > { %v9970_v49 = vadd.f32 %v9969_v6, %v9941_v23 }
 0x4e2   : > { %v9988_v52 = vmax.f32 %v9970_v49, 0.0 }
 0x4e4   : > { %v15315_v39 = vpack.c.bf16 %v9988_v52, %v9987_v3 }
 0x4e6   : > { %15316 = vst [vmem:[#allocation3] sm:$0xff] %v15315_v39  }
 0x4ed   : > { %v10011_v13 = vld [vmem:[#allocation3] sm:$0xf]  ;;  %v10012_v57 = vld [vmem:[#allocation3 + $0x4] sm:$0xf] }
 0x4ee   : > { %v10027_v60 = vrot.slane %v10011_v13, 3  ;;  %v10028_v58 = vrot.slane %v10012_v57, 3 }
 0x4f0   : > { %v10037_v20 = vsel %vm5973_vm4, %v10011_v13, %v10027_v60  ;;  %v10038_v14 = vsel %vm5977_vm14, %v10011_v13, %v10027_v60  ;;  %v10041_v32 = vsel %vm5981_vm15, %v10011_v13, %v10027_v60  ;;  %v10044_v54 = vsel %vm5985_vm0, %v10011_v13, %v10027_v60  ;;  %v9914_v13 = vpop.f32.mrf.mxu2 }
 0x4f1   : > { %v10040_v12 = vrot.slane %v10038_v14, 1  ;;  %v10043_v5 = vrot.slane %v10041_v32, 2  ;;  %v10046_v59 = vrot.slane %v10044_v54, 3  ;;  %v10049_v9 = vsel %vm5973_vm4, %v10012_v57, %v10028_v58 }
 0x4f2   : > { %v10050_v53 = vsel %vm5977_vm14, %v10012_v57, %v10028_v58  ;;  %v10053_v40 = vsel %vm5981_vm15, %v10012_v57, %v10028_v58  ;;  %v10056_v50 = vsel %vm5985_vm0, %v10012_v57, %v10028_v58  ;;  %v10163_v26 = vunpack.c.l.bf16 %v10037_v20  ;;  %v9885_v20 = vpop.f32.mrf.mxu1 }
 0x4f3   : > { %v10052_v28 = vrot.slane %v10050_v53, 1  ;;  %v10055_v45 = vrot.slane %v10053_v40, 2  ;;  %v10058_v62 = vrot.slane %v10056_v50, 3  ;;  %v10164_v48 = vunpack.c.l.bf16 %v10040_v12  ;;  %v9972_v53 = vpop.f32.mrf.mxu0 }
 0x4f4   : > { %v10165_v25 = vunpack.c.l.bf16 %v10043_v5  ;;  %v10166_v15 = vunpack.c.l.bf16 %v10046_v59  ;;  %v14349_v44 = vrot.slane %v10163_v26, 9  ;;  %v10275_v55 = vunpack.c.l.bf16 %v10049_v9  ;;  %v10613_v59 = vld [vmem:[#allocation5] sm:$0x7] }
 0x4f5   : > { %v14350_v10 = vrot.slane %v10164_v48, 9  ;;  %v10276_v41 = vunpack.c.l.bf16 %v10052_v28  ;;  %v10277_v63 = vunpack.c.l.bf16 %v10055_v45  ;;  %v10278_v42 = vunpack.c.l.bf16 %v10058_v62  ;;  %v9943_v45 = vpop.f32.mrf.mxu3 }
 0x4f6   : > { %v14351_v56 = vrot.slane %v10165_v25, 9  ;;  %v14352_v34 = vrot.slane %v10166_v15, 9  ;;  %v10243_v17 = vmax.f32 %v10163_v26, %v14349_v44  ;;  %v14365_v35 = vrot.slane %v10275_v55, 9 }
 0x4f7   : > { %v10244_v36 = vmax.f32 %v10164_v48, %v14350_v10  ;;  %v14366_v4 = vrot.slane %v10276_v41, 9  ;;  %v14367_v31 = vrot.slane %v10277_v63, 9  ;;  %v14368_v19 = vrot.slane %v10278_v42, 9 }
 0x4f8   : > { %v10245_v16 = vmax.f32 %v10165_v25, %v14351_v56  ;;  %v10246_v24 = vmax.f32 %v10166_v15, %v14352_v34  ;;  %v10355_v61 = vmax.f32 %v10275_v55, %v14365_v35  ;;  %v9857_v9 = vadd.f32 %v18125_v2, %v18127_v7  ;;  %v9916_v15 = vpop.f32.mrf.mxu2 }
 0x4f9   : > { %v10356_v43 = vmax.f32 %v10276_v41, %v14366_v4  ;;  %v10357_v11 = vmax.f32 %v10277_v63, %v14367_v31  ;;  %v10358_v46 = vmax.f32 %v10278_v42, %v14368_v19  ;;  %v10621_v28 = vrot.slane %v10613_v59, 2 }
 0x4fa   : > { %v10419_v51 = vmax.f32 %v10243_v17, %v10355_v61  ;;  %v9859_v62 = vadd.f32 %v18129_v1, %v18135_v33  ;;  %v9886_v48 = vadd.f32 %v9885_v20, %v9857_v9  ;;  %v9887_v7 = vpop.f32.mrf.mxu1 }
 0x4fb   : > { %v10420_v8 = vmax.f32 %v10244_v36, %v10356_v43  ;;  %v10421_v27 = vmax.f32 %v10245_v16, %v10357_v11  ;;  %v10422_v37 = vmax.f32 %v10246_v24, %v10358_v46  ;;  %v10628_v2 = vsel %vm10625_vm6, %v10613_v59, %v10621_v28  ;;  %v9974_v17 = vpop.f32.mrf.mxu0  ;;  %v15185_v36 = vld [vmem:[%s18644_s5 + $0xc8] sm:$0xff] }
 0x4fc   : > { %v10435_v47 = vpack.c.bf16 %v10419_v51, %v10419_v51  ;;  %v9915_v44 = vadd.f32 %v9914_v13, %v9886_v48  ;;  %v9888_v63 = vadd.f32 %v9887_v7, %v9859_v62  ;;  %v10658_v56 = vshrl.u32 %v10628_v2, 16 }
 0x4fd   : > { %v10436_v21 = vpack.c.bf16 %v10420_v8, %v10420_v8  ;;  %v10437_v23 = vpack.c.bf16 %v10421_v27, %v10421_v27  ;;  %v10438_v6 = vpack.c.bf16 %v10422_v37, %v10422_v37  ;;  %v10661_v34 = vshll.u32 %v10628_v2, 16  ;;  %v9945_v31 = vpop.f32.mrf.mxu3 }
 0x4fe   : > { %v10467_v49 = vunpack.c.l.b16 %v10435_v47  ;;  %v9944_v42 = vadd.f32 %v9943_v45, %v9915_v44  ;;  %v9917_v1 = vadd.f32 %v9916_v15, %v9888_v63  ;;  %v10630_v33 = vsel %vm10629_vm7, %v10613_v59, %v10621_v28 }
 0x4ff   : > { %v10468_v3 = vunpack.c.l.b16 %v10436_v21  ;;  %v10469_v52 = vunpack.c.l.b16 %v10437_v23  ;;  %v10470_v39 = vunpack.c.l.b16 %v10438_v6  ;;  %v10632_v24 = vrot.slane %v10630_v33, 2 }
 0x500   : > { %v14381_v14 = vunpack.i.l.s16 %v10467_v49  ;;  %v9973_v19 = vadd.f32 %v9972_v53, %v9944_v42  ;;  %v9946_v16 = vadd.f32 %v9945_v31, %v9917_v1  ;;  %v10660_v61 = vrot.slane %v10658_v56, 6  ;;  %v9919_v11 = vpop.f32.mrf.mxu2 }
 0x501   : > { %v14382_v57 = vunpack.i.l.s16 %v10468_v3  ;;  %v14383_v60 = vunpack.i.l.s16 %v10469_v52  ;;  %v14384_v58 = vunpack.i.l.s16 %v10470_v39  ;;  %v10663_v43 = vrot.slane %v10661_v34, 7 }
 0x502   : > { %v9975_v46 = vadd.f32 %v9974_v17, %v9946_v16  ;;  %v9890_v51 = vpop.f32.mrf.mxu1  ;;  %v9989_v8 = vmax.f32 %v9973_v19, 0.0  ;;  %v10667_v47 = vshll.u32 %v10632_v24, 16 }
 0x503   : > { %v10515_v32 = vrot.slane %v14382_v57, 7  ;;  %v10517_v54 = vrot.slane %v14383_v60, 6  ;;  %v10519_v5 = vrot.slane %v14384_v58, 5  ;;  %v10664_v37 = vor.u32 %v10663_v43, %v10660_v61  ;;  %v18171_v49 = vpop.f32.mrf.mxu0 }
 0x504   : > { %v9990_v27 = vmax.f32 %v9975_v46, 0.0  ;;  %v10669_v39 = vrot.slane %v10667_v47, 7 }
 0x505   : > { %v10516_v12 = vsel %vm5977_vm14, %v10515_v32, %v14381_v14  ;;  %v10665_v52 = vrot.slane %v10664_v37, 2 }
 0x506   : > { %v10518_v40 = vsel %vm5981_vm15, %v10517_v54, %v10516_v12  ;;  %v15320_v21 = vpack.c.bf16 %v9990_v27, %v9989_v8  ;;  %v9948_v54 = vpop.f32.mrf.mxu3 }
 0x507   : > { %v10520_v50 = vsel %vm5985_vm0, %v10519_v5, %v10518_v40  ;;  %v9862_v5 = vadd.f32 %v18137_v0, %v18139_v38  ;;  %v10670_v40 = vsel %vm18175_vm9, %v10665_v52, %v10669_v39 }
 0x508   : > { %v10539_v26 = vpack.c.b16 %v10520_v50, %v10520_v50  ;;  %15352 = vst [vmem:[#allocation3 + $0x8] sm:$0xff] %v15320_v21   ;;  %v9921_v32 = vpop.f32.mrf.mxu2 }
 0x509   : > { %v9891_v48 = vadd.f32 %v9890_v51, %v9862_v5 }
 0x50a   : > { %v10544_v25 = vshrl.u32 %v10539_v26, 16  ;;  %v10547_v10 = vshll.u32 %v10539_v26, 16  ;;  %v9892_v12 = vpop.f32.mrf.mxu1 }
 0x50b   : > { %v9920_v38 = vadd.f32 %v9919_v11, %v9891_v48 }
 0x50c   : > { %v10546_v55 = vrot.slane %v10544_v25, 7  ;;  %v9979_v25 = vpop.f32.mrf.mxu0 }
 0x50e   : > { %v10549_v41 = vor.u32 %v10547_v10, %v10546_v55  ;;  %v9893_v55 = vadd.f32 %v9892_v12, %v18141_v30  ;;  %v9950_v42 = vpop.f32.mrf.mxu3  ;;  %v9949_v30 = vadd.f32 %v9948_v54, %v9920_v38 }
 0x50f   : > { %v10013_v28 = vld [vmem:[#allocation3 + $0x8] sm:$0xf]  ;;  %v10014_v15 = vld [vmem:[#allocation3 + $0xc] sm:$0xf] }
 0x510   : > { %v10575_v35 = vsel %vm15722_vm8, 0, %v10549_v41  ;;  %v10029_v44 = vrot.slane %v10013_v28, 3  ;;  %v10030_v10 = vrot.slane %v10014_v15, 3  ;;  %v9922_v63 = vadd.f32 %v9921_v32, %v9893_v55  ;;  %v9924_v19 = vpop.f32.mrf.mxu2 }
 0x511   : > { %v10582_v4 = vsel %vm15746_vm10, %v10575_v35, 0 }
 0x512   : > { %10587 = vst [vmem:[#allocation5 + $0x4] sm:$0x7] %v10582_v4  ;;  %v10061_v2 = vsel %vm5973_vm4, %v10013_v28, %v10029_v44  ;;  %v10062_v7 = vsel %vm5977_vm14, %v10013_v28, %v10029_v44  ;;  %v10065_v41 = vsel %vm5981_vm15, %v10013_v28, %v10029_v44  ;;  %v9895_v56 = vpop.f32.mrf.mxu1  ;;  %v10068_v35 = vsel %vm5985_vm0, %v10013_v28, %v10029_v44 }
 0x513   : > { %v10064_v34 = vrot.slane %v10062_v7, 1  ;;  %v10067_v17 = vrot.slane %v10065_v41, 2  ;;  %v10070_v1 = vrot.slane %v10068_v35, 3  ;;  %v10073_v33 = vsel %vm5973_vm4, %v10014_v15, %v10030_v10 }
 0x514   : > { %v10074_v4 = vsel %vm5977_vm14, %v10014_v15, %v10030_v10  ;;  %v10077_v31 = vsel %vm5981_vm15, %v10014_v15, %v10030_v10  ;;  %v10080_v61 = vsel %vm5985_vm0, %v10014_v15, %v10030_v10  ;;  %v10167_v43 = vunpack.c.l.bf16 %v10061_v2 }
 0x515   : > { %v10076_v16 = vrot.slane %v10074_v4, 1  ;;  %v10079_v24 = vrot.slane %v10077_v31, 2  ;;  %v10082_v11 = vrot.slane %v10080_v61, 3  ;;  %v10168_v46 = vunpack.c.l.bf16 %v10064_v34 }
 0x516   : > { %v10169_v51 = vunpack.c.l.bf16 %v10067_v17  ;;  %v10170_v8 = vunpack.c.l.bf16 %v10070_v1  ;;  %v14353_v27 = vrot.slane %v10167_v43, 9  ;;  %v10279_v37 = vunpack.c.l.bf16 %v10073_v33  ;;  %v9953_v5 = vpop.f32.mrf.mxu3 }
 0x517   : > { %v10280_v47 = vunpack.c.l.bf16 %v10076_v16  ;;  %v10281_v21 = vunpack.c.l.bf16 %v10079_v24  ;;  %v10282_v52 = vunpack.c.l.bf16 %v10082_v11  ;;  %v9951_v28 = vadd.f32 %v9950_v42, %v9922_v63 }
 0x518   : > { %v10247_v39 = vmax.f32 %v10167_v43, %v14353_v27  ;;  %v9926_v10 = vpop.f32.mrf.mxu2 }
 0x519   : > { %v10593_v23 = vld [vmem:[#allocation5 + $0x4] sm:$0x3]  ;;  %v14372_v12 = vrot.slane %v10282_v52, 9 }
 0x51a   : > { %v10614_v6 = vld [vmem:[#allocation5 + $0x4] sm:$0x7]  ;;  %10600 = vst [vmem:[#allocation1 + $0x1] ss:$2 sm:$0xff] %v10593_v23  ;;  %v14354_v23 = vrot.slane %v10168_v46, 9 }
 0x51b   : > { %v10622_v3 = vrot.slane %v10614_v6, 2 }
 0x51d   : > { %v10635_v13 = vsel %vm10625_vm6, %v10614_v6, %v10622_v3  ;;  %v10636_v57 = vsel %vm10629_vm7, %v10614_v6, %v10622_v3  ;;  %v14355_v6 = vrot.slane %v10169_v51, 9  ;;  %v14356_v3 = vrot.slane %v10170_v8, 9 }
 0x51e   : > { %v10638_v58 = vrot.slane %v10636_v57, 2  ;;  %v10671_v20 = vshrl.u32 %v10635_v13, 16  ;;  %v10674_v14 = vshll.u32 %v10635_v13, 16  ;;  %v14369_v13 = vrot.slane %v10279_v37, 9  ;;  %v9955_v33 = vpop.f32.mrf.mxu3 }
 0x51f   : > { %v14370_v57 = vrot.slane %v10280_v47, 9  ;;  %v10249_v32 = vmax.f32 %v10169_v51, %v14355_v6  ;;  %v10250_v54 = vmax.f32 %v10170_v8, %v14356_v3 }
 0x520   : > { %v10673_v59 = vrot.slane %v10671_v20, 6  ;;  %v10676_v9 = vrot.slane %v10674_v14, 7  ;;  %v10680_v53 = vshll.u32 %v10638_v58, 16  ;;  %v14371_v58 = vrot.slane %v10281_v21, 9  ;;  %v9982_v20 = vpop.f32.mrf.mxu0 }
 0x521   : > { %v10607_v50 = vld.sshfl [vmem:[#allocation1] sm:$0xff pattern:$0x75643120]  ;;  %v10248_v14 = vmax.f32 %v10168_v46, %v14354_v23 }
 0x522   : > { %v10677_v26 = vor.u32 %v10676_v9, %v10673_v59  ;;  %10611 = vst [vmem:[#allocation2] sm:$0xf] %v10607_v50  ;;  %v10682_v62 = vrot.slane %v10680_v53, 7  ;;  %v10359_v59 = vmax.f32 %v10279_v37, %v14369_v13  ;;  %v10360_v9 = vmax.f32 %v10280_v47, %v14370_v57 }
 0x523   : > { %10711 = vst [vmem:[#allocation1] ss:$2 sm:$0xff] %v10670_v40  ;;  %v10361_v53 = vmax.f32 %v10281_v21, %v14371_v58  ;;  %v9896_v40 = vadd.f32 %v9895_v56, %v18143_v18  ;;  %v10362_v50 = vmax.f32 %v10282_v52, %v14372_v12 }
 0x524   : > { %v10678_v45 = vrot.slane %v10677_v26, 2  ;;  %v9978_v26 = vadd.f32 %v18171_v49, %v9949_v30  ;;  %v10424_v48 = vmax.f32 %v10248_v14, %v10360_v9 }
 0x525   : > { %v10425_v15 = vmax.f32 %v10249_v32, %v10361_v53  ;;  %v9925_v44 = vadd.f32 %v9924_v19, %v9896_v40  ;;  %v10426_v55 = vmax.f32 %v10250_v54, %v10362_v50 }
 0x526   : > { %v10683_v0 = vsel %vm18175_vm9, %v10678_v45, %v10682_v62  ;;  %v9897_v45 = vpop.f32.mrf.mxu1  ;;  %v10423_v62 = vmax.f32 %v10247_v39, %v10359_v59  ;;  %v10440_v7 = vpack.c.bf16 %v10424_v48, %v10424_v48  ;;  %v9991_v18 = vmax.f32 %v9978_v26, 0.0 }
 0x527   : > { %10714 = vst [vmem:[#allocation1 + $0x1] ss:$2 sm:$0xff] %v10683_v0  ;;  %v9980_v0 = vadd.f32 %v9979_v25, %v9951_v28  ;;  %v9898_v38 = vadd.f32 %v9897_v45, %v18148_v22  ;;  %v10441_v41 = vpack.c.bf16 %v10425_v15, %v10425_v15  ;;  %v9954_v34 = vadd.f32 %v9953_v5, %v9925_v44 }
 0x528   : > { %v10439_v2 = vpack.c.bf16 %v10423_v62, %v10423_v62  ;;  %v10442_v17 = vpack.c.bf16 %v10426_v55, %v10426_v55  ;;  %v10472_v49 = vunpack.c.l.b16 %v10440_v7  ;;  %v9984_v22 = vpop.f32.mrf.mxu0 }
 0x529   : > { %v9992_v56 = vmax.f32 %v9980_v0, 0.0  ;;  %v10473_v63 = vunpack.c.l.b16 %v10441_v41  ;;  %v9927_v42 = vadd.f32 %v9926_v10, %v9898_v38  ;;  %v9983_v25 = vadd.f32 %v9982_v20, %v9954_v34 }
 0x52a   : > { %v10471_v35 = vunpack.c.l.b16 %v10439_v2  ;;  %v10474_v30 = vunpack.c.l.b16 %v10442_v17  ;;  %v14386_v4 = vunpack.i.l.s16 %v10472_v49 }
 0x52b   : > { %v15325_v1 = vpack.c.bf16 %v9992_v56, %v9991_v18  ;;  %v14387_v31 = vunpack.i.l.s16 %v10473_v63  ;;  %v9956_v19 = vadd.f32 %v9955_v33, %v9927_v42  ;;  %v9993_v8 = vmax.f32 %v9983_v25, 0.0 }
 0x52c   : > { %v14388_v16 = vunpack.i.l.s16 %v10474_v30  ;;  %v14385_v24 = vunpack.i.l.s16 %v10471_v35  ;;  %v10521_v61 = vrot.slane %v14386_v4, 7  ;;  %v10728_v35 = vld [vmem:[#allocation5 + $0x4] sm:$0x6] }
 0x52d   : > { %15353 = vst [vmem:[#allocation3 + $0x10] sm:$0xff] %v15325_v1   ;;  %v10523_v43 = vrot.slane %v14387_v31, 6  ;;  %v9985_v11 = vadd.f32 %v9984_v22, %v9956_v19  ;;  %v10727_v31 = vld [vmem:[#allocation5] sm:$0x6]  ;;  %v10736_v25 = vrot.slane %v10728_v35, 2 }
 0x52e   : > { %v10522_v46 = vsel %vm5977_vm14, %v10521_v61, %v14385_v24  ;;  %v10525_v51 = vrot.slane %v14388_v16, 5 }
 0x52f   : > { %v9994_v27 = vmax.f32 %v9985_v11, 0.0  ;;  %v10524_v37 = vsel %vm5981_vm15, %v10523_v43, %v10522_v46 }
 0x530   : > { %v10526_v47 = vsel %vm5985_vm0, %v10525_v51, %v10524_v37  ;;  %v10735_v51 = vrot.slane %v10727_v31, 2 }
 0x531   : > { %v15330_v21 = vpack.c.bf16 %v9994_v27, %v9993_v8  ;;  %v10540_v23 = vpack.c.b16 %v10526_v47, %v10526_v47  ;;  %v10748_v8 = vsel %vm10625_vm6, %v10728_v35, %v10736_v25  ;;  %v10750_v27 = vsel %vm10629_vm7, %v10728_v35, %v10736_v25 }
 0x533   : > { %15354 = vst [vmem:[#allocation3 + $0x18] sm:$0xff] %v15330_v21   ;;  %v10551_v52 = vshrl.u32 %v10540_v23, 16  ;;  %v10554_v58 = vshll.u32 %v10540_v23, 16 }
 0x534   : > { %v10015_v6 = vld [vmem:[#allocation3 + $0x10] sm:$0xf]  ;;  %v10016_v3 = vld [vmem:[#allocation3 + $0x14] sm:$0xf] }
 0x535   : > { %v10031_v39 = vrot.slane %v10015_v6, 3  ;;  %v10032_v13 = vrot.slane %v10016_v3, 3  ;;  %v10553_v57 = vrot.slane %v10551_v52, 7  ;;  %v18218_v52 = vsel %vm10625_vm6, %v10727_v31, %v10735_v51 }
 0x537   : > { %v10086_v20 = vsel %vm5977_vm14, %v10015_v6, %v10031_v39  ;;  %v10089_v14 = vsel %vm5981_vm15, %v10015_v6, %v10031_v39  ;;  %v10085_v32 = vsel %vm5973_vm4, %v10015_v6, %v10031_v39  ;;  %v10092_v5 = vsel %vm5985_vm0, %v10015_v6, %v10031_v39 }
 0x538   : > { %v10088_v54 = vrot.slane %v10086_v20, 1  ;;  %v10091_v12 = vrot.slane %v10089_v14, 2  ;;  %v10556_v59 = vor.u32 %v10554_v58, %v10553_v57  ;;  %v10097_v9 = vsel %vm5973_vm4, %v10016_v3, %v10032_v13  ;;  %v15167_v58 = vld [vmem:[%s18644_s5 + $0x38] sm:$0xff] }
 0x539   : > { %v10098_v53 = vsel %vm5977_vm14, %v10016_v3, %v10032_v13  ;;  %v10101_v40 = vsel %vm5981_vm15, %v10016_v3, %v10032_v13  ;;  %v10094_v50 = vrot.slane %v10092_v5, 3  ;;  %v10104_v45 = vsel %vm5985_vm0, %v10016_v3, %v10032_v13  ;;  %11842 = vmatpush.bf16.msra.mxu1 %v15167_v58 }
 0x53a   : > { %v10100_v26 = vrot.slane %v10098_v53, 1  ;;  %v10103_v28 = vrot.slane %v10101_v40, 2  ;;  %v10576_v62 = vsel %vm15722_vm8, 0, %v10556_v59  ;;  %v10106_v48 = vrot.slane %v10104_v45, 3  ;;  %v10017_v46 = vld [vmem:[#allocation3 + $0x18] sm:$0xf] }
 0x53b   : > { %v10171_v15 = vunpack.c.l.bf16 %v10085_v32  ;;  %v10583_v44 = vsel %vm15746_vm10, %v10576_v62, 0  ;;  %v10283_v55 = vunpack.c.l.bf16 %v10097_v9  ;;  %v10172_v0 = vunpack.c.l.bf16 %v10088_v54  ;;  %v10018_v47 = vld [vmem:[#allocation3 + $0x1c] sm:$0xf]  ;;  %v15166_v62 = vld [vmem:[%s18644_s5 + $0x30] sm:$0xff] }
 0x53c   : > { %10588 = vst [vmem:[#allocation5 + $0x8] sm:$0x7] %v10583_v44  ;;  %v10284_v38 = vunpack.c.l.bf16 %v10100_v26  ;;  %v10173_v10 = vunpack.c.l.bf16 %v10091_v12  ;;  %v10174_v2 = vunpack.c.l.bf16 %v10094_v50  ;;  %v10285_v7 = vunpack.c.l.bf16 %v10103_v28  ;;  %v10721_v40 = vld.sshfl [vmem:[#allocation1] sm:$0xff pattern:$0x75643120] }
 0x53d   : > { %v10286_v41 = vunpack.c.l.bf16 %v10106_v48  ;;  %v14357_v34 = vrot.slane %v10171_v15, 9  ;;  %v14373_v17 = vrot.slane %v10283_v55, 9  ;;  %v14358_v18 = vrot.slane %v10172_v0, 9  ;;  %10725 = vst [vmem:[#allocation2 + $0x4] sm:$0xf] %v10721_v40  ;;  %11843 = vmatpush.bf16.msra.mxu1 %v15166_v62  ;;  %v15183_v40 = vld [vmem:[%s18644_s5 + $0xb8] sm:$0xff] }
 0x53e   : > { %v14374_v56 = vrot.slane %v10284_v38, 9  ;;  %v14359_v49 = vrot.slane %v10173_v10, 9  ;;  %v14360_v63 = vrot.slane %v10174_v2, 9  ;;  %v14375_v42 = vrot.slane %v10285_v7, 9  ;;  %11870 = vmatpush.bf16.msrb.mxu3 %v15183_v40 }
 0x53f   : > { %v14376_v30 = vrot.slane %v10286_v41, 9  ;;  %v10251_v1 = vmax.f32 %v10171_v15, %v14357_v34  ;;  %v10363_v33 = vmax.f32 %v10283_v55, %v14373_v17  ;;  %v10252_v19 = vmax.f32 %v10172_v0, %v14358_v18 }
 0x540   : > { %v10364_v22 = vmax.f32 %v10284_v38, %v14374_v56  ;;  %v10253_v16 = vmax.f32 %v10173_v10, %v14359_v49  ;;  %v10254_v24 = vmax.f32 %v10174_v2, %v14360_v63  ;;  %v10365_v61 = vmax.f32 %v10285_v7, %v14375_v42  ;;  %v15175_v63 = vld [vmem:[%s18644_s5 + $0x78] sm:$0xff]  ;;  %v15165_v42 = vld [vmem:[%s18644_s5 + $0x28] sm:$0xff] }
 0x541   : > { %v10366_v43 = vmax.f32 %v10286_v41, %v14376_v30  ;;  %v10427_v11 = vmax.f32 %v10251_v1, %v10363_v33  ;;  %v10033_v6 = vrot.slane %v10017_v46, 3  ;;  %v14399_v39 = vrot.slane %v10748_v8, 9  ;;  %11856 = vmatpush.bf16.msrb.mxu2 %v15175_v63  ;;  %11844 = vmatpush.bf16.msra.mxu1 %v15165_v42 }
 0x542   : > { %v10428_v37 = vmax.f32 %v10252_v19, %v10364_v22  ;;  %v10429_v21 = vmax.f32 %v10253_v16, %v10365_v61  ;;  %v14400_v13 = vrot.slane %v10750_v27, 9  ;;  %v10034_v57 = vrot.slane %v10018_v47, 3 }
 0x543   : > { %v10594_v4 = vld [vmem:[#allocation5 + $0x8] sm:$0x3]  ;;  %v10430_v23 = vmax.f32 %v10254_v24, %v10366_v43  ;;  %v10443_v3 = vpack.c.bf16 %v10427_v11, %v10427_v11  ;;  %v18224_v20 = vsel %vm10629_vm7, %v10727_v31, %v10735_v51  ;;  %v10110_v5 = vsel %vm5977_vm14, %v10017_v46, %v10033_v6 }
 0x544   : > { %10603 = vst [vmem:[#allocation1 + $0x10] ss:$2 sm:$0xff] %v10594_v4  ;;  %v10444_v32 = vpack.c.bf16 %v10428_v37, %v10428_v37  ;;  %v10445_v54 = vpack.c.bf16 %v10429_v21, %v10429_v21  ;;  %v14397_v59 = vrot.slane %v18218_v52, 9  ;;  %v10113_v53 = vsel %vm5981_vm15, %v10017_v46, %v10033_v6  ;;  %v18252_v31 = vld [vmem:[#allocation5 + $0x8] sm:$0x7] }
 0x545   : > { %v10446_v12 = vpack.c.bf16 %v10430_v23, %v10430_v23  ;;  %v10475_v9 = vunpack.c.l.b16 %v10443_v3  ;;  %v14398_v50 = vrot.slane %v18224_v20, 9  ;;  %v10780_v26 = vsel %vm18227_vm13, %v14399_v39, %v14400_v13  ;;  %v15164_v37 = vld [vmem:[%s18644_s5 + $0x20] sm:$0xff] }
 0x546   : > { %v10116_v28 = vsel %vm5985_vm0, %v10017_v46, %v10033_v6  ;;  %v10122_v45 = vsel %vm5977_vm14, %v10018_v47, %v10034_v57  ;;  %v10476_v48 = vunpack.c.l.b16 %v10444_v32  ;;  %v10109_v15 = vsel %vm5973_vm4, %v10017_v46, %v10033_v6  ;;  %10793 = vst [vmem:[#allocation1 + $0x1] ss:$2 sm:$0xff] %v10780_v26  ;;  %11845 = vmatpush.bf16.msra.mxu1 %v15164_v37  ;;  %v15163_v26 = vld [vmem:[%s18644_s5 + $0x18] sm:$0xff]  ;;  %v18312_v37 = vld [vmem:[#allocation5 + $0x8] sm:$0x7] }
 0x547   : > { %v10112_v44 = vrot.slane %v10110_v5, 1  ;;  %v10125_v55 = vsel %vm5981_vm15, %v10018_v47, %v10034_v57  ;;  %v10477_v0 = vunpack.c.l.b16 %v10445_v54  ;;  %v10478_v38 = vunpack.c.l.b16 %v10446_v12 }
 0x548   : > { %v10115_v10 = vrot.slane %v10113_v53, 2  ;;  %v10121_v2 = vsel %vm5973_vm4, %v10018_v47, %v10034_v57  ;;  %v14389_v7 = vunpack.i.l.s16 %v10475_v9  ;;  %v14390_v41 = vunpack.i.l.s16 %v10476_v48 }
 0x549   : > { %v10118_v34 = vrot.slane %v10116_v28, 3  ;;  %v10124_v17 = vrot.slane %v10122_v45, 1  ;;  %v14391_v18 = vunpack.i.l.s16 %v10477_v0  ;;  %v14392_v56 = vunpack.i.l.s16 %v10478_v38  ;;  %v15173_v28 = vld [vmem:[%s18644_s5 + $0x68] sm:$0xff] }
 0x54a   : > { %v10127_v35 = vrot.slane %v10125_v55, 2  ;;  %v10128_v49 = vsel %vm5985_vm0, %v10018_v47, %v10034_v57  ;;  %v10527_v30 = vrot.slane %v14390_v41, 7  ;;  %v10175_v33 = vunpack.c.l.bf16 %v10109_v15  ;;  %v15174_v47 = vld [vmem:[%s18644_s5 + $0x70] sm:$0xff]  ;;  %11846 = vmatpush.bf16.msra.mxu1 %v15163_v26  ;;  %v18277_v15 = vld [vmem:[#allocation5 + $0x4] sm:$0x7]  ;;  %v15172_v41 = vld [vmem:[%s18644_s5 + $0x60] sm:$0xff] }
 0x54b   : > { %v10130_v1 = vrot.slane %v10128_v49, 3  ;;  %v10176_v4 = vunpack.c.l.bf16 %v10112_v44  ;;  %v10529_v25 = vrot.slane %v14391_v18, 6  ;;  %v10531_v19 = vrot.slane %v14392_v56, 5  ;;  %11857 = vmatpush.bf16.msrb.mxu2 %v15174_v47 }
 0x54c   : > { %v10177_v22 = vunpack.c.l.bf16 %v10115_v10  ;;  %v10178_v16 = vunpack.c.l.bf16 %v10118_v34  ;;  %v10528_v24 = vsel %vm5977_vm14, %v10527_v30, %v14389_v7  ;;  %v14361_v61 = vrot.slane %v10175_v33, 9  ;;  %v15162_v7 = vld [vmem:[%s18644_s5 + $0x10] sm:$0xff] }
 0x54d   : > { %v14362_v43 = vrot.slane %v10176_v4, 9  ;;  %v10287_v11 = vunpack.c.l.bf16 %v10121_v2  ;;  %v10530_v46 = vsel %vm5981_vm15, %v10529_v25, %v10528_v24  ;;  %v10288_v27 = vunpack.c.l.bf16 %v10124_v17  ;;  %v15182_v34 = vld [vmem:[%s18644_s5 + $0xb0] sm:$0xff]  ;;  %v15161_v25 = vld [vmem:[%s18644_s5 + $0x8] sm:$0xff] }
 0x54e   : > { %v14363_v51 = vrot.slane %v10177_v22, 9  ;;  %v14364_v8 = vrot.slane %v10178_v16, 9  ;;  %v10623_v21 = vrot.slane %v18252_v31, 2  ;;  %v10532_v23 = vsel %vm5985_vm0, %v10531_v19, %v10530_v46  ;;  %11847 = vmatpush.bf16.msra.mxu1 %v15162_v7  ;;  %11871 = vmatpush.bf16.msrb.mxu3 %v15182_v34  ;;  %v15171_v19 = vld [vmem:[%s18644_s5 + $0x58] sm:$0xff]  ;;  %v10729_v34 = vld [vmem:[#allocation5 + $0x8] sm:$0x6] }
 0x54f   : > { %v10255_v6 = vmax.f32 %v10175_v33, %v14361_v61  ;;  %v10289_v3 = vunpack.c.l.bf16 %v10127_v35  ;;  %v10541_v39 = vpack.c.b16 %v10532_v23, %v10532_v23  ;;  %v10256_v13 = vmax.f32 %v10176_v4, %v14362_v43  ;;  %11858 = vmatpush.bf16.msrb.mxu2 %v15173_v28  ;;  %v10807_v43 = vld [vmem:[#allocation5 + $0x4] sm:$0x3] }
 0x550   : > { %v10257_v57 = vmax.f32 %v10177_v22, %v14363_v51  ;;  %v10290_v58 = vunpack.c.l.bf16 %v10130_v1  ;;  %v14377_v20 = vrot.slane %v10287_v11, 9  ;;  %v14378_v32 = vrot.slane %v10288_v27, 9  ;;  %v15181_v22 = vld [vmem:[%s18644_s5 + $0xa8] sm:$0xff]  ;;  %v10808_v51 = vld [vmem:[#allocation5 + $0x8] sm:$0x3] }
 0x551   : > { %v14379_v54 = vrot.slane %v10289_v3, 9  ;;  %v10776_v12 = vsel %vm18227_vm13, %v14397_v59, %v14398_v50  ;;  %v10558_v5 = vshrl.u32 %v10541_v39, 16  ;;  %v10258_v9 = vmax.f32 %v10178_v16, %v14364_v8 }
 0x552   : > { %v14380_v53 = vrot.slane %v10290_v58, 9  ;;  %v10367_v45 = vmax.f32 %v10287_v11, %v14377_v20  ;;  %v10368_v52 = vmax.f32 %v10288_v27, %v14378_v32  ;;  %10790 = vst [vmem:[#allocation1] ss:$2 sm:$0xff] %v10776_v12  ;;  %v10561_v50 = vshll.u32 %v10541_v39, 16  ;;  %11848 = vmatpush.bf16.msra.mxu1 %v15161_v25  ;;  %11872 = vmatpush.bf16.msrb.mxu3 %v15181_v22  ;;  %v15215_v25 = vld [vmem:[%s18644_s5 + $0x1b8] sm:$0xff] }
 0x553   : > { %v10369_v62 = vmax.f32 %v10289_v3, %v14379_v54  ;;  %v10560_v59 = vrot.slane %v10558_v5, 7  ;;  %v10641_v44 = vsel %vm10625_vm6, %v18252_v31, %v10623_v21  ;;  %v10836_v35 = vrot.slane %v18277_v15, 2  ;;  %11859 = vmatpush.bf16.msrb.mxu2 %v15172_v41  ;;  %v15160_v3 = vld [vmem:[%s18644_s5] sm:$0xff]  ;;  %11926 = vmatpush.bf16.msrb.mxu0 %v15215_v25 }
 0x554   : > { %v10370_v48 = vmax.f32 %v10290_v58, %v14380_v53  ;;  %v10431_v55 = vmax.f32 %v10255_v6, %v10367_v45  ;;  %v10432_v0 = vmax.f32 %v10256_v13, %v10368_v52  ;;  %v10684_v49 = vshrl.u32 %v10641_v44, 16  ;;  %v15191_v58 = vld [vmem:[%s18644_s5 + $0xf8] sm:$0xff] }
 0x555   : > { %v10433_v38 = vmax.f32 %v10257_v57, %v10369_v62  ;;  %v10563_v10 = vor.u32 %v10561_v50, %v10560_v59  ;;  %v10687_v4 = vshll.u32 %v10641_v44, 16  ;;  %v10842_v11 = vsel %vm10625_vm6, %v18277_v15, %v10836_v35  ;;  %v15169_v44 = vld [vmem:[%s18644_s5 + $0x48] sm:$0xff] }
 0x556   : > { %v10434_v2 = vmax.f32 %v10258_v9, %v10370_v48  ;;  %v10447_v17 = vpack.c.bf16 %v10431_v55, %v10431_v55  ;;  %v10448_v18 = vpack.c.bf16 %v10432_v0, %v10432_v0  ;;  %v10642_v46 = vsel %vm10629_vm7, %v18252_v31, %v10623_v21  ;;  %v15170_v31 = vld [vmem:[%s18644_s5 + $0x50] sm:$0xff]  ;;  %v15180_v21 = vld [vmem:[%s18644_s5 + $0xa0] sm:$0xff]  ;;  %11849 = vmatpush.bf16.msra.mxu1 %v15160_v3 }
 0x557   : > { %v10449_v56 = vpack.c.bf16 %v10433_v38, %v10433_v38  ;;  %v10577_v63 = vsel %vm15722_vm8, 0, %v10563_v10  ;;  %v10686_v27 = vrot.slane %v10684_v49, 6  ;;  %11860 = vmatpush.bf16.msrb.mxu2 %v15171_v19  ;;  %v10689_v6 = vrot.slane %v10687_v4, 7  ;;  %11873 = vmatpush.bf16.msrb.mxu3 %v15180_v21 }
 0x558   : > { %v10584_v42 = vsel %vm15746_vm10, %v10577_v63, 0  ;;  %v10450_v30 = vpack.c.bf16 %v10434_v2, %v10434_v2  ;;  %v10480_v1 = vunpack.c.l.b16 %v10448_v18  ;;  %v10479_v16 = vunpack.c.l.b16 %v10447_v17  ;;  %v15190_v2 = vld [vmem:[%s18644_s5 + $0xf0] sm:$0xff]  ;;  %v15168_v17 = vld [vmem:[%s18644_s5 + $0x40] sm:$0xff] }
 0x559   : > { %v10481_v33 = vunpack.c.l.b16 %v10449_v56  ;;  %10589 = vst [vmem:[#allocation5 + $0xc] sm:$0x7] %v10584_v42  ;;  %v10800_v61 = vld.sshfl [vmem:[#allocation1] sm:$0xff pattern:$0x75643120]  ;;  %v10864_v39 = vshrl.u32 %v10842_v11, 16  ;;  %v10690_v40 = vor.u32 %v10689_v6, %v10686_v27  ;;  %v10843_v28 = vsel %vm10629_vm7, %v18277_v15, %v10836_v35 }
 0x55a   : > { %v14394_v24 = vunpack.i.l.s16 %v10480_v1  ;;  %10804 = vst [vmem:[#allocation2 + $0x8] sm:$0xf] %v10800_v61  ;;  %v10482_v47 = vunpack.c.l.b16 %v10450_v30  ;;  %v10644_v13 = vrot.slane %v10642_v46, 2  ;;  %v14393_v57 = vunpack.i.l.s16 %v10479_v16  ;;  %11884 = vmatpush.bf16.msrb.mxu1 %v15191_v58  ;;  %v15179_v15 = vld [vmem:[%s18644_s5 + $0x98] sm:$0xff]  ;;  %v15178_v18 = vld [vmem:[%s18644_s5 + $0x90] sm:$0xff]  ;;  %v15189_v42 = vld [vmem:[%s18644_s5 + $0xe8] sm:$0xff] }
 0x55b   : > { %v14395_v8 = vunpack.i.l.s16 %v10481_v33  ;;  %10812 = vst [vmem:[#allocation1] ss:$2 sm:$0xff] %v10807_v43  ;;  %v10837_v20 = vrot.slane %v18312_v37, 2  ;;  %11861 = vmatpush.bf16.msrb.mxu2 %v15170_v31  ;;  %v10867_v53 = vshll.u32 %v10842_v11, 16  ;;  %v10866_v45 = vrot.slane %v10864_v39, 6  ;;  %11874 = vmatpush.bf16.msrb.mxu3 %v15179_v15  ;;  %v15199_v30 = vld [vmem:[%s18644_s5 + $0x138] sm:$0xff] }
 0x55c   : > { %v10533_v23 = vrot.slane %v14394_v24, 7  ;;  %10815 = vst [vmem:[#allocation1 + $0x1] ss:$2 sm:$0xff] %v10808_v51  ;;  %v14396_v5 = vunpack.i.l.s16 %v10482_v47  ;;  %v10693_v52 = vshll.u32 %v10644_v13, 16  ;;  %v10691_v41 = vrot.slane %v10690_v40, 2  ;;  %v15177_v46 = vld [vmem:[%s18644_s5 + $0x88] sm:$0xff] }
 0x55d   : > { %v10535_v32 = vrot.slane %v14395_v8, 6  ;;  %v10848_v62 = vsel %vm10625_vm6, %v18312_v37, %v10837_v20  ;;  %v10869_v7 = vrot.slane %v10867_v53, 7  ;;  %v10845_v1 = vrot.slane %v10843_v28, 2  ;;  %v15188_v47 = vld [vmem:[%s18644_s5 + $0xe0] sm:$0xff]  ;;  %v14423_v28 = vld [vmem:[#allocation2] sm:$0xf] }
 0x55e   : > { %v10534_v9 = vsel %vm5977_vm14, %v10533_v23, %v14393_v57  ;;  %v10537_v10 = vrot.slane %v14396_v5, 5  ;;  %11885 = vmatpush.bf16.msrb.mxu1 %v15190_v2  ;;  %v10695_v33 = vrot.slane %v10693_v52, 7  ;;  %v10877_v4 = vshrl.u32 %v10848_v62, 16  ;;  %v15198_v23 = vld [vmem:[%s18644_s5 + $0x130] sm:$0xff]  ;;  %v15187_v5 = vld [vmem:[%s18644_s5 + $0xd8] sm:$0xff]  ;;  %v15213_v15 = vld [vmem:[%s18644_s5 + $0x1a8] sm:$0xff] }
 0x55f   : > { %v10536_v48 = vsel %vm5981_vm15, %v10535_v32, %v10534_v9  ;;  %11862 = vmatpush.bf16.msrb.mxu2 %v15169_v44  ;;  %v10880_v19 = vshll.u32 %v10848_v62, 16  ;;  %v10737_v43 = vrot.slane %v10729_v34, 2  ;;  %11875 = vmatpush.bf16.msrb.mxu3 %v15178_v18  ;;  %v10870_v51 = vor.u32 %v10869_v7, %v10866_v45  ;;  %v15214_v57 = vld [vmem:[%s18644_s5 + $0x1b0] sm:$0xff]  ;;  %v15176_v32 = vld [vmem:[%s18644_s5 + $0x80] sm:$0xff]  ;;  %v15197_v9 = vld [vmem:[%s18644_s5 + $0x128] sm:$0xff] }
 0x560   : > { %v10595_v54 = vld [vmem:[#allocation5 + $0xc] sm:$0x3]  ;;  %v10538_v63 = vsel %vm5985_vm0, %v10537_v10, %v10536_v48  ;;  %v10696_v61 = vsel %vm18175_vm9, %v10691_v41, %v10695_v33  ;;  %v10849_v6 = vsel %vm10629_vm7, %v18312_v37, %v10837_v20  ;;  %v10873_v31 = vshll.u32 %v10845_v1, 16  ;;  %v15207_v45 = vld [vmem:[%s18644_s5 + $0x178] sm:$0xff]  ;;  %11927 = vmatpush.bf16.msrb.mxu0 %v15214_v57 }
 0x561   : > { %v10616_v12 = vld [vmem:[#allocation5 + $0xc] sm:$0x7]  ;;  %10606 = vst [vmem:[#allocation1 + $0x11] ss:$2 sm:$0xff] %v10595_v54  ;;  %v10542_v11 = vpack.c.b16 %v10538_v63, %v10538_v63  ;;  %v10879_v21 = vrot.slane %v10877_v4, 6  ;;  %v10882_v39 = vrot.slane %v10880_v19, 7  ;;  %v10755_v20 = vsel %vm10625_vm6, %v10729_v34, %v10737_v43 }
 0x562   : > { %v10624_v26 = vrot.slane %v10616_v12, 2  ;;  %v10730_v24 = vld [vmem:[#allocation5 + $0xc] sm:$0x6]  ;;  %11886 = vmatpush.bf16.msrb.mxu1 %v15189_v42  ;;  %v10871_v37 = vrot.slane %v10870_v51, 2  ;;  %v10757_v54 = vsel %vm10629_vm7, %v10729_v34, %v10737_v43  ;;  %v10875_v52 = vrot.slane %v10873_v31, 7  ;;  %v15206_v42 = vld [vmem:[%s18644_s5 + $0x170] sm:$0xff] }
 0x563   : > { %11863 = vmatpush.bf16.msrb.mxu2 %v15168_v17  ;;  %v10738_v3 = vrot.slane %v10730_v24, 2  ;;  %v10565_v58 = vshrl.u32 %v10542_v11, 16  ;;  %11876 = vmatpush.bf16.msrb.mxu3 %v15177_v46  ;;  %v10933_v62 = vld [vmem:[#allocation5 + $0x4] sm:$0x6]  ;;  %v10830_v48 = vld [vmem:[#allocation5 + $0xc] sm:$0x7] }
 0x564   : > { %v10647_v59 = vsel %vm10625_vm6, %v10616_v12, %v10624_v26  ;;  %v10648_v50 = vsel %vm10629_vm7, %v10616_v12, %v10624_v26  ;;  %v10851_v12 = vrot.slane %v10849_v6, 2  ;;  %v10568_v26 = vshll.u32 %v10542_v11, 16  ;;  %v10822_v7 = vld.sshfl [vmem:[#allocation1] sm:$0xff pattern:$0x75643120]  ;;  %v15186_v17 = vld [vmem:[%s18644_s5 + $0xd0] sm:$0xff]  ;;  %11928 = vmatpush.bf16.msrb.mxu0 %v15213_v15 }
 0x565   : > { %v10650_v55 = vrot.slane %v10648_v50, 2  ;;  %v10697_v0 = vshrl.u32 %v10647_v59, 16  ;;  %v10700_v38 = vshll.u32 %v10647_v59, 16  ;;  %v10762_v53 = vsel %vm10625_vm6, %v10730_v24, %v10738_v3  ;;  %v15196_v18 = vld [vmem:[%s18644_s5 + $0x120] sm:$0xff]  ;;  %10826 = vst [vmem:[#allocation2 + $0xc] sm:$0xf] %v10822_v7 }
 0x566   : > { %11887 = vmatpush.bf16.msrb.mxu1 %v15188_v47  ;;  %v10567_v40 = vrot.slane %v10565_v58, 7  ;;  %v10883_v59 = vor.u32 %v10882_v39, %v10879_v21  ;;  %v10764_v50 = vsel %vm10629_vm7, %v10730_v24, %v10738_v3  ;;  %v10886_v41 = vshll.u32 %v10851_v12, 16  ;;  %v15205_v43 = vld [vmem:[%s18644_s5 + $0x168] sm:$0xff]  ;;  %v18449_v3 = vld [vmem:[#allocation5 + $0xc] sm:$0x7]  ;;  %v15194_v21 = vld [vmem:[%s18644_s5 + $0x110] sm:$0xff] }
 0x567   : > { %v10699_v56 = vrot.slane %v10697_v0, 6  ;;  %v10702_v35 = vrot.slane %v10700_v38, 7  ;;  %v10706_v49 = vshll.u32 %v10650_v55, 16  ;;  %11898 = vmatpush.bf16.msra.mxu2 %v15199_v30  ;;  %v14401_v55 = vrot.slane %v10755_v20, 9  ;;  %v10934_v38 = vld [vmem:[#allocation5 + $0x8] sm:$0x6]  ;;  %11877 = vmatpush.bf16.msrb.mxu3 %v15176_v32 }
 0x568   : > { %v10608_v22 = vld.sshfl [vmem:[#allocation1 + $0x10] sm:$0xff pattern:$0x75643120]  ;;  %v14402_v0 = vrot.slane %v10757_v54, 9  ;;  %v10570_v10 = vor.u32 %v10568_v26, %v10567_v40  ;;  %v14403_v34 = vrot.slane %v10762_v53, 9  ;;  %v10884_v30 = vrot.slane %v10883_v59, 2  ;;  %11929 = vmatpush.bf16.msrb.mxu0 %v15212_v29 }
 0x569   : > { %v10703_v16 = vor.u32 %v10702_v35, %v10699_v56  ;;  %10612 = vst [vmem:[#allocation2 + $0x24] sm:$0xf] %v10608_v22  ;;  %v10708_v27 = vrot.slane %v10706_v49, 7  ;;  %v10876_v56 = vsel %vm18175_vm9, %v10871_v37, %v10875_v52  ;;  %v14404_v35 = vrot.slane %v10764_v50, 9  ;;  %v15184_v31 = vld [vmem:[%s18644_s5 + $0xc0] sm:$0xff]  ;;  %v15223_v20 = vld [vmem:[%s18644_s5 + $0x1f8] sm:$0xff] }
 0x56a   : > { %10717 = vst [vmem:[#allocation1 + $0x10] ss:$2 sm:$0xff] %v10696_v61  ;;  %11888 = vmatpush.bf16.msrb.mxu1 %v15187_v5  ;;  %v10838_v49 = vrot.slane %v10830_v48, 2  ;;  %v10578_v63 = vsel %vm15722_vm8, 0, %v10570_v10  ;;  %v10941_v4 = vrot.slane %v10933_v62, 2  ;;  %v10784_v25 = vsel %vm18227_vm13, %v14401_v55, %v14402_v0  ;;  %v15203_v52 = vld [vmem:[%s18644_s5 + $0x158] sm:$0xff] }
 0x56b   : > { %v10704_v8 = vrot.slane %v10703_v16, 2  ;;  %11899 = vmatpush.bf16.msra.mxu2 %v15198_v23  ;;  %11912 = vmatpush.bf16.msra.mxu3 %v15207_v45  ;;  %10917 = vst [vmem:[#allocation1] ss:$2 sm:$0xff] %v10876_v56  ;;  %v10585_v1 = vsel %vm15746_vm10, %v10578_v63, 0  ;;  %v10888_v19 = vrot.slane %v10886_v41, 7  ;;  %v10942_v22 = vrot.slane %v10934_v38, 2 }
 0x56c   : > { %10590 = vst [vmem:[#allocation5 + $0x10] sm:$0x7] %v10585_v1  ;;  %v15195_v16 = vld [vmem:[%s18644_s5 + $0x118] sm:$0xff]  ;;  %v10788_v24 = vsel %vm18227_vm13, %v14403_v34, %v14404_v35  ;;  %v10854_v61 = vsel %vm10625_vm6, %v10830_v48, %v10838_v49  ;;  %v18436_v46 = vsel %vm10625_vm6, %v10933_v62, %v10941_v4  ;;  %v18439_v51 = vsel %vm10629_vm7, %v10933_v62, %v10941_v4  ;;  %v10809_v53 = vld [vmem:[#allocation5 + $0xc] sm:$0x3]  ;;  %v15193_v45 = vld [vmem:[%s18644_s5 + $0x108] sm:$0xff] }
 0x56d   : > { %v10709_v13 = vsel %vm18175_vm9, %v10704_v8, %v10708_v27  ;;  %v10889_v11 = vsel %vm18175_vm9, %v10884_v30, %v10888_v19  ;;  %v18441_v8 = vld [vmem:[#allocation5 + $0x8] sm:$0x7]  ;;  %v18444_v27 = vsel %vm10625_vm6, %v10934_v38, %v10942_v22  ;;  %v18447_v47 = vsel %vm10629_vm7, %v10934_v38, %v10942_v22  ;;  %v15211_v62 = vld [vmem:[%s18644_s5 + $0x198] sm:$0xff]  ;;  %v15222_v15 = vld [vmem:[%s18644_s5 + $0x1f0] sm:$0xff] }
 0x56e   : > { %10720 = vst [vmem:[#allocation1 + $0x11] ss:$2 sm:$0xff] %v10709_v13  ;;  %11889 = vmatpush.bf16.msrb.mxu1 %v15186_v17  ;;  %v10890_v23 = vshrl.u32 %v10854_v61, 16  ;;  %v10893_v6 = vshll.u32 %v10854_v61, 16  ;;  %v10855_v39 = vsel %vm10629_vm7, %v10830_v48, %v10838_v49  ;;  %v15204_v13 = vld [vmem:[%s18644_s5 + $0x160] sm:$0xff]  ;;  %v14405_v57 = vrot.slane %v18436_v46, 9  ;;  %11930 = vmatpush.bf16.msrb.mxu0 %v15211_v62 }
 0x56f   : > { %11900 = vmatpush.bf16.msra.mxu2 %v15197_v9  ;;  %11913 = vmatpush.bf16.msra.mxu3 %v15206_v42  ;;  %10920 = vst [vmem:[#allocation1 + $0x1] ss:$2 sm:$0xff] %v10889_v11  ;;  %v14406_v58 = vrot.slane %v18439_v51, 9  ;;  %v11036_v32 = vrot.slane %v18441_v8, 2  ;;  %v14407_v54 = vrot.slane %v18444_v27, 9  ;;  %v14408_v12 = vrot.slane %v18447_v47, 9 }
 0x570   : > { %v15155_v44 = vld [vmem:[#allocation2 + $0x20] sm:$0xf0]  ;;  %v11037_v5 = vrot.slane %v18449_v3, 2  ;;  %v10857_v40 = vrot.slane %v10855_v39, 2  ;;  %v10892_v26 = vrot.slane %v10890_v23, 6  ;;  %v15192_v56 = vld [vmem:[%s18644_s5 + $0x100] sm:$0xff] }
 0x571   : > { %v14424_v2 = vor.u32 %v15155_v44, %v14423_v28  ;;  %v10895_v28 = vrot.slane %v10893_v6, 7  ;;  %v15151_v38 = vld [vmem:[#allocation2 + $0x4] sm:$0xf]  ;;  %v15202_v63 = vld [vmem:[%s18644_s5 + $0x150] sm:$0xff]  ;;  %v15231_v42 = vld [vmem:[%s18644_s5 + $0x238] sm:$0xff]  ;;  %v10976_v1 = vsel %vm18227_vm13, %v14405_v57, %v14406_v58  ;;  %v10980_v19 = vsel %vm18227_vm13, %v14407_v54, %v14408_v12 }
 0x572   : > { %11890 = vmatpush.bf16.msrb.mxu1 %v15185_v36  ;;  %v11048_v35 = vsel %vm10625_vm6, %v18449_v3, %v11037_v5  ;;  %v15210_v30 = vld [vmem:[%s18644_s5 + $0x190] sm:$0xff]  ;;  %v10899_v4 = vshll.u32 %v10857_v40, 16  ;;  %v18511_v22 = vsel %vm10629_vm7, %v18441_v8, %v11036_v32  ;;  %v15209_v39 = vld [vmem:[%s18644_s5 + $0x188] sm:$0xff]  ;;  %v11049_v54 = vsel %vm10629_vm7, %v18449_v3, %v11037_v5  ;;  %v15200_v3 = vld [vmem:[%s18644_s5 + $0x140] sm:$0xff] }
 0x573   : > { %11850 = vmatmul.bf16.vlgmr.msra.gmra.mxu1 %v14424_v2  ;;  %11901 = vmatpush.bf16.msra.mxu2 %v15196_v18  ;;  %v10831_v37 = vld [vmem:[#allocation5 + $0x10] sm:$0x7]  ;;  %v11042_v2 = vsel %vm10625_vm6, %v18441_v8, %v11036_v32  ;;  %v10896_v34 = vor.u32 %v10895_v28, %v10892_v26  ;;  %v14431_v46 = vld [vmem:[#allocation2 + $0x8] sm:$0xf]  ;;  %v11080_v51 = vshll.u32 %v11048_v35, 16  ;;  %v15219_v62 = vld [vmem:[%s18644_s5 + $0x1d8] sm:$0xff] }
 0x574   : > { %11914 = vmatpush.bf16.msra.mxu3 %v15205_v43  ;;  %v10839_v9 = vrot.slane %v10831_v37, 2  ;;  %v10810_v59 = vld [vmem:[#allocation5 + $0x10] sm:$0x3]  ;;  %v11067_v36 = vshll.u32 %v11042_v2, 16  ;;  %11931 = vmatpush.bf16.msrb.mxu0 %v15210_v30  ;;  %v11077_v43 = vshrl.u32 %v11048_v35, 16  ;;  %v15230_v23 = vld [vmem:[%s18644_s5 + $0x230] sm:$0xff] }
 0x575   : > { %v10722_v33 = vld.sshfl [vmem:[#allocation1 + $0x10] sm:$0xff pattern:$0x75643120]  ;;  %v10897_v61 = vrot.slane %v10896_v34, 2  ;;  %v10936_v11 = vld [vmem:[#allocation5 + $0x10] sm:$0x6] }
 0x576   : > { %10726 = vst [vmem:[#allocation2 + $0x28] sm:$0xf] %v10722_v33  ;;  %11891 = vmatpush.bf16.msrb.mxu1 %v15184_v31  ;;  %v10860_v50 = vsel %vm10625_vm6, %v10831_v37, %v10839_v9  ;;  %v10861_v48 = vsel %vm10629_vm7, %v10831_v37, %v10839_v9  ;;  %v10927_v41 = vld.sshfl [vmem:[#allocation1] sm:$0xff pattern:$0x75643120]  ;;  %v11064_v33 = vshrl.u32 %v11042_v2, 16 }
 0x577   : > { %10796 = vst [vmem:[#allocation1 + $0x10] ss:$2 sm:$0xff] %v10784_v25  ;;  %11902 = vmatpush.bf16.msra.mxu2 %v15195_v16  ;;  %v10903_v55 = vshrl.u32 %v10860_v50, 16  ;;  %v10906_v0 = vshll.u32 %v10860_v50, 16  ;;  %v10863_v7 = vrot.slane %v10861_v48, 2  ;;  %v15221_v25 = vld [vmem:[%s18644_s5 + $0x1e8] sm:$0xff] }
 0x578   : > { %10799 = vst [vmem:[#allocation1 + $0x11] ss:$2 sm:$0xff] %v10788_v24  ;;  %11915 = vmatpush.bf16.msra.mxu3 %v15204_v13  ;;  %v10935_v16 = vld [vmem:[#allocation5 + $0xc] sm:$0x6]  ;;  %v15201_v8 = vld [vmem:[%s18644_s5 + $0x148] sm:$0xff]  ;;  %v10901_v6 = vrot.slane %v10899_v4, 7  ;;  %11932 = vmatpush.bf16.msrb.mxu0 %v15209_v39 }
 0x579   : > { %v10905_v17 = vrot.slane %v10903_v55, 6  ;;  %v10908_v18 = vrot.slane %v10906_v0, 7  ;;  %10931 = vst [vmem:[#allocation2 + $0x10] sm:$0xf] %v10927_v41  ;;  %v10912_v24 = vshll.u32 %v10863_v7, 16  ;;  %v11045_v13 = vrot.slane %v18511_v22, 2 }
 0x57a   : > { %11940 = vmatpush.bf16.msra.mxu1 %v15223_v20  ;;  %10990 = vst [vmem:[#allocation1] ss:$2 sm:$0xff] %v10976_v1  ;;  %v10943_v57 = vrot.slane %v10935_v16, 2  ;;  %v11066_v37 = vrot.slane %v11064_v33, 6  ;;  %v18526_v20 = vld [vmem:[#allocation5 + $0x14] sm:$0x7]  ;;  %v10902_v9 = vsel %vm18175_vm9, %v10897_v61, %v10901_v6 }
 0x57b   : > { %11903 = vmatpush.bf16.msra.mxu2 %v15194_v21  ;;  %v10909_v29 = vor.u32 %v10908_v18, %v10905_v17  ;;  %10993 = vst [vmem:[#allocation1 + $0x1] ss:$2 sm:$0xff] %v10980_v19  ;;  %v15220_v21 = vld [vmem:[%s18644_s5 + $0x1e0] sm:$0xff]  ;;  %v10914_v58 = vrot.slane %v10912_v24, 7  ;;  %v10944_v12 = vrot.slane %v10936_v11, 2  ;;  %v11069_v40 = vrot.slane %v11067_v36, 7 }
 0x57c   : > { %11916 = vmatpush.bf16.msra.mxu3 %v15203_v52  ;;  %v15229_v5 = vld [vmem:[%s18644_s5 + $0x228] sm:$0xff]  ;;  %v11079_v28 = vrot.slane %v11077_v43, 6  ;;  %v10963_v50 = vsel %vm10629_vm7, %v10935_v16, %v10943_v57  ;;  %v11007_v48 = vld [vmem:[#allocation5 + $0x8] sm:$0x3]  ;;  %v15152_v18 = vld [vmem:[#allocation2 + $0xc] sm:$0xf] }
 0x57d   : > { %v14425_v10 = vld [vmem:[#allocation2 + $0x24] sm:$0xf0]  ;;  %v10910_v27 = vrot.slane %v10909_v29, 2  ;;  %v10970_v55 = vsel %vm10629_vm7, %v10936_v11, %v10944_v12  ;;  %v18552_v0 = vld [vmem:[#allocation5 + $0x10] sm:$0x7]  ;;  %v15228_v7 = vld [vmem:[%s18644_s5 + $0x220] sm:$0xff]  ;;  %v11070_v41 = vor.u32 %v11069_v40, %v11066_v37 }
 0x57e   : > { %v14428_v49 = vor.u32 %v15151_v38, %v14425_v10  ;;  %11941 = vmatpush.bf16.msra.mxu1 %v15222_v15  ;;  %v10968_v15 = vsel %vm10625_vm6, %v10936_v11, %v10944_v12  ;;  %v11008_v38 = vld [vmem:[#allocation5 + $0xc] sm:$0x3]  ;;  %v11039_v10 = vrot.slane %v18526_v20, 2  ;;  %v11133_v2 = vld [vmem:[#allocation5 + $0x8] sm:$0x6]  ;;  %v14410_v17 = vrot.slane %v10963_v50, 9 }
 0x57f   : > { %v10801_v44 = vld.sshfl [vmem:[#allocation1 + $0x10] sm:$0xff pattern:$0x75643120]  ;;  %11904 = vmatpush.bf16.msra.mxu2 %v15193_v45  ;;  %v10915_v26 = vsel %vm18175_vm9, %v10910_v27, %v10914_v58  ;;  %v11082_v45 = vrot.slane %v11080_v51, 7  ;;  %v11134_v33 = vld [vmem:[#allocation5 + $0xc] sm:$0x6] }
 0x580   : > { %10805 = vst [vmem:[#allocation2 + $0x2c] sm:$0xf] %v10801_v44  ;;  %11864 = vmatmul.bf16.vlgmr.msrb.gmra.mxu2 %v14428_v49  ;;  %11917 = vmatpush.bf16.msra.mxu3 %v15202_v63  ;;  %v11051_v44 = vrot.slane %v11049_v54, 2  ;;  %v14411_v49 = vrot.slane %v10968_v15, 9  ;;  %v14412_v63 = vrot.slane %v10970_v55, 9  ;;  %v15218_v1 = vld [vmem:[%s18644_s5 + $0x1d0] sm:$0xff]  ;;  %v11060_v36 = vsel %vm10625_vm6, %v18526_v20, %v11039_v10 }
 0x581   : > { %10818 = vst [vmem:[#allocation1 + $0x10] ss:$2 sm:$0xff] %v10809_v53  ;;  %v15208_v53 = vld [vmem:[%s18644_s5 + $0x180] sm:$0xff]  ;;  %v11083_v35 = vor.u32 %v11082_v45, %v11079_v28  ;;  %v11071_v19 = vrot.slane %v11070_v41, 2  ;;  %v15227_v22 = vld [vmem:[%s18644_s5 + $0x218] sm:$0xff]  ;;  %v11142_v43 = vrot.slane %v11134_v33, 2 }
 0x582   : > { %10821 = vst [vmem:[#allocation1 + $0x11] ss:$2 sm:$0xff] %v10810_v59  ;;  %11942 = vmatpush.bf16.msra.mxu1 %v15221_v25  ;;  %v11000_v52 = vld.sshfl [vmem:[#allocation1] sm:$0xff pattern:$0x75643120]  ;;  %v10961_v59 = vsel %vm10625_vm6, %v10935_v16, %v10943_v57  ;;  %11933 = vmatpush.bf16.msrb.mxu0 %v15208_v53  ;;  %v11086_v29 = vshll.u32 %v11051_v44, 16 }
 0x583   : > { %11905 = vmatpush.bf16.msra.mxu2 %v15192_v56  ;;  %11004 = vst [vmem:[#allocation2 + $0x14] sm:$0xf] %v11000_v52  ;;  %v14409_v34 = vrot.slane %v10961_v59, 9  ;;  %v11073_v56 = vshll.u32 %v11045_v13, 16  ;;  %v11141_v16 = vrot.slane %v11133_v2, 2  ;;  %v11084_v61 = vrot.slane %v11083_v35, 2 }
 0x584   : > { %11918 = vmatpush.bf16.msra.mxu3 %v15201_v8  ;;  %11012 = vst [vmem:[#allocation1] ss:$2 sm:$0xff] %v11007_v48  ;;  %v15217_v27 = vld [vmem:[%s18644_s5 + $0x1c8] sm:$0xff]  ;;  %v11088_v8 = vrot.slane %v11086_v29, 7  ;;  %v11103_v6 = vshrl.u32 %v11060_v36, 16  ;;  %v15226_v39 = vld [vmem:[%s18644_s5 + $0x210] sm:$0xff]  ;;  %v11154_v12 = vsel %vm10625_vm6, %v11134_v33, %v11142_v43  ;;  %v11156_v40 = vsel %vm10629_vm7, %v11134_v33, %v11142_v43 }
 0x585   : > { %11015 = vst [vmem:[#allocation1 + $0x1] ss:$2 sm:$0xff] %v11008_v38  ;;  %v10984_v24 = vsel %vm18227_vm13, %v14409_v34, %v14410_v17  ;;  %v11075_v51 = vrot.slane %v11073_v56, 7  ;;  %v11149_v54 = vsel %vm10629_vm7, %v11133_v2, %v11141_v16  ;;  %v11010_v28 = vld [vmem:[#allocation5 + $0x14] sm:$0x3]  ;;  %v14415_v44 = vrot.slane %v11154_v12, 9 }
 0x586   : > { %11943 = vmatpush.bf16.msra.mxu1 %v15220_v21  ;;  %v11089_v58 = vsel %vm18175_vm9, %v11084_v61, %v11088_v8  ;;  %v15225_v59 = vld [vmem:[%s18644_s5 + $0x208] sm:$0xff]  ;;  %v14414_v48 = vrot.slane %v11149_v54, 9  ;;  %v14416_v55 = vrot.slane %v11156_v40, 9 }
 0x587   : > { %v15156_v47 = vld [vmem:[#allocation2 + $0x28] sm:$0xf0]  ;;  %11954 = vmatpush.bf16.msrb.mxu2 %v15231_v42  ;;  %v11038_v42 = vrot.slane %v18552_v0, 2  ;;  %v11076_v21 = vsel %vm18175_vm9, %v11071_v19, %v11075_v51 }
 0x588   : > { %v14432_v31 = vor.u32 %v15156_v47, %v14431_v46  ;;  %11919 = vmatpush.bf16.msra.mxu3 %v15200_v3  ;;  %v10988_v46 = vsel %vm18227_vm13, %v14411_v49, %v14412_v63  ;;  %v14439_v3 = vld [vmem:[#allocation2 + $0x10] sm:$0xf]  ;;  %v11180_v56 = vsel %vm18227_vm13, %v14415_v44, %v14416_v55  ;;  %v11136_v63 = vld [vmem:[#allocation5 + $0x14] sm:$0x6] }
 0x589   : > { %v10823_v32 = vld.sshfl [vmem:[#allocation1 + $0x10] sm:$0xff pattern:$0x75643120]  ;;  %v11054_v11 = vsel %vm10625_vm6, %v18552_v0, %v11038_v42 }
 0x58a   : > { %11878 = vmatmul.bf16.vlgmr.msrb.gmra.mxu3 %v14432_v31  ;;  %10827 = vst [vmem:[#allocation2 + $0x30] sm:$0xf] %v10823_v32  ;;  %11944 = vmatpush.bf16.msra.mxu1 %v15219_v62  ;;  %v11106_v31 = vshll.u32 %v11060_v36, 16  ;;  %v11090_v13 = vshrl.u32 %v11054_v11, 16  ;;  %v11093_v57 = vshll.u32 %v11054_v11, 16  ;;  %v15216_v32 = vld [vmem:[%s18644_s5 + $0x1c0] sm:$0xff] }
 0x58b   : > { %10923 = vst [vmem:[#allocation1 + $0x10] ss:$2 sm:$0xff] %v10902_v9  ;;  %11955 = vmatpush.bf16.msrb.mxu2 %v15230_v23  ;;  %v11061_v23 = vsel %vm10629_vm7, %v18526_v20, %v11039_v10  ;;  %v11147_v20 = vsel %vm10625_vm6, %v11133_v2, %v11141_v16  ;;  %v11105_v9 = vrot.slane %v11103_v6, 6 }
 0x58c   : > { %10926 = vst [vmem:[#allocation1 + $0x11] ss:$2 sm:$0xff] %v10915_v26  ;;  %v11022_v47 = vld.sshfl [vmem:[#allocation1] sm:$0xff pattern:$0x75643120]  ;;  %v11063_v37 = vrot.slane %v11061_v23, 2  ;;  %v11055_v26 = vsel %vm10629_vm7, %v18552_v0, %v11038_v42 }
 0x58d   : > { %11026 = vst [vmem:[#allocation2 + $0x18] sm:$0xf] %v11022_v47  ;;  %v11108_v53 = vrot.slane %v11106_v31, 7  ;;  %v11092_v52 = vrot.slane %v11090_v13, 6  ;;  %v11095_v62 = vrot.slane %v11093_v57, 7  ;;  %v14413_v50 = vrot.slane %v11147_v20, 9 }
 0x58e   : > { %11945 = vmatpush.bf16.msra.mxu1 %v15218_v1  ;;  %11117 = vst [vmem:[#allocation1] ss:$2 sm:$0xff] %v11076_v21  ;;  %v11009_v0 = vld [vmem:[#allocation5 + $0x10] sm:$0x3]  ;;  %v11057_v38 = vrot.slane %v11055_v26, 2  ;;  %v11112_v2 = vshll.u32 %v11063_v37, 16 }
 0x58f   : > { %11956 = vmatpush.bf16.msrb.mxu2 %v15229_v5  ;;  %11120 = vst [vmem:[#allocation1 + $0x1] ss:$2 sm:$0xff] %v11089_v58  ;;  %v11109_v10 = vor.u32 %v11108_v53, %v11105_v9  ;;  %v11096_v41 = vor.u32 %v11095_v62, %v11092_v52  ;;  %v11176_v17 = vsel %vm18227_vm13, %v14413_v50, %v14414_v48  ;;  %v11135_v42 = vld [vmem:[#allocation5 + $0x10] sm:$0x6]  ;;  %v15153_v1 = vld [vmem:[#allocation2 + $0x14] sm:$0xf] }
 0x590   : > { %v11114_v49 = vrot.slane %v11112_v2, 7 }
 0x591   : > { %v14433_v30 = vld [vmem:[#allocation2 + $0x2c] sm:$0xf0]  ;;  %v11110_v35 = vrot.slane %v11109_v10, 2 }
 0x592   : > { %v14436_v4 = vor.u32 %v15152_v18, %v14433_v30  ;;  %11946 = vmatpush.bf16.msra.mxu1 %v15217_v27  ;;  %v11099_v18 = vshll.u32 %v11057_v38, 16  ;;  %v11097_v30 = vrot.slane %v11096_v41, 2 }
 0x593   : > { %v10928_v25 = vld.sshfl [vmem:[#allocation1 + $0x10] sm:$0xff pattern:$0x75643120]  ;;  %11957 = vmatpush.bf16.msrb.mxu2 %v15228_v7  ;;  %v15224_v7 = vld [vmem:[%s18644_s5 + $0x200] sm:$0xff]  ;;  %v11115_v19 = vsel %vm18175_vm9, %v11110_v35, %v11114_v49 }
 0x594   : > { %11892 = vmatmul.bf16.vlgmr.msrb.gmra.mxu1 %v14436_v4  ;;  %10932 = vst [vmem:[#allocation2 + $0x34] sm:$0xf] %v10928_v25  ;;  %v11144_v4 = vrot.slane %v11136_v63, 2  ;;  %v11101_v25 = vrot.slane %v11099_v18, 7  ;;  %v14447_v23 = vld [vmem:[#allocation2 + $0x18] sm:$0xf] }
 0x595   : > { %10996 = vst [vmem:[#allocation1 + $0x10] ss:$2 sm:$0xff] %v10984_v24 }
 0x596   : > { %10999 = vst [vmem:[#allocation1 + $0x11] ss:$2 sm:$0xff] %v10988_v46  ;;  %11947 = vmatpush.bf16.msra.mxu1 %v15216_v32  ;;  %v11127_v34 = vld.sshfl [vmem:[#allocation1] sm:$0xff pattern:$0x75643120]  ;;  %v11102_v16 = vsel %vm18175_vm9, %v11097_v30, %v11101_v25  ;;  %v11168_v24 = vsel %vm10625_vm6, %v11136_v63, %v11144_v4  ;;  %v11170_v61 = vsel %vm10629_vm7, %v11136_v63, %v11144_v4 }
 0x597   : > { %11958 = vmatpush.bf16.msrb.mxu2 %v15227_v22  ;;  %11131 = vst [vmem:[#allocation2 + $0x1c] sm:$0xf] %v11127_v34  ;;  %v11143_v22 = vrot.slane %v11135_v42, 2  ;;  %v14419_v51 = vrot.slane %v11168_v24, 9  ;;  %v14420_v27 = vrot.slane %v11170_v61, 9 }
 0x598   : > { %11190 = vst [vmem:[#allocation1] ss:$2 sm:$0xff] %v11176_v17 }
 0x599   : > { %11193 = vst [vmem:[#allocation1 + $0x1] ss:$2 sm:$0xff] %v11180_v56  ;;  %v11161_v11 = vsel %vm10625_vm6, %v11135_v42, %v11143_v22  ;;  %v11163_v46 = vsel %vm10629_vm7, %v11135_v42, %v11143_v22  ;;  %v11188_v21 = vsel %vm18227_vm13, %v14419_v51, %v14420_v27 }
 0x59a   : > { %v14417_v47 = vrot.slane %v11161_v11, 9  ;;  %v14418_v8 = vrot.slane %v11163_v46, 9 }
 0x59b   : > { %v15157_v5 = vld [vmem:[#allocation2 + $0x30] sm:$0xf0]  ;;  %11959 = vmatpush.bf16.msrb.mxu2 %v15226_v39 }
 0x59c   : > { %v14440_v45 = vor.u32 %v15157_v5, %v14439_v3  ;;  %v11184_v39 = vsel %vm18227_vm13, %v14417_v47, %v14418_v8 }
 0x59d   : > { %v11001_v15 = vld.sshfl [vmem:[#allocation1 + $0x10] sm:$0xff pattern:$0x75643120] }
 0x59e   : > { %11906 = vmatmul.bf16.vlgmr.msra.gmra.mxu2 %v14440_v45  ;;  %11005 = vst [vmem:[#allocation2 + $0x38] sm:$0xf] %v11001_v15  ;;  %v15154_v13 = vld [vmem:[#allocation2 + $0x1c] sm:$0xf] }
 0x59f   : > { %11018 = vst [vmem:[#allocation1 + $0x10] ss:$2 sm:$0xff] %v11009_v0  ;;  %11960 = vmatpush.bf16.msrb.mxu2 %v15225_v59 }
 0x5a0   : > { %11021 = vst [vmem:[#allocation1 + $0x11] ss:$2 sm:$0xff] %v11010_v28  ;;  %v11200_v43 = vld.sshfl [vmem:[#allocation1] sm:$0xff pattern:$0x75643120] }
 0x5a1   : > { %11204 = vst [vmem:[#allocation2 + $0x20] sm:$0xf] %v11200_v43  ;;  %v15411_v28 = vld [vmem:[#allocation11] ss:$0 sm:$0xff] }
 0x5a3   : > { %11961 = vmatpush.bf16.msrb.mxu2 %v15224_v7 }
 0x5a5   : > { %v14441_v33 = vld [vmem:[#allocation2 + $0x34] sm:$0xf0] }
 0x5a6   : > { %v14444_v29 = vor.u32 %v15153_v1, %v14441_v33 }
 0x5a7   : > { %v11023_v36 = vld.sshfl [vmem:[#allocation1 + $0x10] sm:$0xff pattern:$0x75643120] }
 0x5a8   : > { %11920 = vmatmul.bf16.vlgmr.msra.gmra.mxu3 %v14444_v29  ;;  %11027 = vst [vmem:[#allocation2 + $0x3c] sm:$0xf] %v11023_v36  ;;  %v14455_v37 = vld [vmem:[#allocation2 + $0x20] sm:$0xf] }
 0x5a9   : > { %11123 = vst [vmem:[#allocation1 + $0x10] ss:$2 sm:$0xff] %v11102_v16 }
 0x5aa   : > { %11126 = vst [vmem:[#allocation1 + $0x11] ss:$2 sm:$0xff] %v11115_v19 }
 0x5af   : > { %v15158_v6 = vld [vmem:[#allocation2 + $0x38] sm:$0xf0] }
 0x5b0   : > { %v14448_v60 = vor.u32 %v15158_v6, %v14447_v23 }
 0x5b1   : > { %v11128_v31 = vld.sshfl [vmem:[#allocation1 + $0x10] sm:$0xff pattern:$0x75643120] }
 0x5b2   : > { %11934 = vmatmul.bf16.vlgmr.msrb.gmra.mxu0 %v14448_v60  ;;  %11132 = vst [vmem:[#allocation2 + $0x40] sm:$0xf] %v11128_v31 }
 0x5b3   : > { %11196 = vst [vmem:[#allocation1 + $0x10] ss:$2 sm:$0xff] %v11184_v39 }
 0x5b4   : > { %11199 = vst [vmem:[#allocation1 + $0x11] ss:$2 sm:$0xff] %v11188_v21 }
 0x5b9   : > { %v14449_v57 = vld [vmem:[#allocation2 + $0x3c] sm:$0xf0] }
 0x5ba   : > { %v14452_v58 = vor.u32 %v15154_v13, %v14449_v57 }
 0x5bb   : > { %v11201_v32 = vld.sshfl [vmem:[#allocation1 + $0x10] sm:$0xff pattern:$0x75643120] }
 0x5bc   : > { %11948 = vmatmul.bf16.vlgmr.msra.gmra.mxu1 %v14452_v58  ;;  %11205 = vst [vmem:[#allocation2 + $0x44] sm:$0xf] %v11201_v32 }
 0x5c3   : > { %v15159_v20 = vld [vmem:[#allocation2 + $0x40] sm:$0xf0] }
 0x5c4   : > { %v14456_v54 = vor.u32 %v15159_v20, %v14455_v37 }
 0x5c6   : > { %11962 = vmatmul.bf16.vlgmr.msrb.gmra.mxu2 %v14456_v54 }
 0x5f0   : > { %v11851_v12 = vpop.f32.mrf.mxu1 }
 0x5f1   : > { %v11852_v52 = vadd.f32 %v15411_v28, %v11851_v12 }
 0x5f8   : > { %v11853_v53 = vpop.f32.mrf.mxu1 }
 0x5f9   : > { %v11854_v59 = vadd.f32 %v15411_v28, %v11853_v53 }
 0x603   : > { %v11865_v9 = vpop.f32.mrf.mxu2 }
 0x604   : > { %v11866_v50 = vadd.f32 %v11865_v9, %v11852_v52 }
 0x60b   : > { %v11867_v26 = vpop.f32.mrf.mxu2 }
 0x60c   : > { %v11868_v48 = vadd.f32 %v11867_v26, %v11854_v59 }
 0x60d   : > { %v11879_v40 = vpop.f32.mrf.mxu3 }
 0x60e   : > { %v11880_v44 = vadd.f32 %v11879_v40, %v11866_v50 }
 0x611   : > { %v11893_v3 = vpop.f32.mrf.mxu1 }
 0x612   : > { %v11894_v10 = vadd.f32 %v11893_v3, %v11880_v44 }
 0x615   : > { %v11881_v14 = vpop.f32.mrf.mxu3 }
 0x616   : > { %v11882_v0 = vadd.f32 %v11881_v14, %v11868_v48 }
 0x619   : > { %v11895_v45 = vpop.f32.mrf.mxu1 }
 0x61a   : > { %v11896_v2 = vadd.f32 %v11895_v45, %v11882_v0 }
 0x621   : > { %v11907_v5 = vpop.f32.mrf.mxu2 }
 0x622   : > { %v11908_v7 = vadd.f32 %v11907_v5, %v11894_v10 }
 0x629   : > { %v11909_v15 = vpop.f32.mrf.mxu2 }
 0x62a   : > { %v11910_v34 = vadd.f32 %v11909_v15, %v11896_v2 }
 0x62b   : > { %v11921_v62 = vpop.f32.mrf.mxu3 }
 0x62c   : > { %v11922_v17 = vadd.f32 %v11921_v62, %v11908_v7 }
 0x62f   : > { %v11935_v55 = vpop.f32.mrf.mxu0 }
 0x630   : > { %v11936_v49 = vadd.f32 %v11935_v55, %v11922_v17 }
 0x633   : > { %v11923_v41 = vpop.f32.mrf.mxu3 }
 0x634   : > { %v11924_v56 = vadd.f32 %v11923_v41, %v11910_v34 }
 0x637   : > { %v11937_v35 = vpop.f32.mrf.mxu0 }
 0x638   : > { %v11938_v42 = vadd.f32 %v11937_v35, %v11924_v56 }
 0x639   : > { %v11949_v38 = vpop.f32.mrf.mxu1 }
 0x63a   : > { %v11950_v30 = vadd.f32 %v11949_v38, %v11936_v49 }
 0x641   : > { %v11951_v63 = vpop.f32.mrf.mxu1 }
 0x642   : > { %v11952_v1 = vadd.f32 %v11951_v63, %v11938_v42 }
 0x649   : > { %v11963_v18 = vpop.f32.mrf.mxu2 }
 0x64a   : > { %v11964_v33 = vadd.f32 %v11963_v18, %v11950_v30 }
 0x64c   : > { %v11968_v25 = vmax.f32 %v11964_v33, 0.0 }
 0x651   : > { %v11965_v4 = vpop.f32.mrf.mxu2 }
 0x652   : > { %v11966_v29 = vadd.f32 %v11965_v4, %v11952_v1 }
 0x654   : > { %v11969_v19 = vmax.f32 %v11966_v29, 0.0 }
 0x656   : > { %v15335_v22 = vpack.c.bf16 %v11969_v19, %v11968_v25 }
 0x658   : > { %15336 = vst [vmem:[#allocation3] sm:$0xff] %v15335_v22  }
 0x65f   : > { %v11974_v36 = vld [vmem:[#allocation3] sm:$0xf]  ;;  %v11975_v16 = vld [vmem:[#allocation3 + $0x4] sm:$0xf] }
 0x660   : > { %v11978_v24 = vrot.slane %v11974_v36, 3  ;;  %v11979_v61 = vrot.slane %v11975_v16, 3 }
 0x662   : > { %v11982_v43 = vsel %vm5973_vm4, %v11974_v36, %v11978_v24  ;;  %v11983_v11 = vsel %vm5977_vm14, %v11974_v36, %v11978_v24  ;;  %v11986_v46 = vsel %vm5981_vm15, %v11974_v36, %v11978_v24  ;;  %v11989_v51 = vsel %vm5985_vm0, %v11974_v36, %v11978_v24 }
 0x663   : > { %v11985_v27 = vrot.slane %v11983_v11, 1  ;;  %v11988_v47 = vrot.slane %v11986_v46, 2  ;;  %v11991_v8 = vrot.slane %v11989_v51, 3  ;;  %v11994_v23 = vsel %vm5973_vm4, %v11975_v16, %v11979_v61 }
 0x664   : > { %v11995_v6 = vsel %vm5977_vm14, %v11975_v16, %v11979_v61  ;;  %v11998_v60 = vsel %vm5981_vm15, %v11975_v16, %v11979_v61  ;;  %v12001_v31 = vsel %vm5985_vm0, %v11975_v16, %v11979_v61  ;;  %v12012_v21 = vunpack.c.l.bf16 %v11982_v43 }
 0x665   : > { %v11997_v39 = vrot.slane %v11995_v6, 1  ;;  %v12000_v13 = vrot.slane %v11998_v60, 2  ;;  %v12003_v57 = vrot.slane %v12001_v31, 3  ;;  %v12013_v58 = vunpack.c.l.bf16 %v11985_v27 }
 0x666   : > { %v12014_v32 = vunpack.c.l.bf16 %v11994_v23  ;;  %v14745_v37 = vrot.slane %v12012_v21, 9  ;;  %v12040_v20 = vunpack.c.l.bf16 %v11988_v47  ;;  %v12041_v54 = vunpack.c.l.bf16 %v11991_v8 }
 0x667   : > { %v12015_v12 = vunpack.c.l.bf16 %v11997_v39  ;;  %v14746_v9 = vrot.slane %v12013_v58, 9  ;;  %v12042_v53 = vunpack.c.l.bf16 %v12000_v13  ;;  %v12043_v40 = vunpack.c.l.bf16 %v12003_v57 }
 0x668   : > { %v14747_v26 = vrot.slane %v12014_v32, 9  ;;  %v14749_v3 = vrot.slane %v12040_v20, 9  ;;  %v14750_v14 = vrot.slane %v12041_v54, 9  ;;  %v12032_v62 = vmax.f32 %v12012_v21, %v14745_v37 }
 0x669   : > { %v14748_v5 = vrot.slane %v12015_v12, 9  ;;  %v12033_v28 = vmax.f32 %v12013_v58, %v14746_v9  ;;  %v14751_v45 = vrot.slane %v12042_v53, 9  ;;  %v14752_v52 = vrot.slane %v12043_v40, 9 }
 0x66a   : > { %v12060_v59 = vmax.f32 %v12040_v20, %v14749_v3  ;;  %v12061_v50 = vmax.f32 %v12041_v54, %v14750_v14  ;;  %v12034_v48 = vmax.f32 %v12014_v32, %v14747_v26 }
 0x66b   : > { %v12035_v44 = vmax.f32 %v12015_v12, %v14748_v5  ;;  %v12062_v15 = vmax.f32 %v12042_v53, %v14751_v45  ;;  %v12063_v55 = vmax.f32 %v12043_v40, %v14752_v52 }
 0x66c   : > { %v12076_v0 = vmax.f32 %v12032_v62, %v12060_v59  ;;  %v12077_v38 = vmax.f32 %v12033_v28, %v12061_v50 }
 0x66d   : > { %v12078_v10 = vmax.f32 %v12034_v48, %v12062_v15  ;;  %v12079_v2 = vmax.f32 %v12035_v44, %v12063_v55 }
 0x66e   : > { %v12080_v7 = vpack.c.bf16 %v12076_v0, %v12076_v0  ;;  %v12081_v41 = vpack.c.bf16 %v12077_v38, %v12077_v38 }
 0x66f   : > { %v12082_v34 = vpack.c.bf16 %v12078_v10, %v12078_v10  ;;  %v12083_v17 = vpack.c.bf16 %v12079_v2, %v12079_v2 }
 0x670   : > { %v12088_v18 = vrot.slane %v12080_v7, 2  ;;  %v12089_v56 = vrot.slane %v12081_v41, 2 }
 0x671   : > { %v12090_v35 = vrot.slane %v12082_v34, 2  ;;  %v12091_v49 = vrot.slane %v12083_v17, 2 }
 0x672   : > { %v12094_v63 = vsel %vm10625_vm6, %v12080_v7, %v12088_v18  ;;  %v12097_v42 = vsel %vm10625_vm6, %v12081_v41, %v12089_v56 }
 0x673   : > { %v12100_v30 = vsel %vm10625_vm6, %v12082_v34, %v12090_v35  ;;  %v12103_v1 = vsel %vm10625_vm6, %v12083_v17, %v12091_v49  ;;  %12104 = vst [vmem:[#allocation1] ss:$2 sm:$0xff] %v12094_v63 }
 0x674   : > { %12108 = vst [vmem:[#allocation1 + $0x10] ss:$2 sm:$0xff] %v12097_v42 }
 0x675   : > { %12112 = vst [vmem:[#allocation1 + $0x20] ss:$2 sm:$0xff] %v12100_v30 }
 0x676   : > { %12116 = vst [vmem:[#allocation1 + $0x30] ss:$2 sm:$0xff] %v12103_v1 }
 0x67a   : > { %v12105_v33 = vld.sshfl [vmem:[#allocation1] sm:$0xff pattern:$0x75643120] }
 0x67b   : > { %v12109_v4 = vld.sshfl [vmem:[#allocation1 + $0x10] sm:$0xff pattern:$0x75643120]  ;;  %v12119_v36 = vunpack.c.l.b16 %v12105_v33 }
 0x67c   : > { %v12113_v29 = vld.sshfl [vmem:[#allocation1 + $0x20] sm:$0xff pattern:$0x75643120]  ;;  %v12120_v25 = vunpack.c.l.b16 %v12109_v4 }
 0x67d   : > { %v12117_v19 = vld.sshfl [vmem:[#allocation1 + $0x30] sm:$0xff pattern:$0x75643120]  ;;  %v12121_v22 = vunpack.c.l.b16 %v12113_v29 }
 0x67e   : > { %v12122_v16 = vunpack.c.l.b16 %v12117_v19  ;;  %v12123_v24 = vrot.slane %v12120_v25, 7 }
 0x67f   : > { %v12125_v61 = vrot.slane %v12121_v22, 6 }
 0x680   : > { %v12124_v43 = vsel %vm5977_vm14, %v12123_v24, %v12119_v36  ;;  %v12127_v11 = vrot.slane %v12122_v16, 5 }
 0x681   : > { %v12126_v46 = vsel %vm5981_vm15, %v12125_v61, %v12124_v43 }
 0x682   : > { %v12128_v51 = vsel %vm5985_vm0, %v12127_v11, %v12126_v46 }
 0x683   : > { %v12129_v27 = vpack.c.b16 %v12128_v51, %v12128_v51 }
 0x685   : > { %v12130_v47 = vrot.slane %v12129_v27, 2 }
 0x687   : > { %v12133_v8 = vsel %vm10625_vm6, %v12129_v27, %v12130_v47 }
 0x688   : > { %12135 = vst [vmem:[%s337_s12] sm:$0x3] %v12133_v8 }
 0x689 PF: > { %s20_s24 = sadd.s32 1, %s15554_s24  }
 0x68a   : > { %p17_p7 = scmp.ge.s32.totalorder %s20_s24, 4  }
 0x68c   :  { %19 = sbr.rel (!%p17_p7) target bundleno = 3 (0x3), region = 131 }
 0x691   :  { %12155 = vsyncpa [#allocation7], 1 }
 0x692   :  { %12157 = vsyncpa [#allocation7 + $0x1], 1 }
 0x693   :  { %12158 = vsyncpa [#allocation9], 1 }
 0x694   :  { %12159 = vsyncpa [#allocation12], 1 }

</bundles_post_ra>
